<compile_context>
chip_gen: v6e
topology: v6e:2x2x1
jax: 0.10.0
libtpu: 0.0.40
codegen_flags: <defaults>
</compile_context>

<pallas_src>
import functools

import jax
import jax.numpy as jnp
from jax.experimental import pallas as pl
from jax.experimental.pallas import tpu as pltpu

EPS = 1e-5
LANE = 128            # channel padding (lane dim)
WGRAN = 16            # width granularity (bf16 packs 16 rows per sublane group)
CONV_TILE_ROWS = 2048     # cap on GEMM M (= toh * ow_pad) per conv grid step
APPLY_TILE_ROWS = 8192    # cap for the memory-bound BN apply / pool passes


def _vmem_limit_bytes():
    # Generation-aware scoped-VMEM request (review): ~0.75x physical, capped at 96 MiB
    # (v5e/v6e: 128 MiB physical, v7x: 64 MiB).  Falls back to a safe default if the
    # hardware query is unavailable (e.g. interpret mode on a non-TPU host).
    try:
        cap = int(pltpu.get_tpu_info().vmem_capacity_bytes)
        if cap > 0:
            return min((cap * 3) // 4, 96 * 1024 * 1024)
    except Exception:
        pass
    return 32 * 1024 * 1024


VMEM_LIMIT = _vmem_limit_bytes()


def _round_up(x, m):
    return ((x + m - 1) // m) * m


def _pick_row_tile(rows, row_width, max_elems):
    """Largest divisor of `rows` whose tile (rows * row_width) stays <= max_elems rows of GEMM."""
    # TODO(synk): switch to pl.cdiv + tail masking so awkward row counts don't shrink the tile.
    best = 1
    for t in range(1, rows + 1):
        if rows % t == 0 and t * row_width <= max_elems:
            best = t
    return best


# ----------------------------------------------------------------------------
# Kernels
# ----------------------------------------------------------------------------
def _conv_stats_kernel(x_ref, w_ref, y_ref, stats_ref, *, k, toh, ow_pad, ow_valid):
    """Conv via k*k accumulated tap GEMMs + per-image per-channel sum / sumsq.

    x_ref:     (1, H_in, W_store, Cin_p)  bf16  full spatial extent of one image
    w_ref:     (k*k, Cin_p, Cout_p)       bf16
    y_ref:     (1, toh, ow_pad, Cout_p)   bf16  conv output tile (pre-BN)
    stats_ref: (1, 8, Cout_p)             f32   rows 0/1 = sum / sumsq (per image)
    """
    r = pl.program_id(1)

    @pl.when(r == 0)
    def _init():
        stats_ref[...] = jnp.zeros(stats_ref.shape, stats_ref.dtype)

    row0 = r * toh
    cin_p = x_ref.shape[-1]
    cout_p = w_ref.shape[-1]

    # k*k accumulated GEMMs: identical MXU FLOPs to one big im2col GEMM, but no
    # concatenated (rows, k*k*Cin) staging buffer in VMEM.
    acc = None
    for kh in range(k):
        for kw in range(k):
            tap = x_ref[0, pl.ds(row0 + kh, toh), pl.ds(kw, ow_pad), :]     # (toh, ow_pad, Cin_p)
            tap = tap.reshape(toh * ow_pad, cin_p)
            part = jnp.dot(tap, w_ref[kh * k + kw],
                           preferred_element_type=jnp.float32)
            acc = part if acc is None else acc + part

    y3 = acc.reshape(toh, ow_pad, cout_p)                                   # f32

    # Zero padded (invalid) output columns so they never pollute the statistics.
    if ow_valid < ow_pad:
        col = jax.lax.broadcasted_iota(jnp.int32, (toh, ow_pad, 1), 1)
        y3 = jnp.where(col < ow_valid, y3, 0.0)

    y_ref[0] = y3.astype(y_ref.dtype)                                       # bf16 store

    # Stats from the f32 values; single merged (2, C) ref update.
    flat = y3.reshape(toh * ow_pad, cout_p)
    upd = jnp.concatenate(
        [jnp.sum(flat, axis=0, keepdims=True),
         jnp.sum(flat * flat, axis=0, keepdims=True)], axis=0)              # (2, Cout_p)
    stats_ref[0, 0:2, :] += upd


def _bn_relu_kernel(y_ref, stats_ref, gamma_ref, beta_ref, o_ref, *, count, ow_pad, out_w):
    """BatchNorm(batch stats) + ReLU, tiled over rows; writes bf16 NHWC activations."""
    inv_count = 1.0 / count
    mean = stats_ref[0:1, :] * inv_count
    var = jnp.maximum(stats_ref[1:2, :] * inv_count - mean * mean, 0.0)
    inv_std = jax.lax.rsqrt(var + EPS)
    a2 = gamma_ref[...] * inv_std                       # (1, C)
    b2 = beta_ref[...] - mean * a2                      # (1, C)
    a = a2.reshape(1, 1, -1)
    b = b2.reshape(1, 1, -1)

    y = y_ref[0].astype(jnp.float32)                    # (toh, ow_pad, C)
    z = jnp.maximum(y * a + b, 0.0)
    o_ref[0, :, 0:ow_pad, :] = z.astype(o_ref.dtype)
    if out_w > ow_pad:
        # defined zeros in the extra storage columns read by the next layer's taps
        o_ref[0, :, ow_pad:out_w, :] = jnp.zeros(
            (z.shape[0], out_w - ow_pad, z.shape[-1]), o_ref.dtype)


def _bn_relu_pool_kernel(y_ref, stats_ref, gamma_ref, beta_ref, o_ref, *, count, tph):
    """BatchNorm + ReLU + row half of the 2x2/stride-2 max-pool (last layer)."""
    inv_count = 1.0 / count
    mean = stats_ref[0:1, :] * inv_count
    var = jnp.maximum(stats_ref[1:2, :] * inv_count - mean * mean, 0.0)
    inv_std = jax.lax.rsqrt(var + EPS)
    a2 = gamma_ref[...] * inv_std
    b2 = beta_ref[...] - mean * a2
    a = a2.reshape(1, 1, -1)
    b = b2.reshape(1, 1, -1)

    y = y_ref[0].astype(jnp.float32)                    # (2*tph, W, C)
    z = jnp.maximum(y * a + b, 0.0)
    z = z.reshape(tph, 2, z.shape[1], z.shape[2])       # split leading dim only
    o_ref[0] = jnp.max(z, axis=1).astype(o_ref.dtype)   # (tph, W, C): rows pooled


# ----------------------------------------------------------------------------
# pallas_call wrappers
# ----------------------------------------------------------------------------
def _conv_stats(x, w_mat, *, k, oh, ow_valid, ow_pad, cout_p):
    n, h_in, w_store, cin_p = x.shape
    toh = _pick_row_tile(oh, ow_pad, CONV_TILE_ROWS)
    kernel = functools.partial(_conv_stats_kernel, k=k, toh=toh,
                               ow_pad=ow_pad, ow_valid=ow_valid)
    y, stats = pl.pallas_call(
        kernel,
        grid=(n, oh // toh),
        in_specs=[
            pl.BlockSpec((1, h_in, w_store, cin_p), lambda nn, r: (nn, 0, 0, 0)),
            pl.BlockSpec((k * k, cin_p, cout_p), lambda nn, r: (0, 0, 0)),
        ],
        out_specs=[
            pl.BlockSpec((1, toh, ow_pad, cout_p), lambda nn, r: (nn, r, 0, 0)),
            pl.BlockSpec((1, 8, cout_p), lambda nn, r: (nn, 0, 0)),
        ],
        out_shape=[
            jax.ShapeDtypeStruct((n, oh, ow_pad, cout_p), jnp.bfloat16),
            jax.ShapeDtypeStruct((n, 8, cout_p), jnp.float32),
        ],
        compiler_params=pltpu.CompilerParams(
            # per-image stats slot -> batch axis is parallel (2 TCs on v7x);
            # only the row axis revisits its stats block.
            dimension_semantics=("parallel", "arbitrary"),
            vmem_limit_bytes=VMEM_LIMIT),
    )(x, w_mat)
    return y, jnp.sum(stats, axis=0)                    # (8, cout_p)


def _bn_relu(y, stats, gamma2d, beta2d, *, count, out_w, out_dtype):
    n, oh, ow_pad, c = y.shape
    toh = _pick_row_tile(oh, out_w, APPLY_TILE_ROWS)
    kernel = functools.partial(_bn_relu_kernel, count=count, ow_pad=ow_pad, out_w=out_w)
    return pl.pallas_call(
        kernel,
        grid=(n, oh // toh),
        in_specs=[
            pl.BlockSpec((1, toh, ow_pad, c), lambda nn, r: (nn, r, 0, 0)),
            pl.BlockSpec((8, c), lambda nn, r: (0, 0)),
            pl.BlockSpec((1, c), lambda nn, r: (0, 0)),
            pl.BlockSpec((1, c), lambda nn, r: (0, 0)),
        ],
        out_specs=pl.BlockSpec((1, toh, out_w, c), lambda nn, r: (nn, r, 0, 0)),
        out_shape=jax.ShapeDtypeStruct((n, oh, out_w, c), out_dtype),
        compiler_params=pltpu.CompilerParams(
            dimension_semantics=("parallel", "parallel"),
            vmem_limit_bytes=VMEM_LIMIT),
    )(y, stats, gamma2d, beta2d)


def _bn_relu_pool(y, stats, gamma2d, beta2d, *, count):
    n, oh, ow_pad, c = y.shape
    ph = oh // 2
    tph = _pick_row_tile(ph, ow_pad, APPLY_TILE_ROWS)
    kernel = functools.partial(_bn_relu_pool_kernel, count=count, tph=tph)
    return pl.pallas_call(
        kernel,
        grid=(n, ph // tph),
        in_specs=[
            pl.BlockSpec((1, 2 * tph, ow_pad, c), lambda nn, r: (nn, r, 0, 0)),
            pl.BlockSpec((8, c), lambda nn, r: (0, 0)),
            pl.BlockSpec((1, c), lambda nn, r: (0, 0)),
            pl.BlockSpec((1, c), lambda nn, r: (0, 0)),
        ],
        out_specs=pl.BlockSpec((1, tph, ow_pad, c), lambda nn, r: (nn, r, 0, 0)),
        out_shape=jax.ShapeDtypeStruct((n, ph, ow_pad, c), jnp.float32),
        compiler_params=pltpu.CompilerParams(
            dimension_semantics=("parallel", "parallel"),
            vmem_limit_bytes=VMEM_LIMIT),
    )(y, stats, gamma2d, beta2d)


# ----------------------------------------------------------------------------
# Parameter / layout prep (XLA glue, one-time per call)
# ----------------------------------------------------------------------------
def _prep_weight(w, cin_p, cout_p, k):
    oc, ic = w.shape[0], w.shape[1]
    wt = jnp.transpose(w, (2, 3, 1, 0))                        # (k, k, ic, oc)
    wp = jnp.zeros((k, k, cin_p, cout_p), jnp.float32).at[:, :, :ic, :oc].set(wt)
    return wp.reshape(k * k, cin_p, cout_p).astype(jnp.bfloat16)


def _prep_vec(v, c_p):
    return jnp.zeros((1, c_p), jnp.float32).at[0, :v.shape[0]].set(v)


@functools.partial(jax.jit, static_argnames=("kernel_size",))
def conv3block_forward(x, params, kernel_size):
    k = kernel_size
    n, c_in, h, w = x.shape
    c_out = params["w1"].shape[0]
    cp = _round_up(max(c_in, c_out), LANE)

    # valid sizes per stage: [input, conv1, conv2, conv3]
    h_sizes = [h - i * (k - 1) for i in range(4)]
    w_sizes = [w - i * (k - 1) for i in range(4)]
    ow_pad = [_round_up(w_sizes[i + 1], WGRAN) for i in range(3)]          # GEMM width
    in_store_w = [_round_up(max(w_sizes[i], ow_pad[i] + k - 1), WGRAN) for i in range(3)]

    # NCHW -> padded NHWC bf16, once at the block boundary
    act = jnp.transpose(x, (0, 2, 3, 1))
    act = jnp.pad(act, ((0, 0), (0, 0), (0, in_store_w[0] - w), (0, cp - c_in)))
    act = act.astype(jnp.bfloat16)

    pooled = None
    for i in (1, 2, 3):
        li = i - 1
        w_mat = _prep_weight(params[f"w{i}"], cp, cp, k)
        # NOTE: conv bias is omitted on purpose -- it cancels exactly under batch-stat BN.
        gamma2d = _prep_vec(params[f"gamma{i}"], cp)
        beta2d = _prep_vec(params[f"beta{i}"], cp)

        oh, ow_valid = h_sizes[li + 1], w_sizes[li + 1]
        y, stats = _conv_stats(act, w_mat, k=k, oh=oh, ow_valid=ow_valid,
                               ow_pad=ow_pad[li], cout_p=cp)
        count = n * oh * ow_valid
        if i < 3:
            act = _bn_relu(y, stats, gamma2d, beta2d, count=count,
                           out_w=in_store_w[li + 1], out_dtype=jnp.bfloat16)
        else:
            pooled = _bn_relu_pool(y, stats, gamma2d, beta2d, count=count)

    ph, pw = h_sizes[3] // 2, w_sizes[3] // 2
    # Column half of the 2x2 max-pool (rows already pooled in-kernel); tiny XLA epilogue.
    t = pooled[:, :, :2 * pw, :c_out]                           # (n, ph, 2*pw, c_out)
    out = jnp.max(t.reshape(n, ph, pw, 2, c_out), axis=3)       # (n, ph, pw, c_out)
    return jnp.transpose(out, (0, 3, 1, 2))                     # back to NCHW


# ----------------------------------------------------------------------------
# Params + pure-JAX reference
# ----------------------------------------------------------------------------
def init_params(key, in_channels, out_channels, kernel_size):
    ks = jax.random.split(key, 6)
    params = {}
    cins = [in_channels, out_channels, out_channels]
    for i in range(3):
        fan_in = cins[i] * kernel_size * kernel_size
        scale = 1.0 / jnp.sqrt(fan_in)
        params[f"w{i + 1}"] = scale * jax.random.normal(
            ks[2 * i], (out_channels, cins[i], kernel_size, kernel_size), jnp.float32)
        params[f"b{i + 1}"] = scale * jax.random.normal(
            ks[2 * i + 1], (out_channels,), jnp.float32)
        params[f"gamma{i + 1}"] = jnp.ones((out_channels,), jnp.float32)
        params[f"beta{i + 1}"] = jnp.zeros((out_channels,), jnp.float32)
    return params


def _reference_forward(x, params, k):
    out = x
    for i in (1, 2, 3):
        out = jax.lax.conv_general_dilated(
            out, params[f"w{i}"], (1, 1), "VALID",
            dimension_numbers=("NCHW", "OIHW", "NCHW"))
        out = out + params[f"b{i}"].reshape(1, -1, 1, 1)
        mean = jnp.mean(out, axis=(0, 2, 3), keepdims=True)
        var = jnp.mean((out - mean) ** 2, axis=(0, 2, 3), keepdims=True)
        out = (out - mean) * jax.lax.rsqrt(var + EPS)
        out = out * params[f"gamma{i}"].reshape(1, -1, 1, 1) \
              + params[f"beta{i}"].reshape(1, -1, 1, 1)
        out = jnp.maximum(out, 0.0)
    n, c, hh, ww = out.shape
    out = out[:, :, :hh - hh % 2, :ww - ww % 2]
    return out.reshape(n, c, hh // 2, 2, ww // 2, 2).max(axis=(3, 5))


if __name__ == "__main__":
    # Small shapes: N=2, C_in=4, H=W=16, C_out=8, kernel=3
    N, C_IN, H, W = 2, 4, 16, 16
    C_OUT, K = 8, 3

    key = jax.random.PRNGKey(0)
    kx, kp = jax.random.split(key)
    x = jax.random.normal(kx, (N, C_IN, H, W), jnp.float32)
    params = init_params(kp, C_IN, C_OUT, K)

    out = conv3block_forward(x, params, K)
    out = jax.block_until_ready(out)

    # conv(16 -> 14 -> 12 -> 10), pool -> 5
    assert out.shape == (N, C_OUT, 5, 5), out.shape
    assert bool(jnp.all(jnp.isfinite(out)))

    ref = _reference_forward(x, params, K)
    max_err = float(jnp.max(jnp.abs(out - ref)))
    assert max_err < 0.35, f"max abs err vs f32 reference: {max_err}"

    print("KERNEL_OK")
</pallas_src>

<mosaic_0001>
module attributes {stable_mosaic.version = 11 : i64} {
  func.func @_conv_stats_kernel(%arg0: i32, %arg1: i32, %arg2: memref<1x16x32x128xbf16, #tpu.memory_space<vmem>>, %arg3: memref<9x128x128xbf16, #tpu.memory_space<vmem>>, %arg4: memref<1x14x16x128xbf16, #tpu.memory_space<vmem>>, %arg5: memref<1x8x128xf32, #tpu.memory_space<vmem>>) attributes {dimension_semantics = [#tpu.dimension_semantics<parallel>, #tpu.dimension_semantics<arbitrary>], iteration_bounds = array<i64: 2, 1>, scalar_prefetch = 0 : i64, scratch_operands = 0 : i64, tpu.core_type = #tpu.core_type<tc>, window_params = [{transform_indices = @transform_0, window_bounds = array<i64: 1, 16, 32, 128>}, {pipeline_mode = #tpu.pipeline_mode<synchronous>, transform_indices = @transform_1, window_bounds = array<i64: 9, 128, 128>}, {transform_indices = @transform_2, window_bounds = array<i64: 1, 14, 16, 128>}, {transform_indices = @transform_3, window_bounds = array<i64: 1, 8, 128>}]} {
    %c0_i32 = arith.constant 0 : i32
    %0 = arith.cmpi eq, %arg1, %c0_i32 : i32
    %1 = arith.extui %0 : i1 to i32
    %c0_i32_0 = arith.constant 0 : i32
    %2 = arith.cmpi ne, %1, %c0_i32_0 : i32
    scf.if %2 {
      %cst_75 = arith.constant 0.000000e+00 : f32
      %109 = vector.broadcast %cst_75 : f32 to vector<1x8x128xf32>
      %c0_76 = arith.constant 0 : index
      %c0_77 = arith.constant 0 : index
      %c0_78 = arith.constant 0 : index
      %110 = vector.load %arg5[%c0_76, %c0_77, %c0_78] : memref<1x8x128xf32, #tpu.memory_space<vmem>>, vector<1x8x128xf32>
      tpu.vector_store %arg5[%c0_76, %c0_77, %c0_78], %109 {strides = array<i32>} : memref<1x8x128xf32, #tpu.memory_space<vmem>>, vector<1x8x128xf32>,
    } else {
    }
    %c14_i32 = arith.constant 14 : i32
    %3 = arith.muli %arg1, %c14_i32 : i32
    %c0_i32_1 = arith.constant 0 : i32
    %4 = arith.addi %3, %c0_i32_1 : i32
    %c0 = arith.constant 0 : index
    %5 = arith.index_cast %4 : i32 to index
    %c0_2 = arith.constant 0 : index
    %c0_3 = arith.constant 0 : index
    %6 = vector.load %arg2[%c0, %5, %c0_2, %c0_3] : memref<1x16x32x128xbf16, #tpu.memory_space<vmem>>, vector<1x14x16x128xbf16>
    %7 = vector.shape_cast %6 : vector<1x14x16x128xbf16> to vector<14x16x128xbf16>
    %8 = vector.shape_cast %7 : vector<14x16x128xbf16> to vector<224x128xbf16>
    %c0_4 = arith.constant 0 : index
    %c0_5 = arith.constant 0 : index
    %c0_6 = arith.constant 0 : index
    %9 = vector.load %arg3[%c0_4, %c0_5, %c0_6] : memref<9x128x128xbf16, #tpu.memory_space<vmem>>, vector<1x128x128xbf16>
    %10 = vector.shape_cast %9 : vector<1x128x128xbf16> to vector<128x128xbf16>
    %cst = arith.constant dense<0.000000e+00> : vector<224x128xf32>
    %11 = tpu.matmul %8, %10, %cst {dimension_numbers = #tpu.dot_dimension_numbers<[1], [0], [0], [1], [0, 0, 1, 1], [], []>} : vector<224x128xbf16>, vector<128x128xbf16>, vector<224x128xf32> -> vector<224x128xf32>
    %c0_i32_7 = arith.constant 0 : i32
    %12 = arith.addi %3, %c0_i32_7 : i32
    %c0_8 = arith.constant 0 : index
    %13 = arith.index_cast %12 : i32 to index
    %c1 = arith.constant 1 : index
    %c0_9 = arith.constant 0 : index
    %14 = vector.load %arg2[%c0_8, %13, %c1, %c0_9] : memref<1x16x32x128xbf16, #tpu.memory_space<vmem>>, vector<1x14x16x128xbf16>
    %15 = vector.shape_cast %14 : vector<1x14x16x128xbf16> to vector<14x16x128xbf16>
    %16 = vector.shape_cast %15 : vector<14x16x128xbf16> to vector<224x128xbf16>
    %c1_10 = arith.constant 1 : index
    %c0_11 = arith.constant 0 : index
    %c0_12 = arith.constant 0 : index
    %17 = vector.load %arg3[%c1_10, %c0_11, %c0_12] : memref<9x128x128xbf16, #tpu.memory_space<vmem>>, vector<1x128x128xbf16>
    %18 = vector.shape_cast %17 : vector<1x128x128xbf16> to vector<128x128xbf16>
    %cst_13 = arith.constant dense<0.000000e+00> : vector<224x128xf32>
    %19 = tpu.matmul %16, %18, %cst_13 {dimension_numbers = #tpu.dot_dimension_numbers<[1], [0], [0], [1], [0, 0, 1, 1], [], []>} : vector<224x128xbf16>, vector<128x128xbf16>, vector<224x128xf32> -> vector<224x128xf32>
    %20 = arith.addf %11, %19 : vector<224x128xf32>
    %c0_i32_14 = arith.constant 0 : i32
    %21 = arith.addi %3, %c0_i32_14 : i32
    %c0_15 = arith.constant 0 : index
    %22 = arith.index_cast %21 : i32 to index
    %c2 = arith.constant 2 : index
    %c0_16 = arith.constant 0 : index
    %23 = vector.load %arg2[%c0_15, %22, %c2, %c0_16] : memref<1x16x32x128xbf16, #tpu.memory_space<vmem>>, vector<1x14x16x128xbf16>
    %24 = vector.shape_cast %23 : vector<1x14x16x128xbf16> to vector<14x16x128xbf16>
    %25 = vector.shape_cast %24 : vector<14x16x128xbf16> to vector<224x128xbf16>
    %c2_17 = arith.constant 2 : index
    %c0_18 = arith.constant 0 : index
    %c0_19 = arith.constant 0 : index
    %26 = vector.load %arg3[%c2_17, %c0_18, %c0_19] : memref<9x128x128xbf16, #tpu.memory_space<vmem>>, vector<1x128x128xbf16>
    %27 = vector.shape_cast %26 : vector<1x128x128xbf16> to vector<128x128xbf16>
    %cst_20 = arith.constant dense<0.000000e+00> : vector<224x128xf32>
    %28 = tpu.matmul %25, %27, %cst_20 {dimension_numbers = #tpu.dot_dimension_numbers<[1], [0], [0], [1], [0, 0, 1, 1], [], []>} : vector<224x128xbf16>, vector<128x128xbf16>, vector<224x128xf32> -> vector<224x128xf32>
    %29 = arith.addf %20, %28 : vector<224x128xf32>
    %c1_i32 = arith.constant 1 : i32
    %30 = arith.addi %3, %c1_i32 : i32
    %c0_21 = arith.constant 0 : index
    %31 = arith.index_cast %30 : i32 to index
    %c0_22 = arith.constant 0 : index
    %c0_23 = arith.constant 0 : index
    %32 = vector.load %arg2[%c0_21, %31, %c0_22, %c0_23] : memref<1x16x32x128xbf16, #tpu.memory_space<vmem>>, vector<1x14x16x128xbf16>
    %33 = vector.shape_cast %32 : vector<1x14x16x128xbf16> to vector<14x16x128xbf16>
    %34 = vector.shape_cast %33 : vector<14x16x128xbf16> to vector<224x128xbf16>
    %c3 = arith.constant 3 : index
    %c0_24 = arith.constant 0 : index
    %c0_25 = arith.constant 0 : index
    %35 = vector.load %arg3[%c3, %c0_24, %c0_25] : memref<9x128x128xbf16, #tpu.memory_space<vmem>>, vector<1x128x128xbf16>
    %36 = vector.shape_cast %35 : vector<1x128x128xbf16> to vector<128x128xbf16>
    %cst_26 = arith.constant dense<0.000000e+00> : vector<224x128xf32>
    %37 = tpu.matmul %34, %36, %cst_26 {dimension_numbers = #tpu.dot_dimension_numbers<[1], [0], [0], [1], [0, 0, 1, 1], [], []>} : vector<224x128xbf16>, vector<128x128xbf16>, vector<224x128xf32> -> vector<224x128xf32>
    %38 = arith.addf %29, %37 : vector<224x128xf32>
    %c1_i32_27 = arith.constant 1 : i32
    %39 = arith.addi %3, %c1_i32_27 : i32
    %c0_28 = arith.constant 0 : index
    %40 = arith.index_cast %39 : i32 to index
    %c1_29 = arith.constant 1 : index
    %c0_30 = arith.constant 0 : index
    %41 = vector.load %arg2[%c0_28, %40, %c1_29, %c0_30] : memref<1x16x32x128xbf16, #tpu.memory_space<vmem>>, vector<1x14x16x128xbf16>
    %42 = vector.shape_cast %41 : vector<1x14x16x128xbf16> to vector<14x16x128xbf16>
    %43 = vector.shape_cast %42 : vector<14x16x128xbf16> to vector<224x128xbf16>
    %c4 = arith.constant 4 : index
    %c0_31 = arith.constant 0 : index
    %c0_32 = arith.constant 0 : index
    %44 = vector.load %arg3[%c4, %c0_31, %c0_32] : memref<9x128x128xbf16, #tpu.memory_space<vmem>>, vector<1x128x128xbf16>
    %45 = vector.shape_cast %44 : vector<1x128x128xbf16> to vector<128x128xbf16>
    %cst_33 = arith.constant dense<0.000000e+00> : vector<224x128xf32>
    %46 = tpu.matmul %43, %45, %cst_33 {dimension_numbers = #tpu.dot_dimension_numbers<[1], [0], [0], [1], [0, 0, 1, 1], [], []>} : vector<224x128xbf16>, vector<128x128xbf16>, vector<224x128xf32> -> vector<224x128xf32>
    %47 = arith.addf %38, %46 : vector<224x128xf32>
    %c1_i32_34 = arith.constant 1 : i32
    %48 = arith.addi %3, %c1_i32_34 : i32
    %c0_35 = arith.constant 0 : index
    %49 = arith.index_cast %48 : i32 to index
    %c2_36 = arith.constant 2 : index
    %c0_37 = arith.constant 0 : index
    %50 = vector.load %arg2[%c0_35, %49, %c2_36, %c0_37] : memref<1x16x32x128xbf16, #tpu.memory_space<vmem>>, vector<1x14x16x128xbf16>
    %51 = vector.shape_cast %50 : vector<1x14x16x128xbf16> to vector<14x16x128xbf16>
    %52 = vector.shape_cast %51 : vector<14x16x128xbf16> to vector<224x128xbf16>
    %c5 = arith.constant 5 : index
    %c0_38 = arith.constant 0 : index
    %c0_39 = arith.constant 0 : index
    %53 = vector.load %arg3[%c5, %c0_38, %c0_39] : memref<9x128x128xbf16, #tpu.memory_space<vmem>>, vector<1x128x128xbf16>
    %54 = vector.shape_cast %53 : vector<1x128x128xbf16> to vector<128x128xbf16>
    %cst_40 = arith.constant dense<0.000000e+00> : vector<224x128xf32>
    %55 = tpu.matmul %52, %54, %cst_40 {dimension_numbers = #tpu.dot_dimension_numbers<[1], [0], [0], [1], [0, 0, 1, 1], [], []>} : vector<224x128xbf16>, vector<128x128xbf16>, vector<224x128xf32> -> vector<224x128xf32>
    %56 = arith.addf %47, %55 : vector<224x128xf32>
    %c2_i32 = arith.constant 2 : i32
    %57 = arith.addi %3, %c2_i32 : i32
    %c0_41 = arith.constant 0 : index
    %58 = arith.index_cast %57 : i32 to index
    %c0_42 = arith.constant 0 : index
    %c0_43 = arith.constant 0 : index
    %59 = vector.load %arg2[%c0_41, %58, %c0_42, %c0_43] : memref<1x16x32x128xbf16, #tpu.memory_space<vmem>>, vector<1x14x16x128xbf16>
    %60 = vector.shape_cast %59 : vector<1x14x16x128xbf16> to vector<14x16x128xbf16>
    %61 = vector.shape_cast %60 : vector<14x16x128xbf16> to vector<224x128xbf16>
    %c6 = arith.constant 6 : index
    %c0_44 = arith.constant 0 : index
    %c0_45 = arith.constant 0 : index
    %62 = vector.load %arg3[%c6, %c0_44, %c0_45] : memref<9x128x128xbf16, #tpu.memory_space<vmem>>, vector<1x128x128xbf16>
    %63 = vector.shape_cast %62 : vector<1x128x128xbf16> to vector<128x128xbf16>
    %cst_46 = arith.constant dense<0.000000e+00> : vector<224x128xf32>
    %64 = tpu.matmul %61, %63, %cst_46 {dimension_numbers = #tpu.dot_dimension_numbers<[1], [0], [0], [1], [0, 0, 1, 1], [], []>} : vector<224x128xbf16>, vector<128x128xbf16>, vector<224x128xf32> -> vector<224x128xf32>
    %65 = arith.addf %56, %64 : vector<224x128xf32>
    %c2_i32_47 = arith.constant 2 : i32
    %66 = arith.addi %3, %c2_i32_47 : i32
    %c0_48 = arith.constant 0 : index
    %67 = arith.index_cast %66 : i32 to index
    %c1_49 = arith.constant 1 : index
    %c0_50 = arith.constant 0 : index
    %68 = vector.load %arg2[%c0_48, %67, %c1_49, %c0_50] : memref<1x16x32x128xbf16, #tpu.memory_space<vmem>>, vector<1x14x16x128xbf16>
    %69 = vector.shape_cast %68 : vector<1x14x16x128xbf16> to vector<14x16x128xbf16>
    %70 = vector.shape_cast %69 : vector<14x16x128xbf16> to vector<224x128xbf16>
    %c7 = arith.constant 7 : index
    %c0_51 = arith.constant 0 : index
    %c0_52 = arith.constant 0 : index
    %71 = vector.load %arg3[%c7, %c0_51, %c0_52] : memref<9x128x128xbf16, #tpu.memory_space<vmem>>, vector<1x128x128xbf16>
    %72 = vector.shape_cast %71 : vector<1x128x128xbf16> to vector<128x128xbf16>
    %cst_53 = arith.constant dense<0.000000e+00> : vector<224x128xf32>
    %73 = tpu.matmul %70, %72, %cst_53 {dimension_numbers = #tpu.dot_dimension_numbers<[1], [0], [0], [1], [0, 0, 1, 1], [], []>} : vector<224x128xbf16>, vector<128x128xbf16>, vector<224x128xf32> -> vector<224x128xf32>
    %74 = arith.addf %65, %73 : vector<224x128xf32>
    %c2_i32_54 = arith.constant 2 : i32
    %75 = arith.addi %3, %c2_i32_54 : i32
    %c0_55 = arith.constant 0 : index
    %76 = arith.index_cast %75 : i32 to index
    %c2_56 = arith.constant 2 : index
    %c0_57 = arith.constant 0 : index
    %77 = vector.load %arg2[%c0_55, %76, %c2_56, %c0_57] : memref<1x16x32x128xbf16, #tpu.memory_space<vmem>>, vector<1x14x16x128xbf16>
    %78 = vector.shape_cast %77 : vector<1x14x16x128xbf16> to vector<14x16x128xbf16>
    %79 = vector.shape_cast %78 : vector<14x16x128xbf16> to vector<224x128xbf16>
    %c8 = arith.constant 8 : index
    %c0_58 = arith.constant 0 : index
    %c0_59 = arith.constant 0 : index
    %80 = vector.load %arg3[%c8, %c0_58, %c0_59] : memref<9x128x128xbf16, #tpu.memory_space<vmem>>, vector<1x128x128xbf16>
    %81 = vector.shape_cast %80 : vector<1x128x128xbf16> to vector<128x128xbf16>
    %cst_60 = arith.constant dense<0.000000e+00> : vector<224x128xf32>
    %82 = tpu.matmul %79, %81, %cst_60 {dimension_numbers = #tpu.dot_dimension_numbers<[1], [0], [0], [1], [0, 0, 1, 1], [], []>} : vector<224x128xbf16>, vector<128x128xbf16>, vector<224x128xf32> -> vector<224x128xf32>
    %83 = arith.addf %74, %82 : vector<224x128xf32>
    %84 = vector.shape_cast %83 : vector<224x128xf32> to vector<14x16x128xf32>
    %85 = tpu.iota {dimensions = array<i32: 1>} : vector<14x16x1xi32>
    %c14_i32_61 = arith.constant 14 : i32
    %86 = vector.broadcast %c14_i32_61 : i32 to vector<14x16x1xi32>
    %87 = arith.cmpi slt, %85, %86 : vector<14x16x1xi32>
    %cst_62 = arith.constant 0.000000e+00 : f32
    %88 = vector.shape_cast %87 : vector<14x16x1xi1> to vector<14x16x1xi1>
    %89 = vector.broadcast %88 : vector<14x16x1xi1> to vector<14x16x128xi1>
    %90 = vector.broadcast %cst_62 : f32 to vector<14x16x128xf32>
    %91 = arith.select %89, %84, %90 : vector<14x16x128xi1>, vector<14x16x128xf32>
    %92 = arith.truncf %91 : vector<14x16x128xf32> to vector<14x16x128xbf16>
    %c0_63 = arith.constant 0 : index
    %c0_64 = arith.constant 0 : index
    %c0_65 = arith.constant 0 : index
    %c0_66 = arith.constant 0 : index
    %93 = vector.load %arg4[%c0_63, %c0_64, %c0_65, %c0_66] : memref<1x14x16x128xbf16, #tpu.memory_space<vmem>>, vector<1x14x16x128xbf16>
    %94 = vector.shape_cast %93 : vector<1x14x16x128xbf16> to vector<14x16x128xbf16>
    %95 = vector.shape_cast %92 : vector<14x16x128xbf16> to vector<1x14x16x128xbf16>
    tpu.vector_store %arg4[%c0_63, %c0_64, %c0_65, %c0_66], %95 {strides = array<i32>} : memref<1x14x16x128xbf16, #tpu.memory_space<vmem>>, vector<1x14x16x128xbf16>,
    %96 = vector.shape_cast %91 : vector<14x16x128xf32> to vector<224x128xf32>
    %cst_67 = arith.constant dense<0.000000e+00> : vector<128xf32>
    %97 = vector.multi_reduction <add>, %96, %cst_67 [0] : vector<224x128xf32> to vector<128xf32>
    %98 = vector.shape_cast %97 : vector<128xf32> to vector<1x128xf32>
    %99 = arith.mulf %96, %96 : vector<224x128xf32>
    %cst_68 = arith.constant dense<0.000000e+00> : vector<128xf32>
    %100 = vector.multi_reduction <add>, %99, %cst_68 [0] : vector<224x128xf32> to vector<128xf32>
    %101 = vector.shape_cast %100 : vector<128xf32> to vector<1x128xf32>
    %102 = tpu.concatenate %98, %101 in 0 : vector<1x128xf32>, vector<1x128xf32> -> vector<2x128xf32>
    %c0_69 = arith.constant 0 : index
    %c0_70 = arith.constant 0 : index
    %c0_71 = arith.constant 0 : index
    %103 = vector.load %arg5[%c0_69, %c0_70, %c0_71] : memref<1x8x128xf32, #tpu.memory_space<vmem>>, vector<1x2x128xf32>
    %104 = vector.shape_cast %103 : vector<1x2x128xf32> to vector<2x128xf32>
    %105 = arith.addf %104, %102 : vector<2x128xf32>
    %c0_72 = arith.constant 0 : index
    %c0_73 = arith.constant 0 : index
    %c0_74 = arith.constant 0 : index
    %106 = vector.load %arg5[%c0_72, %c0_73, %c0_74] : memref<1x8x128xf32, #tpu.memory_space<vmem>>, vector<1x2x128xf32>
    %107 = vector.shape_cast %106 : vector<1x2x128xf32> to vector<2x128xf32>
    %108 = vector.shape_cast %105 : vector<2x128xf32> to vector<1x2x128xf32>
    tpu.vector_store %arg5[%c0_72, %c0_73, %c0_74], %108 {strides = array<i32>} : memref<1x8x128xf32, #tpu.memory_space<vmem>>, vector<1x2x128xf32>,
    return
  }
  func.func @transform_0(%arg0: i32, %arg1: i32) -> (i32, i32, i32, i32) {
    %c0_i32 = arith.constant 0 : i32
    %c0_i32_0 = arith.constant 0 : i32
    %c0_i32_1 = arith.constant 0 : i32
    %c0_i32_2 = arith.constant 0 : i32
    return %arg0, %c0_i32, %c0_i32_0, %c0_i32_1 : i32, i32, i32, i32
  }
  func.func @transform_1(%arg0: i32, %arg1: i32) -> (i32, i32, i32) {
    %c0_i32 = arith.constant 0 : i32
    %c0_i32_0 = arith.constant 0 : i32
    %c0_i32_1 = arith.constant 0 : i32
    %c0_i32_2 = arith.constant 0 : i32
    return %c0_i32, %c0_i32_0, %c0_i32_1 : i32, i32, i32
  }
  func.func @transform_2(%arg0: i32, %arg1: i32) -> (i32, i32, i32, i32) {
    %c0_i32 = arith.constant 0 : i32
    %c0_i32_0 = arith.constant 0 : i32
    %c0_i32_1 = arith.constant 0 : i32
    return %arg0, %arg1, %c0_i32, %c0_i32_0 : i32, i32, i32, i32
  }
  func.func @transform_3(%arg0: i32, %arg1: i32) -> (i32, i32, i32) {
    %c0_i32 = arith.constant 0 : i32
    %c0_i32_0 = arith.constant 0 : i32
    %c0_i32_1 = arith.constant 0 : i32
    return %arg0, %c0_i32, %c0_i32_0 : i32, i32, i32
  }
}

module attributes {stable_mosaic.version = 11 : i64} {
  func.func @_bn_relu_kernel(%arg0: i32, %arg1: i32, %arg2: memref<1x14x16x128xbf16, #tpu.memory_space<vmem>>, %arg3: memref<8x128xf32, #tpu.memory_space<vmem>>, %arg4: memref<1x128xf32, #tpu.memory_space<vmem>>, %arg5: memref<1x128xf32, #tpu.memory_space<vmem>>, %arg6: memref<1x14x32x128xbf16, #tpu.memory_space<vmem>>) attributes {dimension_semantics = [#tpu.dimension_semantics<parallel>, #tpu.dimension_semantics<parallel>], iteration_bounds = array<i64: 2, 1>, scalar_prefetch = 0 : i64, scratch_operands = 0 : i64, tpu.core_type = #tpu.core_type<tc>, window_params = [{transform_indices = @transform_0, window_bounds = array<i64: 1, 14, 16, 128>}, {pipeline_mode = #tpu.pipeline_mode<synchronous>, transform_indices = @transform_1, window_bounds = array<i64: 8, 128>}, {pipeline_mode = #tpu.pipeline_mode<synchronous>, transform_indices = @transform_2, window_bounds = array<i64: 1, 128>}, {pipeline_mode = #tpu.pipeline_mode<synchronous>, transform_indices = @transform_3, window_bounds = array<i64: 1, 128>}, {transform_indices = @transform_4, window_bounds = array<i64: 1, 14, 32, 128>}]} {
    %c0 = arith.constant 0 : index
    %c0_0 = arith.constant 0 : index
    %0 = vector.load %arg3[%c0, %c0_0] : memref<8x128xf32, #tpu.memory_space<vmem>>, vector<1x128xf32>
    %cst = arith.constant 0.00255102036 : f32
    %1 = vector.broadcast %cst : f32 to vector<1x128xf32>
    %2 = arith.mulf %0, %1 : vector<1x128xf32>
    %c1 = arith.constant 1 : index
    %c0_1 = arith.constant 0 : index
    %3 = vector.load %arg3[%c1, %c0_1] : memref<8x128xf32, #tpu.memory_space<vmem>>, vector<1x128xf32>
    %cst_2 = arith.constant 0.00255102036 : f32
    %4 = vector.broadcast %cst_2 : f32 to vector<1x128xf32>
    %5 = arith.mulf %3, %4 : vector<1x128xf32>
    %6 = arith.mulf %2, %2 : vector<1x128xf32>
    %7 = arith.subf %5, %6 : vector<1x128xf32>
    %cst_3 = arith.constant 0.000000e+00 : f32
    %8 = vector.broadcast %cst_3 : f32 to vector<1x128xf32>
    %9 = arith.maximumf %7, %8 : vector<1x128xf32>
    %cst_4 = arith.constant 9.99999974E-6 : f32
    %10 = vector.broadcast %cst_4 : f32 to vector<1x128xf32>
    %11 = arith.addf %9, %10 : vector<1x128xf32>
    %12 = math.rsqrt %11 : vector<1x128xf32>
    %c0_5 = arith.constant 0 : index
    %c0_6 = arith.constant 0 : index
    %13 = vector.load %arg4[%c0_5, %c0_6] : memref<1x128xf32, #tpu.memory_space<vmem>>, vector<1x128xf32>
    %14 = arith.mulf %13, %12 : vector<1x128xf32>
    %c0_7 = arith.constant 0 : index
    %c0_8 = arith.constant 0 : index
    %15 = vector.load %arg5[%c0_7, %c0_8] : memref<1x128xf32, #tpu.memory_space<vmem>>, vector<1x128xf32>
    %16 = arith.mulf %2, %14 : vector<1x128xf32>
    %17 = arith.subf %15, %16 : vector<1x128xf32>
    %18 = vector.shape_cast %14 : vector<1x128xf32> to vector<1x1x128xf32>
    %19 = vector.shape_cast %17 : vector<1x128xf32> to vector<1x1x128xf32>
    %c0_9 = arith.constant 0 : index
    %c0_10 = arith.constant 0 : index
    %c0_11 = arith.constant 0 : index
    %c0_12 = arith.constant 0 : index
    %20 = vector.load %arg2[%c0_9, %c0_10, %c0_11, %c0_12] : memref<1x14x16x128xbf16, #tpu.memory_space<vmem>>, vector<1x14x16x128xbf16>
    %21 = vector.shape_cast %20 : vector<1x14x16x128xbf16> to vector<14x16x128xbf16>
    %22 = arith.extf %21 : vector<14x16x128xbf16> to vector<14x16x128xf32>
    %23 = vector.broadcast %18 : vector<1x1x128xf32> to vector<14x16x128xf32>
    %24 = arith.mulf %22, %23 : vector<14x16x128xf32>
    %25 = vector.broadcast %19 : vector<1x1x128xf32> to vector<14x16x128xf32>
    %26 = arith.addf %24, %25 : vector<14x16x128xf32>
    %cst_13 = arith.constant 0.000000e+00 : f32
    %27 = vector.broadcast %cst_13 : f32 to vector<14x16x128xf32>
    %28 = arith.maximumf %26, %27 : vector<14x16x128xf32>
    %29 = arith.truncf %28 : vector<14x16x128xf32> to vector<14x16x128xbf16>
    %c0_14 = arith.constant 0 : index
    %c0_15 = arith.constant 0 : index
    %c0_16 = arith.constant 0 : index
    %c0_17 = arith.constant 0 : index
    %30 = vector.load %arg6[%c0_14, %c0_15, %c0_16, %c0_17] : memref<1x14x32x128xbf16, #tpu.memory_space<vmem>>, vector<1x14x16x128xbf16>
    %31 = vector.shape_cast %30 : vector<1x14x16x128xbf16> to vector<14x16x128xbf16>
    %32 = vector.shape_cast %29 : vector<14x16x128xbf16> to vector<1x14x16x128xbf16>
    tpu.vector_store %arg6[%c0_14, %c0_15, %c0_16, %c0_17], %32 {strides = array<i32>} : memref<1x14x32x128xbf16, #tpu.memory_space<vmem>>, vector<1x14x16x128xbf16>,
    %cst_18 = arith.constant 0.000000e+00 : bf16
    %33 = vector.broadcast %cst_18 : bf16 to vector<14x16x128xbf16>
    %c0_19 = arith.constant 0 : index
    %c0_20 = arith.constant 0 : index
    %c16 = arith.constant 16 : index
    %c0_21 = arith.constant 0 : index
    %34 = vector.load %arg6[%c0_19, %c0_20, %c16, %c0_21] : memref<1x14x32x128xbf16, #tpu.memory_space<vmem>>, vector<1x14x16x128xbf16>
    %35 = vector.shape_cast %34 : vector<1x14x16x128xbf16> to vector<14x16x128xbf16>
    %36 = vector.shape_cast %33 : vector<14x16x128xbf16> to vector<1x14x16x128xbf16>
    tpu.vector_store %arg6[%c0_19, %c0_20, %c16, %c0_21], %36 {strides = array<i32>} : memref<1x14x32x128xbf16, #tpu.memory_space<vmem>>, vector<1x14x16x128xbf16>,
    return
  }
  func.func @transform_0(%arg0: i32, %arg1: i32) -> (i32, i32, i32, i32) {
    %c0_i32 = arith.constant 0 : i32
    %c0_i32_0 = arith.constant 0 : i32
    %c0_i32_1 = arith.constant 0 : i32
    return %arg0, %arg1, %c0_i32, %c0_i32_0 : i32, i32, i32, i32
  }
  func.func @transform_1(%arg0: i32, %arg1: i32) -> (i32, i32) {
    %c0_i32 = arith.constant 0 : i32
    %c0_i32_0 = arith.constant 0 : i32
    %c0_i32_1 = arith.constant 0 : i32
    return %c0_i32, %c0_i32_0 : i32, i32
  }
  func.func @transform_2(%arg0: i32, %arg1: i32) -> (i32, i32) {
    %c0_i32 = arith.constant 0 : i32
    %c0_i32_0 = arith.constant 0 : i32
    %c0_i32_1 = arith.constant 0 : i32
    return %c0_i32, %c0_i32_0 : i32, i32
  }
  func.func @transform_3(%arg0: i32, %arg1: i32) -> (i32, i32) {
    %c0_i32 = arith.constant 0 : i32
    %c0_i32_0 = arith.constant 0 : i32
    %c0_i32_1 = arith.constant 0 : i32
    return %c0_i32, %c0_i32_0 : i32, i32
  }
  func.func @transform_4(%arg0: i32, %arg1: i32) -> (i32, i32, i32, i32) {
    %c0_i32 = arith.constant 0 : i32
    %c0_i32_0 = arith.constant 0 : i32
    %c0_i32_1 = arith.constant 0 : i32
    return %arg0, %arg1, %c0_i32, %c0_i32_0 : i32, i32, i32, i32
  }
}

module attributes {stable_mosaic.version = 11 : i64} {
  func.func @_conv_stats_kernel(%arg0: i32, %arg1: i32, %arg2: memref<1x14x32x128xbf16, #tpu.memory_space<vmem>>, %arg3: memref<9x128x128xbf16, #tpu.memory_space<vmem>>, %arg4: memref<1x12x16x128xbf16, #tpu.memory_space<vmem>>, %arg5: memref<1x8x128xf32, #tpu.memory_space<vmem>>) attributes {dimension_semantics = [#tpu.dimension_semantics<parallel>, #tpu.dimension_semantics<arbitrary>], iteration_bounds = array<i64: 2, 1>, scalar_prefetch = 0 : i64, scratch_operands = 0 : i64, tpu.core_type = #tpu.core_type<tc>, window_params = [{transform_indices = @transform_0, window_bounds = array<i64: 1, 14, 32, 128>}, {pipeline_mode = #tpu.pipeline_mode<synchronous>, transform_indices = @transform_1, window_bounds = array<i64: 9, 128, 128>}, {transform_indices = @transform_2, window_bounds = array<i64: 1, 12, 16, 128>}, {transform_indices = @transform_3, window_bounds = array<i64: 1, 8, 128>}]} {
    %c0_i32 = arith.constant 0 : i32
    %0 = arith.cmpi eq, %arg1, %c0_i32 : i32
    %1 = arith.extui %0 : i1 to i32
    %c0_i32_0 = arith.constant 0 : i32
    %2 = arith.cmpi ne, %1, %c0_i32_0 : i32
    scf.if %2 {
      %cst_75 = arith.constant 0.000000e+00 : f32
      %109 = vector.broadcast %cst_75 : f32 to vector<1x8x128xf32>
      %c0_76 = arith.constant 0 : index
      %c0_77 = arith.constant 0 : index
      %c0_78 = arith.constant 0 : index
      %110 = vector.load %arg5[%c0_76, %c0_77, %c0_78] : memref<1x8x128xf32, #tpu.memory_space<vmem>>, vector<1x8x128xf32>
      tpu.vector_store %arg5[%c0_76, %c0_77, %c0_78], %109 {strides = array<i32>} : memref<1x8x128xf32, #tpu.memory_space<vmem>>, vector<1x8x128xf32>,
    } else {
    }
    %c12_i32 = arith.constant 12 : i32
    %3 = arith.muli %arg1, %c12_i32 : i32
    %c0_i32_1 = arith.constant 0 : i32
    %4 = arith.addi %3, %c0_i32_1 : i32
    %c0 = arith.constant 0 : index
    %5 = arith.index_cast %4 : i32 to index
    %c0_2 = arith.constant 0 : index
    %c0_3 = arith.constant 0 : index
    %6 = vector.load %arg2[%c0, %5, %c0_2, %c0_3] : memref<1x14x32x128xbf16, #tpu.memory_space<vmem>>, vector<1x12x16x128xbf16>
    %7 = vector.shape_cast %6 : vector<1x12x16x128xbf16> to vector<12x16x128xbf16>
    %8 = vector.shape_cast %7 : vector<12x16x128xbf16> to vector<192x128xbf16>
    %c0_4 = arith.constant 0 : index
    %c0_5 = arith.constant 0 : index
    %c0_6 = arith.constant 0 : index
    %9 = vector.load %arg3[%c0_4, %c0_5, %c0_6] : memref<9x128x128xbf16, #tpu.memory_space<vmem>>, vector<1x128x128xbf16>
    %10 = vector.shape_cast %9 : vector<1x128x128xbf16> to vector<128x128xbf16>
    %cst = arith.constant dense<0.000000e+00> : vector<192x128xf32>
    %11 = tpu.matmul %8, %10, %cst {dimension_numbers = #tpu.dot_dimension_numbers<[1], [0], [0], [1], [0, 0, 1, 1], [], []>} : vector<192x128xbf16>, vector<128x128xbf16>, vector<192x128xf32> -> vector<192x128xf32>
    %c0_i32_7 = arith.constant 0 : i32
    %12 = arith.addi %3, %c0_i32_7 : i32
    %c0_8 = arith.constant 0 : index
    %13 = arith.index_cast %12 : i32 to index
    %c1 = arith.constant 1 : index
    %c0_9 = arith.constant 0 : index
    %14 = vector.load %arg2[%c0_8, %13, %c1, %c0_9] : memref<1x14x32x128xbf16, #tpu.memory_space<vmem>>, vector<1x12x16x128xbf16>
    %15 = vector.shape_cast %14 : vector<1x12x16x128xbf16> to vector<12x16x128xbf16>
    %16 = vector.shape_cast %15 : vector<12x16x128xbf16> to vector<192x128xbf16>
    %c1_10 = arith.constant 1 : index
    %c0_11 = arith.constant 0 : index
    %c0_12 = arith.constant 0 : index
    %17 = vector.load %arg3[%c1_10, %c0_11, %c0_12] : memref<9x128x128xbf16, #tpu.memory_space<vmem>>, vector<1x128x128xbf16>
    %18 = vector.shape_cast %17 : vector<1x128x128xbf16> to vector<128x128xbf16>
    %cst_13 = arith.constant dense<0.000000e+00> : vector<192x128xf32>
    %19 = tpu.matmul %16, %18, %cst_13 {dimension_numbers = #tpu.dot_dimension_numbers<[1], [0], [0], [1], [0, 0, 1, 1], [], []>} : vector<192x128xbf16>, vector<128x128xbf16>, vector<192x128xf32> -> vector<192x128xf32>
    %20 = arith.addf %11, %19 : vector<192x128xf32>
    %c0_i32_14 = arith.constant 0 : i32
    %21 = arith.addi %3, %c0_i32_14 : i32
    %c0_15 = arith.constant 0 : index
    %22 = arith.index_cast %21 : i32 to index
    %c2 = arith.constant 2 : index
    %c0_16 = arith.constant 0 : index
    %23 = vector.load %arg2[%c0_15, %22, %c2, %c0_16] : memref<1x14x32x128xbf16, #tpu.memory_space<vmem>>, vector<1x12x16x128xbf16>
    %24 = vector.shape_cast %23 : vector<1x12x16x128xbf16> to vector<12x16x128xbf16>
    %25 = vector.shape_cast %24 : vector<12x16x128xbf16> to vector<192x128xbf16>
    %c2_17 = arith.constant 2 : index
    %c0_18 = arith.constant 0 : index
    %c0_19 = arith.constant 0 : index
    %26 = vector.load %arg3[%c2_17, %c0_18, %c0_19] : memref<9x128x128xbf16, #tpu.memory_space<vmem>>, vector<1x128x128xbf16>
    %27 = vector.shape_cast %26 : vector<1x128x128xbf16> to vector<128x128xbf16>
    %cst_20 = arith.constant dense<0.000000e+00> : vector<192x128xf32>
    %28 = tpu.matmul %25, %27, %cst_20 {dimension_numbers = #tpu.dot_dimension_numbers<[1], [0], [0], [1], [0, 0, 1, 1], [], []>} : vector<192x128xbf16>, vector<128x128xbf16>, vector<192x128xf32> -> vector<192x128xf32>
    %29 = arith.addf %20, %28 : vector<192x128xf32>
    %c1_i32 = arith.constant 1 : i32
    %30 = arith.addi %3, %c1_i32 : i32
    %c0_21 = arith.constant 0 : index
    %31 = arith.index_cast %30 : i32 to index
    %c0_22 = arith.constant 0 : index
    %c0_23 = arith.constant 0 : index
    %32 = vector.load %arg2[%c0_21, %31, %c0_22, %c0_23] : memref<1x14x32x128xbf16, #tpu.memory_space<vmem>>, vector<1x12x16x128xbf16>
    %33 = vector.shape_cast %32 : vector<1x12x16x128xbf16> to vector<12x16x128xbf16>
    %34 = vector.shape_cast %33 : vector<12x16x128xbf16> to vector<192x128xbf16>
    %c3 = arith.constant 3 : index
    %c0_24 = arith.constant 0 : index
    %c0_25 = arith.constant 0 : index
    %35 = vector.load %arg3[%c3, %c0_24, %c0_25] : memref<9x128x128xbf16, #tpu.memory_space<vmem>>, vector<1x128x128xbf16>
    %36 = vector.shape_cast %35 : vector<1x128x128xbf16> to vector<128x128xbf16>
    %cst_26 = arith.constant dense<0.000000e+00> : vector<192x128xf32>
    %37 = tpu.matmul %34, %36, %cst_26 {dimension_numbers = #tpu.dot_dimension_numbers<[1], [0], [0], [1], [0, 0, 1, 1], [], []>} : vector<192x128xbf16>, vector<128x128xbf16>, vector<192x128xf32> -> vector<192x128xf32>
    %38 = arith.addf %29, %37 : vector<192x128xf32>
    %c1_i32_27 = arith.constant 1 : i32
    %39 = arith.addi %3, %c1_i32_27 : i32
    %c0_28 = arith.constant 0 : index
    %40 = arith.index_cast %39 : i32 to index
    %c1_29 = arith.constant 1 : index
    %c0_30 = arith.constant 0 : index
    %41 = vector.load %arg2[%c0_28, %40, %c1_29, %c0_30] : memref<1x14x32x128xbf16, #tpu.memory_space<vmem>>, vector<1x12x16x128xbf16>
    %42 = vector.shape_cast %41 : vector<1x12x16x128xbf16> to vector<12x16x128xbf16>
    %43 = vector.shape_cast %42 : vector<12x16x128xbf16> to vector<192x128xbf16>
    %c4 = arith.constant 4 : index
    %c0_31 = arith.constant 0 : index
    %c0_32 = arith.constant 0 : index
    %44 = vector.load %arg3[%c4, %c0_31, %c0_32] : memref<9x128x128xbf16, #tpu.memory_space<vmem>>, vector<1x128x128xbf16>
    %45 = vector.shape_cast %44 : vector<1x128x128xbf16> to vector<128x128xbf16>
    %cst_33 = arith.constant dense<0.000000e+00> : vector<192x128xf32>
    %46 = tpu.matmul %43, %45, %cst_33 {dimension_numbers = #tpu.dot_dimension_numbers<[1], [0], [0], [1], [0, 0, 1, 1], [], []>} : vector<192x128xbf16>, vector<128x128xbf16>, vector<192x128xf32> -> vector<192x128xf32>
    %47 = arith.addf %38, %46 : vector<192x128xf32>
    %c1_i32_34 = arith.constant 1 : i32
    %48 = arith.addi %3, %c1_i32_34 : i32
    %c0_35 = arith.constant 0 : index
    %49 = arith.index_cast %48 : i32 to index
    %c2_36 = arith.constant 2 : index
    %c0_37 = arith.constant 0 : index
    %50 = vector.load %arg2[%c0_35, %49, %c2_36, %c0_37] : memref<1x14x32x128xbf16, #tpu.memory_space<vmem>>, vector<1x12x16x128xbf16>
    %51 = vector.shape_cast %50 : vector<1x12x16x128xbf16> to vector<12x16x128xbf16>
    %52 = vector.shape_cast %51 : vector<12x16x128xbf16> to vector<192x128xbf16>
    %c5 = arith.constant 5 : index
    %c0_38 = arith.constant 0 : index
    %c0_39 = arith.constant 0 : index
    %53 = vector.load %arg3[%c5, %c0_38, %c0_39] : memref<9x128x128xbf16, #tpu.memory_space<vmem>>, vector<1x128x128xbf16>
    %54 = vector.shape_cast %53 : vector<1x128x128xbf16> to vector<128x128xbf16>
    %cst_40 = arith.constant dense<0.000000e+00> : vector<192x128xf32>
    %55 = tpu.matmul %52, %54, %cst_40 {dimension_numbers = #tpu.dot_dimension_numbers<[1], [0], [0], [1], [0, 0, 1, 1], [], []>} : vector<192x128xbf16>, vector<128x128xbf16>, vector<192x128xf32> -> vector<192x128xf32>
    %56 = arith.addf %47, %55 : vector<192x128xf32>
    %c2_i32 = arith.constant 2 : i32
    %57 = arith.addi %3, %c2_i32 : i32
    %c0_41 = arith.constant 0 : index
    %58 = arith.index_cast %57 : i32 to index
    %c0_42 = arith.constant 0 : index
    %c0_43 = arith.constant 0 : index
    %59 = vector.load %arg2[%c0_41, %58, %c0_42, %c0_43] : memref<1x14x32x128xbf16, #tpu.memory_space<vmem>>, vector<1x12x16x128xbf16>
    %60 = vector.shape_cast %59 : vector<1x12x16x128xbf16> to vector<12x16x128xbf16>
    %61 = vector.shape_cast %60 : vector<12x16x128xbf16> to vector<192x128xbf16>
    %c6 = arith.constant 6 : index
    %c0_44 = arith.constant 0 : index
    %c0_45 = arith.constant 0 : index
    %62 = vector.load %arg3[%c6, %c0_44, %c0_45] : memref<9x128x128xbf16, #tpu.memory_space<vmem>>, vector<1x128x128xbf16>
    %63 = vector.shape_cast %62 : vector<1x128x128xbf16> to vector<128x128xbf16>
    %cst_46 = arith.constant dense<0.000000e+00> : vector<192x128xf32>
    %64 = tpu.matmul %61, %63, %cst_46 {dimension_numbers = #tpu.dot_dimension_numbers<[1], [0], [0], [1], [0, 0, 1, 1], [], []>} : vector<192x128xbf16>, vector<128x128xbf16>, vector<192x128xf32> -> vector<192x128xf32>
    %65 = arith.addf %56, %64 : vector<192x128xf32>
    %c2_i32_47 = arith.constant 2 : i32
    %66 = arith.addi %3, %c2_i32_47 : i32
    %c0_48 = arith.constant 0 : index
    %67 = arith.index_cast %66 : i32 to index
    %c1_49 = arith.constant 1 : index
    %c0_50 = arith.constant 0 : index
    %68 = vector.load %arg2[%c0_48, %67, %c1_49, %c0_50] : memref<1x14x32x128xbf16, #tpu.memory_space<vmem>>, vector<1x12x16x128xbf16>
    %69 = vector.shape_cast %68 : vector<1x12x16x128xbf16> to vector<12x16x128xbf16>
    %70 = vector.shape_cast %69 : vector<12x16x128xbf16> to vector<192x128xbf16>
    %c7 = arith.constant 7 : index
    %c0_51 = arith.constant 0 : index
    %c0_52 = arith.constant 0 : index
    %71 = vector.load %arg3[%c7, %c0_51, %c0_52] : memref<9x128x128xbf16, #tpu.memory_space<vmem>>, vector<1x128x128xbf16>
    %72 = vector.shape_cast %71 : vector<1x128x128xbf16> to vector<128x128xbf16>
    %cst_53 = arith.constant dense<0.000000e+00> : vector<192x128xf32>
    %73 = tpu.matmul %70, %72, %cst_53 {dimension_numbers = #tpu.dot_dimension_numbers<[1], [0], [0], [1], [0, 0, 1, 1], [], []>} : vector<192x128xbf16>, vector<128x128xbf16>, vector<192x128xf32> -> vector<192x128xf32>
    %74 = arith.addf %65, %73 : vector<192x128xf32>
    %c2_i32_54 = arith.constant 2 : i32
    %75 = arith.addi %3, %c2_i32_54 : i32
    %c0_55 = arith.constant 0 : index
    %76 = arith.index_cast %75 : i32 to index
    %c2_56 = arith.constant 2 : index
    %c0_57 = arith.constant 0 : index
    %77 = vector.load %arg2[%c0_55, %76, %c2_56, %c0_57] : memref<1x14x32x128xbf16, #tpu.memory_space<vmem>>, vector<1x12x16x128xbf16>
    %78 = vector.shape_cast %77 : vector<1x12x16x128xbf16> to vector<12x16x128xbf16>
    %79 = vector.shape_cast %78 : vector<12x16x128xbf16> to vector<192x128xbf16>
    %c8 = arith.constant 8 : index
    %c0_58 = arith.constant 0 : index
    %c0_59 = arith.constant 0 : index
    %80 = vector.load %arg3[%c8, %c0_58, %c0_59] : memref<9x128x128xbf16, #tpu.memory_space<vmem>>, vector<1x128x128xbf16>
    %81 = vector.shape_cast %80 : vector<1x128x128xbf16> to vector<128x128xbf16>
    %cst_60 = arith.constant dense<0.000000e+00> : vector<192x128xf32>
    %82 = tpu.matmul %79, %81, %cst_60 {dimension_numbers = #tpu.dot_dimension_numbers<[1], [0], [0], [1], [0, 0, 1, 1], [], []>} : vector<192x128xbf16>, vector<128x128xbf16>, vector<192x128xf32> -> vector<192x128xf32>
    %83 = arith.addf %74, %82 : vector<192x128xf32>
    %84 = vector.shape_cast %83 : vector<192x128xf32> to vector<12x16x128xf32>
    %85 = tpu.iota {dimensions = array<i32: 1>} : vector<12x16x1xi32>
    %c12_i32_61 = arith.constant 12 : i32
    %86 = vector.broadcast %c12_i32_61 : i32 to vector<12x16x1xi32>
    %87 = arith.cmpi slt, %85, %86 : vector<12x16x1xi32>
    %cst_62 = arith.constant 0.000000e+00 : f32
    %88 = vector.shape_cast %87 : vector<12x16x1xi1> to vector<12x16x1xi1>
    %89 = vector.broadcast %88 : vector<12x16x1xi1> to vector<12x16x128xi1>
    %90 = vector.broadcast %cst_62 : f32 to vector<12x16x128xf32>
    %91 = arith.select %89, %84, %90 : vector<12x16x128xi1>, vector<12x16x128xf32>
    %92 = arith.truncf %91 : vector<12x16x128xf32> to vector<12x16x128xbf16>
    %c0_63 = arith.constant 0 : index
    %c0_64 = arith.constant 0 : index
    %c0_65 = arith.constant 0 : index
    %c0_66 = arith.constant 0 : index
    %93 = vector.load %arg4[%c0_63, %c0_64, %c0_65, %c0_66] : memref<1x12x16x128xbf16, #tpu.memory_space<vmem>>, vector<1x12x16x128xbf16>
    %94 = vector.shape_cast %93 : vector<1x12x16x128xbf16> to vector<12x16x128xbf16>
    %95 = vector.shape_cast %92 : vector<12x16x128xbf16> to vector<1x12x16x128xbf16>
    tpu.vector_store %arg4[%c0_63, %c0_64, %c0_65, %c0_66], %95 {strides = array<i32>} : memref<1x12x16x128xbf16, #tpu.memory_space<vmem>>, vector<1x12x16x128xbf16>,
    %96 = vector.shape_cast %91 : vector<12x16x128xf32> to vector<192x128xf32>
    %cst_67 = arith.constant dense<0.000000e+00> : vector<128xf32>
    %97 = vector.multi_reduction <add>, %96, %cst_67 [0] : vector<192x128xf32> to vector<128xf32>
    %98 = vector.shape_cast %97 : vector<128xf32> to vector<1x128xf32>
    %99 = arith.mulf %96, %96 : vector<192x128xf32>
    %cst_68 = arith.constant dense<0.000000e+00> : vector<128xf32>
    %100 = vector.multi_reduction <add>, %99, %cst_68 [0] : vector<192x128xf32> to vector<128xf32>
    %101 = vector.shape_cast %100 : vector<128xf32> to vector<1x128xf32>
    %102 = tpu.concatenate %98, %101 in 0 : vector<1x128xf32>, vector<1x128xf32> -> vector<2x128xf32>
    %c0_69 = arith.constant 0 : index
    %c0_70 = arith.constant 0 : index
    %c0_71 = arith.constant 0 : index
    %103 = vector.load %arg5[%c0_69, %c0_70, %c0_71] : memref<1x8x128xf32, #tpu.memory_space<vmem>>, vector<1x2x128xf32>
    %104 = vector.shape_cast %103 : vector<1x2x128xf32> to vector<2x128xf32>
    %105 = arith.addf %104, %102 : vector<2x128xf32>
    %c0_72 = arith.constant 0 : index
    %c0_73 = arith.constant 0 : index
    %c0_74 = arith.constant 0 : index
    %106 = vector.load %arg5[%c0_72, %c0_73, %c0_74] : memref<1x8x128xf32, #tpu.memory_space<vmem>>, vector<1x2x128xf32>
    %107 = vector.shape_cast %106 : vector<1x2x128xf32> to vector<2x128xf32>
    %108 = vector.shape_cast %105 : vector<2x128xf32> to vector<1x2x128xf32>
    tpu.vector_store %arg5[%c0_72, %c0_73, %c0_74], %108 {strides = array<i32>} : memref<1x8x128xf32, #tpu.memory_space<vmem>>, vector<1x2x128xf32>,
    return
  }
  func.func @transform_0(%arg0: i32, %arg1: i32) -> (i32, i32, i32, i32) {
    %c0_i32 = arith.constant 0 : i32
    %c0_i32_0 = arith.constant 0 : i32
    %c0_i32_1 = arith.constant 0 : i32
    %c0_i32_2 = arith.constant 0 : i32
    return %arg0, %c0_i32, %c0_i32_0, %c0_i32_1 : i32, i32, i32, i32
  }
  func.func @transform_1(%arg0: i32, %arg1: i32) -> (i32, i32, i32) {
    %c0_i32 = arith.constant 0 : i32
    %c0_i32_0 = arith.constant 0 : i32
    %c0_i32_1 = arith.constant 0 : i32
    %c0_i32_2 = arith.constant 0 : i32
    return %c0_i32, %c0_i32_0, %c0_i32_1 : i32, i32, i32
  }
  func.func @transform_2(%arg0: i32, %arg1: i32) -> (i32, i32, i32, i32) {
    %c0_i32 = arith.constant 0 : i32
    %c0_i32_0 = arith.constant 0 : i32
    %c0_i32_1 = arith.constant 0 : i32
    return %arg0, %arg1, %c0_i32, %c0_i32_0 : i32, i32, i32, i32
  }
  func.func @transform_3(%arg0: i32, %arg1: i32) -> (i32, i32, i32) {
    %c0_i32 = arith.constant 0 : i32
    %c0_i32_0 = arith.constant 0 : i32
    %c0_i32_1 = arith.constant 0 : i32
    return %arg0, %c0_i32, %c0_i32_0 : i32, i32, i32
  }
}

module attributes {stable_mosaic.version = 11 : i64} {
  func.func @_bn_relu_kernel(%arg0: i32, %arg1: i32, %arg2: memref<1x12x16x128xbf16, #tpu.memory_space<vmem>>, %arg3: memref<8x128xf32, #tpu.memory_space<vmem>>, %arg4: memref<1x128xf32, #tpu.memory_space<vmem>>, %arg5: memref<1x128xf32, #tpu.memory_space<vmem>>, %arg6: memref<1x12x32x128xbf16, #tpu.memory_space<vmem>>) attributes {dimension_semantics = [#tpu.dimension_semantics<parallel>, #tpu.dimension_semantics<parallel>], iteration_bounds = array<i64: 2, 1>, scalar_prefetch = 0 : i64, scratch_operands = 0 : i64, tpu.core_type = #tpu.core_type<tc>, window_params = [{transform_indices = @transform_0, window_bounds = array<i64: 1, 12, 16, 128>}, {pipeline_mode = #tpu.pipeline_mode<synchronous>, transform_indices = @transform_1, window_bounds = array<i64: 8, 128>}, {pipeline_mode = #tpu.pipeline_mode<synchronous>, transform_indices = @transform_2, window_bounds = array<i64: 1, 128>}, {pipeline_mode = #tpu.pipeline_mode<synchronous>, transform_indices = @transform_3, window_bounds = array<i64: 1, 128>}, {transform_indices = @transform_4, window_bounds = array<i64: 1, 12, 32, 128>}]} {
    %c0 = arith.constant 0 : index
    %c0_0 = arith.constant 0 : index
    %0 = vector.load %arg3[%c0, %c0_0] : memref<8x128xf32, #tpu.memory_space<vmem>>, vector<1x128xf32>
    %cst = arith.constant 0.00347222225 : f32
    %1 = vector.broadcast %cst : f32 to vector<1x128xf32>
    %2 = arith.mulf %0, %1 : vector<1x128xf32>
    %c1 = arith.constant 1 : index
    %c0_1 = arith.constant 0 : index
    %3 = vector.load %arg3[%c1, %c0_1] : memref<8x128xf32, #tpu.memory_space<vmem>>, vector<1x128xf32>
    %cst_2 = arith.constant 0.00347222225 : f32
    %4 = vector.broadcast %cst_2 : f32 to vector<1x128xf32>
    %5 = arith.mulf %3, %4 : vector<1x128xf32>
    %6 = arith.mulf %2, %2 : vector<1x128xf32>
    %7 = arith.subf %5, %6 : vector<1x128xf32>
    %cst_3 = arith.constant 0.000000e+00 : f32
    %8 = vector.broadcast %cst_3 : f32 to vector<1x128xf32>
    %9 = arith.maximumf %7, %8 : vector<1x128xf32>
    %cst_4 = arith.constant 9.99999974E-6 : f32
    %10 = vector.broadcast %cst_4 : f32 to vector<1x128xf32>
    %11 = arith.addf %9, %10 : vector<1x128xf32>
    %12 = math.rsqrt %11 : vector<1x128xf32>
    %c0_5 = arith.constant 0 : index
    %c0_6 = arith.constant 0 : index
    %13 = vector.load %arg4[%c0_5, %c0_6] : memref<1x128xf32, #tpu.memory_space<vmem>>, vector<1x128xf32>
    %14 = arith.mulf %13, %12 : vector<1x128xf32>
    %c0_7 = arith.constant 0 : index
    %c0_8 = arith.constant 0 : index
    %15 = vector.load %arg5[%c0_7, %c0_8] : memref<1x128xf32, #tpu.memory_space<vmem>>, vector<1x128xf32>
    %16 = arith.mulf %2, %14 : vector<1x128xf32>
    %17 = arith.subf %15, %16 : vector<1x128xf32>
    %18 = vector.shape_cast %14 : vector<1x128xf32> to vector<1x1x128xf32>
    %19 = vector.shape_cast %17 : vector<1x128xf32> to vector<1x1x128xf32>
    %c0_9 = arith.constant 0 : index
    %c0_10 = arith.constant 0 : index
    %c0_11 = arith.constant 0 : index
    %c0_12 = arith.constant 0 : index
    %20 = vector.load %arg2[%c0_9, %c0_10, %c0_11, %c0_12] : memref<1x12x16x128xbf16, #tpu.memory_space<vmem>>, vector<1x12x16x128xbf16>
    %21 = vector.shape_cast %20 : vector<1x12x16x128xbf16> to vector<12x16x128xbf16>
    %22 = arith.extf %21 : vector<12x16x128xbf16> to vector<12x16x128xf32>
    %23 = vector.broadcast %18 : vector<1x1x128xf32> to vector<12x16x128xf32>
    %24 = arith.mulf %22, %23 : vector<12x16x128xf32>
    %25 = vector.broadcast %19 : vector<1x1x128xf32> to vector<12x16x128xf32>
    %26 = arith.addf %24, %25 : vector<12x16x128xf32>
    %cst_13 = arith.constant 0.000000e+00 : f32
    %27 = vector.broadcast %cst_13 : f32 to vector<12x16x128xf32>
    %28 = arith.maximumf %26, %27 : vector<12x16x128xf32>
    %29 = arith.truncf %28 : vector<12x16x128xf32> to vector<12x16x128xbf16>
    %c0_14 = arith.constant 0 : index
    %c0_15 = arith.constant 0 : index
    %c0_16 = arith.constant 0 : index
    %c0_17 = arith.constant 0 : index
    %30 = vector.load %arg6[%c0_14, %c0_15, %c0_16, %c0_17] : memref<1x12x32x128xbf16, #tpu.memory_space<vmem>>, vector<1x12x16x128xbf16>
    %31 = vector.shape_cast %30 : vector<1x12x16x128xbf16> to vector<12x16x128xbf16>
    %32 = vector.shape_cast %29 : vector<12x16x128xbf16> to vector<1x12x16x128xbf16>
    tpu.vector_store %arg6[%c0_14, %c0_15, %c0_16, %c0_17], %32 {strides = array<i32>} : memref<1x12x32x128xbf16, #tpu.memory_space<vmem>>, vector<1x12x16x128xbf16>,
    %cst_18 = arith.constant 0.000000e+00 : bf16
    %33 = vector.broadcast %cst_18 : bf16 to vector<12x16x128xbf16>
    %c0_19 = arith.constant 0 : index
    %c0_20 = arith.constant 0 : index
    %c16 = arith.constant 16 : index
    %c0_21 = arith.constant 0 : index
    %34 = vector.load %arg6[%c0_19, %c0_20, %c16, %c0_21] : memref<1x12x32x128xbf16, #tpu.memory_space<vmem>>, vector<1x12x16x128xbf16>
    %35 = vector.shape_cast %34 : vector<1x12x16x128xbf16> to vector<12x16x128xbf16>
    %36 = vector.shape_cast %33 : vector<12x16x128xbf16> to vector<1x12x16x128xbf16>
    tpu.vector_store %arg6[%c0_19, %c0_20, %c16, %c0_21], %36 {strides = array<i32>} : memref<1x12x32x128xbf16, #tpu.memory_space<vmem>>, vector<1x12x16x128xbf16>,
    return
  }
  func.func @transform_0(%arg0: i32, %arg1: i32) -> (i32, i32, i32, i32) {
    %c0_i32 = arith.constant 0 : i32
    %c0_i32_0 = arith.constant 0 : i32
    %c0_i32_1 = arith.constant 0 : i32
    return %arg0, %arg1, %c0_i32, %c0_i32_0 : i32, i32, i32, i32
  }
  func.func @transform_1(%arg0: i32, %arg1: i32) -> (i32, i32) {
    %c0_i32 = arith.constant 0 : i32
    %c0_i32_0 = arith.constant 0 : i32
    %c0_i32_1 = arith.constant 0 : i32
    return %c0_i32, %c0_i32_0 : i32, i32
  }
  func.func @transform_2(%arg0: i32, %arg1: i32) -> (i32, i32) {
    %c0_i32 = arith.constant 0 : i32
    %c0_i32_0 = arith.constant 0 : i32
    %c0_i32_1 = arith.constant 0 : i32
    return %c0_i32, %c0_i32_0 : i32, i32
  }
  func.func @transform_3(%arg0: i32, %arg1: i32) -> (i32, i32) {
    %c0_i32 = arith.constant 0 : i32
    %c0_i32_0 = arith.constant 0 : i32
    %c0_i32_1 = arith.constant 0 : i32
    return %c0_i32, %c0_i32_0 : i32, i32
  }
  func.func @transform_4(%arg0: i32, %arg1: i32) -> (i32, i32, i32, i32) {
    %c0_i32 = arith.constant 0 : i32
    %c0_i32_0 = arith.constant 0 : i32
    %c0_i32_1 = arith.constant 0 : i32
    return %arg0, %arg1, %c0_i32, %c0_i32_0 : i32, i32, i32, i32
  }
}

module attributes {stable_mosaic.version = 11 : i64} {
  func.func @_conv_stats_kernel(%arg0: i32, %arg1: i32, %arg2: memref<1x12x32x128xbf16, #tpu.memory_space<vmem>>, %arg3: memref<9x128x128xbf16, #tpu.memory_space<vmem>>, %arg4: memref<1x10x16x128xbf16, #tpu.memory_space<vmem>>, %arg5: memref<1x8x128xf32, #tpu.memory_space<vmem>>) attributes {dimension_semantics = [#tpu.dimension_semantics<parallel>, #tpu.dimension_semantics<arbitrary>], iteration_bounds = array<i64: 2, 1>, scalar_prefetch = 0 : i64, scratch_operands = 0 : i64, tpu.core_type = #tpu.core_type<tc>, window_params = [{transform_indices = @transform_0, window_bounds = array<i64: 1, 12, 32, 128>}, {pipeline_mode = #tpu.pipeline_mode<synchronous>, transform_indices = @transform_1, window_bounds = array<i64: 9, 128, 128>}, {transform_indices = @transform_2, window_bounds = array<i64: 1, 10, 16, 128>}, {transform_indices = @transform_3, window_bounds = array<i64: 1, 8, 128>}]} {
    %c0_i32 = arith.constant 0 : i32
    %0 = arith.cmpi eq, %arg1, %c0_i32 : i32
    %1 = arith.extui %0 : i1 to i32
    %c0_i32_0 = arith.constant 0 : i32
    %2 = arith.cmpi ne, %1, %c0_i32_0 : i32
    scf.if %2 {
      %cst_75 = arith.constant 0.000000e+00 : f32
      %109 = vector.broadcast %cst_75 : f32 to vector<1x8x128xf32>
      %c0_76 = arith.constant 0 : index
      %c0_77 = arith.constant 0 : index
      %c0_78 = arith.constant 0 : index
      %110 = vector.load %arg5[%c0_76, %c0_77, %c0_78] : memref<1x8x128xf32, #tpu.memory_space<vmem>>, vector<1x8x128xf32>
      tpu.vector_store %arg5[%c0_76, %c0_77, %c0_78], %109 {strides = array<i32>} : memref<1x8x128xf32, #tpu.memory_space<vmem>>, vector<1x8x128xf32>,
    } else {
    }
    %c10_i32 = arith.constant 10 : i32
    %3 = arith.muli %arg1, %c10_i32 : i32
    %c0_i32_1 = arith.constant 0 : i32
    %4 = arith.addi %3, %c0_i32_1 : i32
    %c0 = arith.constant 0 : index
    %5 = arith.index_cast %4 : i32 to index
    %c0_2 = arith.constant 0 : index
    %c0_3 = arith.constant 0 : index
    %6 = vector.load %arg2[%c0, %5, %c0_2, %c0_3] : memref<1x12x32x128xbf16, #tpu.memory_space<vmem>>, vector<1x10x16x128xbf16>
    %7 = vector.shape_cast %6 : vector<1x10x16x128xbf16> to vector<10x16x128xbf16>
    %8 = vector.shape_cast %7 : vector<10x16x128xbf16> to vector<160x128xbf16>
    %c0_4 = arith.constant 0 : index
    %c0_5 = arith.constant 0 : index
    %c0_6 = arith.constant 0 : index
    %9 = vector.load %arg3[%c0_4, %c0_5, %c0_6] : memref<9x128x128xbf16, #tpu.memory_space<vmem>>, vector<1x128x128xbf16>
    %10 = vector.shape_cast %9 : vector<1x128x128xbf16> to vector<128x128xbf16>
    %cst = arith.constant dense<0.000000e+00> : vector<160x128xf32>
    %11 = tpu.matmul %8, %10, %cst {dimension_numbers = #tpu.dot_dimension_numbers<[1], [0], [0], [1], [0, 0, 1, 1], [], []>} : vector<160x128xbf16>, vector<128x128xbf16>, vector<160x128xf32> -> vector<160x128xf32>
    %c0_i32_7 = arith.constant 0 : i32
    %12 = arith.addi %3, %c0_i32_7 : i32
    %c0_8 = arith.constant 0 : index
    %13 = arith.index_cast %12 : i32 to index
    %c1 = arith.constant 1 : index
    %c0_9 = arith.constant 0 : index
    %14 = vector.load %arg2[%c0_8, %13, %c1, %c0_9] : memref<1x12x32x128xbf16, #tpu.memory_space<vmem>>, vector<1x10x16x128xbf16>
    %15 = vector.shape_cast %14 : vector<1x10x16x128xbf16> to vector<10x16x128xbf16>
    %16 = vector.shape_cast %15 : vector<10x16x128xbf16> to vector<160x128xbf16>
    %c1_10 = arith.constant 1 : index
    %c0_11 = arith.constant 0 : index
    %c0_12 = arith.constant 0 : index
    %17 = vector.load %arg3[%c1_10, %c0_11, %c0_12] : memref<9x128x128xbf16, #tpu.memory_space<vmem>>, vector<1x128x128xbf16>
    %18 = vector.shape_cast %17 : vector<1x128x128xbf16> to vector<128x128xbf16>
    %cst_13 = arith.constant dense<0.000000e+00> : vector<160x128xf32>
    %19 = tpu.matmul %16, %18, %cst_13 {dimension_numbers = #tpu.dot_dimension_numbers<[1], [0], [0], [1], [0, 0, 1, 1], [], []>} : vector<160x128xbf16>, vector<128x128xbf16>, vector<160x128xf32> -> vector<160x128xf32>
    %20 = arith.addf %11, %19 : vector<160x128xf32>
    %c0_i32_14 = arith.constant 0 : i32
    %21 = arith.addi %3, %c0_i32_14 : i32
    %c0_15 = arith.constant 0 : index
    %22 = arith.index_cast %21 : i32 to index
    %c2 = arith.constant 2 : index
    %c0_16 = arith.constant 0 : index
    %23 = vector.load %arg2[%c0_15, %22, %c2, %c0_16] : memref<1x12x32x128xbf16, #tpu.memory_space<vmem>>, vector<1x10x16x128xbf16>
    %24 = vector.shape_cast %23 : vector<1x10x16x128xbf16> to vector<10x16x128xbf16>
    %25 = vector.shape_cast %24 : vector<10x16x128xbf16> to vector<160x128xbf16>
    %c2_17 = arith.constant 2 : index
    %c0_18 = arith.constant 0 : index
    %c0_19 = arith.constant 0 : index
    %26 = vector.load %arg3[%c2_17, %c0_18, %c0_19] : memref<9x128x128xbf16, #tpu.memory_space<vmem>>, vector<1x128x128xbf16>
    %27 = vector.shape_cast %26 : vector<1x128x128xbf16> to vector<128x128xbf16>
    %cst_20 = arith.constant dense<0.000000e+00> : vector<160x128xf32>
    %28 = tpu.matmul %25, %27, %cst_20 {dimension_numbers = #tpu.dot_dimension_numbers<[1], [0], [0], [1], [0, 0, 1, 1], [], []>} : vector<160x128xbf16>, vector<128x128xbf16>, vector<160x128xf32> -> vector<160x128xf32>
    %29 = arith.addf %20, %28 : vector<160x128xf32>
    %c1_i32 = arith.constant 1 : i32
    %30 = arith.addi %3, %c1_i32 : i32
    %c0_21 = arith.constant 0 : index
    %31 = arith.index_cast %30 : i32 to index
    %c0_22 = arith.constant 0 : index
    %c0_23 = arith.constant 0 : index
    %32 = vector.load %arg2[%c0_21, %31, %c0_22, %c0_23] : memref<1x12x32x128xbf16, #tpu.memory_space<vmem>>, vector<1x10x16x128xbf16>
    %33 = vector.shape_cast %32 : vector<1x10x16x128xbf16> to vector<10x16x128xbf16>
    %34 = vector.shape_cast %33 : vector<10x16x128xbf16> to vector<160x128xbf16>
    %c3 = arith.constant 3 : index
    %c0_24 = arith.constant 0 : index
    %c0_25 = arith.constant 0 : index
    %35 = vector.load %arg3[%c3, %c0_24, %c0_25] : memref<9x128x128xbf16, #tpu.memory_space<vmem>>, vector<1x128x128xbf16>
    %36 = vector.shape_cast %35 : vector<1x128x128xbf16> to vector<128x128xbf16>
    %cst_26 = arith.constant dense<0.000000e+00> : vector<160x128xf32>
    %37 = tpu.matmul %34, %36, %cst_26 {dimension_numbers = #tpu.dot_dimension_numbers<[1], [0], [0], [1], [0, 0, 1, 1], [], []>} : vector<160x128xbf16>, vector<128x128xbf16>, vector<160x128xf32> -> vector<160x128xf32>
    %38 = arith.addf %29, %37 : vector<160x128xf32>
    %c1_i32_27 = arith.constant 1 : i32
    %39 = arith.addi %3, %c1_i32_27 : i32
    %c0_28 = arith.constant 0 : index
    %40 = arith.index_cast %39 : i32 to index
    %c1_29 = arith.constant 1 : index
    %c0_30 = arith.constant 0 : index
    %41 = vector.load %arg2[%c0_28, %40, %c1_29, %c0_30] : memref<1x12x32x128xbf16, #tpu.memory_space<vmem>>, vector<1x10x16x128xbf16>
    %42 = vector.shape_cast %41 : vector<1x10x16x128xbf16> to vector<10x16x128xbf16>
    %43 = vector.shape_cast %42 : vector<10x16x128xbf16> to vector<160x128xbf16>
    %c4 = arith.constant 4 : index
    %c0_31 = arith.constant 0 : index
    %c0_32 = arith.constant 0 : index
    %44 = vector.load %arg3[%c4, %c0_31, %c0_32] : memref<9x128x128xbf16, #tpu.memory_space<vmem>>, vector<1x128x128xbf16>
    %45 = vector.shape_cast %44 : vector<1x128x128xbf16> to vector<128x128xbf16>
    %cst_33 = arith.constant dense<0.000000e+00> : vector<160x128xf32>
    %46 = tpu.matmul %43, %45, %cst_33 {dimension_numbers = #tpu.dot_dimension_numbers<[1], [0], [0], [1], [0, 0, 1, 1], [], []>} : vector<160x128xbf16>, vector<128x128xbf16>, vector<160x128xf32> -> vector<160x128xf32>
    %47 = arith.addf %38, %46 : vector<160x128xf32>
    %c1_i32_34 = arith.constant 1 : i32
    %48 = arith.addi %3, %c1_i32_34 : i32
    %c0_35 = arith.constant 0 : index
    %49 = arith.index_cast %48 : i32 to index
    %c2_36 = arith.constant 2 : index
    %c0_37 = arith.constant 0 : index
    %50 = vector.load %arg2[%c0_35, %49, %c2_36, %c0_37] : memref<1x12x32x128xbf16, #tpu.memory_space<vmem>>, vector<1x10x16x128xbf16>
    %51 = vector.shape_cast %50 : vector<1x10x16x128xbf16> to vector<10x16x128xbf16>
    %52 = vector.shape_cast %51 : vector<10x16x128xbf16> to vector<160x128xbf16>
    %c5 = arith.constant 5 : index
    %c0_38 = arith.constant 0 : index
    %c0_39 = arith.constant 0 : index
    %53 = vector.load %arg3[%c5, %c0_38, %c0_39] : memref<9x128x128xbf16, #tpu.memory_space<vmem>>, vector<1x128x128xbf16>
    %54 = vector.shape_cast %53 : vector<1x128x128xbf16> to vector<128x128xbf16>
    %cst_40 = arith.constant dense<0.000000e+00> : vector<160x128xf32>
    %55 = tpu.matmul %52, %54, %cst_40 {dimension_numbers = #tpu.dot_dimension_numbers<[1], [0], [0], [1], [0, 0, 1, 1], [], []>} : vector<160x128xbf16>, vector<128x128xbf16>, vector<160x128xf32> -> vector<160x128xf32>
    %56 = arith.addf %47, %55 : vector<160x128xf32>
    %c2_i32 = arith.constant 2 : i32
    %57 = arith.addi %3, %c2_i32 : i32
    %c0_41 = arith.constant 0 : index
    %58 = arith.index_cast %57 : i32 to index
    %c0_42 = arith.constant 0 : index
    %c0_43 = arith.constant 0 : index
    %59 = vector.load %arg2[%c0_41, %58, %c0_42, %c0_43] : memref<1x12x32x128xbf16, #tpu.memory_space<vmem>>, vector<1x10x16x128xbf16>
    %60 = vector.shape_cast %59 : vector<1x10x16x128xbf16> to vector<10x16x128xbf16>
    %61 = vector.shape_cast %60 : vector<10x16x128xbf16> to vector<160x128xbf16>
    %c6 = arith.constant 6 : index
    %c0_44 = arith.constant 0 : index
    %c0_45 = arith.constant 0 : index
    %62 = vector.load %arg3[%c6, %c0_44, %c0_45] : memref<9x128x128xbf16, #tpu.memory_space<vmem>>, vector<1x128x128xbf16>
    %63 = vector.shape_cast %62 : vector<1x128x128xbf16> to vector<128x128xbf16>
    %cst_46 = arith.constant dense<0.000000e+00> : vector<160x128xf32>
    %64 = tpu.matmul %61, %63, %cst_46 {dimension_numbers = #tpu.dot_dimension_numbers<[1], [0], [0], [1], [0, 0, 1, 1], [], []>} : vector<160x128xbf16>, vector<128x128xbf16>, vector<160x128xf32> -> vector<160x128xf32>
    %65 = arith.addf %56, %64 : vector<160x128xf32>
    %c2_i32_47 = arith.constant 2 : i32
    %66 = arith.addi %3, %c2_i32_47 : i32
    %c0_48 = arith.constant 0 : index
    %67 = arith.index_cast %66 : i32 to index
    %c1_49 = arith.constant 1 : index
    %c0_50 = arith.constant 0 : index
    %68 = vector.load %arg2[%c0_48, %67, %c1_49, %c0_50] : memref<1x12x32x128xbf16, #tpu.memory_space<vmem>>, vector<1x10x16x128xbf16>
    %69 = vector.shape_cast %68 : vector<1x10x16x128xbf16> to vector<10x16x128xbf16>
    %70 = vector.shape_cast %69 : vector<10x16x128xbf16> to vector<160x128xbf16>
    %c7 = arith.constant 7 : index
    %c0_51 = arith.constant 0 : index
    %c0_52 = arith.constant 0 : index
    %71 = vector.load %arg3[%c7, %c0_51, %c0_52] : memref<9x128x128xbf16, #tpu.memory_space<vmem>>, vector<1x128x128xbf16>
    %72 = vector.shape_cast %71 : vector<1x128x128xbf16> to vector<128x128xbf16>
    %cst_53 = arith.constant dense<0.000000e+00> : vector<160x128xf32>
    %73 = tpu.matmul %70, %72, %cst_53 {dimension_numbers = #tpu.dot_dimension_numbers<[1], [0], [0], [1], [0, 0, 1, 1], [], []>} : vector<160x128xbf16>, vector<128x128xbf16>, vector<160x128xf32> -> vector<160x128xf32>
    %74 = arith.addf %65, %73 : vector<160x128xf32>
    %c2_i32_54 = arith.constant 2 : i32
    %75 = arith.addi %3, %c2_i32_54 : i32
    %c0_55 = arith.constant 0 : index
    %76 = arith.index_cast %75 : i32 to index
    %c2_56 = arith.constant 2 : index
    %c0_57 = arith.constant 0 : index
    %77 = vector.load %arg2[%c0_55, %76, %c2_56, %c0_57] : memref<1x12x32x128xbf16, #tpu.memory_space<vmem>>, vector<1x10x16x128xbf16>
    %78 = vector.shape_cast %77 : vector<1x10x16x128xbf16> to vector<10x16x128xbf16>
    %79 = vector.shape_cast %78 : vector<10x16x128xbf16> to vector<160x128xbf16>
    %c8 = arith.constant 8 : index
    %c0_58 = arith.constant 0 : index
    %c0_59 = arith.constant 0 : index
    %80 = vector.load %arg3[%c8, %c0_58, %c0_59] : memref<9x128x128xbf16, #tpu.memory_space<vmem>>, vector<1x128x128xbf16>
    %81 = vector.shape_cast %80 : vector<1x128x128xbf16> to vector<128x128xbf16>
    %cst_60 = arith.constant dense<0.000000e+00> : vector<160x128xf32>
    %82 = tpu.matmul %79, %81, %cst_60 {dimension_numbers = #tpu.dot_dimension_numbers<[1], [0], [0], [1], [0, 0, 1, 1], [], []>} : vector<160x128xbf16>, vector<128x128xbf16>, vector<160x128xf32> -> vector<160x128xf32>
    %83 = arith.addf %74, %82 : vector<160x128xf32>
    %84 = vector.shape_cast %83 : vector<160x128xf32> to vector<10x16x128xf32>
    %85 = tpu.iota {dimensions = array<i32: 1>} : vector<10x16x1xi32>
    %c10_i32_61 = arith.constant 10 : i32
    %86 = vector.broadcast %c10_i32_61 : i32 to vector<10x16x1xi32>
    %87 = arith.cmpi slt, %85, %86 : vector<10x16x1xi32>
    %cst_62 = arith.constant 0.000000e+00 : f32
    %88 = vector.shape_cast %87 : vector<10x16x1xi1> to vector<10x16x1xi1>
    %89 = vector.broadcast %88 : vector<10x16x1xi1> to vector<10x16x128xi1>
    %90 = vector.broadcast %cst_62 : f32 to vector<10x16x128xf32>
    %91 = arith.select %89, %84, %90 : vector<10x16x128xi1>, vector<10x16x128xf32>
    %92 = arith.truncf %91 : vector<10x16x128xf32> to vector<10x16x128xbf16>
    %c0_63 = arith.constant 0 : index
    %c0_64 = arith.constant 0 : index
    %c0_65 = arith.constant 0 : index
    %c0_66 = arith.constant 0 : index
    %93 = vector.load %arg4[%c0_63, %c0_64, %c0_65, %c0_66] : memref<1x10x16x128xbf16, #tpu.memory_space<vmem>>, vector<1x10x16x128xbf16>
    %94 = vector.shape_cast %93 : vector<1x10x16x128xbf16> to vector<10x16x128xbf16>
    %95 = vector.shape_cast %92 : vector<10x16x128xbf16> to vector<1x10x16x128xbf16>
    tpu.vector_store %arg4[%c0_63, %c0_64, %c0_65, %c0_66], %95 {strides = array<i32>} : memref<1x10x16x128xbf16, #tpu.memory_space<vmem>>, vector<1x10x16x128xbf16>,
    %96 = vector.shape_cast %91 : vector<10x16x128xf32> to vector<160x128xf32>
    %cst_67 = arith.constant dense<0.000000e+00> : vector<128xf32>
    %97 = vector.multi_reduction <add>, %96, %cst_67 [0] : vector<160x128xf32> to vector<128xf32>
    %98 = vector.shape_cast %97 : vector<128xf32> to vector<1x128xf32>
    %99 = arith.mulf %96, %96 : vector<160x128xf32>
    %cst_68 = arith.constant dense<0.000000e+00> : vector<128xf32>
    %100 = vector.multi_reduction <add>, %99, %cst_68 [0] : vector<160x128xf32> to vector<128xf32>
    %101 = vector.shape_cast %100 : vector<128xf32> to vector<1x128xf32>
    %102 = tpu.concatenate %98, %101 in 0 : vector<1x128xf32>, vector<1x128xf32> -> vector<2x128xf32>
    %c0_69 = arith.constant 0 : index
    %c0_70 = arith.constant 0 : index
    %c0_71 = arith.constant 0 : index
    %103 = vector.load %arg5[%c0_69, %c0_70, %c0_71] : memref<1x8x128xf32, #tpu.memory_space<vmem>>, vector<1x2x128xf32>
    %104 = vector.shape_cast %103 : vector<1x2x128xf32> to vector<2x128xf32>
    %105 = arith.addf %104, %102 : vector<2x128xf32>
    %c0_72 = arith.constant 0 : index
    %c0_73 = arith.constant 0 : index
    %c0_74 = arith.constant 0 : index
    %106 = vector.load %arg5[%c0_72, %c0_73, %c0_74] : memref<1x8x128xf32, #tpu.memory_space<vmem>>, vector<1x2x128xf32>
    %107 = vector.shape_cast %106 : vector<1x2x128xf32> to vector<2x128xf32>
    %108 = vector.shape_cast %105 : vector<2x128xf32> to vector<1x2x128xf32>
    tpu.vector_store %arg5[%c0_72, %c0_73, %c0_74], %108 {strides = array<i32>} : memref<1x8x128xf32, #tpu.memory_space<vmem>>, vector<1x2x128xf32>,
    return
  }
  func.func @transform_0(%arg0: i32, %arg1: i32) -> (i32, i32, i32, i32) {
    %c0_i32 = arith.constant 0 : i32
    %c0_i32_0 = arith.constant 0 : i32
    %c0_i32_1 = arith.constant 0 : i32
    %c0_i32_2 = arith.constant 0 : i32
    return %arg0, %c0_i32, %c0_i32_0, %c0_i32_1 : i32, i32, i32, i32
  }
  func.func @transform_1(%arg0: i32, %arg1: i32) -> (i32, i32, i32) {
    %c0_i32 = arith.constant 0 : i32
    %c0_i32_0 = arith.constant 0 : i32
    %c0_i32_1 = arith.constant 0 : i32
    %c0_i32_2 = arith.constant 0 : i32
    return %c0_i32, %c0_i32_0, %c0_i32_1 : i32, i32, i32
  }
  func.func @transform_2(%arg0: i32, %arg1: i32) -> (i32, i32, i32, i32) {
    %c0_i32 = arith.constant 0 : i32
    %c0_i32_0 = arith.constant 0 : i32
    %c0_i32_1 = arith.constant 0 : i32
    return %arg0, %arg1, %c0_i32, %c0_i32_0 : i32, i32, i32, i32
  }
  func.func @transform_3(%arg0: i32, %arg1: i32) -> (i32, i32, i32) {
    %c0_i32 = arith.constant 0 : i32
    %c0_i32_0 = arith.constant 0 : i32
    %c0_i32_1 = arith.constant 0 : i32
    return %arg0, %c0_i32, %c0_i32_0 : i32, i32, i32
  }
}

module attributes {stable_mosaic.version = 11 : i64} {
  func.func @_bn_relu_pool_kernel(%arg0: i32, %arg1: i32, %arg2: memref<1x10x16x128xbf16, #tpu.memory_space<vmem>>, %arg3: memref<8x128xf32, #tpu.memory_space<vmem>>, %arg4: memref<1x128xf32, #tpu.memory_space<vmem>>, %arg5: memref<1x128xf32, #tpu.memory_space<vmem>>, %arg6: memref<1x5x16x128xf32, #tpu.memory_space<vmem>>) attributes {dimension_semantics = [#tpu.dimension_semantics<parallel>, #tpu.dimension_semantics<parallel>], iteration_bounds = array<i64: 2, 1>, scalar_prefetch = 0 : i64, scratch_operands = 0 : i64, tpu.core_type = #tpu.core_type<tc>, window_params = [{transform_indices = @transform_0, window_bounds = array<i64: 1, 10, 16, 128>}, {pipeline_mode = #tpu.pipeline_mode<synchronous>, transform_indices = @transform_1, window_bounds = array<i64: 8, 128>}, {pipeline_mode = #tpu.pipeline_mode<synchronous>, transform_indices = @transform_2, window_bounds = array<i64: 1, 128>}, {pipeline_mode = #tpu.pipeline_mode<synchronous>, transform_indices = @transform_3, window_bounds = array<i64: 1, 128>}, {transform_indices = @transform_4, window_bounds = array<i64: 1, 5, 16, 128>}]} {
    %c0 = arith.constant 0 : index
    %c0_0 = arith.constant 0 : index
    %0 = vector.load %arg3[%c0, %c0_0] : memref<8x128xf32, #tpu.memory_space<vmem>>, vector<1x128xf32>
    %cst = arith.constant 5.000000e-03 : f32
    %1 = vector.broadcast %cst : f32 to vector<1x128xf32>
    %2 = arith.mulf %0, %1 : vector<1x128xf32>
    %c1 = arith.constant 1 : index
    %c0_1 = arith.constant 0 : index
    %3 = vector.load %arg3[%c1, %c0_1] : memref<8x128xf32, #tpu.memory_space<vmem>>, vector<1x128xf32>
    %cst_2 = arith.constant 5.000000e-03 : f32
    %4 = vector.broadcast %cst_2 : f32 to vector<1x128xf32>
    %5 = arith.mulf %3, %4 : vector<1x128xf32>
    %6 = arith.mulf %2, %2 : vector<1x128xf32>
    %7 = arith.subf %5, %6 : vector<1x128xf32>
    %cst_3 = arith.constant 0.000000e+00 : f32
    %8 = vector.broadcast %cst_3 : f32 to vector<1x128xf32>
    %9 = arith.maximumf %7, %8 : vector<1x128xf32>
    %cst_4 = arith.constant 9.99999974E-6 : f32
    %10 = vector.broadcast %cst_4 : f32 to vector<1x128xf32>
    %11 = arith.addf %9, %10 : vector<1x128xf32>
    %12 = math.rsqrt %11 : vector<1x128xf32>
    %c0_5 = arith.constant 0 : index
    %c0_6 = arith.constant 0 : index
    %13 = vector.load %arg4[%c0_5, %c0_6] : memref<1x128xf32, #tpu.memory_space<vmem>>, vector<1x128xf32>
    %14 = arith.mulf %13, %12 : vector<1x128xf32>
    %c0_7 = arith.constant 0 : index
    %c0_8 = arith.constant 0 : index
    %15 = vector.load %arg5[%c0_7, %c0_8] : memref<1x128xf32, #tpu.memory_space<vmem>>, vector<1x128xf32>
    %16 = arith.mulf %2, %14 : vector<1x128xf32>
    %17 = arith.subf %15, %16 : vector<1x128xf32>
    %18 = vector.shape_cast %14 : vector<1x128xf32> to vector<1x1x128xf32>
    %19 = vector.shape_cast %17 : vector<1x128xf32> to vector<1x1x128xf32>
    %c0_9 = arith.constant 0 : index
    %c0_10 = arith.constant 0 : index
    %c0_11 = arith.constant 0 : index
    %c0_12 = arith.constant 0 : index
    %20 = vector.load %arg2[%c0_9, %c0_10, %c0_11, %c0_12] : memref<1x10x16x128xbf16, #tpu.memory_space<vmem>>, vector<1x10x16x128xbf16>
    %21 = vector.shape_cast %20 : vector<1x10x16x128xbf16> to vector<10x16x128xbf16>
    %22 = arith.extf %21 : vector<10x16x128xbf16> to vector<10x16x128xf32>
    %23 = vector.broadcast %18 : vector<1x1x128xf32> to vector<10x16x128xf32>
    %24 = arith.mulf %22, %23 : vector<10x16x128xf32>
    %25 = vector.broadcast %19 : vector<1x1x128xf32> to vector<10x16x128xf32>
    %26 = arith.addf %24, %25 : vector<10x16x128xf32>
    %cst_13 = arith.constant 0.000000e+00 : f32
    %27 = vector.broadcast %cst_13 : f32 to vector<10x16x128xf32>
    %28 = arith.maximumf %26, %27 : vector<10x16x128xf32>
    %29 = vector.shape_cast %28 : vector<10x16x128xf32> to vector<5x2x16x128xf32>
    %cst_14 = arith.constant dense<0xFF800000> : vector<5x16x128xf32>
    %30 = vector.multi_reduction <maximumf>, %29, %cst_14 [1] : vector<5x2x16x128xf32> to vector<5x16x128xf32>
    %c0_15 = arith.constant 0 : index
    %c0_16 = arith.constant 0 : index
    %c0_17 = arith.constant 0 : index
    %c0_18 = arith.constant 0 : index
    %31 = vector.load %arg6[%c0_15, %c0_16, %c0_17, %c0_18] : memref<1x5x16x128xf32, #tpu.memory_space<vmem>>, vector<1x5x16x128xf32>
    %32 = vector.shape_cast %31 : vector<1x5x16x128xf32> to vector<5x16x128xf32>
    %33 = vector.shape_cast %30 : vector<5x16x128xf32> to vector<1x5x16x128xf32>
    tpu.vector_store %arg6[%c0_15, %c0_16, %c0_17, %c0_18], %33 {strides = array<i32>} : memref<1x5x16x128xf32, #tpu.memory_space<vmem>>, vector<1x5x16x128xf32>,
    return
  }
  func.func @transform_0(%arg0: i32, %arg1: i32) -> (i32, i32, i32, i32) {
    %c0_i32 = arith.constant 0 : i32
    %c0_i32_0 = arith.constant 0 : i32
    %c0_i32_1 = arith.constant 0 : i32
    return %arg0, %arg1, %c0_i32, %c0_i32_0 : i32, i32, i32, i32
  }
  func.func @transform_1(%arg0: i32, %arg1: i32) -> (i32, i32) {
    %c0_i32 = arith.constant 0 : i32
    %c0_i32_0 = arith.constant 0 : i32
    %c0_i32_1 = arith.constant 0 : i32
    return %c0_i32, %c0_i32_0 : i32, i32
  }
  func.func @transform_2(%arg0: i32, %arg1: i32) -> (i32, i32) {
    %c0_i32 = arith.constant 0 : i32
    %c0_i32_0 = arith.constant 0 : i32
    %c0_i32_1 = arith.constant 0 : i32
    return %c0_i32, %c0_i32_0 : i32, i32
  }
  func.func @transform_3(%arg0: i32, %arg1: i32) -> (i32, i32) {
    %c0_i32 = arith.constant 0 : i32
    %c0_i32_0 = arith.constant 0 : i32
    %c0_i32_1 = arith.constant 0 : i32
    return %c0_i32, %c0_i32_0 : i32, i32
  }
  func.func @transform_4(%arg0: i32, %arg1: i32) -> (i32, i32, i32, i32) {
    %c0_i32 = arith.constant 0 : i32
    %c0_i32_0 = arith.constant 0 : i32
    %c0_i32_1 = arith.constant 0 : i32
    return %arg0, %arg1, %c0_i32, %c0_i32_0 : i32, i32, i32, i32
  }
}

</mosaic_0001>

<bundles_post_ra>
// kernel: conv3block_forward.7
= control target key start
LH: loop header
LB: loop body
LE: loop exit
PB: predicated region body
PF: predicated region fallthrough
CT: control target
= control target key end

     0   :  { %s969_s15 = smov 0   ;;  %s971_s16 = smov 0   ;;  %s1199_s0 = inlined_call_operand.vmem [shape: bf16[2,14,16,128], index: 0, kind: input, shape index: {}]   ;;  %s1200_s1 = inlined_call_operand.vmem [shape: f32[8,128], index: 1, kind: input, shape index: {}]   ;;  %s1201_s2 = inlined_call_operand.vmem [shape: f32[1,128], index: 2, kind: input, shape index: {}]   ;;  %s1202_s3 = inlined_call_operand.vmem [shape: f32[1,128], index: 3, kind: input, shape index: {}]   ;;  %s1203_s4 = inlined_call_operand.vmem [shape: bf16[2,14,32,128], index: 4, kind: output, shape index: {}]  }
   0x1   :  { %s973_s17 = smov 0  }
   0x2 LB: > { %s26_s18 = sadd.s32 1, %s937_s16  ;;  %p677_p0 = scmp.ge.s32.totalorder %s941_s17, 1  ;;  %s941_s17 = sphi %s973_s17, %s14_s17   ;;  %s937_s16 = sphi %s971_s16, %s1205_s16   ;;  %s933_s15 = sphi %s969_s15, %s1204_s15  }
   0x3   : > { %p28_p1 = scmp.ge.s32.totalorder %s26_s18, 2  ;;  %p184_p2 = scmp.lt.s32.totalorder %s941_s17, 3 }
   0x5   : > { %s1207_s18 = smov (%p28_p1, %s26_s18), 0  ;;  %p185_p3 = pnand %p677_p0, %p184_p2 }
   0x6   : > { %p221_p4 = scmp.lt.s32.totalorder (!%p185_p3), %s933_s15, 1 }
   0x7   : > { %188 = sbr.rel (%p185_p3) target bundleno = 71 (0x47), region = 36 }
   0xc   : > { %v243_v0 = vld [vmem:[%s1200_s1] sm:$0x1]  ;;  %v245_v1 = vld [vmem:[%s1200_s1 + $0x1] sm:$0x1]  ;;  %s1209_s15 = smov (!%p221_p4, %s933_s15), 1  ;;  %v943_v7 = vmov 0   ;;  %v314_v9 = vlaneseq }
   0xd   : > { %v993_v2 = vmul.f32 0.0025510204, %v243_v0  ;;  %v246_v3 = vmul.f32 0.0025510204, %v245_v1  ;;  %s891_s23 = smul.u32 224, %s1209_s15 }
   0xe   : > { %s890_s27 = smul.u32 112, %s1209_s15  ;;  %v315_v10 = vshrl.u32 %v314_v9, 7  ;;  %v252_v23 = vld [vmem:[%s1201_s2] sm:$0x1] }
   0xf   : > { %v247_v4 = vmul.f32 %v993_v2, %v993_v2  ;;  %s1003_s26 = scalar_lea.vmem %s1203_s4, %s891_s23  ;;  %v254_v47 = vld [vmem:[%s1202_s3] sm:$0x1] }
  0x10   : > { %549 = vst [vmem:[%s1003_s26 + $0x8] sm:$0xf] %v943_v7  ;;  %550 = vst [vmem:[%s1003_s26 + $0xc] sm:$0xf] %v943_v7  ;;  %s1037_s30 = scalar_lea.vmem %s1199_s0, %s890_s27  ;;  %v316_v19 = vsub.s32 0, %v315_v10 }
  0x11   : > { %v248_v5 = vsub.f32 %v246_v3, %v247_v4  ;;  %551 = vst [vmem:[%s1003_s26 + $0x18] sm:$0xf] %v943_v7  ;;  %552 = vst [vmem:[%s1003_s26 + $0x1c] sm:$0xf] %v943_v7  ;;  %v739_v11 = vld [vmem:[%s1037_s30] sm:$0xff]   ;;  %v864_v12 = vld [vmem:[%s1037_s30 + $0x8] sm:$0xff]  }
  0x12   : > { %553 = vst [vmem:[%s1003_s26 + $0x28] sm:$0xf] %v943_v7  ;;  %554 = vst [vmem:[%s1003_s26 + $0x2c] sm:$0xf] %v943_v7  ;;  %v865_v13 = vld [vmem:[%s1037_s30 + $0x10] sm:$0xff]   ;;  %v866_v14 = vld [vmem:[%s1037_s30 + $0x18] sm:$0xff]   ;;  %v740_v17 = vunpack.c.l.bf16 %v739_v11  ;;  %v741_v18 = vunpack.c.h.bf16 %v739_v11  ;;  %v744_v20 = vunpack.c.l.bf16 %v864_v12  ;;  %v745_v24 = vunpack.c.h.bf16 %v864_v12 }
  0x13   : > { %v249_v6 = vmax.f32 %v248_v5, 0.0  ;;  %555 = vst [vmem:[%s1003_s26 + $0x38] sm:$0xf] %v943_v7  ;;  %556 = vst [vmem:[%s1003_s26 + $0x3c] sm:$0xf] %v943_v7  ;;  %v867_v15 = vld [vmem:[%s1037_s30 + $0x20] sm:$0xff]   ;;  %v748_v25 = vunpack.c.l.bf16 %v865_v13  ;;  %v749_v26 = vunpack.c.h.bf16 %v865_v13  ;;  %v752_v27 = vunpack.c.l.bf16 %v866_v14 }
  0x14   : > { %557 = vst [vmem:[%s1003_s26 + $0x48] sm:$0xf] %v943_v7  ;;  %558 = vst [vmem:[%s1003_s26 + $0x4c] sm:$0xf] %v943_v7  ;;  %v868_v16 = vld [vmem:[%s1037_s30 + $0x28] sm:$0xff]   ;;  %v869_v21 = vld [vmem:[%s1037_s30 + $0x30] sm:$0xff]   ;;  %v753_v29 = vunpack.c.h.bf16 %v866_v14  ;;  %v756_v30 = vunpack.c.l.bf16 %v867_v15  ;;  %v757_v31 = vunpack.c.h.bf16 %v867_v15 }
  0x15   : > { %559 = vst [vmem:[%s1003_s26 + $0x58] sm:$0xf] %v943_v7  ;;  %560 = vst [vmem:[%s1003_s26 + $0x5c] sm:$0xf] %v943_v7  ;;  %v250_v8 = vadd.f32 1e-05, %v249_v6  ;;  %v760_v32 = vunpack.c.l.bf16 %v868_v16  ;;  %v761_v36 = vunpack.c.h.bf16 %v868_v16  ;;  %v764_v37 = vunpack.c.l.bf16 %v869_v21 }
  0x16   : > { %561 = vst [vmem:[%s1003_s26 + $0x68] sm:$0xf] %v943_v7  ;;  %562 = vst [vmem:[%s1003_s26 + $0x6c] sm:$0xf] %v943_v7  ;;  %v1047_v22 = vld [vmem:[%s1037_s30 + $0x38] sm:$0xff]   ;;  %v1053_v28 = vld [vmem:[%s1037_s30 + $0x40] sm:$0xff]   ;;  %v765_v38 = vunpack.c.h.bf16 %v869_v21 }
  0x17   : > { %563 = vst [vmem:[%s1003_s26 + $0x78] sm:$0xf] %v943_v7  ;;  %564 = vst [vmem:[%s1003_s26 + $0x7c] sm:$0xf] %v943_v7  ;;  %917 = vrsqrt.f32 %v250_v8  ;;  %v1056_v33 = vld [vmem:[%s1037_s30 + $0x48] sm:$0xff]   ;;  %v1059_v34 = vld [vmem:[%s1037_s30 + $0x50] sm:$0xff]   ;;  %v768_v39 = vunpack.c.l.bf16 %v1047_v22  ;;  %v769_v42 = vunpack.c.h.bf16 %v1047_v22  ;;  %v772_v43 = vunpack.c.l.bf16 %v1053_v28 }
  0x18   : > { %565 = vst [vmem:[%s1003_s26 + $0x88] sm:$0xf] %v943_v7  ;;  %566 = vst [vmem:[%s1003_s26 + $0x8c] sm:$0xf] %v943_v7  ;;  %v1063_v40 = vld [vmem:[%s1037_s30 + $0x58] sm:$0xff]   ;;  %v773_v44 = vunpack.c.h.bf16 %v1053_v28  ;;  %v1069_v45 = vld [vmem:[%s1037_s30 + $0x60] sm:$0xff]   ;;  %v776_v48 = vunpack.c.l.bf16 %v1056_v33  ;;  %v777_v49 = vunpack.c.h.bf16 %v1056_v33  ;;  %v780_v50 = vunpack.c.l.bf16 %v1059_v34 }
  0x19   : > { %567 = vst [vmem:[%s1003_s26 + $0x98] sm:$0xf] %v943_v7  ;;  %568 = vst [vmem:[%s1003_s26 + $0x9c] sm:$0xf] %v943_v7  ;;  %v1072_v46 = vld [vmem:[%s1037_s30 + $0x68] sm:$0xff]   ;;  %v781_v51 = vunpack.c.h.bf16 %v1059_v34  ;;  %v784_v54 = vunpack.c.l.bf16 %v1063_v40  ;;  %v785_v55 = vunpack.c.h.bf16 %v1063_v40  ;;  %v788_v56 = vunpack.c.l.bf16 %v1069_v45 }
  0x1a   : > { %569 = vst [vmem:[%s1003_s26 + $0xa8] sm:$0xf] %v943_v7  ;;  %570 = vst [vmem:[%s1003_s26 + $0xac] sm:$0xf] %v943_v7  ;;  %v789_v57 = vunpack.c.h.bf16 %v1069_v45  ;;  %v792_v58 = vunpack.c.l.bf16 %v1072_v46  ;;  %v793_v59 = vunpack.c.h.bf16 %v1072_v46 }
  0x1b   : > { %571 = vst [vmem:[%s1003_s26 + $0xb8] sm:$0xf] %v943_v7  ;;  %572 = vst [vmem:[%s1003_s26 + $0xbc] sm:$0xf] %v943_v7 }
  0x1c   : > { %573 = vst [vmem:[%s1003_s26 + $0xc8] sm:$0xf] %v943_v7  ;;  %574 = vst [vmem:[%s1003_s26 + $0xcc] sm:$0xf] %v943_v7 }
  0x1d   : > { %575 = vst [vmem:[%s1003_s26 + $0xd8] sm:$0xf] %v943_v7  ;;  %576 = vst [vmem:[%s1003_s26 + $0xdc] sm:$0xf] %v943_v7 }
  0x24   : > { %v918_v35 = vpop.eup %917 }
  0x25   : > { %v253_v41 = vmul.f32 %v918_v35, %v252_v23 }
  0x27   : > { %v255_v52 = vmul.f32 %v253_v41, %v993_v2  ;;  %v1082_v53 = vrot.slane %v253_v41, %v316_v19 }
  0x29   : > { %v256_v60 = vsub.f32 %v254_v47, %v255_v52  ;;  %v319_v61 = vmul.f32 %v740_v17, %v1082_v53  ;;  %v320_v62 = vmul.f32 %v741_v18, %v1082_v53  ;;  %v321_v63 = vmul.f32 %v744_v20, %v1082_v53 }
  0x2a   : > { %v322_v0 = vmul.f32 %v745_v24, %v1082_v53  ;;  %v323_v1 = vmul.f32 %v748_v25, %v1082_v53  ;;  %v324_v2 = vmul.f32 %v749_v26, %v1082_v53  ;;  %v325_v3 = vmul.f32 %v752_v27, %v1082_v53 }
  0x2b   : > { %v1097_v4 = vrot.slane %v256_v60, %v316_v19  ;;  %v326_v5 = vmul.f32 %v753_v29, %v1082_v53  ;;  %v327_v6 = vmul.f32 %v756_v30, %v1082_v53  ;;  %v328_v7 = vmul.f32 %v757_v31, %v1082_v53 }
  0x2c   : > { %v329_v8 = vmul.f32 %v760_v32, %v1082_v53  ;;  %v330_v9 = vmul.f32 %v761_v36, %v1082_v53  ;;  %v331_v10 = vmul.f32 %v764_v37, %v1082_v53  ;;  %v332_v11 = vmul.f32 %v765_v38, %v1082_v53 }
  0x2d   : > { %v353_v12 = vadd.f32 %v1097_v4, %v319_v61  ;;  %v354_v13 = vadd.f32 %v1097_v4, %v320_v62  ;;  %v355_v14 = vadd.f32 %v1097_v4, %v321_v63  ;;  %v356_v15 = vadd.f32 %v1097_v4, %v322_v0 }
  0x2e   : > { %v357_v16 = vadd.f32 %v1097_v4, %v323_v1  ;;  %v358_v17 = vadd.f32 %v1097_v4, %v324_v2  ;;  %v359_v18 = vadd.f32 %v1097_v4, %v325_v3  ;;  %v360_v19 = vadd.f32 %v1097_v4, %v326_v5 }
  0x2f   : > { %v381_v20 = vmax.f32 %v353_v12, 0.0  ;;  %v382_v21 = vmax.f32 %v354_v13, 0.0  ;;  %v383_v23 = vmax.f32 %v355_v14, 0.0  ;;  %v384_v24 = vmax.f32 %v356_v15, 0.0 }
  0x30   : > { %v385_v25 = vmax.f32 %v357_v16, 0.0  ;;  %v386_v26 = vmax.f32 %v358_v17, 0.0  ;;  %v387_v27 = vmax.f32 %v359_v18, 0.0  ;;  %v388_v29 = vmax.f32 %v360_v19, 0.0 }
  0x31   : > { %v797_v30 = vpack.c.bf16 %v382_v21, %v381_v20  ;;  %v802_v31 = vpack.c.bf16 %v384_v24, %v383_v23  ;;  %v361_v32 = vadd.f32 %v1097_v4, %v327_v6  ;;  %v362_v35 = vadd.f32 %v1097_v4, %v328_v7 }
  0x32   : > { %v807_v36 = vpack.c.bf16 %v386_v26, %v385_v25  ;;  %v812_v37 = vpack.c.bf16 %v388_v29, %v387_v27  ;;  %v363_v38 = vadd.f32 %v1097_v4, %v329_v8  ;;  %v364_v41 = vadd.f32 %v1097_v4, %v330_v9 }
  0x33   : > { %798 = vst [vmem:[%s1003_s26] sm:$0xff] %v797_v30   ;;  %877 = vst [vmem:[%s1003_s26 + $0x10] sm:$0xff] %v802_v31   ;;  %v389_v47 = vmax.f32 %v361_v32, 0.0  ;;  %v390_v52 = vmax.f32 %v362_v35, 0.0  ;;  %v365_v60 = vadd.f32 %v1097_v4, %v331_v10  ;;  %v366_v61 = vadd.f32 %v1097_v4, %v332_v11 }
  0x34   : > { %878 = vst [vmem:[%s1003_s26 + $0x20] sm:$0xff] %v807_v36   ;;  %879 = vst [vmem:[%s1003_s26 + $0x30] sm:$0xff] %v812_v37   ;;  %v391_v62 = vmax.f32 %v363_v38, 0.0  ;;  %v392_v63 = vmax.f32 %v364_v41, 0.0  ;;  %v333_v0 = vmul.f32 %v768_v39, %v1082_v53  ;;  %v334_v1 = vmul.f32 %v769_v42, %v1082_v53 }
  0x35   : > { %v817_v2 = vpack.c.bf16 %v390_v52, %v389_v47  ;;  %v393_v3 = vmax.f32 %v365_v60, 0.0  ;;  %v394_v5 = vmax.f32 %v366_v61, 0.0  ;;  %v335_v6 = vmul.f32 %v772_v43, %v1082_v53 }
  0x36   : > { %v822_v7 = vpack.c.bf16 %v392_v63, %v391_v62  ;;  %v367_v8 = vadd.f32 %v1097_v4, %v333_v0  ;;  %v368_v9 = vadd.f32 %v1097_v4, %v334_v1  ;;  %v336_v39 = vmul.f32 %v773_v44, %v1082_v53 }
  0x37   : > { %880 = vst [vmem:[%s1003_s26 + $0x40] sm:$0xff] %v817_v2   ;;  %v827_v22 = vpack.c.bf16 %v394_v5, %v393_v3  ;;  %v369_v42 = vadd.f32 %v1097_v4, %v335_v6  ;;  %v337_v10 = vmul.f32 %v776_v48, %v1082_v53  ;;  %v338_v43 = vmul.f32 %v777_v49, %v1082_v53 }
  0x38   : > { %881 = vst [vmem:[%s1003_s26 + $0x50] sm:$0xff] %v822_v7   ;;  %v395_v11 = vmax.f32 %v367_v8, 0.0  ;;  %v396_v12 = vmax.f32 %v368_v9, 0.0  ;;  %v370_v13 = vadd.f32 %v1097_v4, %v336_v39  ;;  %v339_v28 = vmul.f32 %v780_v50, %v1082_v53 }
  0x39   : > { %882 = vst [vmem:[%s1003_s26 + $0x60] sm:$0xff] %v827_v22   ;;  %v397_v44 = vmax.f32 %v369_v42, 0.0  ;;  %v371_v14 = vadd.f32 %v1097_v4, %v337_v10  ;;  %v372_v48 = vadd.f32 %v1097_v4, %v338_v43  ;;  %v340_v33 = vmul.f32 %v781_v51, %v1082_v53 }
  0x3a   : > { %v832_v49 = vpack.c.bf16 %v396_v12, %v395_v11  ;;  %v398_v15 = vmax.f32 %v370_v13, 0.0  ;;  %v373_v16 = vadd.f32 %v1097_v4, %v339_v28  ;;  %v341_v17 = vmul.f32 %v784_v54, %v1082_v53 }
  0x3b   : > { %v399_v50 = vmax.f32 %v371_v14, 0.0  ;;  %v400_v18 = vmax.f32 %v372_v48, 0.0  ;;  %v374_v19 = vadd.f32 %v1097_v4, %v340_v33  ;;  %v342_v20 = vmul.f32 %v785_v55, %v1082_v53 }
  0x3c   : > { %883 = vst [vmem:[%s1003_s26 + $0x70] sm:$0xff] %v832_v49   ;;  %v837_v34 = vpack.c.bf16 %v398_v15, %v397_v44  ;;  %v401_v51 = vmax.f32 %v373_v16, 0.0  ;;  %v375_v21 = vadd.f32 %v1097_v4, %v341_v17  ;;  %v343_v23 = vmul.f32 %v788_v56, %v1082_v53 }
  0x3d   : > { %v842_v24 = vpack.c.bf16 %v400_v18, %v399_v50  ;;  %v402_v54 = vmax.f32 %v374_v19, 0.0  ;;  %v376_v25 = vadd.f32 %v1097_v4, %v342_v20  ;;  %v344_v40 = vmul.f32 %v789_v57, %v1082_v53 }
  0x3e   : > { %884 = vst [vmem:[%s1003_s26 + $0x80] sm:$0xff] %v837_v34   ;;  %v403_v55 = vmax.f32 %v375_v21, 0.0  ;;  %v377_v26 = vadd.f32 %v1097_v4, %v343_v23  ;;  %v345_v27 = vmul.f32 %v792_v58, %v1082_v53  ;;  %v346_v56 = vmul.f32 %v793_v59, %v1082_v53 }
  0x3f   : > { %885 = vst [vmem:[%s1003_s26 + $0x90] sm:$0xff] %v842_v24   ;;  %v847_v29 = vpack.c.bf16 %v402_v54, %v401_v51  ;;  %v404_v30 = vmax.f32 %v376_v25, 0.0  ;;  %v378_v45 = vadd.f32 %v1097_v4, %v344_v40 }
  0x40   : > { %v405_v57 = vmax.f32 %v377_v26, 0.0  ;;  %v379_v31 = vadd.f32 %v1097_v4, %v345_v27  ;;  %v380_v32 = vadd.f32 %v1097_v4, %v346_v56 }
  0x41   : > { %886 = vst [vmem:[%s1003_s26 + $0xa0] sm:$0xff] %v847_v29   ;;  %v852_v35 = vpack.c.bf16 %v404_v30, %v403_v55  ;;  %v406_v36 = vmax.f32 %v378_v45, 0.0 }
  0x42   : > { %v407_v58 = vmax.f32 %v379_v31, 0.0  ;;  %v408_v37 = vmax.f32 %v380_v32, 0.0 }
  0x43   : > { %887 = vst [vmem:[%s1003_s26 + $0xb0] sm:$0xff] %v852_v35   ;;  %v857_v46 = vpack.c.bf16 %v406_v36, %v405_v57 }
  0x44   : > { %v862_v53 = vpack.c.bf16 %v408_v37, %v407_v58 }
  0x45   : > { %888 = vst [vmem:[%s1003_s26 + $0xc0] sm:$0xff] %v857_v46  }
  0x46   : > { %889 = vst [vmem:[%s1003_s26 + $0xd0] sm:$0xff] %v862_v53  }
  0x47 PF: > { %s14_s17 = sadd.s32 1, %s941_s17   ;;  %s1204_s15 = smov %s937_s16 }
  0x48   : > { %p11_p5 = scmp.ge.s32.totalorder %s14_s17, 4   ;;  %s1205_s16 = smov %s1207_s18 }
  0x4a   :  { %13 = sbr.rel (!%p11_p5) target bundleno = 2 (0x2), region = 66 }

// kernel: conv3block_forward.9
= control target key start
LH: loop header
LB: loop body
LE: loop exit
PB: predicated region body
PF: predicated region fallthrough
CT: control target
= control target key end

     0   :  { %s895_s15 = smov 0   ;;  %s897_s16 = smov 0   ;;  %s1089_s0 = inlined_call_operand.vmem [shape: bf16[2,12,16,128], index: 0, kind: input, shape index: {}]   ;;  %s1090_s1 = inlined_call_operand.vmem [shape: f32[8,128], index: 1, kind: input, shape index: {}]   ;;  %s1091_s2 = inlined_call_operand.vmem [shape: f32[1,128], index: 2, kind: input, shape index: {}]   ;;  %s1092_s3 = inlined_call_operand.vmem [shape: f32[1,128], index: 3, kind: input, shape index: {}]   ;;  %s1093_s4 = inlined_call_operand.vmem [shape: bf16[2,12,32,128], index: 4, kind: output, shape index: {}]  }
   0x1   :  { %s899_s17 = smov 0  }
   0x2 LB: > { %s26_s18 = sadd.s32 1, %s863_s16  ;;  %p633_p0 = scmp.ge.s32.totalorder %s867_s17, 1  ;;  %s867_s17 = sphi %s899_s17, %s14_s17   ;;  %s863_s16 = sphi %s897_s16, %s1095_s16   ;;  %s859_s15 = sphi %s895_s15, %s1094_s15  }
   0x3   : > { %p28_p1 = scmp.ge.s32.totalorder %s26_s18, 2  ;;  %p184_p2 = scmp.lt.s32.totalorder %s867_s17, 3 }
   0x5   : > { %s1097_s18 = smov (%p28_p1, %s26_s18), 0  ;;  %p185_p3 = pnand %p633_p0, %p184_p2 }
   0x6   : > { %p221_p4 = scmp.lt.s32.totalorder (!%p185_p3), %s859_s15, 1 }
   0x7   : > { %188 = sbr.rel (%p185_p3) target bundleno = 68 (0x44), region = 36 }
   0xc   : > { %v243_v0 = vld [vmem:[%s1090_s1] sm:$0x1]  ;;  %v245_v1 = vld [vmem:[%s1090_s1 + $0x1] sm:$0x1]  ;;  %s1099_s15 = smov (!%p221_p4, %s859_s15), 1  ;;  %v869_v7 = vmov 0   ;;  %v306_v9 = vlaneseq }
   0xd   : > { %v919_v2 = vmul.f32 0.0034722222, %v243_v0  ;;  %v246_v3 = vmul.f32 0.0034722222, %v245_v1  ;;  %s817_s23 = smul.u32 192, %s1099_s15 }
   0xe   : > { %s816_s27 = smul.u32 96, %s1099_s15  ;;  %v307_v10 = vshrl.u32 %v306_v9, 7  ;;  %v252_v17 = vld [vmem:[%s1091_s2] sm:$0x1] }
   0xf   : > { %v247_v4 = vmul.f32 %v919_v2, %v919_v2  ;;  %s929_s26 = scalar_lea.vmem %s1093_s4, %s817_s23  ;;  %v254_v41 = vld [vmem:[%s1092_s3] sm:$0x1] }
  0x10   : > { %509 = vst [vmem:[%s929_s26 + $0x8] sm:$0xf] %v869_v7  ;;  %510 = vst [vmem:[%s929_s26 + $0xc] sm:$0xf] %v869_v7  ;;  %s959_s30 = scalar_lea.vmem %s1089_s0, %s816_s27  ;;  %v308_v20 = vsub.s32 0, %v307_v10 }
  0x11   : > { %v248_v5 = vsub.f32 %v246_v3, %v247_v4  ;;  %511 = vst [vmem:[%s929_s26 + $0x18] sm:$0xf] %v869_v7  ;;  %512 = vst [vmem:[%s929_s26 + $0x1c] sm:$0xf] %v869_v7  ;;  %v687_v11 = vld [vmem:[%s959_s30] sm:$0xff]   ;;  %v794_v12 = vld [vmem:[%s959_s30 + $0x8] sm:$0xff]  }
  0x12   : > { %513 = vst [vmem:[%s929_s26 + $0x28] sm:$0xf] %v869_v7  ;;  %514 = vst [vmem:[%s929_s26 + $0x2c] sm:$0xf] %v869_v7  ;;  %v795_v13 = vld [vmem:[%s959_s30 + $0x10] sm:$0xff]   ;;  %v796_v14 = vld [vmem:[%s959_s30 + $0x18] sm:$0xff]   ;;  %v688_v18 = vunpack.c.l.bf16 %v687_v11  ;;  %v689_v19 = vunpack.c.h.bf16 %v687_v11  ;;  %v692_v21 = vunpack.c.l.bf16 %v794_v12  ;;  %v693_v23 = vunpack.c.h.bf16 %v794_v12 }
  0x13   : > { %v249_v6 = vmax.f32 %v248_v5, 0.0  ;;  %515 = vst [vmem:[%s929_s26 + $0x38] sm:$0xf] %v869_v7  ;;  %516 = vst [vmem:[%s929_s26 + $0x3c] sm:$0xf] %v869_v7  ;;  %v797_v15 = vld [vmem:[%s959_s30 + $0x20] sm:$0xff]   ;;  %v696_v24 = vunpack.c.l.bf16 %v795_v13  ;;  %v697_v25 = vunpack.c.h.bf16 %v795_v13  ;;  %v700_v26 = vunpack.c.l.bf16 %v796_v14 }
  0x14   : > { %517 = vst [vmem:[%s929_s26 + $0x48] sm:$0xf] %v869_v7  ;;  %518 = vst [vmem:[%s929_s26 + $0x4c] sm:$0xf] %v869_v7  ;;  %v798_v16 = vld [vmem:[%s959_s30 + $0x28] sm:$0xff]   ;;  %v799_v22 = vld [vmem:[%s959_s30 + $0x30] sm:$0xff]   ;;  %v701_v30 = vunpack.c.h.bf16 %v796_v14  ;;  %v704_v31 = vunpack.c.l.bf16 %v797_v15  ;;  %v705_v32 = vunpack.c.h.bf16 %v797_v15 }
  0x15   : > { %519 = vst [vmem:[%s929_s26 + $0x58] sm:$0xf] %v869_v7  ;;  %520 = vst [vmem:[%s929_s26 + $0x5c] sm:$0xf] %v869_v7  ;;  %v250_v8 = vadd.f32 1e-05, %v249_v6  ;;  %v708_v33 = vunpack.c.l.bf16 %v798_v16  ;;  %v709_v36 = vunpack.c.h.bf16 %v798_v16  ;;  %v712_v37 = vunpack.c.l.bf16 %v799_v22 }
  0x16   : > { %521 = vst [vmem:[%s929_s26 + $0x68] sm:$0xf] %v869_v7  ;;  %522 = vst [vmem:[%s929_s26 + $0x6c] sm:$0xf] %v869_v7  ;;  %v972_v27 = vld [vmem:[%s959_s30 + $0x38] sm:$0xff]   ;;  %v975_v28 = vld [vmem:[%s959_s30 + $0x40] sm:$0xff]   ;;  %v713_v38 = vunpack.c.h.bf16 %v799_v22 }
  0x17   : > { %523 = vst [vmem:[%s929_s26 + $0x78] sm:$0xf] %v869_v7  ;;  %524 = vst [vmem:[%s929_s26 + $0x7c] sm:$0xf] %v869_v7  ;;  %843 = vrsqrt.f32 %v250_v8  ;;  %v978_v34 = vld [vmem:[%s959_s30 + $0x48] sm:$0xff]   ;;  %v981_v39 = vld [vmem:[%s959_s30 + $0x50] sm:$0xff]   ;;  %v716_v42 = vunpack.c.l.bf16 %v972_v27  ;;  %v717_v43 = vunpack.c.h.bf16 %v972_v27  ;;  %v720_v44 = vunpack.c.l.bf16 %v975_v28 }
  0x18   : > { %525 = vst [vmem:[%s929_s26 + $0x88] sm:$0xf] %v869_v7  ;;  %526 = vst [vmem:[%s929_s26 + $0x8c] sm:$0xf] %v869_v7  ;;  %v984_v40 = vld [vmem:[%s959_s30 + $0x58] sm:$0xff]   ;;  %v721_v45 = vunpack.c.h.bf16 %v975_v28  ;;  %v724_v48 = vunpack.c.l.bf16 %v978_v34  ;;  %v725_v49 = vunpack.c.h.bf16 %v978_v34  ;;  %v728_v50 = vunpack.c.l.bf16 %v981_v39 }
  0x19   : > { %527 = vst [vmem:[%s929_s26 + $0x98] sm:$0xf] %v869_v7  ;;  %528 = vst [vmem:[%s929_s26 + $0x9c] sm:$0xf] %v869_v7  ;;  %v729_v51 = vunpack.c.h.bf16 %v981_v39  ;;  %v732_v52 = vunpack.c.l.bf16 %v984_v40  ;;  %v733_v53 = vunpack.c.h.bf16 %v984_v40 }
  0x1a   : > { %529 = vst [vmem:[%s929_s26 + $0xa8] sm:$0xf] %v869_v7  ;;  %530 = vst [vmem:[%s929_s26 + $0xac] sm:$0xf] %v869_v7 }
  0x1b   : > { %531 = vst [vmem:[%s929_s26 + $0xb8] sm:$0xf] %v869_v7  ;;  %532 = vst [vmem:[%s929_s26 + $0xbc] sm:$0xf] %v869_v7 }
  0x24   : > { %v844_v29 = vpop.eup %843 }
  0x25   : > { %v253_v35 = vmul.f32 %v844_v29, %v252_v17 }
  0x27   : > { %v255_v46 = vmul.f32 %v253_v35, %v919_v2  ;;  %v994_v47 = vrot.slane %v253_v35, %v308_v20 }
  0x29   : > { %v256_v54 = vsub.f32 %v254_v41, %v255_v46  ;;  %v311_v55 = vmul.f32 %v688_v18, %v994_v47  ;;  %v312_v56 = vmul.f32 %v689_v19, %v994_v47  ;;  %v313_v57 = vmul.f32 %v692_v21, %v994_v47 }
  0x2a   : > { %v314_v58 = vmul.f32 %v693_v23, %v994_v47  ;;  %v315_v59 = vmul.f32 %v696_v24, %v994_v47  ;;  %v316_v60 = vmul.f32 %v697_v25, %v994_v47  ;;  %v317_v61 = vmul.f32 %v700_v26, %v994_v47 }
  0x2b   : > { %v1009_v62 = vrot.slane %v256_v54, %v308_v20  ;;  %v318_v63 = vmul.f32 %v701_v30, %v994_v47  ;;  %v319_v0 = vmul.f32 %v704_v31, %v994_v47  ;;  %v320_v1 = vmul.f32 %v705_v32, %v994_v47 }
  0x2c   : > { %v321_v2 = vmul.f32 %v708_v33, %v994_v47  ;;  %v322_v3 = vmul.f32 %v709_v36, %v994_v47  ;;  %v323_v4 = vmul.f32 %v712_v37, %v994_v47  ;;  %v324_v5 = vmul.f32 %v713_v38, %v994_v47 }
  0x2d   : > { %v341_v6 = vadd.f32 %v1009_v62, %v311_v55  ;;  %v342_v7 = vadd.f32 %v1009_v62, %v312_v56  ;;  %v343_v8 = vadd.f32 %v1009_v62, %v313_v57  ;;  %v344_v9 = vadd.f32 %v1009_v62, %v314_v58 }
  0x2e   : > { %v345_v10 = vadd.f32 %v1009_v62, %v315_v59  ;;  %v346_v11 = vadd.f32 %v1009_v62, %v316_v60  ;;  %v347_v12 = vadd.f32 %v1009_v62, %v317_v61  ;;  %v348_v13 = vadd.f32 %v1009_v62, %v318_v63 }
  0x2f   : > { %v365_v14 = vmax.f32 %v341_v6, 0.0  ;;  %v366_v15 = vmax.f32 %v342_v7, 0.0  ;;  %v367_v16 = vmax.f32 %v343_v8, 0.0  ;;  %v368_v17 = vmax.f32 %v344_v9, 0.0 }
  0x30   : > { %v369_v18 = vmax.f32 %v345_v10, 0.0  ;;  %v370_v19 = vmax.f32 %v346_v11, 0.0  ;;  %v371_v20 = vmax.f32 %v347_v12, 0.0  ;;  %v372_v21 = vmax.f32 %v348_v13, 0.0 }
  0x31   : > { %v737_v22 = vpack.c.bf16 %v366_v15, %v365_v14  ;;  %v742_v23 = vpack.c.bf16 %v368_v17, %v367_v16  ;;  %v349_v24 = vadd.f32 %v1009_v62, %v319_v0  ;;  %v350_v25 = vadd.f32 %v1009_v62, %v320_v1 }
  0x32   : > { %v747_v26 = vpack.c.bf16 %v370_v19, %v369_v18  ;;  %v752_v27 = vpack.c.bf16 %v372_v21, %v371_v20  ;;  %v351_v29 = vadd.f32 %v1009_v62, %v321_v2  ;;  %v352_v30 = vadd.f32 %v1009_v62, %v322_v3 }
  0x33   : > { %738 = vst [vmem:[%s929_s26] sm:$0xff] %v737_v22   ;;  %805 = vst [vmem:[%s929_s26 + $0x10] sm:$0xff] %v742_v23   ;;  %v373_v31 = vmax.f32 %v349_v24, 0.0  ;;  %v374_v32 = vmax.f32 %v350_v25, 0.0  ;;  %v353_v33 = vadd.f32 %v1009_v62, %v323_v4  ;;  %v354_v35 = vadd.f32 %v1009_v62, %v324_v5 }
  0x34   : > { %806 = vst [vmem:[%s929_s26 + $0x20] sm:$0xff] %v747_v26   ;;  %807 = vst [vmem:[%s929_s26 + $0x30] sm:$0xff] %v752_v27   ;;  %v375_v36 = vmax.f32 %v351_v29, 0.0  ;;  %v376_v37 = vmax.f32 %v352_v30, 0.0  ;;  %v325_v38 = vmul.f32 %v716_v42, %v994_v47  ;;  %v326_v41 = vmul.f32 %v717_v43, %v994_v47 }
  0x35   : > { %v757_v46 = vpack.c.bf16 %v374_v32, %v373_v31  ;;  %v377_v54 = vmax.f32 %v353_v33, 0.0  ;;  %v378_v55 = vmax.f32 %v354_v35, 0.0  ;;  %v327_v56 = vmul.f32 %v720_v44, %v994_v47 }
  0x36   : > { %v762_v57 = vpack.c.bf16 %v376_v37, %v375_v36  ;;  %v355_v58 = vadd.f32 %v1009_v62, %v325_v38  ;;  %v356_v59 = vadd.f32 %v1009_v62, %v326_v41  ;;  %v328_v60 = vmul.f32 %v721_v45, %v994_v47 }
  0x37   : > { %808 = vst [vmem:[%s929_s26 + $0x40] sm:$0xff] %v757_v46   ;;  %v767_v42 = vpack.c.bf16 %v378_v55, %v377_v54  ;;  %v357_v43 = vadd.f32 %v1009_v62, %v327_v56  ;;  %v329_v61 = vmul.f32 %v724_v48, %v994_v47  ;;  %v330_v44 = vmul.f32 %v725_v49, %v994_v47 }
  0x38   : > { %809 = vst [vmem:[%s929_s26 + $0x50] sm:$0xff] %v762_v57   ;;  %v379_v63 = vmax.f32 %v355_v58, 0.0  ;;  %v380_v0 = vmax.f32 %v356_v59, 0.0  ;;  %v358_v1 = vadd.f32 %v1009_v62, %v328_v60  ;;  %v331_v28 = vmul.f32 %v728_v50, %v994_v47 }
  0x39   : > { %810 = vst [vmem:[%s929_s26 + $0x60] sm:$0xff] %v767_v42   ;;  %v381_v45 = vmax.f32 %v357_v43, 0.0  ;;  %v359_v2 = vadd.f32 %v1009_v62, %v329_v61  ;;  %v360_v48 = vadd.f32 %v1009_v62, %v330_v44  ;;  %v332_v34 = vmul.f32 %v729_v51, %v994_v47 }
  0x3a   : > { %v772_v49 = vpack.c.bf16 %v380_v0, %v379_v63  ;;  %v382_v3 = vmax.f32 %v358_v1, 0.0  ;;  %v361_v4 = vadd.f32 %v1009_v62, %v331_v28  ;;  %v333_v50 = vmul.f32 %v732_v52, %v994_v47 }
  0x3b   : > { %v383_v5 = vmax.f32 %v359_v2, 0.0  ;;  %v384_v6 = vmax.f32 %v360_v48, 0.0  ;;  %v362_v7 = vadd.f32 %v1009_v62, %v332_v34  ;;  %v334_v39 = vmul.f32 %v733_v53, %v994_v47 }
  0x3c   : > { %811 = vst [vmem:[%s929_s26 + $0x70] sm:$0xff] %v772_v49   ;;  %v777_v51 = vpack.c.bf16 %v382_v3, %v381_v45  ;;  %v385_v8 = vmax.f32 %v361_v4, 0.0  ;;  %v363_v9 = vadd.f32 %v1009_v62, %v333_v50 }
  0x3d   : > { %v782_v10 = vpack.c.bf16 %v384_v6, %v383_v5  ;;  %v386_v11 = vmax.f32 %v362_v7, 0.0  ;;  %v364_v12 = vadd.f32 %v1009_v62, %v334_v39 }
  0x3e   : > { %812 = vst [vmem:[%s929_s26 + $0x80] sm:$0xff] %v777_v51   ;;  %v387_v52 = vmax.f32 %v363_v9, 0.0 }
  0x3f   : > { %813 = vst [vmem:[%s929_s26 + $0x90] sm:$0xff] %v782_v10   ;;  %v787_v13 = vpack.c.bf16 %v386_v11, %v385_v8  ;;  %v388_v14 = vmax.f32 %v364_v12, 0.0 }
  0x41   : > { %814 = vst [vmem:[%s929_s26 + $0xa0] sm:$0xff] %v787_v13   ;;  %v792_v15 = vpack.c.bf16 %v388_v14, %v387_v52 }
  0x43   : > { %815 = vst [vmem:[%s929_s26 + $0xb0] sm:$0xff] %v792_v15  }
  0x44 PF: > { %s14_s17 = sadd.s32 1, %s867_s17   ;;  %s1094_s15 = smov %s863_s16 }
  0x45   : > { %p11_p5 = scmp.ge.s32.totalorder %s14_s17, 4   ;;  %s1095_s16 = smov %s1097_s18 }
  0x47   :  { %13 = sbr.rel (!%p11_p5) target bundleno = 2 (0x2), region = 66 }

// kernel: conv3block_forward.11
= control target key start
LH: loop header
LB: loop body
LE: loop exit
PB: predicated region body
PF: predicated region fallthrough
CT: control target
= control target key end

     0   :  { %s618_s15 = smov 0   ;;  %s620_s16 = smov 0   ;;  %s748_s0 = inlined_call_operand.vmem [shape: bf16[2,10,16,128], index: 0, kind: input, shape index: {}]   ;;  %s749_s1 = inlined_call_operand.vmem [shape: f32[8,128], index: 1, kind: input, shape index: {}]   ;;  %s750_s2 = inlined_call_operand.vmem [shape: f32[1,128], index: 2, kind: input, shape index: {}]   ;;  %s751_s3 = inlined_call_operand.vmem [shape: f32[1,128], index: 3, kind: input, shape index: {}]   ;;  %s752_s4 = inlined_call_operand.vmem [shape: f32[2,5,16,128], index: 4, kind: output, shape index: {}]  }
   0x1   :  { %s622_s17 = smov 0  }
   0x2 LB: > { %s26_s18 = sadd.s32 1, %s587_s16  ;;  %p488_p0 = scmp.ge.s32.totalorder %s591_s17, 1  ;;  %s591_s17 = sphi %s622_s17, %s14_s17   ;;  %s587_s16 = sphi %s620_s16, %s754_s16   ;;  %s583_s15 = sphi %s618_s15, %s753_s15  }
   0x3   : > { %p28_p1 = scmp.ge.s32.totalorder %s26_s18, 2  ;;  %p184_p2 = scmp.lt.s32.totalorder %s591_s17, 3 }
   0x5   : > { %s756_s18 = smov (%p28_p1, %s26_s18), 0  ;;  %p185_p3 = pnand %p488_p0, %p184_p2 }
   0x6   : > { %p221_p4 = scmp.lt.s32.totalorder (!%p185_p3), %s583_s15, 1 }
   0x7   : > { %188 = sbr.rel (%p185_p3) target bundleno = 64 (0x40), region = 36 }
   0xc   : > { %v242_v0 = vld [vmem:[%s749_s1] sm:$0x1]  ;;  %v244_v1 = vld [vmem:[%s749_s1 + $0x1] sm:$0x1]  ;;  %s758_s15 = smov (!%p221_p4, %s583_s15), 1  ;;  %v297_v8 = vlaneseq }
   0xd   : > { %v243_v2 = vmul.f32 0.005, %v242_v0  ;;  %v245_v3 = vmul.f32 0.005, %v244_v1  ;;  %s542_s23 = smul.u32 80, %s758_s15 }
   0xe   : > { %v298_v9 = vshrl.u32 %v297_v8, 7  ;;  %v251_v14 = vld [vmem:[%s750_s2] sm:$0x1] }
   0xf   : > { %v246_v4 = vmul.f32 %v243_v2, %v243_v2  ;;  %s229_s26 = scalar_lea.vmem %s748_s0, %s542_s23  ;;  %v253_v34 = vld [vmem:[%s751_s3] sm:$0x1]  ;;  %s703_s7 = scalar_lea.vmem %s752_s4, %s542_s23 }
  0x10   : > { %v494_v10 = vld [vmem:[%s229_s26] sm:$0xff]   ;;  %v533_v11 = vld [vmem:[%s229_s26 + $0x8] sm:$0xff]   ;;  %v534_v12 = vld [vmem:[%s229_s26 + $0x10] sm:$0xff]   ;;  %v299_v19 = vsub.s32 0, %v298_v9 }
  0x11   : > { %v247_v5 = vsub.f32 %v245_v3, %v246_v4  ;;  %v535_v13 = vld [vmem:[%s229_s26 + $0x18] sm:$0xff]   ;;  %v536_v15 = vld [vmem:[%s229_s26 + $0x20] sm:$0xff]   ;;  %v537_v16 = vld [vmem:[%s229_s26 + $0x28] sm:$0xff]   ;;  %v495_v17 = vunpack.c.l.bf16 %v494_v10  ;;  %v499_v18 = vunpack.c.l.bf16 %v533_v11  ;;  %v496_v20 = vunpack.c.h.bf16 %v494_v10 }
  0x12   : > { %v653_v21 = vld [vmem:[%s229_s26 + $0x30] sm:$0xff]   ;;  %v655_v22 = vld [vmem:[%s229_s26 + $0x38] sm:$0xff]   ;;  %v500_v24 = vunpack.c.h.bf16 %v533_v11  ;;  %v503_v25 = vunpack.c.l.bf16 %v534_v12  ;;  %v507_v26 = vunpack.c.l.bf16 %v535_v13  ;;  %v504_v27 = vunpack.c.h.bf16 %v534_v12  ;;  %v657_v32 = vld [vmem:[%s229_s26 + $0x40] sm:$0xff]  }
  0x13   : > { %v248_v6 = vmax.f32 %v247_v5, 0.0  ;;  %v508_v29 = vunpack.c.h.bf16 %v535_v13  ;;  %v511_v30 = vunpack.c.l.bf16 %v536_v15  ;;  %v515_v31 = vunpack.c.l.bf16 %v537_v16  ;;  %v659_v33 = vld [vmem:[%s229_s26 + $0x48] sm:$0xff]  }
  0x14   : > { %v512_v35 = vunpack.c.h.bf16 %v536_v15  ;;  %v516_v36 = vunpack.c.h.bf16 %v537_v16  ;;  %v519_v37 = vunpack.c.l.bf16 %v653_v21  ;;  %v523_v38 = vunpack.c.l.bf16 %v655_v22 }
  0x15   : > { %v249_v7 = vadd.f32 1e-05, %v248_v6  ;;  %v520_v41 = vunpack.c.h.bf16 %v653_v21  ;;  %v524_v42 = vunpack.c.h.bf16 %v655_v22  ;;  %v527_v43 = vunpack.c.l.bf16 %v657_v32 }
  0x16   : > { %v531_v44 = vunpack.c.l.bf16 %v659_v33  ;;  %v528_v45 = vunpack.c.h.bf16 %v657_v32  ;;  %v532_v46 = vunpack.c.h.bf16 %v659_v33 }
  0x17   : > { %567 = vrsqrt.f32 %v249_v7 }
  0x24   : > { %v568_v23 = vpop.eup %567 }
  0x25   : > { %v252_v28 = vmul.f32 %v568_v23, %v251_v14 }
  0x27   : > { %v254_v39 = vmul.f32 %v252_v28, %v243_v2  ;;  %v666_v40 = vrot.slane %v252_v28, %v299_v19 }
  0x29   : > { %v255_v47 = vsub.f32 %v253_v34, %v254_v39  ;;  %v302_v48 = vmul.f32 %v495_v17, %v666_v40  ;;  %v304_v49 = vmul.f32 %v499_v18, %v666_v40  ;;  %v303_v50 = vmul.f32 %v496_v20, %v666_v40 }
  0x2a   : > { %v305_v51 = vmul.f32 %v500_v24, %v666_v40  ;;  %v306_v52 = vmul.f32 %v503_v25, %v666_v40  ;;  %v308_v53 = vmul.f32 %v507_v26, %v666_v40  ;;  %v307_v54 = vmul.f32 %v504_v27, %v666_v40 }
  0x2b   : > { %v681_v55 = vrot.slane %v255_v47, %v299_v19  ;;  %v309_v56 = vmul.f32 %v508_v29, %v666_v40  ;;  %v310_v57 = vmul.f32 %v511_v30, %v666_v40  ;;  %v312_v58 = vmul.f32 %v515_v31, %v666_v40 }
  0x2c   : > { %v311_v59 = vmul.f32 %v512_v35, %v666_v40  ;;  %v313_v60 = vmul.f32 %v516_v36, %v666_v40  ;;  %v314_v61 = vmul.f32 %v519_v37, %v666_v40  ;;  %v316_v62 = vmul.f32 %v523_v38, %v666_v40 }
  0x2d   : > { %v328_v63 = vadd.f32 %v681_v55, %v302_v48  ;;  %v330_v0 = vadd.f32 %v681_v55, %v304_v49  ;;  %v329_v1 = vadd.f32 %v681_v55, %v303_v50  ;;  %v331_v2 = vadd.f32 %v681_v55, %v305_v51 }
  0x2e   : > { %v332_v3 = vadd.f32 %v681_v55, %v306_v52  ;;  %v334_v4 = vadd.f32 %v681_v55, %v308_v53  ;;  %v333_v5 = vadd.f32 %v681_v55, %v307_v54  ;;  %v335_v6 = vadd.f32 %v681_v55, %v309_v56 }
  0x2f   : > { %v348_v7 = vmax.f32 %v328_v63, 0.0  ;;  %v350_v8 = vmax.f32 %v330_v0, 0.0  ;;  %v349_v9 = vmax.f32 %v329_v1, 0.0  ;;  %v351_v10 = vmax.f32 %v331_v2, 0.0 }
  0x30   : > { %v352_v11 = vmax.f32 %v332_v3, 0.0  ;;  %v354_v12 = vmax.f32 %v334_v4, 0.0  ;;  %v353_v13 = vmax.f32 %v333_v5, 0.0  ;;  %v355_v14 = vmax.f32 %v335_v6, 0.0 }
  0x31   : > { %v368_v15 = vmax.f32 %v348_v7, %v350_v8  ;;  %v369_v16 = vmax.f32 %v349_v9, %v351_v10  ;;  %v336_v17 = vadd.f32 %v681_v55, %v310_v57  ;;  %v338_v18 = vadd.f32 %v681_v55, %v312_v58 }
  0x32   : > { %v370_v19 = vmax.f32 %v352_v11, %v354_v12  ;;  %v371_v20 = vmax.f32 %v353_v13, %v355_v14  ;;  %v337_v21 = vadd.f32 %v681_v55, %v311_v59  ;;  %v339_v22 = vadd.f32 %v681_v55, %v313_v60 }
  0x33   : > { %378 = vst [vmem:[%s703_s7] sm:$0xff] %v368_v15  ;;  %379 = vst [vmem:[%s703_s7 + $0x8] sm:$0xff] %v369_v16  ;;  %v356_v23 = vmax.f32 %v336_v17, 0.0  ;;  %v358_v24 = vmax.f32 %v338_v18, 0.0  ;;  %v340_v25 = vadd.f32 %v681_v55, %v314_v61  ;;  %v342_v26 = vadd.f32 %v681_v55, %v316_v62 }
  0x34   : > { %380 = vst [vmem:[%s703_s7 + $0x10] sm:$0xff] %v370_v19  ;;  %381 = vst [vmem:[%s703_s7 + $0x18] sm:$0xff] %v371_v20  ;;  %v357_v27 = vmax.f32 %v337_v21, 0.0  ;;  %v359_v28 = vmax.f32 %v339_v22, 0.0  ;;  %v315_v29 = vmul.f32 %v520_v41, %v666_v40  ;;  %v317_v30 = vmul.f32 %v524_v42, %v666_v40 }
  0x35   : > { %v372_v31 = vmax.f32 %v356_v23, %v358_v24  ;;  %v360_v34 = vmax.f32 %v340_v25, 0.0  ;;  %v362_v35 = vmax.f32 %v342_v26, 0.0  ;;  %v318_v36 = vmul.f32 %v527_v43, %v666_v40 }
  0x36   : > { %v373_v37 = vmax.f32 %v357_v27, %v359_v28  ;;  %v341_v38 = vadd.f32 %v681_v55, %v315_v29  ;;  %v343_v39 = vadd.f32 %v681_v55, %v317_v30  ;;  %v320_v47 = vmul.f32 %v531_v44, %v666_v40 }
  0x37   : > { %382 = vst [vmem:[%s703_s7 + $0x20] sm:$0xff] %v372_v31  ;;  %v374_v48 = vmax.f32 %v360_v34, %v362_v35  ;;  %v344_v41 = vadd.f32 %v681_v55, %v318_v36  ;;  %v319_v42 = vmul.f32 %v528_v45, %v666_v40  ;;  %v321_v43 = vmul.f32 %v532_v46, %v666_v40 }
  0x38   : > { %383 = vst [vmem:[%s703_s7 + $0x28] sm:$0xff] %v373_v37  ;;  %v361_v49 = vmax.f32 %v341_v38, 0.0  ;;  %v363_v50 = vmax.f32 %v343_v39, 0.0  ;;  %v346_v44 = vadd.f32 %v681_v55, %v320_v47 }
  0x39   : > { %384 = vst [vmem:[%s703_s7 + $0x30] sm:$0xff] %v374_v48  ;;  %v364_v51 = vmax.f32 %v344_v41, 0.0  ;;  %v345_v52 = vadd.f32 %v681_v55, %v319_v42  ;;  %v347_v53 = vadd.f32 %v681_v55, %v321_v43 }
  0x3a   : > { %v375_v54 = vmax.f32 %v361_v49, %v363_v50  ;;  %v366_v32 = vmax.f32 %v346_v44, 0.0 }
  0x3b   : > { %v365_v45 = vmax.f32 %v345_v52, 0.0  ;;  %v367_v56 = vmax.f32 %v347_v53, 0.0 }
  0x3c   : > { %385 = vst [vmem:[%s703_s7 + $0x38] sm:$0xff] %v375_v54  ;;  %v376_v33 = vmax.f32 %v364_v51, %v366_v32 }
  0x3d   : > { %v377_v40 = vmax.f32 %v365_v45, %v367_v56 }
  0x3e   : > { %386 = vst [vmem:[%s703_s7 + $0x40] sm:$0xff] %v376_v33 }
  0x3f   : > { %387 = vst [vmem:[%s703_s7 + $0x48] sm:$0xff] %v377_v40 }
  0x40 PF: > { %s14_s17 = sadd.s32 1, %s591_s17   ;;  %s753_s15 = smov %s587_s16 }
  0x41   : > { %p11_p5 = scmp.ge.s32.totalorder %s14_s17, 4   ;;  %s754_s16 = smov %s756_s18 }
  0x43   :  { %13 = sbr.rel (!%p11_p5) target bundleno = 2 (0x2), region = 66 }

// kernel: conv3block_forward.8
= control target key start
LH: loop header
LB: loop body
LE: loop exit
PB: predicated region body
PF: predicated region fallthrough
CT: control target
= control target key end

     0   :  { %s5773_s12 = smov 0   ;;  %s5775_s13 = smov 0   ;;  %s7368_s0 = inlined_call_operand.vmem [shape: bf16[2,14,32,128], index: 0, kind: input, shape index: {}]   ;;  %s7369_s1 = inlined_call_operand.vmem [shape: bf16[9,128,128], index: 1, kind: input, shape index: {}]   ;;  %s7370_s2 = inlined_call_operand.vmem [shape: bf16[2,12,16,128], index: 2, kind: output, shape index: {0}]   ;;  %s7371_s3 = inlined_call_operand.vmem [shape: f32[2,8,128], index: 3, kind: output, shape index: {1}]  }
   0x1   :  { %s5777_s14 = smov 0  }
   0x2 LB: > { %s26_s15 = sadd.s32 1, %s5746_s13  ;;  %p4424_p0 = scmp.ge.s32.totalorder %s5750_s14, 1  ;;  %s5750_s14 = sphi %s5777_s14, %s14_s14   ;;  %s5746_s13 = sphi %s5775_s13, %s7407_s13   ;;  %s5742_s12 = sphi %s5773_s12, %s7406_s12  }
   0x3   : > { %p28_p1 = scmp.ge.s32.totalorder %s26_s15, 2  ;;  %p154_p2 = scmp.lt.s32.totalorder %s5750_s14, 3 }
   0x5   : > { %s7409_s15 = smov (%p28_p1, %s26_s15), 0  ;;  %p155_p3 = pnand %p4424_p0, %p154_p2 }
   0x7   : > { %158 = sbr.rel (%p155_p3) target bundleno = 507 (0x1fb), region = 28 }
   0xc   : > { %v5620_v0 = vld [vmem:[%s7369_s1 + $0x78] sm:$0xff]   ;;  %p187_p4 = scmp.lt.s32.totalorder %s5742_s12, 1  ;;  %v5622_v2 = vld [vmem:[%s7369_s1 + $0x70] sm:$0xff]   ;;  %v5624_v4 = vld [vmem:[%s7369_s1 + $0x68] sm:$0xff]   ;;  %vm269_vm0 = vsmask.f32 3328 }
   0xd   : > { %v5621_v1 = vld [vmem:[%s7369_s1 + $0x38] sm:$0xff]   ;;  %5217 = vmatprep.subr.bf16.mxu0 %v5620_v0  ;;  %v5623_v3 = vld [vmem:[%s7369_s1 + $0x30] sm:$0xff]   ;;  %v5625_v5 = vld [vmem:[%s7369_s1 + $0x28] sm:$0xff]   ;;  %vm270_vm1 = vsmask.f32 7440  ;;  %vm1087_vm3 = vcmask 1042432  }
   0xe   : > { %5257 = vmatprep.subr.bf16.mxu1 %v5621_v1  ;;  %5218 = vmatpush3.bf16.msra.mxu0 %v5620_v0  ;;  %s7411_s12 = smov (!%p187_p4, %s5742_s12), 1  ;;  %v5626_v6 = vld [vmem:[%s7369_s1 + $0x60] sm:$0xff]   ;;  %v5628_v8 = vld [vmem:[%s7369_s1 + $0x58] sm:$0xff]   ;;  %v5630_v10 = vld [vmem:[%s7369_s1 + $0x50] sm:$0xff]   ;;  %vm1088_vm4 = vcmask 1046532   ;;  %vm4287_vm7 = vcmask 1040384  }
   0xf   : > { %5258 = vmatpush3.bf16.msra.mxu1 %v5621_v1  ;;  %5219 = vmatprep.subr.bf16.mxu0 %v5622_v2  ;;  %v5627_v7 = vld [vmem:[%s7369_s1 + $0x20] sm:$0xff]   ;;  %s5593_s5 = smul.u32 224, %s7411_s12  ;;  %v5629_v9 = vld [vmem:[%s7369_s1 + $0x18] sm:$0xff]   ;;  %v5631_v11 = vld [vmem:[%s7369_s1 + $0x10] sm:$0xff]  }
  0x10   : > { %5259 = vmatprep.subr.bf16.mxu1 %v5623_v3  ;;  %v5632_v17 = vld [vmem:[%s7369_s1 + $0x48] sm:$0xff]   ;;  %v5634_v36 = vld [vmem:[%s7369_s1 + $0x40] sm:$0xff]   ;;  %vm5871_vm2 = vmor %vm269_vm0, %vm270_vm1  ;;  %s5594_s7 = smul.u32 96, %s7411_s12 }
  0x11   : > { %s5827_s16 = scalar_lea.vmem %s7368_s0, %s5593_s5  ;;  %v5633_v31 = vld [vmem:[%s7369_s1 + $0x8] sm:$0xff]   ;;  %v5635_v51 = vld [vmem:[%s7369_s1] sm:$0xff]   ;;  %v5638_v1 = vld [vmem:[%s7369_s1 + $0xb8] sm:$0xff]  }
  0x12   : > { %5220 = vmatpush3.bf16.msra.mxu0 %v5622_v2  ;;  %v217_v12 = vld [vmem:[%s5827_s16] sm:$0xf]  ;;  %v5837_v13 = vld [vmem:[%s5827_s16 + $0x4] sm:$0xf]  ;;  %v5840_v14 = vld [vmem:[%s5827_s16 + $0x8] sm:$0x1]  ;;  %s7246_s9 = scalar_lea.vmem %s7370_s2, %s5594_s7 }
  0x13   : > { %5260 = vmatpush3.bf16.msra.mxu1 %v5623_v3  ;;  %5221 = vmatprep.subr.bf16.mxu0 %v5624_v4  ;;  %v273_v15 = vshrl.u32 %v217_v12, 16  ;;  %v276_v16 = vshll.u32 %v217_v12, 16  ;;  %v282_v18 = vshll.u32 %v5837_v13, 16  ;;  %v286_v19 = vshrl.u32 %v5837_v13, 16  ;;  %v5849_v21 = vld [vmem:[%s5827_s16 + $0x10] sm:$0xf]  ;;  %vm6150_vm5 = vmor %vm1087_vm3, %vm1088_vm4 }
  0x14   : > { %5261 = vmatprep.subr.bf16.mxu1 %v5625_v5  ;;  %v292_v20 = vshll.u32 %v5840_v14, 16  ;;  %v4464_v24 = vcombine.low %v217_v12, %v5837_v13  ;;  %v5853_v25 = vld [vmem:[%s5827_s16 + $0x14] sm:$0xf]  ;;  %v5856_v26 = vld [vmem:[%s5827_s16 + $0x18] sm:$0x1]  ;;  %v1095_v29 = vrot.slane %v5840_v14, 5 }
  0x15   : > { %v275_v22 = vrot.slane %v273_v15, 4  ;;  %v278_v23 = vrot.slane %v276_v16, 5  ;;  %v284_v27 = vrot.slane %v282_v18, 5  ;;  %v288_v28 = vrot.slane %v286_v19, 4  ;;  %v5879_v49 = vld [vmem:[%s5827_s16 + $0x20] sm:$0xf] }
  0x16   : > { %5222 = vmatpush3.bf16.msra.mxu0 %v5624_v4  ;;  %v297_v30 = vshrl.u32 %v5849_v21, 16  ;;  %5273 = vmatprep.mubr.bf16.mxu1 %v4464_v24  ;;  %v300_v33 = vshll.u32 %v5849_v21, 16  ;;  %v306_v34 = vshll.u32 %v5853_v25, 16  ;;  %v310_v35 = vshrl.u32 %v5853_v25, 16  ;;  %v5882_v50 = vld [vmem:[%s5827_s16 + $0x24] sm:$0xf] }
  0x17   : > { %5262 = vmatpush3.bf16.msra.mxu1 %v5625_v5  ;;  %5223 = vmatprep.subr.bf16.mxu0 %v5626_v6  ;;  %v279_v32 = vor.u32 %v278_v23, %v275_v22  ;;  %v289_v38 = vor.u32 %v288_v28, %v284_v27  ;;  %v294_v39 = vrot.slane %v292_v20, 5  ;;  %v316_v41 = vshll.u32 %v5856_v26, 16  ;;  %v5890_v55 = vld [vmem:[%s5827_s16 + $0x28] sm:$0x1]  ;;  %v5899_v61 = vld [vmem:[%s5827_s16 + $0x30] sm:$0xf] }
  0x18   : > { %5263 = vmatprep.subr.bf16.mxu1 %v5627_v7  ;;  %v299_v40 = vrot.slane %v297_v30, 4  ;;  %v302_v43 = vrot.slane %v300_v33, 5  ;;  %v308_v44 = vrot.slane %v306_v34, 5  ;;  %v312_v45 = vrot.slane %v310_v35, 4  ;;  %v5905_v3 = vld [vmem:[%s5827_s16 + $0x34] sm:$0xf] }
  0x19   : > { %v280_v42 = vrot.slane %v279_v32, 4  ;;  %v290_v46 = vrot.slane %v289_v38, 4  ;;  %v318_v47 = vrot.slane %v316_v41, 5  ;;  %v4465_v48 = vcombine.low %v5849_v21, %v5853_v25  ;;  %v5645_v15 = vld [vmem:[%s7369_s1 + $0xf8] sm:$0xff]   ;;  %v5925_v22 = vld [vmem:[%s5827_s16 + $0x40] sm:$0xf] }
  0x1a   : > { %5224 = vmatpush3.bf16.msra.mxu0 %v5626_v6  ;;  %v303_v53 = vor.u32 %v302_v43, %v299_v40  ;;  %v313_v54 = vor.u32 %v312_v45, %v308_v44  ;;  %v321_v56 = vshrl.u32 %v5879_v49, 16  ;;  %v324_v58 = vshll.u32 %v5879_v49, 16  ;;  %v5931_v30 = vld [vmem:[%s5827_s16 + $0x44] sm:$0xf]  ;;  %v5937_v35 = vld [vmem:[%s5827_s16 + $0x48] sm:$0x1] }
  0x1b   : > { %5264 = vmatpush3.bf16.msra.mxu1 %v5627_v7  ;;  %5225 = vmatprep.subr.bf16.mxu0 %v5628_v8  ;;  %v285_v52 = vsel %vm5871_vm2, %v280_v42, %v284_v27  ;;  %v295_v57 = vsel %vm5871_vm2, %v290_v46, %v294_v39  ;;  %v330_v59 = vshll.u32 %v5882_v50, 16  ;;  %v334_v60 = vshrl.u32 %v5882_v50, 16  ;;  %v5944_v42 = vld [vmem:[%s5827_s16 + $0x50] sm:$0xf] }
  0x1c   : > { %5265 = vmatprep.subr.bf16.mxu1 %v5629_v9  ;;  %v4444_v62 = vcombine.low %v285_v52, %v295_v57  ;;  %v304_v63 = vrot.slane %v303_v53, 4  ;;  %v314_v0 = vrot.slane %v313_v54, 4  ;;  %v323_v2 = vrot.slane %v321_v56, 4  ;;  %v5642_v52 = vld [vmem:[%s7369_s1 + $0xa8] sm:$0xff]   ;;  %v5958_v54 = vld [vmem:[%s5827_s16 + $0x54] sm:$0xf] }
  0x1d   : > { %v326_v4 = vrot.slane %v324_v58, 5  ;;  %v332_v5 = vrot.slane %v330_v59, 5  ;;  %v336_v6 = vrot.slane %v334_v60, 4  ;;  %v340_v7 = vshll.u32 %v5890_v55, 16 }
  0x1e   : > { %5226 = vmatpush3.bf16.msra.mxu0 %v5628_v8  ;;  %5233 = vmatprep.mubr.bf16.mxu0 %v4444_v62  ;;  %v309_v8 = vsel %vm5871_vm2, %v304_v63, %v308_v44  ;;  %v345_v12 = vshrl.u32 %v5899_v61, 16  ;;  %v348_v24 = vshll.u32 %v5899_v61, 16  ;;  %v354_v27 = vshll.u32 %v5905_v3, 16 }
  0x1f   : > { %5266 = vmatpush3.bf16.msra.mxu1 %v5629_v9  ;;  %5227 = vmatprep.subr.bf16.mxu0 %v5630_v10  ;;  %v319_v9 = vsel %vm5871_vm2, %v314_v0, %v318_v47  ;;  %v327_v18 = vor.u32 %v326_v4, %v323_v2  ;;  %v337_v19 = vor.u32 %v336_v6, %v332_v5  ;;  %v342_v20 = vrot.slane %v340_v7, 5  ;;  %v5967_v4 = vld [vmem:[%s5827_s16 + $0x58] sm:$0x1] }
  0x20   : > { %5267 = vmatprep.subr.bf16.mxu1 %v5631_v11  ;;  %v4445_v16 = vcombine.low %v309_v8, %v319_v9  ;;  %v347_v23 = vrot.slane %v345_v12, 4  ;;  %v358_v28 = vshrl.u32 %v5905_v3, 16  ;;  %v4467_v34 = vcombine.low %v5899_v61, %v5905_v3  ;;  %v5650_v61 = vld [vmem:[%s7369_s1 + $0x98] sm:$0xff]  }
  0x21   : > { %v338_v32 = vrot.slane %v337_v19, 4  ;;  %v350_v38 = vrot.slane %v348_v24, 5  ;;  %v356_v39 = vrot.slane %v354_v27, 5  ;;  %v369_v41 = vshrl.u32 %v5925_v22, 16  ;;  %v5985_v19 = vld [vmem:[%s5827_s16 + $0x64] sm:$0xf] }
  0x22   : > { %5228 = vmatpush3.bf16.msra.mxu0 %v5630_v10  ;;  %v4466_v10 = vcombine.low %v5879_v49, %v5882_v50  ;;  %v360_v40 = vrot.slane %v358_v28, 4  ;;  %v372_v46 = vshll.u32 %v5925_v22, 16  ;;  %v378_v57 = vshll.u32 %v5931_v30, 16  ;;  %v5992_v27 = vld [vmem:[%s5827_s16 + $0x68] sm:$0x1] }
  0x23   : > { %5268 = vmatpush3.bf16.msra.mxu1 %v5631_v11  ;;  %5229 = vmatprep.subr.bf16.mxu0 %v5632_v17  ;;  %v5915_v11 = vld [vmem:[%s5827_s16 + $0x38] sm:$0x1]  ;;  %v343_v44 = vsel %vm5871_vm2, %v338_v32, %v342_v20  ;;  %v351_v49 = vor.u32 %v350_v38, %v347_v23  ;;  %v371_v53 = vrot.slane %v369_v41, 4  ;;  %v382_v21 = vshrl.u32 %v5931_v30, 16  ;;  %v5998_v38 = vld [vmem:[%s5827_s16 + $0x70] sm:$0xf] }
  0x24   : > { %5269 = vmatprep.subr.bf16.mxu1 %v5633_v31  ;;  %v364_v33 = vshll.u32 %v5915_v11, 16  ;;  %v374_v56 = vrot.slane %v372_v46, 5  ;;  %v4468_v60 = vcombine.low %v5925_v22, %v5931_v30  ;;  %v393_v62 = vshrl.u32 %v5944_v42, 16 }
  0x25   : > { %v352_v58 = vrot.slane %v351_v49, 4  ;;  %v380_v0 = vrot.slane %v378_v57, 5  ;;  %v396_v9 = vshll.u32 %v5944_v42, 16  ;;  %v406_v22 = vshrl.u32 %v5958_v54, 16 }
  0x26   : > { %5230 = vmatpush3.bf16.msra.mxu0 %v5632_v17  ;;  %v5639_v17 = vld [vmem:[%s7369_s1 + $0xb0] sm:$0xff]   ;;  %v366_v45 = vrot.slane %v364_v33, 5  ;;  %v375_v63 = vor.u32 %v374_v56, %v371_v53  ;;  %v395_v8 = vrot.slane %v393_v62, 4  ;;  %v412_v23 = vshll.u32 %v5967_v4, 16 }
  0x27   : > { %5270 = vmatpush3.bf16.msra.mxu1 %v5633_v31  ;;  %5231 = vmatprep.subr.bf16.mxu0 %v5634_v36  ;;  %v328_v31 = vrot.slane %v327_v18, 4  ;;  %v357_v6 = vsel %vm5871_vm2, %v352_v58, %v356_v39  ;;  %v402_v18 = vshll.u32 %v5958_v54, 16  ;;  %v398_v20 = vrot.slane %v396_v9, 5 }
  0x28   : > { %5271 = vmatprep.subr.bf16.mxu1 %v5635_v51  ;;  %v4469_v24 = vcombine.low %v5944_v42, %v5958_v54  ;;  %v414_v41 = vrot.slane %v412_v23, 5  ;;  %v426_v46 = vshll.u32 %v5985_v19, 16  ;;  %v436_v57 = vshll.u32 %v5992_v27, 16  ;;  %v5658_v23 = vld [vmem:[%s7369_s1 + $0xd0] sm:$0xff]  }
  0x29   : > { %v333_v43 = vsel %vm5871_vm2, %v328_v31, %v332_v5  ;;  %v5651_v5 = vld [vmem:[%s7369_s1 + $0xe8] sm:$0xff]   ;;  %v404_v32 = vrot.slane %v402_v18, 5  ;;  %v441_v62 = vshrl.u32 %v5998_v38, 16  ;;  %v1113_v14 = vrot.slane %v5905_v3, 5 }
  0x2a   : > { %5232 = vmatpush3.bf16.msra.mxu0 %v5634_v36  ;;  %v5647_v36 = vld [vmem:[%s7369_s1 + $0xf0] sm:$0xff]   ;;  %v4446_v47 = vcombine.low %v333_v43, %v343_v44  ;;  %v428_v53 = vrot.slane %v426_v46, 5 }
  0x2b   : > { %5272 = vmatpush3.bf16.msra.mxu1 %v5635_v51  ;;  %5297 = vmatprep.subr.bf16.mxu0 %v5638_v1  ;;  %v361_v51 = vor.u32 %v360_v40, %v356_v39  ;;  %v5652_v39 = vld [vmem:[%s7369_s1 + $0xe0] sm:$0xff]   ;;  %v408_v40 = vrot.slane %v406_v22, 4  ;;  %v6008_v43 = vld [vmem:[%s5827_s16 + $0x74] sm:$0xf]  ;;  %v5657_v22 = vld [vmem:[%s7369_s1 + $0x88] sm:$0xff]  }
  0x2c   : > { %5337 = vmatprep.subr.bf16.mxu1 %v5645_v15  ;;  %v454_v9 = vshrl.u32 %v6008_v43, 16 }
  0x2d   : > { %5234 = vmatmul.mubr.bf16.vlgmr.msra.gmra.mxu0 %v4445_v16  ;;  %v362_v59 = vrot.slane %v361_v51, 4  ;;  %v409_v51 = vor.u32 %v408_v40, %v404_v32 }
  0x2e   : > { %5274 = vmatmul.mubr.bf16.vlgmr.msra.gmra.mxu1 %v4465_v48  ;;  %5298 = vmatpush3.bf16.msra.mxu0 %v5638_v1  ;;  %v388_v48 = vshll.u32 %v5937_v35, 16  ;;  %v384_v1 = vrot.slane %v382_v21, 4 }
  0x2f   : > { %5299 = vmatprep.subr.bf16.mxu0 %v5639_v17  ;;  %5277 = vmatprep.mubr.bf16.mxu1 %v4466_v10  ;;  %v367_v7 = vsel %vm5871_vm2, %v362_v59, %v366_v45  ;;  %v5978_v10 = vld [vmem:[%s5827_s16 + $0x60] sm:$0xf]  ;;  %v410_v59 = vrot.slane %v409_v51, 4 }
  0x30   : > { %5237 = vmatprep.mubr.bf16.mxu0 %v4446_v47  ;;  %5338 = vmatpush3.bf16.msra.mxu1 %v5645_v15  ;;  %v390_v2 = vrot.slane %v388_v48, 5  ;;  %v4447_v12 = vcombine.low %v357_v6, %v367_v7  ;;  %v376_v15 = vrot.slane %v375_v63, 4  ;;  %v385_v16 = vor.u32 %v384_v1, %v380_v0  ;;  %v5656_v48 = vld [vmem:[%s7369_s1 + $0xd8] sm:$0xff]  }
  0x31   : > { %5339 = vmatprep.subr.bf16.mxu1 %v5647_v36  ;;  %v417_v33 = vshrl.u32 %v5978_v10, 16  ;;  %v420_v42 = vshll.u32 %v5978_v10, 16  ;;  %v430_v47 = vshrl.u32 %v5985_v19, 16  ;;  %v4470_v21 = vcombine.low %v5978_v10, %v5985_v19  ;;  %v6027_v1 = vld [vmem:[%s5827_s16 + $0x78] sm:$0x1]  ;;  %v5653_v10 = vld [vmem:[%s7369_s1 + $0x90] sm:$0xff]  }
  0x32   : > { %5300 = vmatpush3.bf16.msra.mxu0 %v5639_v17  ;;  %v5646_v17 = vld [vmem:[%s7369_s1 + $0xa0] sm:$0xff]   ;;  %v381_v28 = vsel %vm5871_vm2, %v376_v15, %v380_v0  ;;  %v386_v31 = vrot.slane %v385_v16, 4  ;;  %v438_v0 = vrot.slane %v436_v57, 5  ;;  %v415_v6 = vsel %vm5871_vm2, %v410_v59, %v414_v41 }
  0x33   : > { %5301 = vmatprep.subr.bf16.mxu0 %v5642_v52  ;;  %v419_v45 = vrot.slane %v417_v33, 4  ;;  %v432_v56 = vrot.slane %v430_v47, 4  ;;  %v4471_v33 = vcombine.low %v5998_v38, %v6008_v43 }
  0x34   : > { %5340 = vmatpush3.bf16.msra.mxu1 %v5647_v36  ;;  %v399_v36 = vor.u32 %v398_v20, %v395_v8  ;;  %v391_v44 = vsel %vm5871_vm2, %v386_v31, %v390_v2  ;;  %v444_v2 = vshll.u32 %v5998_v38, 16  ;;  %v443_v8 = vrot.slane %v441_v62, 4  ;;  %v6041_v20 = vld [vmem:[%s5827_s16 + $0x84] sm:$0xf]  ;;  %v5661_v38 = vld [vmem:[%s7369_s1 + $0xc8] sm:$0xff]  }
  0x35   : > { %5238 = vmatmul.mubr.bf16.gmra.mxu0 %v4447_v12  ;;  %5341 = vmatprep.subr.bf16.mxu1 %v5651_v5  ;;  %v433_v63 = vor.u32 %v432_v56, %v428_v53  ;;  %v6038_v12 = vld [vmem:[%s5827_s16 + $0x80] sm:$0xf]  ;;  %v456_v31 = vrot.slane %v454_v9, 4 }
  0x36   : > { %5278 = vmatmul.mubr.bf16.gmra.mxu1 %v4467_v34  ;;  %5302 = vmatpush3.bf16.msra.mxu0 %v5642_v52  ;;  %v4448_v34 = vcombine.low %v381_v28, %v391_v44  ;;  %v400_v49 = vrot.slane %v399_v36, 4  ;;  %v422_v52 = vrot.slane %v420_v42, 5  ;;  %v446_v18 = vrot.slane %v444_v2, 5  ;;  %v6058_v36 = vld [vmem:[%s5827_s16 + $0x90] sm:$0xf] }
  0x37   : > { %5281 = vmatprep.mubr.bf16.mxu1 %v4468_v60  ;;  %5303 = vmatprep.subr.bf16.mxu0 %v5646_v17  ;;  %v434_v16 = vrot.slane %v433_v63, 4  ;;  %v465_v41 = vshrl.u32 %v6038_v12, 16  ;;  %v468_v42 = vshll.u32 %v6038_v12, 16  ;;  %v6065_v44 = vld [vmem:[%s5827_s16 + $0x94] sm:$0xf]  ;;  %v489_v62 = vshrl.u32 %v6058_v36, 16 }
  0x38   : > { %5342 = vmatpush3.bf16.msra.mxu1 %v5651_v5  ;;  %5241 = vmatprep.mubr.bf16.mxu0 %v4448_v34  ;;  %v405_v58 = vsel %vm5871_vm2, %v400_v49, %v404_v32  ;;  %v423_v60 = vor.u32 %v422_v52, %v419_v45  ;;  %v450_v5 = vshll.u32 %v6008_v43, 16  ;;  %v460_v32 = vshll.u32 %v6027_v1, 16 }
  0x39   : > { %5343 = vmatprep.subr.bf16.mxu1 %v5652_v39  ;;  %v4449_v15 = vcombine.low %v405_v58, %v415_v6  ;;  %v439_v40 = vsel %vm5871_vm2, %v434_v16, %v438_v0  ;;  %v467_v49 = vrot.slane %v465_v41, 4  ;;  %v470_v51 = vrot.slane %v468_v42, 5  ;;  %v6086_v6 = vld [vmem:[%s5827_s16 + $0xa0] sm:$0xf]  ;;  %v6113_v42 = vld [vmem:[%s5827_s16 + $0xb0] sm:$0xf] }
  0x3a   : > { %5304 = vmatpush3.bf16.msra.mxu0 %v5646_v17  ;;  %v424_v7 = vrot.slane %v423_v60, 4  ;;  %v452_v17 = vrot.slane %v450_v5, 5  ;;  %v462_v47 = vrot.slane %v460_v32, 5  ;;  %v478_v52 = vshrl.u32 %v6041_v20, 16  ;;  %v6078_v60 = vld [vmem:[%s5827_s16 + $0x98] sm:$0x1] }
  0x3b   : > { %5305 = vmatprep.subr.bf16.mxu0 %v5650_v61  ;;  %v492_v2 = vshll.u32 %v6058_v36, 16  ;;  %v498_v5 = vshll.u32 %v6065_v44, 16  ;;  %v5663_v16 = vld [vmem:[%s7369_s1 + $0xc0] sm:$0xff]   ;;  %v6105_v32 = vld [vmem:[%s5827_s16 + $0xa8] sm:$0x1]  ;;  %v4473_v41 = vcombine.low %v6058_v36, %v6065_v44 }
  0x3c   : > { %5344 = vmatpush3.bf16.msra.mxu1 %v5652_v39  ;;  %v429_v28 = vsel %vm5871_vm2, %v424_v7, %v428_v53  ;;  %v6055_v39 = vld [vmem:[%s5827_s16 + $0x88] sm:$0x1]  ;;  %v457_v46 = vor.u32 %v456_v31, %v452_v17  ;;  %v480_v59 = vrot.slane %v478_v52, 4  ;;  %v5662_v7 = vld [vmem:[%s7369_s1 + $0x80] sm:$0xff]   ;;  %v508_v31 = vshll.u32 %v6078_v60, 16 }
  0x3d   : > { %5345 = vmatprep.subr.bf16.mxu1 %v5656_v48  ;;  %5242 = vmatmul.mubr.bf16.gmra.mxu0 %v4449_v15  ;;  %v4450_v45 = vcombine.low %v429_v28, %v439_v40  ;;  %v484_v57 = vshll.u32 %v6055_v39, 16  ;;  %v6092_v15 = vld [vmem:[%s5827_s16 + $0xa4] sm:$0xf]  ;;  %v502_v28 = vshrl.u32 %v6065_v44, 16 }
  0x3e   : > { %5282 = vmatmul.mubr.bf16.gmra.mxu1 %v4469_v24  ;;  %5306 = vmatpush3.bf16.msra.mxu0 %v5650_v61  ;;  %v447_v24 = vor.u32 %v446_v18, %v443_v8  ;;  %v474_v61 = vshll.u32 %v6041_v20, 16  ;;  %v458_v53 = vrot.slane %v457_v46, 4  ;;  %v6100_v18 = vld [vmem:[%s7369_s1 + $0x138] sm:$0xff]   ;;  %v526_v36 = vshrl.u32 %v6092_v15, 16 }
  0x3f   : > { %5285 = vmatprep.mubr.bf16.mxu1 %v4470_v21  ;;  %5307 = vmatprep.subr.bf16.mxu0 %v5653_v10  ;;  %v4472_v21 = vcombine.low %v6038_v12, %v6041_v20  ;;  %v486_v0 = vrot.slane %v484_v57, 5  ;;  %v491_v12 = vrot.slane %v489_v62, 4  ;;  %v504_v46 = vrot.slane %v502_v28, 4 }
  0x40   : > { %5346 = vmatpush3.bf16.msra.mxu1 %v5656_v48  ;;  %v448_v34 = vrot.slane %v447_v24, 4  ;;  %5245 = vmatprep.mubr.bf16.mxu0 %v4450_v45  ;;  %v476_v56 = vrot.slane %v474_v61, 5  ;;  %v471_v48 = vor.u32 %v470_v51, %v467_v49  ;;  %v463_v63 = vsel %vm5871_vm2, %v458_v53, %v462_v47  ;;  %v6117_v61 = vld [vmem:[%s5827_s16 + $0xb4] sm:$0xf] }
  0x41   : > { %5347 = vmatprep.subr.bf16.mxu1 %v5658_v23  ;;  %v510_v47 = vrot.slane %v508_v31, 5  ;;  %v522_v51 = vshll.u32 %v6092_v15, 16 }
  0x42   : > { %5308 = vmatpush3.bf16.msra.mxu0 %v5653_v10  ;;  %v453_v58 = vsel %vm5871_vm2, %v448_v34, %v452_v17  ;;  %v472_v9 = vrot.slane %v471_v48, 4  ;;  %v481_v10 = vor.u32 %v480_v59, %v476_v56  ;;  %v494_v17 = vrot.slane %v492_v2, 5 }
  0x43   : > { %5309 = vmatprep.subr.bf16.mxu0 %v5657_v22  ;;  %v4451_v8 = vcombine.low %v453_v58, %v463_v63  ;;  %v528_v58 = vrot.slane %v526_v36, 4  ;;  %v4474_v48 = vcombine.low %v6086_v6, %v6092_v15  ;;  %v537_v2 = vshrl.u32 %v6113_v42, 16 }
  0x44   : > { %5348 = vmatpush3.bf16.msra.mxu1 %v5658_v23  ;;  %v500_v23 = vrot.slane %v498_v5, 5  ;;  %v477_v40 = vsel %vm5871_vm2, %v472_v9, %v476_v56  ;;  %v482_v24 = vrot.slane %v481_v10, 4  ;;  %v495_v45 = vor.u32 %v494_v17, %v491_v12 }
  0x45   : > { %5349 = vmatprep.subr.bf16.mxu1 %v5661_v38  ;;  %5246 = vmatmul.mubr.bf16.gmra.mxu0 %v4451_v8  ;;  %v540_v8 = vshll.u32 %v6113_v42, 16  ;;  %v539_v12 = vrot.slane %v537_v2, 4  ;;  %v550_v17 = vshrl.u32 %v6117_v61, 16  ;;  %v1106_v2 = vrot.slane %v5882_v50, 5 }
  0x46   : > { %5286 = vmatmul.mubr.bf16.gmra.mxu1 %v4471_v33  ;;  %5310 = vmatpush3.bf16.msra.mxu0 %v5657_v22  ;;  %v513_v33 = vshrl.u32 %v6086_v6, 16  ;;  %v516_v22 = vshll.u32 %v6086_v6, 16  ;;  %v487_v34 = vsel %vm5871_vm2, %v482_v24, %v486_v0  ;;  %v496_v53 = vrot.slane %v495_v45, 4  ;;  %v6130_v0 = vld [vmem:[%s5827_s16 + $0xb8] sm:$0x1] }
  0x47   : > { %5289 = vmatprep.mubr.bf16.mxu1 %v4472_v21  ;;  %5311 = vmatprep.subr.bf16.mxu0 %v5662_v7  ;;  %v4452_v52 = vcombine.low %v477_v40, %v487_v34  ;;  %v505_v56 = vor.u32 %v504_v46, %v500_v23  ;;  %v524_v21 = vrot.slane %v522_v51, 5  ;;  %v546_v6 = vshll.u32 %v6117_v61, 16 }
  0x48   : > { %5350 = vmatpush3.bf16.msra.mxu1 %v5661_v38  ;;  %v515_v49 = vrot.slane %v513_v33, 4  ;;  %v518_v57 = vrot.slane %v516_v22, 5  ;;  %v532_v38 = vshll.u32 %v6105_v32, 16  ;;  %v501_v59 = vsel %vm5871_vm2, %v496_v53, %v500_v23  ;;  %v1051_v23 = vld [vmem:[%s5827_s16] sm:$0xe] }
  0x49   : > { %5351 = vmatprep.subr.bf16.mxu1 %v5663_v16  ;;  %5249 = vmatprep.mubr.bf16.mxu0 %v4452_v52  ;;  %v506_v62 = vrot.slane %v505_v56, 4  ;;  %v529_v5 = vor.u32 %v528_v58, %v524_v21  ;;  %v542_v40 = vrot.slane %v540_v8, 5  ;;  %v548_v24 = vrot.slane %v546_v6, 5  ;;  %v1052_v33 = vld [vmem:[%s5827_s16 + $0x10] sm:$0xe] }
  0x4a   : > { %5312 = vmatpush3.bf16.msra.mxu0 %v5662_v7  ;;  %v519_v63 = vor.u32 %v518_v57, %v515_v49  ;;  %v534_v7 = vrot.slane %v532_v38, 5  ;;  %v552_v45 = vrot.slane %v550_v17, 4  ;;  %v556_v46 = vshll.u32 %v6130_v0, 16  ;;  %v1053_v57 = vld [vmem:[%s5827_s16 + $0x20] sm:$0xe] }
  0x4b   : > { %5377 = vmatprep.subr.bf16.mxu0 %v6100_v18  ;;  %v511_v9 = vsel %vm5871_vm2, %v506_v62, %v510_v47  ;;  %v530_v31 = vrot.slane %v529_v5, 4  ;;  %v543_v34 = vor.u32 %v542_v40, %v539_v12  ;;  %v4484_v49 = vrot.slane %v1051_v23, 9  ;;  %v1054_v6 = vld [vmem:[%s5827_s16 + $0x30] sm:$0xe]  ;;  %v1055_v12 = vld [vmem:[%s5827_s16 + $0x40] sm:$0xe] }
  0x4c   : > { %5352 = vmatpush3.bf16.msra.mxu1 %v5663_v16  ;;  %v520_v10 = vrot.slane %v519_v63, 4  ;;  %v6142_v16 = vld [vmem:[%s7369_s1 + $0x178] sm:$0xff]   ;;  %v4453_v28 = vcombine.low %v501_v59, %v511_v9  ;;  %v1092_v51 = vrot.slane %v5837_v13, 5  ;;  %v553_v52 = vor.u32 %v552_v45, %v548_v24  ;;  %v5665_v17 = vld [vmem:[%s5827_s16 + $0x20] sm:$0xff]  }
  0x4d   : > { %5417 = vmatprep.subr.bf16.mxu1 %v6142_v16  ;;  %v535_v22 = vsel %vm5871_vm2, %v530_v31, %v534_v7  ;;  %v558_v53 = vrot.slane %v556_v46, 5  ;;  %v4475_v56 = vcombine.low %v6113_v42, %v6117_v61  ;;  %v1099_v59 = vrot.slane %v5853_v25, 5 }
  0x4e   : > { %5290 = vmatmul.mubr.bf16.gmra.mxu1 %v4473_v41  ;;  %v525_v41 = vsel %vm5871_vm2, %v520_v10, %v524_v21  ;;  %5250 = vmatmul.mubr.bf16.gmra.mxu0 %v4453_v28  ;;  %v544_v21 = vrot.slane %v543_v34, 4  ;;  %v1093_v58 = vsel %vm6150_vm5, %v4484_v49, %v1092_v51  ;;  %v1094_v38 = vrot.slane %v1092_v51, 4  ;;  %v5667_v34 = vld [vmem:[%s7369_s1 + $0x130] sm:$0xff]  }
  0x4f   : > { %5293 = vmatprep.mubr.bf16.mxu1 %v4474_v48  ;;  %v4454_v36 = vcombine.low %v525_v41, %v535_v22  ;;  %v5664_v48 = vld [vmem:[%s5827_s16 + $0x10] sm:$0xff]   ;;  %v1102_v62 = vrot.slane %v5856_v26, 5  ;;  %v554_v13 = vrot.slane %v553_v52, 4  ;;  %v4485_v63 = vrot.slane %v1052_v33, 9 }
  0x50   : > { %v549_v42 = vsel %vm5871_vm2, %v544_v21, %v548_v24  ;;  %v1096_v5 = vsel %vm6150_vm5, %v1094_v38, %v1095_v29  ;;  %v1101_v7 = vrot.slane %v1099_v59, 4  ;;  %v4486_v25 = vrot.slane %v1053_v57, 9  ;;  %v5668_v29 = vld [vmem:[%s5827_s16 + $0x30] sm:$0xff]   ;;  %v5669_v57 = vld [vmem:[%s5827_s16 + $0x40] sm:$0xff]  }
  0x51   : > { %5253 = vmatprep.mubr.bf16.mxu0 %v4454_v36  ;;  %v559_v26 = vsel %vm5871_vm2, %v554_v13, %v558_v53  ;;  %v4512_v8 = vcombine.low %v1093_v58, %v1096_v5  ;;  %v1108_v9 = vrot.slane %v1106_v2, 4  ;;  %v1109_v10 = vrot.slane %v5890_v55, 5  ;;  %v1056_v33 = vld [vmem:[%s5827_s16 + $0x50] sm:$0xe]  ;;  %v5674_v5 = vld [vmem:[%s7369_s1 + $0x120] sm:$0xff]  }
  0x52   : > { %v4455_v50 = vcombine.low %v549_v42, %v559_v26  ;;  %v4487_v23 = vrot.slane %v1054_v6, 9  ;;  %v1100_v28 = vsel %vm6150_vm5, %v4485_v63, %v1099_v59  ;;  %v1103_v31 = vsel %vm6150_vm5, %v1101_v7, %v1102_v62  ;;  %v5675_v55 = vld [vmem:[%s7369_s1 + $0x170] sm:$0xff]  }
  0x53   : > { %v1116_v40 = vrot.slane %v5915_v11, 5  ;;  %v1120_v24 = vrot.slane %v5931_v30, 5  ;;  %v1107_v3 = vsel %vm6150_vm5, %v4486_v25, %v1106_v2  ;;  %v1110_v41 = vsel %vm6150_vm5, %v1108_v9, %v1109_v10  ;;  %v1058_v21 = vld [vmem:[%s5827_s16 + $0x70] sm:$0xe]  ;;  %v1059_v2 = vld [vmem:[%s5827_s16 + $0x80] sm:$0xe] }
  0x54   : > { %v4488_v45 = vrot.slane %v1055_v12, 9  ;;  %v1127_v46 = vrot.slane %v5958_v54, 5  ;;  %v1115_v22 = vrot.slane %v1113_v14, 4  ;;  %v1123_v11 = vrot.slane %v5937_v35, 5  ;;  %v1057_v35 = vld [vmem:[%s5827_s16 + $0x60] sm:$0xe] }
  0x55   : > { %v4513_v30 = vcombine.low %v1100_v28, %v1103_v31  ;;  %v4489_v49 = vrot.slane %v1056_v33, 9  ;;  %v1130_v51 = vrot.slane %v5967_v4, 5  ;;  %v4514_v36 = vcombine.low %v1107_v3, %v1110_v41  ;;  %v5670_v4 = vld [vmem:[%s7369_s1 + $0x128] sm:$0xff]   ;;  %v5671_v58 = vld [vmem:[%s5827_s16 + $0x50] sm:$0xff]   ;;  %v5672_v12 = vld [vmem:[%s5827_s16 + $0x60] sm:$0xff]  }
  0x56   : > { %5294 = vmatmul.mubr.bf16.gmra.mxu1 %v4475_v56  ;;  %5254 = vmatmul.mubr.bf16.gmra.mxu0 %v4455_v50  ;;  %v1122_v52 = vrot.slane %v1120_v24, 4  ;;  %v1134_v53 = vrot.slane %v5985_v19, 5  ;;  %v1129_v54 = vrot.slane %v1127_v46, 4  ;;  %v1137_v56 = vrot.slane %v5992_v27, 5  ;;  %v1060_v50 = vld [vmem:[%s5827_s16 + $0x90] sm:$0xe] }
  0x57   : > { %5353 = vmatprep.mubr.bf16.mxu1 %v5664_v48  ;;  %5313 = vmatprep.mubr.bf16.mxu0 %v4512_v8  ;;  %v1141_v38 = vrot.slane %v6008_v43, 5  ;;  %v5679_v48 = vld [vmem:[%s7369_s1 + $0x168] sm:$0xff]   ;;  %v1114_v27 = vsel %vm6150_vm5, %v4487_v23, %v1113_v14  ;;  %v1121_v59 = vsel %vm6150_vm5, %v4488_v45, %v1120_v24  ;;  %v4490_v62 = vrot.slane %v1057_v35, 9  ;;  %v5684_v28 = vld [vmem:[%s7369_s1 + $0x158] sm:$0xff]   ;;  %v1062_v45 = vld [vmem:[%s5827_s16 + $0xb0] sm:$0xe] }
  0x58   : > { %v1124_v43 = vsel %vm6150_vm5, %v1122_v52, %v1123_v11  ;;  %v1148_v13 = vrot.slane %v6041_v20, 5  ;;  %v1144_v63 = vrot.slane %v6027_v1, 5  ;;  %v4491_v7 = vrot.slane %v1058_v21, 9  ;;  %v5680_v20 = vld [vmem:[%s7369_s1 + $0x160] sm:$0xff]   ;;  %v5678_v3 = vld [vmem:[%s7369_s1 + $0x118] sm:$0xff]  }
  0x59   : > { %v1143_v25 = vrot.slane %v1141_v38, 4  ;;  %v1155_v26 = vrot.slane %v6065_v44, 5  ;;  %v4516_v1 = vcombine.low %v1121_v59, %v1124_v43  ;;  %v4492_v8 = vrot.slane %v1059_v2, 9  ;;  %v4593_v43 = vld [vmem:[%s5827_s16 + $0x14] sm:$0xf] }
  0x5a   : > { %v1151_v6 = vrot.slane %v6055_v39, 5  ;;  %v1128_v9 = vsel %vm6150_vm5, %v4489_v49, %v1127_v46  ;;  %v1131_v10 = vsel %vm6150_vm5, %v1129_v54, %v1130_v51  ;;  %v1150_v14 = vrot.slane %v1148_v13, 4  ;;  %v5676_v39 = vld [vmem:[%s5827_s16 + $0x70] sm:$0xff]  }
  0x5b   : > { %v1158_v44 = vrot.slane %v6078_v60, 5  ;;  %v1157_v23 = vrot.slane %v1155_v26, 4  ;;  %v4517_v31 = vcombine.low %v1128_v9, %v1131_v10  ;;  %v1165_v60 = vrot.slane %v6105_v32, 5 }
  0x5c   : > { %v6266_v32 = vsel %vm6150_vm5, %v1143_v25, %v1144_v63  ;;  %v6270_v19 = vsel %vm6150_vm5, %v4492_v8, %v1148_v13  ;;  %v1169_v46 = vrot.slane %v6117_v61, 5  ;;  %v6277_v11 = vsel %vm6150_vm5, %v1150_v14, %v1151_v6  ;;  %v5686_v61 = vld [vmem:[%s7369_s1 + $0x150] sm:$0xff]   ;;  %v5691_v25 = vld [vmem:[%s7369_s1 + $0x140] sm:$0xff]  }
  0x5d   : > { %v4495_v49 = vrot.slane %v1062_v45, 9  ;;  %v1804_v63 = vshll.u32 %v4593_v43, 16  ;;  %v1808_v2 = vshrl.u32 %v4593_v43, 16  ;;  %v4595_v6 = vld [vmem:[%s5827_s16 + $0x20] sm:$0xf] }
  0x5e   : > { %5354 = vmatmul.mubr.bf16.vlgmr.msra.gmra.mxu1 %v5665_v17  ;;  %5314 = vmatmul.mubr.bf16.vlgmr.msra.gmra.mxu0 %v4513_v30  ;;  %v4493_v17 = vrot.slane %v1060_v50, 9  ;;  %v1171_v52 = vrot.slane %v1169_v46, 4 }
  0x5f   : > { %5357 = vmatprep.mubr.bf16.mxu1 %v5668_v29  ;;  %5418 = vmatpush3.bf16.msra.mxu1 %v6142_v16  ;;  %v1117_v16 = vsel %vm6150_vm5, %v1115_v22, %v1116_v40  ;;  %v1162_v29 = vrot.slane %v6092_v15, 5  ;;  %v1061_v40 = vld [vmem:[%s5827_s16 + $0xa0] sm:$0xe]  ;;  %v1135_v15 = vsel %vm6150_vm5, %v4490_v62, %v1134_v53  ;;  %v1172_v22 = vrot.slane %v6130_v0, 5  ;;  %v4594_v62 = vld [vmem:[%s5827_s16 + $0x18] sm:$0x1] }
  0x60   : > { %5419 = vmatprep.subr.bf16.mxu1 %v5675_v55  ;;  %5378 = vmatpush3.bf16.msra.mxu0 %v6100_v18  ;;  %v1136_v18 = vrot.slane %v1134_v53, 4  ;;  %v4515_v42 = vcombine.low %v1114_v27, %v1117_v16  ;;  %v4494_v41 = vrot.slane %v1061_v40, 9  ;;  %v6281_v30 = vsel %vm6150_vm5, %v4493_v17, %v1155_v26  ;;  %v5681_v53 = vld [vmem:[%s7369_s1 + $0x110] sm:$0xff]   ;;  %v5685_v27 = vld [vmem:[%s7369_s1 + $0x108] sm:$0xff]  }
  0x61   : > { %5317 = vmatprep.mubr.bf16.mxu0 %v4514_v36  ;;  %5379 = vmatprep.subr.bf16.mxu0 %v5667_v34  ;;  %v1164_v24 = vrot.slane %v1162_v29, 4  ;;  %v6303_v54 = vsel %vm6150_vm5, %v4495_v49, %v1169_v46  ;;  %v2401_v8 = vrot.slane %v4594_v62, 5  ;;  %v1806_v50 = vrot.slane %v1804_v63, 5 }
  0x62   : > { %v1138_v33 = vsel %vm6150_vm5, %v1136_v18, %v1137_v56  ;;  %v6292_v51 = vsel %vm6150_vm5, %v4494_v41, %v1162_v29  ;;  %v5677_v56 = vld [vmem:[%s5827_s16 + $0x80] sm:$0xff]   ;;  %v1810_v9 = vrot.slane %v1808_v2, 4  ;;  %v4597_v29 = vld [vmem:[%s5827_s16 + $0x28] sm:$0x1] }
  0x63   : > { %5420 = vmatpush3.bf16.msra.mxu1 %v5675_v55  ;;  %v6259_v55 = vsel %vm6150_vm5, %v4491_v7, %v1141_v38  ;;  %v4518_v0 = vcombine.low %v1135_v15, %v1138_v33  ;;  %v6296_v36 = vsel %vm6150_vm5, %v1164_v24, %v1165_v60  ;;  %v4592_v38 = vld [vmem:[%s5827_s16 + $0x10] sm:$0xf]  ;;  %v2398_v7 = vrot.slane %v4593_v43, 5  ;;  %v5690_v15 = vld [vmem:[%s7369_s1 + $0x100] sm:$0xff]   ;;  %v4599_v43 = vld [vmem:[%s5827_s16 + $0x34] sm:$0xf] }
  0x64   : > { %5421 = vmatprep.subr.bf16.mxu1 %v5679_v48  ;;  %5380 = vmatpush3.bf16.msra.mxu0 %v5667_v34  ;;  %v6285_v34 = vsel %vm6150_vm5, %v1157_v23, %v1158_v44  ;;  %v4519_v35 = vcombine.low %v6259_v55, %v6266_v32  ;;  %v4522_v16 = vcombine.low %v6292_v51, %v6296_v36  ;;  %v1795_v13 = vshrl.u32 %v4592_v38, 16  ;;  %v4596_v44 = vld [vmem:[%s5827_s16 + $0x24] sm:$0xf] }
  0x65   : > { %5381 = vmatprep.subr.bf16.mxu0 %v5670_v4  ;;  %v4521_v21 = vcombine.low %v6281_v30, %v6285_v34  ;;  %v1798_v18 = vshll.u32 %v4592_v38, 16  ;;  %v2400_v14 = vrot.slane %v2398_v7, 4  ;;  %v1822_v23 = vshll.u32 %v4595_v6, 16 }
  0x66   : > { %5358 = vmatmul.mubr.bf16.gmra.mxu1 %v5669_v57  ;;  %5318 = vmatmul.mubr.bf16.gmra.mxu0 %v4515_v42  ;;  %v4520_v57 = vcombine.low %v6270_v19, %v6277_v11  ;;  %v1814_v42 = vshll.u32 %v4594_v62, 16  ;;  %v1828_v24 = vshll.u32 %v4596_v44, 16  ;;  %v1832_v60 = vshrl.u32 %v4596_v44, 16  ;;  %v4600_v62 = vld [vmem:[%s5827_s16 + $0x38] sm:$0x1] }
  0x67   : > { %5361 = vmatprep.mubr.bf16.mxu1 %v5671_v58  ;;  %5422 = vmatpush3.bf16.msra.mxu1 %v5679_v48  ;;  %v5689_v58 = vld [vmem:[%s7369_s1 + $0x148] sm:$0xff]   ;;  %v5682_v48 = vld [vmem:[%s5827_s16 + $0x90] sm:$0xff]   ;;  %v1800_v26 = vrot.slane %v1798_v18, 5  ;;  %v6344_v40 = vsel %vm6150_vm5, %v2400_v14, %v2401_v8  ;;  %v1824_v41 = vrot.slane %v1822_v23, 5  ;;  %v1862_v8 = vshll.u32 %v4600_v62, 16  ;;  %v6393_v23 = vld [vmem:[%s7369_s1 + $0x1f8] sm:$0xff]  }
  0x68   : > { %5423 = vmatprep.subr.bf16.mxu1 %v5680_v20  ;;  %5382 = vmatpush3.bf16.msra.mxu0 %v5670_v4  ;;  %v6314_v4 = vsel %vm6150_vm5, %v1171_v52, %v1172_v22  ;;  %v1816_v10 = vrot.slane %v1814_v42, 5  ;;  %v1830_v45 = vrot.slane %v1828_v24, 5  ;;  %v1834_v46 = vrot.slane %v1832_v60, 4 }
  0x69   : > { %5321 = vmatprep.mubr.bf16.mxu0 %v4516_v1  ;;  %5383 = vmatprep.subr.bf16.mxu0 %v5674_v5  ;;  %v4523_v59 = vcombine.low %v6303_v54, %v6314_v4  ;;  %v1838_v22 = vshll.u32 %v4597_v29, 16  ;;  %v2412_v24 = vrot.slane %v4599_v43, 5  ;;  %v2415_v60 = vrot.slane %v4600_v62, 5  ;;  %v4606_v62 = vld [vmem:[%s5827_s16 + $0x58] sm:$0x1] }
  0x6a   : > { %v1835_v38 = vor.u32 %v1834_v46, %v1830_v45  ;;  %v1910_v54 = vshll.u32 %v4606_v62, 16  ;;  %v4607_v4 = vld [vmem:[%s5827_s16 + $0x60] sm:$0xf] }
  0x6b   : > { %5424 = vmatpush3.bf16.msra.mxu1 %v5680_v20  ;;  %v1797_v20 = vrot.slane %v1795_v13, 4  ;;  %v5687_v13 = vld [vmem:[%s5827_s16 + $0xb0] sm:$0xff]   ;;  %v2414_v30 = vrot.slane %v2412_v24, 4 }
  0x6c   : > { %5425 = vmatprep.subr.bf16.mxu1 %v5684_v28  ;;  %5384 = vmatpush3.bf16.msra.mxu0 %v5674_v5  ;;  %v4664_v5 = vld [vmem:[%s5827_s16 + $0x10] sm:$0xe] }
  0x6d   : > { %5385 = vmatprep.subr.bf16.mxu0 %v5678_v3  ;;  %v4676_v1 = vrot.slane %v4664_v5, 9  ;;  %v1852_v5 = vshll.u32 %v4599_v43, 16  ;;  %v2416_v36 = vsel %vm6150_vm5, %v2414_v30, %v2415_v60 }
  0x6e   : > { %5362 = vmatmul.mubr.bf16.gmra.mxu1 %v5672_v12  ;;  %5322 = vmatmul.mubr.bf16.gmra.mxu0 %v4517_v31  ;;  %v1801_v12 = vor.u32 %v1800_v26, %v1797_v20  ;;  %v1811_v31 = vor.u32 %v1810_v9, %v1806_v50 }
  0x6f   : > { %5365 = vmatprep.mubr.bf16.mxu1 %v5676_v39  ;;  %5426 = vmatpush3.bf16.msra.mxu1 %v5684_v28  ;;  %v6338_v17 = vsel %vm6150_vm5, %v4676_v1, %v2398_v7  ;;  %v1819_v39 = vshrl.u32 %v4595_v6, 16  ;;  %v4665_v28 = vld [vmem:[%s5827_s16 + $0x20] sm:$0xe]  ;;  %v4666_v7 = vld [vmem:[%s5827_s16 + $0x30] sm:$0xe]  ;;  %v1856_v1 = vshrl.u32 %v4599_v43, 16 }
  0x70   : > { %5427 = vmatprep.subr.bf16.mxu1 %v5686_v61  ;;  %5325 = vmatprep.mubr.bf16.mxu0 %v4518_v0  ;;  %v1802_v33 = vrot.slane %v1801_v12, 4  ;;  %v4704_v55 = vcombine.low %v6338_v17, %v6344_v40  ;;  %v1812_v32 = vrot.slane %v1811_v31, 4  ;;  %v4677_v52 = vrot.slane %v4665_v28, 9  ;;  %v4601_v6 = vld [vmem:[%s5827_s16 + $0x40] sm:$0xf] }
  0x71   : > { %5386 = vmatpush3.bf16.msra.mxu0 %v5678_v3  ;;  %v1821_v3 = vrot.slane %v1819_v39, 4  ;;  %v1854_v12 = vrot.slane %v1852_v5, 5  ;;  %v1864_v39 = vrot.slane %v1862_v8, 5  ;;  %v4678_v31 = vrot.slane %v4666_v7, 9 }
  0x72   : > { %5387 = vmatprep.subr.bf16.mxu0 %v5681_v53  ;;  %v1807_v49 = vsel %vm5871_vm2, %v1802_v33, %v1806_v50  ;;  %v4602_v50 = vld [vmem:[%s5827_s16 + $0x44] sm:$0xf]  ;;  %v4603_v33 = vld [vmem:[%s5827_s16 + $0x48] sm:$0x1] }
  0x73   : > { %5428 = vmatpush3.bf16.msra.mxu1 %v5686_v61  ;;  %v5683_v61 = vld [vmem:[%s5827_s16 + $0xa0] sm:$0xff]   ;;  %v1825_v0 = vor.u32 %v1824_v41, %v1821_v3  ;;  %v1867_v3 = vshrl.u32 %v4601_v6, 16  ;;  %v1870_v41 = vshll.u32 %v4601_v6, 16  ;;  %v1880_v34 = vshrl.u32 %v4602_v50, 16 }
  0x74   : > { %5429 = vmatprep.subr.bf16.mxu1 %v5689_v58 }
  0x75   : > { %5388 = vmatpush3.bf16.msra.mxu0 %v5681_v53  ;;  %v2405_v53 = vrot.slane %v4596_v44, 5  ;;  %v1826_v63 = vrot.slane %v1825_v0, 4  ;;  %v1872_v0 = vrot.slane %v1870_v41, 5 }
  0x76   : > { %5366 = vmatmul.mubr.bf16.gmra.mxu1 %v5677_v56  ;;  %5389 = vmatprep.subr.bf16.mxu0 %v5685_v27  ;;  %v4598_v56 = vld [vmem:[%s5827_s16 + $0x30] sm:$0xf] }
  0x77   : > { %5369 = vmatprep.mubr.bf16.mxu1 %v5682_v48  ;;  %5430 = vmatpush3.bf16.msra.mxu1 %v5689_v58  ;;  %v1817_v58 = vsel %vm5871_vm2, %v1812_v32, %v1816_v10  ;;  %v2408_v48 = vrot.slane %v4597_v29, 5  ;;  %v6367_v19 = vsel %vm6150_vm5, %v4677_v52, %v2405_v53  ;;  %v2407_v11 = vrot.slane %v2405_v53, 4 }
  0x78   : > { %5326 = vmatmul.mubr.bf16.gmra.mxu0 %v4519_v35  ;;  %5431 = vmatprep.subr.bf16.mxu1 %v5691_v25  ;;  %v1840_v35 = vrot.slane %v1838_v22, 5  ;;  %v6363_v18 = vcombine.low %v1807_v49, %v1817_v58  ;;  %v1843_v2 = vshrl.u32 %v4598_v56, 16  ;;  %v1846_v42 = vshll.u32 %v4598_v56, 16  ;;  %v4604_v56 = vld [vmem:[%s5827_s16 + $0x50] sm:$0xf] }
  0x79   : > { %5329 = vmatprep.mubr.bf16.mxu0 %v4520_v57  ;;  %5390 = vmatpush3.bf16.msra.mxu0 %v5685_v27  ;;  %v6372_v57 = vld [vmem:[%s7369_s1 + $0x1b8] sm:$0xff]   ;;  %v1836_v27 = vrot.slane %v1835_v38, 4  ;;  %v1831_v20 = vsel %vm5871_vm2, %v1826_v63, %v1830_v45  ;;  %v6379_v26 = vsel %vm6150_vm5, %v2407_v11, %v2408_v48  ;;  %v1858_v29 = vrot.slane %v1856_v1, 4  ;;  %v5688_v45 = vld [vmem:[%s5827_s16 + $0xc0] sm:$0xff]   ;;  %v4605_v58 = vld [vmem:[%s5827_s16 + $0x54] sm:$0xf] }
  0x7a   : > { %5391 = vmatprep.subr.bf16.mxu0 %v5690_v15  ;;  %v4705_v9 = vcombine.low %v6367_v19, %v6379_v26  ;;  %v1845_v10 = vrot.slane %v1843_v2, 4  ;;  %v1848_v14 = vrot.slane %v1846_v42, 5  ;;  %v1876_v32 = vshll.u32 %v4602_v50, 16  ;;  %v6465_v26 = vld [vmem:[%s5827_s16 + $0x74] sm:$0xf] }
  0x7b   : > { %5432 = vmatpush3.bf16.msra.mxu1 %v5691_v25  ;;  %v1841_v25 = vsel %vm5871_vm2, %v1836_v27, %v1840_v35  ;;  %v6406_v22 = vsel %vm6150_vm5, %v4678_v31, %v2412_v24  ;;  %v1869_v49 = vrot.slane %v1867_v3, 4  ;;  %v1886_v53 = vshll.u32 %v4603_v33, 16  ;;  %v5697_v31 = vld [vmem:[%s7369_s1 + $0x1f0] sm:$0xff]   ;;  %v4609_v3 = vld [vmem:[%s5827_s16 + $0x68] sm:$0x1] }
  0x7c   : > { %v6387_v44 = vcombine.low %v1831_v20, %v1841_v25  ;;  %v1849_v28 = vor.u32 %v1848_v14, %v1845_v10  ;;  %5497 = vmatprep.subr.bf16.mxu1 %v6393_v23  ;;  %v1878_v52 = vrot.slane %v1876_v32, 5  ;;  %v4706_v35 = vcombine.low %v6406_v22, %v2416_v36  ;;  %v4668_v20 = vld [vmem:[%s5827_s16 + $0x50] sm:$0xe]  ;;  %v4669_v22 = vld [vmem:[%s5827_s16 + $0x60] sm:$0xe] }
  0x7d   : > { %5392 = vmatpush3.bf16.msra.mxu0 %v5690_v15  ;;  %v1859_v15 = vor.u32 %v1858_v29, %v1854_v12  ;;  %v1873_v48 = vor.u32 %v1872_v0, %v1869_v49  ;;  %v1888_v11 = vrot.slane %v1886_v53, 5  ;;  %v2419_v27 = vrot.slane %v4602_v50, 5  ;;  %v4610_v49 = vld [vmem:[%s5827_s16 + $0x70] sm:$0xf] }
  0x7e   : > { %5370 = vmatmul.mubr.bf16.gmra.mxu1 %v5683_v61  ;;  %5457 = vmatprep.subr.bf16.mxu0 %v6372_v57  ;;  %v1850_v46 = vrot.slane %v1849_v28, 4  ;;  %v2422_v42 = vrot.slane %v4603_v33, 5  ;;  %v1891_v5 = vshrl.u32 %v4604_v56, 16  ;;  %v1894_v7 = vshll.u32 %v4604_v56, 16  ;;  %v5693_v0 = vld [vmem:[%s7369_s1 + $0x1b0] sm:$0xff]  }
  0x7f   : > { %5373 = vmatprep.mubr.bf16.mxu1 %v5687_v13  ;;  %v1860_v61 = vrot.slane %v1859_v15, 4  ;;  %v1874_v2 = vrot.slane %v1873_v48, 4  ;;  %v2421_v6 = vrot.slane %v2419_v27, 4  ;;  %v1900_v25 = vshll.u32 %v4605_v58, 16 }
  0x80   : > { %5330 = vmatmul.mubr.bf16.gmra.mxu0 %v4521_v21  ;;  %v4667_v21 = vld [vmem:[%s5827_s16 + $0x40] sm:$0xe]  ;;  %v1855_v51 = vsel %vm5871_vm2, %v1850_v46, %v1854_v12  ;;  %v1893_v40 = vrot.slane %v1891_v5, 4  ;;  %v1904_v50 = vshrl.u32 %v4605_v58, 16  ;;  %v1912_v24 = vrot.slane %v1910_v54, 5 }
  0x81   : > { %5333 = vmatprep.mubr.bf16.mxu0 %v4522_v16  ;;  %v1882_v16 = vrot.slane %v1880_v34, 4  ;;  %v1865_v38 = vsel %vm5871_vm2, %v1860_v61, %v1864_v39  ;;  %v4679_v43 = vrot.slane %v4667_v21, 9  ;;  %v1879_v17 = vsel %vm5871_vm2, %v1874_v2, %v1878_v52 }
  0x82   : > { %v6419_v13 = vcombine.low %v1855_v51, %v1865_v38  ;;  %v6439_v14 = vsel %vm6150_vm5, %v2421_v6, %v2422_v42  ;;  %v1902_v12 = vrot.slane %v1900_v25, 5  ;;  %v1906_v28 = vrot.slane %v1904_v50, 4  ;;  %v5694_v38 = vld [vmem:[%s7369_s1 + $0x1a8] sm:$0xff]   ;;  %v5700_v50 = vld [vmem:[%s7369_s1 + $0x1e0] sm:$0xff]  }
  0x83   : > { %v1883_v63 = vor.u32 %v1882_v16, %v1878_v52  ;;  %v6427_v8 = vsel %vm6150_vm5, %v4679_v43, %v2419_v27  ;;  %v4680_v60 = vrot.slane %v4668_v20, 9  ;;  %v2426_v15 = vrot.slane %v4605_v58, 5  ;;  %v5699_v58 = vld [vmem:[%s7369_s1 + $0x1e8] sm:$0xff]   ;;  %v4670_v20 = vld [vmem:[%s5827_s16 + $0x70] sm:$0xe] }
  0x84   : > { %v4707_v29 = vcombine.low %v6427_v8, %v6439_v14  ;;  %v2429_v33 = vrot.slane %v4606_v62, 5  ;;  %v1907_v32 = vor.u32 %v1906_v28, %v1902_v12  ;;  %v1918_v46 = vshll.u32 %v4607_v4, 16  ;;  %v6479_v62 = vld [vmem:[%s5827_s16 + $0x78] sm:$0x1]  ;;  %v5696_v8 = vld [vmem:[%s7369_s1 + $0x1a0] sm:$0xff]  }
  0x85   : > { %v1884_v1 = vrot.slane %v1883_v63, 4  ;;  %v2427_v30 = vsel %vm6150_vm5, %v4680_v60, %v2426_v15  ;;  %v2428_v34 = vrot.slane %v2426_v15, 4  ;;  %v1934_v56 = vshll.u32 %v4609_v3, 16 }
  0x86   : > { %5374 = vmatmul.mubr.bf16.gmra.mxu1 %v5688_v45  ;;  %v1915_v45 = vshrl.u32 %v4607_v4, 16  ;;  %v1908_v51 = vrot.slane %v1907_v32, 4  ;;  %v1920_v19 = vrot.slane %v1918_v46, 5  ;;  %v4681_v43 = vrot.slane %v4669_v22, 9  ;;  %v4671_v22 = vld [vmem:[%s5827_s16 + $0x80] sm:$0xe] }
  0x87   : > { %5433 = vmatprep.mubr.bf16.mxu1 %v4704_v55  ;;  %v1896_v55 = vrot.slane %v1894_v7, 5  ;;  %v1889_v10 = vsel %vm5871_vm2, %v1884_v1, %v1888_v11  ;;  %v2436_v42 = vrot.slane %v4609_v3, 5  ;;  %v1939_v5 = vshrl.u32 %v4610_v49, 16  ;;  %v6514_v3 = vld [vmem:[%s5827_s16 + $0x88] sm:$0x1] }
  0x88   : > { %5334 = vmatmul.mubr.bf16.gmra.mxu0 %v4523_v59  ;;  %v6442_v59 = vcombine.low %v1879_v17, %v1889_v10  ;;  %v1917_v36 = vrot.slane %v1915_v45, 4  ;;  %v1942_v7 = vshll.u32 %v4610_v49, 16  ;;  %v1958_v4 = vshll.u32 %v6479_v62, 16 }
  0x89   : > { %5393 = vmatprep.mubr.bf16.mxu0 %v6363_v18  ;;  %v1897_v39 = vor.u32 %v1896_v55, %v1893_v40  ;;  %v4608_v18 = vld [vmem:[%s5827_s16 + $0x64] sm:$0xf]  ;;  %v1941_v17 = vrot.slane %v1939_v5, 4  ;;  %v1952_v55 = vshrl.u32 %v6465_v26, 16  ;;  %v4682_v60 = vrot.slane %v4670_v20, 9 }
  0x8a   : > { %v1924_v21 = vshll.u32 %v4608_v18, 16  ;;  %v1928_v61 = vshrl.u32 %v4608_v18, 16  ;;  %v1921_v48 = vor.u32 %v1920_v19, %v1917_v36  ;;  %v2433_v27 = vrot.slane %v4608_v18, 5  ;;  %v5698_v19 = vld [vmem:[%s7369_s1 + $0x198] sm:$0xff]  }
  0x8b   : > { %v1898_v41 = vrot.slane %v1897_v39, 4  ;;  %v1944_v40 = vrot.slane %v1942_v7, 5  ;;  %v4613_v39 = vld [vmem:[%s5827_s16 + $0x80] sm:$0xf]  ;;  %v2440_v15 = vrot.slane %v6465_v26, 5 }
  0x8c   : > { %v1926_v16 = vrot.slane %v1924_v21, 5  ;;  %v1930_v53 = vrot.slane %v1928_v61, 4  ;;  %v1922_v2 = vrot.slane %v1921_v48, 4  ;;  %v6486_v6 = vsel %vm6150_vm5, %v4681_v43, %v2433_v27  ;;  %v5701_v48 = vld [vmem:[%s7369_s1 + $0x190] sm:$0xff]   ;;  %v6541_v43 = vld [vmem:[%s5827_s16 + $0x98] sm:$0x1] }
  0x8d   : > { %v1903_v52 = vsel %vm5871_vm2, %v1898_v41, %v1902_v12  ;;  %v1945_v14 = vor.u32 %v1944_v40, %v1941_v17  ;;  %v1963_v45 = vshrl.u32 %v4613_v39, 16  ;;  %v1966_v46 = vshll.u32 %v4613_v39, 16  ;;  %v4619_v39 = vld [vmem:[%s5827_s16 + $0xa0] sm:$0xf] }
  0x8e   : > { %5434 = vmatmul.mubr.bf16.vlgmr.msra.gmra.mxu1 %v4705_v9  ;;  %v2430_v9 = vsel %vm6150_vm5, %v2428_v34, %v2429_v33  ;;  %v1931_v11 = vor.u32 %v1930_v53, %v1926_v16  ;;  %v1927_v25 = vsel %vm5871_vm2, %v1922_v2, %v1926_v16  ;;  %v2443_v33 = vrot.slane %v6479_v62, 5  ;;  %v5704_v62 = vld [vmem:[%s7369_s1 + $0x1d0] sm:$0xff]  }
  0x8f   : > { %5437 = vmatprep.mubr.bf16.mxu1 %v4706_v35  ;;  %5498 = vmatpush3.bf16.msra.mxu1 %v6393_v23  ;;  %v1913_v23 = vsel %vm5871_vm2, %v1908_v51, %v1912_v24  ;;  %v4708_v35 = vcombine.low %v2427_v30, %v2430_v9  ;;  %v1960_v24 = vrot.slane %v1958_v4, 5  ;;  %v1946_v41 = vrot.slane %v1945_v14, 4  ;;  %v5702_v30 = vld [vmem:[%s7369_s1 + $0x1d8] sm:$0xff]  }
  0x90   : > { %5499 = vmatprep.subr.bf16.mxu1 %v5697_v31  ;;  %5394 = vmatmul.mubr.bf16.vlgmr.msra.gmra.mxu0 %v6387_v44  ;;  %v4648_v63 = vcombine.low %v1903_v52, %v1913_v23  ;;  %v1936_v44 = vrot.slane %v1934_v56, 5  ;;  %v1932_v1 = vrot.slane %v1931_v11, 4  ;;  %v2441_v34 = vsel %vm6150_vm5, %v4682_v60, %v2440_v15 }
  0x91   : > { %5458 = vmatpush3.bf16.msra.mxu0 %v6372_v57  ;;  %5397 = vmatprep.mubr.bf16.mxu0 %v6419_v13  ;;  %v2435_v57 = vrot.slane %v2433_v27, 4  ;;  %v1948_v13 = vshll.u32 %v6465_v26, 16  ;;  %v2442_v21 = vrot.slane %v2440_v15, 4  ;;  %v1965_v51 = vrot.slane %v1963_v45, 4  ;;  %v6530_v26 = vld [vmem:[%s5827_s16 + $0x94] sm:$0xf] }
  0x92   : > { %5459 = vmatprep.subr.bf16.mxu0 %v5693_v0  ;;  %v1937_v10 = vsel %vm5871_vm2, %v1932_v1, %v1936_v44  ;;  %v1968_v36 = vrot.slane %v1966_v46, 5  ;;  %v1982_v56 = vshll.u32 %v6514_v3, 16  ;;  %v2000_v40 = vshrl.u32 %v6530_v26, 16 }
  0x93   : > { %5500 = vmatpush3.bf16.msra.mxu1 %v5697_v31  ;;  %v2437_v12 = vsel %vm6150_vm5, %v2435_v57, %v2436_v42  ;;  %v1950_v54 = vrot.slane %v1948_v13, 5  ;;  %v6504_v28 = vcombine.low %v1927_v25, %v1937_v10  ;;  %v4614_v31 = vld [vmem:[%s5827_s16 + $0x84] sm:$0xf]  ;;  %v2444_v9 = vsel %vm6150_vm5, %v2442_v21, %v2443_v33 }
  0x94   : > { %5501 = vmatprep.subr.bf16.mxu1 %v5699_v58  ;;  %v4709_v18 = vcombine.low %v6486_v6, %v2437_v12  ;;  %v1972_v61 = vshll.u32 %v4614_v31, 16  ;;  %v1976_v49 = vshrl.u32 %v4614_v31, 16  ;;  %v1969_v23 = vor.u32 %v1968_v36, %v1965_v51 }
  0x95   : > { %5460 = vmatpush3.bf16.msra.mxu0 %v5693_v0  ;;  %v1951_v0 = vsel %vm5871_vm2, %v1946_v41, %v1950_v54  ;;  %v1984_v44 = vrot.slane %v1982_v56, 5  ;;  %v2447_v27 = vrot.slane %v4614_v31, 5  ;;  %v2450_v42 = vrot.slane %v6514_v3, 5  ;;  %v5703_v31 = vld [vmem:[%s7369_s1 + $0x188] sm:$0xff]  }
  0x96   : > { %5438 = vmatmul.mubr.bf16.gmra.mxu1 %v4707_v29  ;;  %5461 = vmatprep.subr.bf16.mxu0 %v5694_v38  ;;  %v1954_v29 = vrot.slane %v1952_v55, 4  ;;  %v1974_v16 = vrot.slane %v1972_v61, 5  ;;  %v1978_v53 = vrot.slane %v1976_v49, 4  ;;  %v1970_v2 = vrot.slane %v1969_v23, 4  ;;  %v4672_v55 = vld [vmem:[%s5827_s16 + $0x90] sm:$0xe] }
  0x97   : > { %5441 = vmatprep.mubr.bf16.mxu1 %v4708_v35  ;;  %5502 = vmatpush3.bf16.msra.mxu1 %v5699_v58  ;;  %v4683_v35 = vrot.slane %v4671_v22, 9  ;;  %v2449_v6 = vrot.slane %v2447_v27, 4  ;;  %v1996_v57 = vshll.u32 %v6530_v26, 16  ;;  %v2006_v4 = vshll.u32 %v6541_v43, 16  ;;  %v4621_v3 = vld [vmem:[%s5827_s16 + $0xa8] sm:$0x1] }
  0x98   : > { %5398 = vmatmul.mubr.bf16.gmra.mxu0 %v6442_v59  ;;  %v1955_v32 = vor.u32 %v1954_v29, %v1950_v54  ;;  %5503 = vmatprep.subr.bf16.mxu1 %v5700_v50  ;;  %v4616_v59 = vld [vmem:[%s5827_s16 + $0x90] sm:$0xf]  ;;  %v1979_v11 = vor.u32 %v1978_v53, %v1974_v16  ;;  %v1975_v13 = vsel %vm5871_vm2, %v1970_v2, %v1974_v16  ;;  %v2002_v14 = vrot.slane %v2000_v40, 4  ;;  %v4620_v29 = vld [vmem:[%s5827_s16 + $0xa4] sm:$0xf] }
  0x99   : > { %5462 = vmatpush3.bf16.msra.mxu0 %v5694_v38  ;;  %5401 = vmatprep.mubr.bf16.mxu0 %v4648_v63  ;;  %v4710_v38 = vcombine.low %v2441_v34, %v2444_v9  ;;  %v1987_v5 = vshrl.u32 %v4616_v59, 16  ;;  %v1990_v7 = vshll.u32 %v4616_v59, 16  ;;  %v2448_v1 = vsel %vm6150_vm5, %v4683_v35, %v2447_v27  ;;  %v4673_v22 = vld [vmem:[%s5827_s16 + $0xa0] sm:$0xe]  ;;  %v4622_v59 = vld [vmem:[%s5827_s16 + $0xb0] sm:$0xf] }
  0x9a   : > { %5463 = vmatprep.subr.bf16.mxu0 %v5696_v8  ;;  %v1956_v52 = vrot.slane %v1955_v32, 4  ;;  %v1980_v20 = vrot.slane %v1979_v11, 4  ;;  %v2451_v12 = vsel %vm6150_vm5, %v2449_v6, %v2450_v42  ;;  %v1998_v54 = vrot.slane %v1996_v57, 5  ;;  %v4674_v40 = vld [vmem:[%s5827_s16 + $0xb0] sm:$0xe] }
  0x9b   : > { %5504 = vmatpush3.bf16.msra.mxu1 %v5700_v50  ;;  %v1989_v25 = vrot.slane %v1987_v5, 4  ;;  %v1992_v17 = vrot.slane %v1990_v7, 5  ;;  %v5705_v50 = vld [vmem:[%s7369_s1 + $0x1c8] sm:$0xff]   ;;  %v4684_v60 = vrot.slane %v4672_v55, 9  ;;  %v2454_v15 = vrot.slane %v6530_v26, 5  ;;  %v5706_v26 = vld [vmem:[%s7369_s1 + $0x180] sm:$0xff]  }
  0x9c   : > { %v1961_v58 = vsel %vm5871_vm2, %v1956_v52, %v1960_v24  ;;  %5505 = vmatprep.subr.bf16.mxu1 %v5702_v30  ;;  %v1985_v10 = vsel %vm5871_vm2, %v1980_v20, %v1984_v44  ;;  %v2008_v24 = vrot.slane %v2006_v4, 5  ;;  %v2457_v33 = vrot.slane %v6541_v43, 5  ;;  %v6594_v43 = vld [vmem:[%s7369_s1 + $0x238] sm:$0xff]  }
  0x9d   : > { %5464 = vmatpush3.bf16.msra.mxu0 %v5696_v8  ;;  %v4650_v63 = vcombine.low %v1951_v0, %v1961_v58  ;;  %v1993_v8 = vor.u32 %v1992_v17, %v1989_v25  ;;  %v2003_v32 = vor.u32 %v2002_v14, %v1998_v54  ;;  %v2011_v45 = vshrl.u32 %v4619_v39, 16 }
  0x9e   : > { %5442 = vmatmul.mubr.bf16.gmra.mxu1 %v4709_v18  ;;  %5465 = vmatprep.subr.bf16.mxu0 %v5698_v19  ;;  %v4711_v18 = vcombine.low %v2448_v1, %v2451_v12  ;;  %v2014_v46 = vshll.u32 %v4619_v39, 16  ;;  %v2455_v34 = vsel %vm6150_vm5, %v4684_v60, %v2454_v15  ;;  %v2456_v21 = vrot.slane %v2454_v15, 4  ;;  %v4627_v60 = vld [vmem:[%s5827_s16 + $0xc8] sm:$0x1] }
  0x9f   : > { %5445 = vmatprep.mubr.bf16.mxu1 %v4710_v38  ;;  %5506 = vmatpush3.bf16.msra.mxu1 %v5702_v30  ;;  %v1994_v41 = vrot.slane %v1993_v8, 4  ;;  %v5707_v30 = vld [vmem:[%s7369_s1 + $0x1c0] sm:$0xff]   ;;  %v2020_v61 = vshll.u32 %v4620_v29, 16  ;;  %v2024_v49 = vshrl.u32 %v4620_v29, 16  ;;  %v2004_v52 = vrot.slane %v2003_v32, 4 }
  0xa0   : > { %5402 = vmatmul.mubr.bf16.gmra.mxu0 %v6504_v28  ;;  %5507 = vmatprep.subr.bf16.mxu1 %v5704_v62  ;;  %v4651_v28 = vcombine.low %v1975_v13, %v1985_v10  ;;  %v2013_v51 = vrot.slane %v2011_v45, 4  ;;  %v2016_v36 = vrot.slane %v2014_v46, 5  ;;  %v2458_v9 = vsel %vm6150_vm5, %v2456_v21, %v2457_v33  ;;  %v4626_v8 = vld [vmem:[%s5827_s16 + $0xc4] sm:$0xf]  ;;  %v4675_v32 = vld [vmem:[%s5827_s16 + $0xc0] sm:$0xe] }
  0xa1   : > { %5405 = vmatprep.mubr.bf16.mxu0 %v4650_v63  ;;  %5466 = vmatpush3.bf16.msra.mxu0 %v5698_v19  ;;  %v1999_v0 = vsel %vm5871_vm2, %v1994_v41, %v1998_v54  ;;  %v6581_v19 = vld [vmem:[%s5827_s16 + $0xb4] sm:$0xf]  ;;  %v2022_v16 = vrot.slane %v2020_v61, 5  ;;  %v2026_v53 = vrot.slane %v2024_v49, 4  ;;  %v2030_v56 = vshll.u32 %v4621_v3, 16 }
  0xa2   : > { %5467 = vmatprep.subr.bf16.mxu0 %v5701_v48  ;;  %v2009_v58 = vsel %vm5871_vm2, %v2004_v52, %v2008_v24  ;;  %v4712_v38 = vcombine.low %v2455_v34, %v2458_v9  ;;  %v2017_v23 = vor.u32 %v2016_v36, %v2013_v51  ;;  %v4685_v35 = vrot.slane %v4673_v22, 9  ;;  %v4625_v54 = vld [vmem:[%s5827_s16 + $0xc0] sm:$0xf] }
  0xa3   : > { %5508 = vmatpush3.bf16.msra.mxu1 %v5704_v62  ;;  %v4652_v62 = vcombine.low %v1999_v0, %v2009_v58  ;;  %v2027_v63 = vor.u32 %v2026_v53, %v2022_v16  ;;  %v2032_v11 = vrot.slane %v2030_v56, 5  ;;  %v2461_v44 = vrot.slane %v4620_v29, 5  ;;  %v4784_v34 = vld [vmem:[%s5827_s16 + $0x20] sm:$0xf]  ;;  %v6620_v0 = vld [vmem:[%s5827_s16 + $0x24] sm:$0xf] }
  0xa4   : > { %5509 = vmatprep.subr.bf16.mxu1 %v5705_v50  ;;  %v2018_v27 = vrot.slane %v2017_v23, 4  ;;  %v2464_v2 = vrot.slane %v4621_v3, 5  ;;  %v2035_v42 = vshrl.u32 %v4622_v59, 16  ;;  %v2038_v5 = vshll.u32 %v4622_v59, 16 }
  0xa5   : > { %5468 = vmatpush3.bf16.msra.mxu0 %v5701_v48  ;;  %v4624_v48 = vld [vmem:[%s5827_s16 + $0xb8] sm:$0x1]  ;;  %v2028_v7 = vrot.slane %v2027_v63, 4  ;;  %v2462_v20 = vsel %vm6150_vm5, %v4685_v35, %v2461_v44  ;;  %v2463_v1 = vrot.slane %v2461_v44, 4  ;;  %v2044_v6 = vshll.u32 %v6581_v19, 16 }
  0xa6   : > { %5446 = vmatmul.mubr.bf16.gmra.mxu1 %v4711_v18  ;;  %5469 = vmatprep.subr.bf16.mxu0 %v5703_v31  ;;  %v2023_v57 = vsel %vm5871_vm2, %v2018_v27, %v2022_v16  ;;  %v2037_v13 = vrot.slane %v2035_v42, 4  ;;  %v2040_v25 = vrot.slane %v2038_v5, 5  ;;  %v2048_v17 = vshrl.u32 %v6581_v19, 16  ;;  %v6627_v35 = vld [vmem:[%s5827_s16 + $0x28] sm:$0x1] }
  0xa7   : > { %5510 = vmatpush3.bf16.msra.mxu1 %v5705_v50  ;;  %5449 = vmatprep.mubr.bf16.mxu1 %v4712_v38  ;;  %v2033_v55 = vsel %vm5871_vm2, %v2028_v7, %v2032_v11  ;;  %v2465_v50 = vsel %vm6150_vm5, %v2463_v1, %v2464_v2  ;;  %v2046_v10 = vrot.slane %v2044_v6, 5  ;;  %v2054_v12 = vshll.u32 %v4624_v48, 16  ;;  %v4787_v44 = vld [vmem:[%s5827_s16 + $0x30] sm:$0xf]  ;;  %v6634_v7 = vld [vmem:[%s5827_s16 + $0x34] sm:$0xf] }
  0xa8   : > { %5406 = vmatmul.mubr.bf16.gmra.mxu0 %v4651_v28  ;;  %5511 = vmatprep.subr.bf16.mxu1 %v5707_v30  ;;  %v4653_v4 = vcombine.low %v2023_v57, %v2033_v55  ;;  %v4713_v39 = vcombine.low %v2462_v20, %v2465_v50  ;;  %v2041_v28 = vor.u32 %v2040_v25, %v2037_v13  ;;  %v2050_v18 = vrot.slane %v2048_v17, 4  ;;  %v5708_v1 = vld [vmem:[%s5827_s16 + $0x20] sm:$0xff]   ;;  %v6646_v50 = vld [vmem:[%s5827_s16 + $0x38] sm:$0x1] }
  0xa9   : > { %5470 = vmatpush3.bf16.msra.mxu0 %v5703_v31  ;;  %5409 = vmatprep.mubr.bf16.mxu0 %v4652_v62  ;;  %v2056_v14 = vrot.slane %v2054_v12, 5  ;;  %v4686_v29 = vrot.slane %v4674_v40, 9  ;;  %v2468_v31 = vrot.slane %v6581_v19, 5  ;;  %v2471_v24 = vrot.slane %v4624_v48, 5 }
  0xaa   : > { %5471 = vmatprep.subr.bf16.mxu0 %v5706_v26  ;;  %v2042_v15 = vrot.slane %v2041_v28, 4  ;;  %v2051_v33 = vor.u32 %v2050_v18, %v2046_v10  ;;  %v2059_v3 = vshrl.u32 %v4625_v54, 16  ;;  %v2062_v41 = vshll.u32 %v4625_v54, 16  ;;  %v6650_v28 = vld [vmem:[%s5827_s16 + $0x44] sm:$0xf] }
  0xab   : > { %5512 = vmatpush3.bf16.msra.mxu1 %v5707_v30  ;;  %v2469_v45 = vsel %vm6150_vm5, %v4686_v29, %v2468_v31  ;;  %v2470_v46 = vrot.slane %v2468_v31, 4  ;;  %v2068_v22 = vshll.u32 %v4626_v8, 16  ;;  %v2072_v30 = vshrl.u32 %v4626_v8, 16  ;;  %v6654_v31 = vld [vmem:[%s5827_s16 + $0x48] sm:$0x1] }
  0xac   : > { %5577 = vmatprep.subr.bf16.mxu1 %v6594_v43  ;;  %v2047_v21 = vsel %vm5871_vm2, %v2042_v15, %v2046_v10  ;;  %v2052_v61 = vrot.slane %v2051_v33, 4  ;;  %v2061_v49 = vrot.slane %v2059_v3, 4  ;;  %v2064_v59 = vrot.slane %v2062_v41, 5 }
  0xad   : > { %5472 = vmatpush3.bf16.msra.mxu0 %v5706_v26  ;;  %v2472_v52 = vsel %vm6150_vm5, %v2470_v46, %v2471_v24  ;;  %v2070_v51 = vrot.slane %v2068_v22, 5  ;;  %v2074_v36 = vrot.slane %v2072_v30, 4  ;;  %v2078_v19 = vshll.u32 %v4627_v60, 16 }
  0xae   : > { %5537 = vmatprep.subr.bf16.mxu0 %v6594_v43  ;;  %5450 = vmatmul.mubr.bf16.gmra.mxu1 %v4713_v39  ;;  %v2057_v26 = vsel %vm5871_vm2, %v2052_v61, %v2056_v14  ;;  %v4714_v9 = vcombine.low %v2469_v45, %v2472_v52  ;;  %v2065_v16 = vor.u32 %v2064_v59, %v2061_v49  ;;  %v4687_v53 = vrot.slane %v4675_v32, 9  ;;  %v4790_v39 = vld [vmem:[%s5827_s16 + $0x40] sm:$0xf]  ;;  %v4793_v52 = vld [vmem:[%s5827_s16 + $0x50] sm:$0xf] }
  0xaf   : > { %v4654_v56 = vcombine.low %v2047_v21, %v2057_v26  ;;  %v2075_v58 = vor.u32 %v2074_v36, %v2070_v51  ;;  %v2080_v38 = vrot.slane %v2078_v19, 5  ;;  %v2475_v23 = vrot.slane %v4626_v8, 5  ;;  %v5709_v36 = vld [vmem:[%s5827_s16 + $0x30] sm:$0xff]  }
  0xb0   : > { %5410 = vmatmul.mubr.bf16.gmra.mxu0 %v4653_v4  ;;  %5453 = vmatprep.mubr.bf16.mxu1 %v4714_v9  ;;  %v2066_v48 = vrot.slane %v2065_v16, 4  ;;  %v2478_v62 = vrot.slane %v4627_v60, 5  ;;  %v3101_v63 = vshrl.u32 %v4784_v34, 16  ;;  %v3104_v11 = vshll.u32 %v4784_v34, 16  ;;  %v6668_v26 = vld [vmem:[%s7369_s1 + $0x230] sm:$0xff]  }
  0xb1   : > { %5413 = vmatprep.mubr.bf16.mxu0 %v4654_v56  ;;  %v2076_v27 = vrot.slane %v2075_v58, 4  ;;  %v2476_v2 = vsel %vm6150_vm5, %v4687_v53, %v2475_v23  ;;  %v2477_v42 = vrot.slane %v2475_v23, 4  ;;  %v3110_v5 = vshll.u32 %v6620_v0, 16  ;;  %v6673_v53 = vld [vmem:[%s5827_s16 + $0x54] sm:$0xf] }
  0xb2   : > { %v2071_v20 = vsel %vm5871_vm2, %v2066_v48, %v2070_v51  ;;  %v3103_v6 = vrot.slane %v3101_v63, 4  ;;  %v3106_v57 = vrot.slane %v3104_v11, 5  ;;  %v3114_v13 = vshrl.u32 %v6620_v0, 16 }
  0xb3   : > { %v2081_v25 = vsel %vm5871_vm2, %v2076_v27, %v2080_v38  ;;  %v2479_v17 = vsel %vm6150_vm5, %v2477_v42, %v2478_v62  ;;  %v3112_v40 = vrot.slane %v3110_v5, 5  ;;  %v3120_v55 = vshll.u32 %v6627_v35, 16  ;;  %v5712_v38 = vld [vmem:[%s5827_s16 + $0x40] sm:$0xff]   ;;  %v6679_v42 = vld [vmem:[%s5827_s16 + $0x58] sm:$0x1] }
  0xb4   : > { %v4655_v10 = vcombine.low %v2071_v20, %v2081_v25  ;;  %v4715_v12 = vcombine.low %v2476_v2, %v2479_v17  ;;  %v3107_v54 = vor.u32 %v3106_v57, %v3103_v6  ;;  %v3116_v4 = vrot.slane %v3114_v13, 4  ;;  %v6687_v17 = vld [vmem:[%s5827_s16 + $0x64] sm:$0xf] }
  0xb5   : > { %v3122_v18 = vrot.slane %v3120_v55, 5  ;;  %v3125_v8 = vshrl.u32 %v4787_v44, 16  ;;  %v3128_v14 = vshll.u32 %v4787_v44, 16  ;;  %v3134_v29 = vshll.u32 %v6634_v7, 16 }
  0xb6   : > { %5454 = vmatmul.mubr.bf16.gmra.mxu1 %v4715_v12  ;;  %v3108_v24 = vrot.slane %v3107_v54, 4  ;;  %v3117_v60 = vor.u32 %v3116_v4, %v3112_v40  ;;  %v3138_v15 = vshrl.u32 %v6634_v7, 16  ;;  %v3144_v33 = vshll.u32 %v6646_v50, 16  ;;  %v6693_v54 = vld [vmem:[%s7369_s1 + $0x228] sm:$0xff]  }
  0xb7   : > { %v3127_v3 = vrot.slane %v3125_v8, 4  ;;  %v3130_v41 = vrot.slane %v3128_v14, 5  ;;  %v3136_v32 = vrot.slane %v3134_v29, 5  ;;  %v3149_v45 = vshrl.u32 %v4790_v39, 16  ;;  %v6696_v4 = vld [vmem:[%s5827_s16 + $0x68] sm:$0x1] }
  0xb8   : > { %5414 = vmatmul.mubr.bf16.gmra.mxu0 %v4655_v10  ;;  %v3113_v46 = vsel %vm5871_vm2, %v3108_v24, %v3112_v40  ;;  %v3118_v22 = vrot.slane %v3117_v60, 4  ;;  %v3140_v30 = vrot.slane %v3138_v15, 4  ;;  %v3146_v34 = vrot.slane %v3144_v33, 5  ;;  %v4799_v33 = vld [vmem:[%s5827_s16 + $0x70] sm:$0xf] }
  0xb9   : > { %5473 = vmatprep.mubr.bf16.mxu0 %v5708_v1  ;;  %v3131_v21 = vor.u32 %v3130_v41, %v3127_v3  ;;  %v3151_v61 = vrot.slane %v3149_v45, 4  ;;  %v3152_v49 = vshll.u32 %v4790_v39, 16  ;;  %v3158_v59 = vshll.u32 %v6650_v28, 16  ;;  %v4796_v1 = vld [vmem:[%s5827_s16 + $0x60] sm:$0xf]  ;;  %v5713_v41 = vld [vmem:[%s5827_s16 + $0x50] sm:$0xff]  }
  0xba   : > { %v3123_v51 = vsel %vm5871_vm2, %v3118_v22, %v3122_v18  ;;  %v3141_v19 = vor.u32 %v3140_v30, %v3136_v32  ;;  %v3162_v9 = vshrl.u32 %v6650_v28, 16  ;;  %v3168_v16 = vshll.u32 %v6654_v31, 16  ;;  %v6709_v30 = vld [vmem:[%s5827_s16 + $0x74] sm:$0xf] }
  0xbb   : > { %v4836_v56 = vcombine.low %v3113_v46, %v3123_v51  ;;  %v3132_v58 = vrot.slane %v3131_v21, 4  ;;  %v3154_v23 = vrot.slane %v3152_v49, 5  ;;  %v3160_v48 = vrot.slane %v3158_v59, 5  ;;  %v5715_v46 = vld [vmem:[%s5827_s16 + $0x60] sm:$0xff]  }
  0xbc   : > { %v3142_v62 = vrot.slane %v3141_v19, 4  ;;  %v3164_v63 = vrot.slane %v3162_v9, 4  ;;  %v3170_v11 = vrot.slane %v3168_v16, 5  ;;  %v3173_v44 = vshrl.u32 %v4793_v52, 16  ;;  %v6716_v59 = vld [vmem:[%s7369_s1 + $0x220] sm:$0xff]  }
  0xbd   : > { %5513 = vmatprep.mubr.bf16.mxu1 %v4836_v56  ;;  %v3137_v27 = vsel %vm5871_vm2, %v3132_v58, %v3136_v32  ;;  %v3155_v2 = vor.u32 %v3154_v23, %v3151_v61  ;;  %v3176_v5 = vshll.u32 %v4793_v52, 16  ;;  %v3182_v20 = vshll.u32 %v6673_v53, 16  ;;  %v6725_v16 = vld [vmem:[%s5827_s16 + $0x78] sm:$0x1] }
  0xbe   : > { %v3147_v6 = vsel %vm5871_vm2, %v3142_v62, %v3146_v34  ;;  %v3165_v57 = vor.u32 %v3164_v63, %v3160_v48  ;;  %v3175_v13 = vrot.slane %v3173_v44, 4  ;;  %v3186_v25 = vshrl.u32 %v6673_v53, 16 }
  0xbf   : > { %v4837_v40 = vcombine.low %v3137_v27, %v3147_v6  ;;  %v3156_v55 = vrot.slane %v3155_v2, 4  ;;  %v3178_v10 = vrot.slane %v3176_v5, 5  ;;  %v3184_v12 = vrot.slane %v3182_v20, 5  ;;  %v6739_v20 = vld [vmem:[%s5827_s16 + $0x88] sm:$0x1] }
  0xc0   : > { %5474 = vmatmul.mubr.bf16.vlgmr.msra.gmra.mxu0 %v5709_v36  ;;  %v3166_v39 = vrot.slane %v3165_v57, 4  ;;  %v3188_v18 = vrot.slane %v3186_v25, 4  ;;  %v3192_v8 = vshll.u32 %v6679_v42, 16  ;;  %v3197_v14 = vshrl.u32 %v4796_v1, 16  ;;  %v5716_v57 = vld [vmem:[%s5827_s16 + $0x70] sm:$0xff]  }
  0xc1   : > { %5538 = vmatpush3.bf16.msra.mxu0 %v6594_v43  ;;  %5477 = vmatprep.mubr.bf16.mxu0 %v5712_v38  ;;  %v3161_v29 = vsel %vm5871_vm2, %v3156_v55, %v3160_v48  ;;  %v3179_v24 = vor.u32 %v3178_v10, %v3175_v13  ;;  %v3200_v60 = vshll.u32 %v4796_v1, 16  ;;  %v3206_v15 = vshll.u32 %v6687_v17, 16  ;;  %v4802_v38 = vld [vmem:[%s5827_s16 + $0x80] sm:$0xf]  ;;  %v4805_v1 = vld [vmem:[%s5827_s16 + $0x90] sm:$0xf] }
  0xc2   : > { %5539 = vmatprep.subr.bf16.mxu0 %v6668_v26  ;;  %5514 = vmatmul.mubr.bf16.vlgmr.msra.gmra.mxu1 %v4837_v40  ;;  %v3171_v3 = vsel %vm5871_vm2, %v3166_v39, %v3170_v11  ;;  %v3189_v32 = vor.u32 %v3188_v18, %v3184_v12  ;;  %v3194_v45 = vrot.slane %v3192_v8, 5  ;;  %v3199_v22 = vrot.slane %v3197_v14, 4  ;;  %v6733_v11 = vld [vmem:[%s5827_s16 + $0x84] sm:$0xf]  ;;  %v6750_v40 = vld [vmem:[%s7369_s1 + $0x218] sm:$0xff]  }
  0xc3   : > { %5585 = vmatpush3.bf16.msra.mxu1 %v6594_v43  ;;  %v4838_v34 = vcombine.low %v3161_v29, %v3171_v3  ;;  %v3180_v21 = vrot.slane %v3179_v24, 4  ;;  %v3202_v61 = vrot.slane %v3200_v60, 5  ;;  %v3208_v49 = vrot.slane %v3206_v15, 5 }
  0xc4   : > { %5578 = vmatprep.subr.bf16.mxu1 %v6668_v26  ;;  %v3190_v52 = vrot.slane %v3189_v32, 4  ;;  %v3210_v43 = vshrl.u32 %v6687_v17, 16  ;;  %v3216_v51 = vshll.u32 %v6696_v4, 16  ;;  %v3221_v36 = vshrl.u32 %v4799_v33, 16 }
  0xc5   : > { %5540 = vmatpush3.bf16.msra.mxu0 %v6668_v26  ;;  %5517 = vmatprep.mubr.bf16.mxu1 %v4838_v34  ;;  %v3185_v19 = vsel %vm5871_vm2, %v3180_v21, %v3184_v12  ;;  %v3203_v9 = vor.u32 %v3202_v61, %v3199_v22  ;;  %v3224_v56 = vshll.u32 %v4799_v33, 16  ;;  %v3230_v58 = vshll.u32 %v6709_v30, 16  ;;  %v5718_v12 = vld [vmem:[%s5827_s16 + $0x80] sm:$0xff]  }
  0xc6   : > { %5541 = vmatprep.subr.bf16.mxu0 %v6693_v54  ;;  %v3195_v23 = vsel %vm5871_vm2, %v3190_v52, %v3194_v45  ;;  %v3212_v48 = vrot.slane %v3210_v43, 4  ;;  %v3218_v62 = vrot.slane %v3216_v51, 5  ;;  %v3223_v63 = vrot.slane %v3221_v36, 4  ;;  %v6777_v52 = vld [vmem:[%s7369_s1 + $0x210] sm:$0xff]  }
  0xc7   : > { %5586 = vmatpush3.bf16.msra.mxu1 %v6668_v26  ;;  %v4839_v44 = vcombine.low %v3185_v19, %v3195_v23  ;;  %v3204_v27 = vrot.slane %v3203_v9, 4  ;;  %v3226_v2 = vrot.slane %v3224_v56, 5  ;;  %v6736_v5 = vrot.slane %v3230_v58, 5  ;;  %v4808_v9 = vld [vmem:[%s5827_s16 + $0xa0] sm:$0xf] }
  0xc8   : > { %5478 = vmatmul.mubr.bf16.gmra.mxu0 %v5713_v41  ;;  %v3213_v6 = vor.u32 %v3212_v48, %v3208_v49  ;;  %v3234_v13 = vshrl.u32 %v6709_v30, 16  ;;  %v3240_v26 = vshll.u32 %v6725_v16, 16  ;;  %v3245_v25 = vshrl.u32 %v4802_v38, 16  ;;  %5579 = vmatprep.subr.bf16.mxu1 %v6693_v54  ;;  %v6784_v48 = vld [vmem:[%s5827_s16 + $0xa4] sm:$0xf] }
  0xc9   : > { %5542 = vmatpush3.bf16.msra.mxu0 %v6693_v54  ;;  %5481 = vmatprep.mubr.bf16.mxu0 %v5715_v46  ;;  %v3209_v55 = vsel %vm5871_vm2, %v3204_v27, %v3208_v49  ;;  %v3227_v10 = vor.u32 %v3226_v2, %v3223_v63  ;;  %v3248_v39 = vshll.u32 %v4802_v38, 16  ;;  %v3254_v18 = vshll.u32 %v6733_v11, 16  ;;  %v6765_v46 = vld [vmem:[%s5827_s16 + $0x94] sm:$0xf]  ;;  %v6772_v49 = vld [vmem:[%s5827_s16 + $0x98] sm:$0x1] }
  0xca   : > { %5543 = vmatprep.subr.bf16.mxu0 %v6716_v59  ;;  %5518 = vmatmul.mubr.bf16.gmra.mxu1 %v4839_v44  ;;  %v3214_v8 = vrot.slane %v3213_v6, 4  ;;  %v3236_v14 = vrot.slane %v3234_v13, 4  ;;  %v3242_v29 = vrot.slane %v3240_v26, 5  ;;  %v3247_v24 = vrot.slane %v3245_v25, 4  ;;  %v5719_v63 = vld [vmem:[%s5827_s16 + $0x90] sm:$0xff]  }
  0xcb   : > { %5587 = vmatpush3.bf16.msra.mxu1 %v6693_v54  ;;  %v3228_v60 = vrot.slane %v3227_v10, 4  ;;  %v3250_v15 = vrot.slane %v3248_v39, 5  ;;  %v3256_v33 = vrot.slane %v3254_v18, 5  ;;  %v3258_v3 = vshrl.u32 %v6733_v11, 16  ;;  %v6793_v2 = vld [vmem:[%s5827_s16 + $0xa8] sm:$0x1] }
  0xcc   : > { %5580 = vmatprep.subr.bf16.mxu1 %v6716_v59  ;;  %v3219_v41 = vsel %vm5871_vm2, %v3214_v8, %v3218_v62  ;;  %v3237_v32 = vor.u32 %v3236_v14, %v6736_v5  ;;  %v3264_v45 = vshll.u32 %v6739_v20, 16  ;;  %v3269_v54 = vshrl.u32 %v4805_v1, 16  ;;  %v4811_v26 = vld [vmem:[%s5827_s16 + $0xb0] sm:$0xf]  ;;  %v5722_v39 = vld [vmem:[%s5827_s16 + $0xa0] sm:$0xff]  }
  0xcd   : > { %5544 = vmatpush3.bf16.msra.mxu0 %v6716_v59  ;;  %v4840_v22 = vcombine.low %v3209_v55, %v3219_v41  ;;  %v3233_v34 = vsel %vm5871_vm2, %v3228_v60, %v6736_v5  ;;  %v3251_v21 = vor.u32 %v3250_v15, %v3247_v24  ;;  %v3260_v61 = vrot.slane %v3258_v3, 4  ;;  %v6799_v5 = vld [vmem:[%s7369_s1 + $0x208] sm:$0xff]   ;;  %v6818_v24 = vld [vmem:[%s7369_s1 + $0x200] sm:$0xff]   ;;  %v6823_v3 = vld [vmem:[%s5827_s16 + $0xb4] sm:$0xf] }
  0xce   : > { %5545 = vmatprep.subr.bf16.mxu0 %v6750_v40  ;;  %v3238_v43 = vrot.slane %v3237_v32, 4  ;;  %v3266_v51 = vrot.slane %v3264_v45, 5  ;;  %v3271_v36 = vrot.slane %v3269_v54, 4  ;;  %v3272_v19 = vshll.u32 %v4805_v1, 16 }
  0xcf   : > { %5588 = vmatpush3.bf16.msra.mxu1 %v6716_v59  ;;  %5521 = vmatprep.mubr.bf16.mxu1 %v4840_v22  ;;  %v3252_v56 = vrot.slane %v3251_v21, 4  ;;  %v3261_v58 = vor.u32 %v3260_v61, %v3256_v33  ;;  %v3278_v38 = vshll.u32 %v6765_v46, 16  ;;  %v3282_v23 = vshrl.u32 %v6765_v46, 16  ;;  %v6828_v22 = vld [vmem:[%s5827_s16 + $0xb8] sm:$0x1] }
  0xd0   : > { %5482 = vmatmul.mubr.bf16.gmra.mxu0 %v5716_v57  ;;  %v3243_v62 = vsel %vm5871_vm2, %v3238_v43, %v3242_v29  ;;  %v3274_v44 = vrot.slane %v3272_v19, 5  ;;  %v3288_v27 = vshll.u32 %v6772_v49, 16  ;;  %v3753_v59 = vrot.slane %v6765_v46, 5  ;;  %5581 = vmatprep.subr.bf16.mxu1 %v6750_v40 }
  0xd1   : > { %5485 = vmatprep.mubr.bf16.mxu0 %v5718_v12  ;;  %5546 = vmatpush3.bf16.msra.mxu0 %v6750_v40  ;;  %v4841_v1 = vcombine.low %v3233_v34, %v3243_v62  ;;  %v3257_v6 = vsel %vm5871_vm2, %v3252_v56, %v3256_v33  ;;  %v3262_v57 = vrot.slane %v3261_v58, 4  ;;  %v3280_v13 = vrot.slane %v3278_v38, 5 }
  0xd2   : > { %5547 = vmatprep.subr.bf16.mxu0 %v6777_v52  ;;  %v3275_v25 = vor.u32 %v3274_v44, %v3271_v36  ;;  %v3284_v55 = vrot.slane %v3282_v23, 4  ;;  %v3290_v10 = vrot.slane %v3288_v27, 5  ;;  %v6807_v12 = vrot.slane %v3753_v59, 4 }
  0xd3   : > { %5589 = vmatpush3.bf16.msra.mxu1 %v6750_v40  ;;  %v3267_v18 = vsel %vm5871_vm2, %v3262_v57, %v3266_v51  ;;  %v3756_v8 = vrot.slane %v6772_v49, 5  ;;  %v3293_v14 = vshrl.u32 %v4808_v9, 16  ;;  %v3296_v29 = vshll.u32 %v4808_v9, 16  ;;  %v4814_v51 = vld [vmem:[%s5827_s16 + $0xc0] sm:$0xf] }
  0xd4   : > { %5522 = vmatmul.mubr.bf16.gmra.mxu1 %v4841_v1  ;;  %5582 = vmatprep.subr.bf16.mxu1 %v6777_v52  ;;  %v4842_v60 = vcombine.low %v3257_v6, %v3267_v18  ;;  %v3276_v15 = vrot.slane %v3275_v25, 4  ;;  %v3285_v33 = vor.u32 %v3284_v55, %v3280_v13  ;;  %v3302_v40 = vshll.u32 %v6784_v48, 16  ;;  %v5723_v1 = vld [vmem:[%s5827_s16 + $0xb0] sm:$0xff]   ;;  %v5725_v57 = vld [vmem:[%s5827_s16 + $0xc0] sm:$0xff]   ;;  %v6849_v55 = vld [vmem:[%s5827_s16 + $0xc8] sm:$0x1] }
  0xd5   : > { %5548 = vmatpush3.bf16.msra.mxu0 %v6777_v52  ;;  %v3295_v41 = vrot.slane %v3293_v14, 4  ;;  %v3298_v32 = vrot.slane %v3296_v29, 5  ;;  %v3306_v45 = vshrl.u32 %v6784_v48, 16  ;;  %v3312_v54 = vshll.u32 %v6793_v2, 16 }
  0xd6   : > { %5549 = vmatprep.subr.bf16.mxu0 %v6799_v5  ;;  %5525 = vmatprep.mubr.bf16.mxu1 %v4842_v60  ;;  %v3281_v34 = vsel %vm5871_vm2, %v3276_v15, %v3280_v13  ;;  %v3286_v21 = vrot.slane %v3285_v33, 4  ;;  %v3304_v61 = vrot.slane %v3302_v40, 5  ;;  %v3317_v43 = vshrl.u32 %v4811_v26, 16 }
  0xd7   : > { %v3299_v36 = vor.u32 %v3298_v32, %v3295_v41  ;;  %v3308_v19 = vrot.slane %v3306_v45, 4  ;;  %v3314_v9 = vrot.slane %v3312_v54, 5  ;;  %v3320_v56 = vshll.u32 %v4811_v26, 16  ;;  %5590 = vmatpush3.bf16.msra.mxu1 %v6777_v52  ;;  %v6844_v52 = vld [vmem:[%s5827_s16 + $0xc4] sm:$0xf] }
  0xd8   : > { %5486 = vmatmul.mubr.bf16.gmra.mxu0 %v5719_v63  ;;  %v3291_v58 = vsel %vm5871_vm2, %v3286_v21, %v3290_v10  ;;  %v3319_v38 = vrot.slane %v3317_v43, 4  ;;  %v3326_v23 = vshll.u32 %v6823_v3, 16  ;;  %v3330_v62 = vshrl.u32 %v6823_v3, 16  ;;  %5583 = vmatprep.subr.bf16.mxu1 %v6799_v5  ;;  %v4817_v41 = vld [vmem:[%s5827_s16 + $0xd0] sm:$0xf] }
  0xd9   : > { %5489 = vmatprep.mubr.bf16.mxu0 %v5722_v39  ;;  %5550 = vmatpush3.bf16.msra.mxu0 %v6799_v5  ;;  %v4843_v63 = vcombine.low %v3281_v34, %v3291_v58  ;;  %v3300_v44 = vrot.slane %v3299_v36, 4  ;;  %v3309_v27 = vor.u32 %v3308_v19, %v3304_v61  ;;  %v3322_v6 = vrot.slane %v3320_v56, 5  ;;  %v6861_v21 = vld [vmem:[%s5827_s16 + $0xd4] sm:$0xf]  ;;  %v6868_v56 = vld [vmem:[%s5827_s16 + $0xd8] sm:$0x1] }
  0xda   : > { %5551 = vmatprep.subr.bf16.mxu0 %v6818_v24  ;;  %v3328_v13 = vrot.slane %v3326_v23, 5  ;;  %v3332_v26 = vrot.slane %v3330_v62, 4  ;;  %v3336_v25 = vshll.u32 %v6828_v22, 16  ;;  %v3341_v10 = vshrl.u32 %v4814_v51, 16 }
  0xdb   : > { %v3305_v39 = vsel %vm5871_vm2, %v3300_v44, %v3304_v61  ;;  %v3310_v18 = vrot.slane %v3309_v27, 4  ;;  %v3323_v14 = vor.u32 %v3322_v6, %v3319_v38  ;;  %v3344_v29 = vshll.u32 %v4814_v51, 16  ;;  %5591 = vmatpush3.bf16.msra.mxu1 %v6799_v5  ;;  %v4856_v44 = vld [vmem:[%s5827_s16 + $0x20] sm:$0xe] }
  0xdc   : > { %5526 = vmatmul.mubr.bf16.gmra.mxu1 %v4843_v63  ;;  %v3333_v60 = vor.u32 %v3332_v26, %v3328_v13  ;;  %v3338_v15 = vrot.slane %v3336_v25, 5  ;;  %v3343_v33 = vrot.slane %v3341_v10, 4  ;;  %v3350_v40 = vshll.u32 %v6844_v52, 16  ;;  %5584 = vmatprep.subr.bf16.mxu1 %v6818_v24 }
  0xdd   : > { %5552 = vmatpush3.bf16.msra.mxu0 %v6818_v24  ;;  %v3315_v32 = vsel %vm5871_vm2, %v3310_v18, %v3314_v9  ;;  %v3324_v45 = vrot.slane %v3323_v14, 4  ;;  %v3346_v54 = vrot.slane %v3344_v29, 5  ;;  %v3354_v34 = vshrl.u32 %v6844_v52, 16  ;;  %v4862_v18 = vld [vmem:[%s5827_s16 + $0x80] sm:$0xe] }
  0xde   : > { %v4844_v61 = vcombine.low %v3305_v39, %v3315_v32  ;;  %v3334_v43 = vrot.slane %v3333_v60, 4  ;;  %v3352_v51 = vrot.slane %v3350_v40, 5  ;;  %v3360_v5 = vshll.u32 %v6849_v55, 16  ;;  %v4857_v32 = vld [vmem:[%s5827_s16 + $0x30] sm:$0xe] }
  0xdf   : > { %v3329_v36 = vsel %vm5871_vm2, %v3324_v45, %v3328_v13  ;;  %v3347_v19 = vor.u32 %v3346_v54, %v3343_v33  ;;  %v3356_v9 = vrot.slane %v3354_v34, 4  ;;  %v3365_v58 = vshrl.u32 %v4817_v41, 16  ;;  %5592 = vmatpush3.bf16.msra.mxu1 %v6818_v24 }
  0xe0   : > { %5490 = vmatmul.mubr.bf16.gmra.mxu0 %v5723_v1  ;;  %5529 = vmatprep.mubr.bf16.mxu1 %v4844_v61  ;;  %v3339_v38 = vsel %vm5871_vm2, %v3334_v43, %v3338_v15  ;;  %v3362_v23 = vrot.slane %v3360_v5, 5  ;;  %v3368_v62 = vshll.u32 %v4817_v41, 16  ;;  %v3374_v63 = vshll.u32 %v6861_v21, 16 }
  0xe1   : > { %5493 = vmatprep.mubr.bf16.mxu0 %v5725_v57  ;;  %v4845_v27 = vcombine.low %v3329_v36, %v3339_v38  ;;  %v3348_v1 = vrot.slane %v3347_v19, 4  ;;  %v3357_v6 = vor.u32 %v3356_v9, %v3352_v51  ;;  %v5726_v57 = vld [vmem:[%s5827_s16 + $0xd0] sm:$0xff]   ;;  %v3367_v13 = vrot.slane %v3365_v58, 4 }
  0xe2   : > { %v3370_v26 = vrot.slane %v3368_v62, 5  ;;  %v3376_v25 = vrot.slane %v3374_v63, 5  ;;  %v3378_v10 = vshrl.u32 %v6861_v21, 16  ;;  %v3384_v39 = vshll.u32 %v6868_v56, 16 }
  0xe3   : > { %v3353_v14 = vsel %vm5871_vm2, %v3348_v1, %v3352_v51  ;;  %v3358_v29 = vrot.slane %v3357_v6, 4  ;;  %v4868_v24 = vrot.slane %v4856_v44, 9  ;;  %v3704_v60 = vrot.slane %v6620_v0, 5  ;;  %v4858_v1 = vld [vmem:[%s5827_s16 + $0x40] sm:$0xe] }
  0xe4   : > { %5530 = vmatmul.mubr.bf16.gmra.mxu1 %v4845_v27  ;;  %v3371_v15 = vor.u32 %v3370_v26, %v3367_v13  ;;  %v3380_v33 = vrot.slane %v3378_v10, 4  ;;  %v3386_v40 = vrot.slane %v3384_v39, 5  ;;  %v3707_v41 = vrot.slane %v6627_v35, 5 }
  0xe5   : > { %v3363_v45 = vsel %vm5871_vm2, %v3358_v29, %v3362_v23  ;;  %v3705_v54 = vsel %vm6150_vm5, %v4868_v24, %v3704_v60  ;;  %v3706_v34 = vrot.slane %v3704_v60, 4  ;;  %v4874_v61 = vrot.slane %v4862_v18, 9  ;;  %v4863_v23 = vld [vmem:[%s5827_s16 + $0x90] sm:$0xe] }
  0xe6   : > { %v4846_v43 = vcombine.low %v3353_v14, %v3363_v45  ;;  %v3372_v51 = vrot.slane %v3371_v15, 4  ;;  %v3381_v0 = vor.u32 %v3380_v33, %v3376_v25  ;;  %v3746_v5 = vrot.slane %v6733_v11, 5  ;;  %v4864_v15 = vld [vmem:[%s5827_s16 + $0xa0] sm:$0xe] }
  0xe7   : > { %v3708_v35 = vsel %vm6150_vm5, %v3706_v34, %v3707_v41  ;;  %v3749_v19 = vrot.slane %v6739_v20, 5  ;;  %v4869_v58 = vrot.slane %v4857_v32, 9  ;;  %v3711_v38 = vrot.slane %v6634_v7, 5 }
  0xe8   : > { %5494 = vmatmul.mubr.bf16.gmra.mxu0 %v5726_v57  ;;  %5533 = vmatprep.mubr.bf16.mxu1 %v4846_v43  ;;  %v3377_v62 = vsel %vm5871_vm2, %v3372_v51, %v3376_v25  ;;  %v3382_v63 = vrot.slane %v3381_v0, 4  ;;  %v4896_v44 = vcombine.low %v3705_v54, %v3708_v35  ;;  %v3747_v11 = vsel %vm6150_vm5, %v4874_v61, %v3746_v5  ;;  %v4865_v0 = vld [vmem:[%s5827_s16 + $0xb0] sm:$0xe] }
  0xe9   : > { %v3748_v6 = vrot.slane %v3746_v5, 4  ;;  %v3712_v20 = vsel %vm6150_vm5, %v4869_v58, %v3711_v38  ;;  %v3713_v7 = vrot.slane %v3711_v38, 4  ;;  %v3714_v25 = vrot.slane %v6646_v50, 5  ;;  %v4860_v38 = vld [vmem:[%s5827_s16 + $0x60] sm:$0xe] }
  0xea   : > { %v3387_v26 = vsel %vm5871_vm2, %v3382_v63, %v3386_v40  ;;  %5553 = vmatprep.mubr.bf16.mxu0 %v4896_v44  ;;  %v4875_v10 = vrot.slane %v4863_v23, 9  ;;  %v3757_v39 = vsel %vm6150_vm5, %v6807_v12, %v3756_v8  ;;  %v4870_v60 = vrot.slane %v4858_v1, 9  ;;  %v4859_v40 = vld [vmem:[%s5827_s16 + $0x50] sm:$0xe] }
  0xeb   : > { %v4847_v14 = vcombine.low %v3377_v62, %v3387_v26  ;;  %v3750_v29 = vsel %vm6150_vm5, %v3748_v6, %v3749_v19  ;;  %v3715_v50 = vsel %vm6150_vm5, %v3713_v7, %v3714_v25  ;;  %v3718_v54 = vrot.slane %v6650_v28, 5 }
  0xec   : > { %v4902_v33 = vcombine.low %v3747_v11, %v3750_v29  ;;  %v3754_v49 = vsel %vm6150_vm5, %v4875_v10, %v3753_v59  ;;  %v4897_v41 = vcombine.low %v3712_v20, %v3715_v50  ;;  %v3721_v34 = vrot.slane %v6654_v31, 5  ;;  %v4866_v20 = vld [vmem:[%s5827_s16 + $0xc0] sm:$0xe] }
  0xed   : > { %v5235_v36 = vpop.f32.mrf.mxu0  ;;  %5534 = vmatmul.mubr.bf16.gmra.mxu1 %v4847_v14  ;;  %v4903_v32 = vcombine.low %v3754_v49, %v3757_v39  ;;  %v4876_v46 = vrot.slane %v4864_v15, 9  ;;  %v3760_v59 = vrot.slane %v6784_v48, 5  ;;  %v3763_v43 = vrot.slane %v6793_v2, 5  ;;  %v4861_v39 = vld [vmem:[%s5827_s16 + $0x70] sm:$0xe] }
  0xee   : > { %v5275_v9 = vpop.f32.mrf.mxu1  ;;  %5565 = vmatprep.mubr.bf16.mxu1 %v4902_v33  ;;  %v3719_v5 = vsel %vm6150_vm5, %v4870_v60, %v3718_v54  ;;  %v4871_v28 = vrot.slane %v4859_v40, 9  ;;  %v3725_v31 = vrot.slane %v6673_v53, 5  ;;  %v3728_v48 = vrot.slane %v6679_v42, 5  ;;  %v4867_v49 = vld [vmem:[%s5827_s16 + $0xd0] sm:$0xe]  ;;  %s4427_s16 = sshll.u32 %s7411_s12, 3 }
  0xef   : > { %v707_v27 = vpop.f32.mrf.mxu0  ;;  %v6899_v57 = vadd.f32 %v5275_v9, %v5235_v36  ;;  %v3720_v36 = vrot.slane %v3718_v54, 4  ;;  %v3761_v19 = vsel %vm6150_vm5, %v4876_v46, %v3760_v59  ;;  %v3762_v9 = vrot.slane %v3760_v59, 4  ;;  %s7118_s6 = scalar_lea.vmem %s7371_s3, %s4427_s16 }
  0xf0   : > { %v956_v13 = vpop.f32.mrf.mxu1  ;;  %5554 = vmatmul.mubr.bf16.vlgmr.msra.gmra.mxu0 %v4897_v41  ;;  %v3726_v62 = vsel %vm6150_vm5, %v4871_v28, %v3725_v31  ;;  %v3727_v63 = vrot.slane %v3725_v31, 4  ;;  %v4877_v53 = vrot.slane %v4865_v0, 9  ;;  %v3767_v1 = vrot.slane %v6823_v3, 5 }
  0xf1   : > { %v5236_v18 = vpop.f32.mrf.mxu0  ;;  %v6913_v24 = vadd.f32 %v956_v13, %v707_v27  ;;  %v3722_v23 = vsel %vm6150_vm5, %v3720_v36, %v3721_v34  ;;  %v3764_v27 = vsel %vm6150_vm5, %v3762_v9, %v3763_v43  ;;  %v3770_v42 = vrot.slane %v6828_v22, 5 }
  0xf2   : > { %v5276_v37 = vpop.f32.mrf.mxu1  ;;  %v4898_v11 = vcombine.low %v3719_v5, %v3722_v23  ;;  %v4904_v7 = vcombine.low %v3761_v19, %v3764_v27  ;;  %v3729_v13 = vsel %vm6150_vm5, %v3727_v63, %v3728_v48  ;;  %v4872_v10 = vrot.slane %v4860_v38, 9 }
  0xf3   : > { %v6922_v12 = vadd.f32 %v5276_v37, %v5236_v18  ;;  %v710_v8 = vpop.f32.mrf.mxu0  ;;  %v4899_v18 = vcombine.low %v3726_v62, %v3729_v13  ;;  %v3768_v14 = vsel %vm6150_vm5, %v4877_v53, %v3767_v1  ;;  %v3769_v3 = vrot.slane %v3767_v1, 4 }
  0xf4   : > { %v959_v45 = vpop.f32.mrf.mxu1  ;;  %5557 = vmatprep.mubr.bf16.mxu0 %v4898_v11  ;;  %v3732_v60 = vrot.slane %v6687_v17, 5  ;;  %v3735_v15 = vrot.slane %v6696_v4, 5  ;;  %v4878_v33 = vrot.slane %v4866_v20, 9  ;;  %v3774_v50 = vrot.slane %v6844_v52, 5 }
  0xf5   : > { %v6927_v61 = vadd.f32 %v959_v45, %v710_v8  ;;  %v5239_v51 = vpop.f32.mrf.mxu0  ;;  %5566 = vmatmul.mubr.bf16.vlgmr.msra.gmra.mxu1 %v4903_v32  ;;  %v3771_v8 = vsel %vm6150_vm5, %v3769_v3, %v3770_v42  ;;  %v3777_v41 = vrot.slane %v6849_v55, 5  ;;  %v4873_v45 = vrot.slane %v4861_v39, 9 }
  0xf6   : > { %v5279_v35 = vpop.f32.mrf.mxu1  ;;  %5569 = vmatprep.mubr.bf16.mxu1 %v4904_v7  ;;  %v4905_v32 = vcombine.low %v3768_v14, %v3771_v8  ;;  %v3733_v17 = vsel %vm6150_vm5, %v4872_v10, %v3732_v60  ;;  %v3734_v54 = vrot.slane %v3732_v60, 4  ;;  %v3775_v4 = vsel %vm6150_vm5, %v4878_v33, %v3774_v50 }
  0xf7   : > { %v6937_v58 = vadd.f32 %v5279_v35, %v5239_v51  ;;  %v723_v2 = vpop.f32.mrf.mxu0  ;;  %v3776_v34 = vrot.slane %v3774_v50, 4  ;;  %v3739_v59 = vrot.slane %v6709_v30, 5  ;;  %v3742_v43 = vrot.slane %v6725_v16, 5 }
  0xf8   : > { %v972_v44 = vpop.f32.mrf.mxu1  ;;  %5558 = vmatmul.mubr.bf16.gmra.mxu0 %v4899_v18  ;;  %v4879_v51 = vrot.slane %v4867_v49, 9  ;;  %v3736_v55 = vsel %vm6150_vm5, %v3734_v54, %v3735_v15  ;;  %v3781_v5 = vrot.slane %v6861_v21, 5  ;;  %v3784_v36 = vrot.slane %v6868_v56, 5 }
  0xf9   : > { %v5240_v6 = vpop.f32.mrf.mxu0  ;;  %v6952_v26 = vadd.f32 %v972_v44, %v723_v2  ;;  %v4900_v28 = vcombine.low %v3733_v17, %v3736_v55  ;;  %v3778_v31 = vsel %vm6150_vm5, %v3776_v34, %v3777_v41  ;;  %v3740_v30 = vsel %vm6150_vm5, %v4873_v45, %v3739_v59 }
  0xfa   : > { %v5280_v25 = vpop.f32.mrf.mxu1  ;;  %v3741_v19 = vrot.slane %v3739_v59, 4  ;;  %v4906_v9 = vcombine.low %v3775_v4, %v3778_v31  ;;  %v3783_v48 = vrot.slane %v3781_v5, 4  ;;  %v3782_v53 = vsel %vm6150_vm5, %v4879_v51, %v3781_v5 }
  0xfb   : > { %v6957_v29 = vadd.f32 %v5280_v25, %v5240_v6  ;;  %v726_v22 = vpop.f32.mrf.mxu0  ;;  %5561 = vmatprep.mubr.bf16.mxu0 %v4900_v28 }
  0xfc   : > { %v975_v37 = vpop.f32.mrf.mxu1  ;;  %v3743_v21 = vsel %vm6150_vm5, %v3741_v19, %v3742_v43  ;;  %v3785_v44 = vsel %vm6150_vm5, %v3783_v48, %v3784_v36 }
  0xfd   : > { %v6965_v40 = vadd.f32 %v975_v37, %v726_v22  ;;  %v5243_v46 = vpop.f32.mrf.mxu0  ;;  %5570 = vmatmul.mubr.bf16.gmra.mxu1 %v4905_v32  ;;  %v4901_v23 = vcombine.low %v3740_v30, %v3743_v21  ;;  %v4907_v6 = vcombine.low %v3782_v53, %v3785_v44 }
  0xfe   : > { %v5283_v52 = vpop.f32.mrf.mxu1  ;;  %5573 = vmatprep.mubr.bf16.mxu1 %v4906_v9 }
  0xff   : > { %v6976_v0 = vadd.f32 %v5283_v52, %v5243_v46  ;;  %v739_v16 = vpop.f32.mrf.mxu0 }
 0x100   : > { %v988_v35 = vpop.f32.mrf.mxu1  ;;  %5562 = vmatmul.mubr.bf16.gmra.mxu0 %v4901_v23 }
 0x101   : > { %v6984_v2 = vadd.f32 %v988_v35, %v739_v16  ;;  %v5244_v56 = vpop.f32.mrf.mxu0 }
 0x102   : > { %v5284_v38 = vpop.f32.mrf.mxu1 }
 0x103   : > { %v6988_v62 = vadd.f32 %v5284_v38, %v5244_v56  ;;  %v742_v11 = vpop.f32.mrf.mxu0 }
 0x104   : > { %v991_v63 = vpop.f32.mrf.mxu1 }
 0x105   : > { %v6994_v27 = vadd.f32 %v991_v63, %v742_v11  ;;  %v5247_v42 = vpop.f32.mrf.mxu0  ;;  %5574 = vmatmul.mubr.bf16.gmra.mxu1 %v4907_v6 }
 0x106   : > { %v5287_v1 = vpop.f32.mrf.mxu1 }
 0x107   : > { %v6996_v20 = vadd.f32 %v5287_v1, %v5247_v42  ;;  %v755_v13 = vpop.f32.mrf.mxu0 }
 0x108   : > { %v1004_v7 = vpop.f32.mrf.mxu1 }
 0x109   : > { %v6998_v25 = vadd.f32 %v1004_v7, %v755_v13  ;;  %v5248_v39 = vpop.f32.mrf.mxu0 }
 0x10a   : > { %v5288_v10 = vpop.f32.mrf.mxu1 }
 0x10b   : > { %v7000_v18 = vadd.f32 %v5288_v10, %v5248_v39  ;;  %v758_v14 = vpop.f32.mrf.mxu0 }
 0x10c   : > { %v1007_v47 = vpop.f32.mrf.mxu1 }
 0x10d   : > { %v7002_v3 = vadd.f32 %v1007_v47, %v758_v14 }
 0x10e   : > { %v5291_v22 = vpop.f32.mrf.mxu1  ;;  %v5251_v60 = vpop.f32.mrf.mxu0 }
 0x10f   : > { %v7004_v15 = vadd.f32 %v5291_v22, %v5251_v60 }
 0x110   : > { %v1020_v37 = vpop.f32.mrf.mxu1  ;;  %v771_v50 = vpop.f32.mrf.mxu0 }
 0x111   : > { %v7006_v49 = vadd.f32 %v1020_v37, %v771_v50 }
 0x112   : > { %v5292_v33 = vpop.f32.mrf.mxu1  ;;  %v5252_v41 = vpop.f32.mrf.mxu0 }
 0x113   : > { %v7008_v45 = vadd.f32 %v5292_v33, %v5252_v41 }
 0x114   : > { %v1023_v8 = vpop.f32.mrf.mxu1  ;;  %v774_v17 = vpop.f32.mrf.mxu0 }
 0x115   : > { %v7010_v54 = vadd.f32 %v1023_v8, %v774_v17 }
 0x116   : > { %v5295_v32 = vpop.f32.mrf.mxu1  ;;  %v5255_v52 = vpop.f32.mrf.mxu0 }
 0x117   : > { %v7012_v34 = vadd.f32 %v5295_v32, %v5255_v52 }
 0x118   : > { %v1036_v4 = vpop.f32.mrf.mxu1  ;;  %v787_v59 = vpop.f32.mrf.mxu0 }
 0x119   : > { %v7014_v43 = vadd.f32 %v1036_v4, %v787_v59 }
 0x11a   : > { %v5296_v46 = vpop.f32.mrf.mxu1  ;;  %v5256_v55 = vpop.f32.mrf.mxu0 }
 0x11b   : > { %v7016_v5 = vadd.f32 %v5296_v46, %v5256_v55 }
 0x11c   : > { %v1039_v51 = vpop.f32.mrf.mxu1  ;;  %v790_v35 = vpop.f32.mrf.mxu0 }
 0x11d   : > { %v7018_v28 = vadd.f32 %v1039_v51, %v790_v35 }
 0x11e   : > { %v5355_v36 = vpop.f32.mrf.mxu1  ;;  %v5315_v30 = vpop.f32.mrf.mxu0 }
 0x11f   : > { %v1418_v19 = vadd.f32 %v5315_v30, %v6899_v57 }
 0x120   : > { %v1639_v31 = vpop.f32.mrf.mxu1  ;;  %v1321_v9 = vpop.f32.mrf.mxu0 }
 0x121   : > { %v7021_v48 = vadd.f32 %v5355_v36, %v1418_v19  ;;  %v1416_v38 = vadd.f32 %v1321_v9, %v6913_v24 }
 0x122   : > { %v5356_v16 = vpop.f32.mrf.mxu1  ;;  %v5316_v56 = vpop.f32.mrf.mxu0 }
 0x123   : > { %v7024_v23 = vadd.f32 %v1639_v31, %v1416_v38  ;;  %v1419_v63 = vadd.f32 %v5316_v56, %v6922_v12 }
 0x124   : > { %v1642_v21 = vpop.f32.mrf.mxu1  ;;  %v1324_v44 = vpop.f32.mrf.mxu0 }
 0x125   : > { %v7027_v11 = vadd.f32 %v5356_v16, %v1419_v63  ;;  %v1417_v1 = vadd.f32 %v1324_v44, %v6927_v61 }
 0x126   : > { %v5359_v53 = vpop.f32.mrf.mxu1  ;;  %v5319_v57 = vpop.f32.mrf.mxu0 }
 0x127   : > { %v7030_v6 = vadd.f32 %v1642_v21, %v1417_v1  ;;  %v1422_v7 = vadd.f32 %v5319_v57, %v6937_v58 }
 0x128   : > { %v1655_v42 = vpop.f32.mrf.mxu1  ;;  %v1337_v24 = vpop.f32.mrf.mxu0 }
 0x129   : > { %v7033_v10 = vadd.f32 %v5359_v53, %v1422_v7  ;;  %v1420_v39 = vadd.f32 %v1337_v24, %v6952_v26 }
 0x12a   : > { %v5360_v13 = vpop.f32.mrf.mxu1  ;;  %v5320_v12 = vpop.f32.mrf.mxu0 }
 0x12b   : > { %v7036_v14 = vadd.f32 %v1655_v42, %v1420_v39  ;;  %v1423_v22 = vadd.f32 %v5320_v12, %v6957_v29 }
 0x12c   : > { %v1658_v47 = vpop.f32.mrf.mxu1  ;;  %v1340_v61 = vpop.f32.mrf.mxu0 }
 0x12d   : > { %v7039_v60 = vadd.f32 %v5360_v13, %v1423_v22  ;;  %v1421_v33 = vadd.f32 %v1340_v61, %v6965_v40 }
 0x12e   : > { %v5363_v37 = vpop.f32.mrf.mxu1  ;;  %v5323_v58 = vpop.f32.mrf.mxu0 }
 0x12f   : > { %v7042_v8 = vadd.f32 %v1658_v47, %v1421_v33  ;;  %v1426_v41 = vadd.f32 %v5323_v58, %v6976_v0 }
 0x130   : > { %v1671_v50 = vpop.f32.mrf.mxu1  ;;  %v1353_v26 = vpop.f32.mrf.mxu0 }
 0x131   : > { %v7045_v17 = vadd.f32 %v5363_v37, %v1426_v41  ;;  %v1424_v4 = vadd.f32 %v1353_v26, %v6984_v2 }
 0x132   : > { %v5364_v32 = vpop.f32.mrf.mxu1  ;;  %v5324_v29 = vpop.f32.mrf.mxu0 }
 0x133   : > { %v7048_v46 = vadd.f32 %v1671_v50, %v1424_v4  ;;  %v1427_v59 = vadd.f32 %v5324_v29, %v6988_v62 }
 0x134   : > { %v1674_v52 = vpop.f32.mrf.mxu1  ;;  %v1356_v40 = vpop.f32.mrf.mxu0 }
 0x135   : > { %v7051_v55 = vadd.f32 %v5364_v32, %v1427_v59  ;;  %v1425_v36 = vadd.f32 %v1356_v40, %v6994_v27 }
 0x136   : > { %v5367_v51 = vpop.f32.mrf.mxu1 }
 0x137   : > { %v7054_v31 = vadd.f32 %v1674_v52, %v1425_v36 }
 0x138   : > { %v1687_v35 = vpop.f32.mrf.mxu1  ;;  %v5327_v0 = vpop.f32.mrf.mxu0 }
 0x139   : > { %v1430_v30 = vadd.f32 %v5327_v0, %v6996_v20 }
 0x13a   : > { %v5368_v19 = vpop.f32.mrf.mxu1  ;;  %v1369_v2 = vpop.f32.mrf.mxu0 }
 0x13b   : > { %v7057_v16 = vadd.f32 %v5367_v51, %v1430_v30  ;;  %v1428_v9 = vadd.f32 %v1369_v2, %v6998_v25 }
 0x13c   : > { %v1690_v38 = vpop.f32.mrf.mxu1  ;;  %v5328_v62 = vpop.f32.mrf.mxu0 }
 0x13d   : > { %v7060_v21 = vadd.f32 %v1687_v35, %v1428_v9  ;;  %v1431_v56 = vadd.f32 %v5328_v62, %v7000_v18 }
 0x13e   : > { %v5371_v63 = vpop.f32.mrf.mxu1  ;;  %v1372_v27 = vpop.f32.mrf.mxu0 }
 0x13f   : > { %v7063_v53 = vadd.f32 %v5368_v19, %v1431_v56  ;;  %v1429_v44 = vadd.f32 %v1372_v27, %v7002_v3 }
 0x140   : > { %v1703_v1 = vpop.f32.mrf.mxu1  ;;  %v5331_v20 = vpop.f32.mrf.mxu0 }
 0x141   : > { %v7066_v42 = vadd.f32 %v1690_v38, %v1429_v44  ;;  %v1434_v57 = vadd.f32 %v5331_v20, %v7004_v15 }
 0x142   : > { %v5372_v7 = vpop.f32.mrf.mxu1  ;;  %v1385_v25 = vpop.f32.mrf.mxu0 }
 0x143   : > { %v7069_v13 = vadd.f32 %v5371_v63, %v1434_v57  ;;  %v1432_v24 = vadd.f32 %v1385_v25, %v7006_v49 }
 0x144   : > { %v1706_v39 = vpop.f32.mrf.mxu1  ;;  %v5332_v18 = vpop.f32.mrf.mxu0 }
 0x145   : > { %v7072_v47 = vadd.f32 %v1703_v1, %v1432_v24  ;;  %v1435_v12 = vadd.f32 %v5332_v18, %v7008_v45 }
 0x146   : > { %v5375_v22 = vpop.f32.mrf.mxu1  ;;  %v1388_v3 = vpop.f32.mrf.mxu0 }
 0x147   : > { %v7075_v37 = vadd.f32 %v5372_v7, %v1435_v12  ;;  %v1433_v61 = vadd.f32 %v1388_v3, %v7010_v54 }
 0x148   : > { %v1719_v33 = vpop.f32.mrf.mxu1  ;;  %v5335_v15 = vpop.f32.mrf.mxu0 }
 0x149   : > { %v7078_v50 = vadd.f32 %v1706_v39, %v1433_v61  ;;  %v1438_v58 = vadd.f32 %v5335_v15, %v7012_v34  ;;  %v5752_v61 = vmov 0.0  }
 0x14a   : > { %v5376_v41 = vpop.f32.mrf.mxu1  ;;  %v1401_v49 = vpop.f32.mrf.mxu0  ;;  %212 = vst [vmem:[%s7118_s6] sm:$0xff] %v5752_v61 }
 0x14b   : > { %v7081_v32 = vadd.f32 %v5375_v22, %v1438_v58  ;;  %v1436_v26 = vadd.f32 %v1401_v49, %v7014_v43 }
 0x14c   : > { %v1722_v4 = vpop.f32.mrf.mxu1  ;;  %v5336_v45 = vpop.f32.mrf.mxu0 }
 0x14d   : > { %v7084_v52 = vadd.f32 %v1719_v33, %v1436_v26  ;;  %v1439_v29 = vadd.f32 %v5336_v45, %v7016_v5 }
 0x14e   : > { %v5435_v59 = vpop.f32.mrf.mxu1  ;;  %v1404_v54 = vpop.f32.mrf.mxu0 }
 0x14f   : > { %v7087_v51 = vadd.f32 %v5376_v41, %v1439_v29  ;;  %v1437_v40 = vadd.f32 %v1404_v54, %v7018_v28 }
 0x150   : > { %v2627_v36 = vpop.f32.mrf.mxu1  ;;  %v5395_v34 = vpop.f32.mrf.mxu0 }
 0x151   : > { %v7090_v35 = vadd.f32 %v1722_v4, %v1437_v40  ;;  %v2326_v0 = vadd.f32 %v5395_v34, %v7021_v48 }
 0x152   : > { %v5436_v30 = vpop.f32.mrf.mxu1  ;;  %v2229_v43 = vpop.f32.mrf.mxu0 }
 0x153   : > { %v7093_v19 = vadd.f32 %v5435_v59, %v2326_v0  ;;  %v2324_v2 = vadd.f32 %v2229_v43, %v7024_v23 }
 0x154   : > { %v2630_v9 = vpop.f32.mrf.mxu1  ;;  %v5396_v5 = vpop.f32.mrf.mxu0 }
 0x155   : > { %v7096_v38 = vadd.f32 %v2627_v36, %v2324_v2  ;;  %v2327_v62 = vadd.f32 %v5396_v5, %v7027_v11 }
 0x156   : > { %v5439_v56 = vpop.f32.mrf.mxu1  ;;  %v2232_v28 = vpop.f32.mrf.mxu0 }
 0x157   : > { %v7099_v63 = vadd.f32 %v5436_v30, %v2327_v62  ;;  %v2325_v27 = vadd.f32 %v2232_v28, %v7030_v6 }
 0x158   : > { %v2643_v48 = vpop.f32.mrf.mxu1  ;;  %v5399_v44 = vpop.f32.mrf.mxu0 }
 0x159   : > { %v7102_v1 = vadd.f32 %v2630_v9, %v2325_v27  ;;  %v2330_v20 = vadd.f32 %v5399_v44, %v7033_v10 }
 0x15a   : > { %v5440_v23 = vpop.f32.mrf.mxu1  ;;  %v2245_v57 = vpop.f32.mrf.mxu0 }
 0x15b   : > { %v7105_v7 = vadd.f32 %v5439_v56, %v2330_v20  ;;  %v2328_v25 = vadd.f32 %v2245_v57, %v7036_v14 }
 0x15c   : > { %v2646_v11 = vpop.f32.mrf.mxu1  ;;  %v5400_v24 = vpop.f32.mrf.mxu0 }
 0x15d   : > { %v7108_v39 = vadd.f32 %v2643_v48, %v2328_v25  ;;  %v2331_v18 = vadd.f32 %v5400_v24, %v7039_v60 }
 0x15e   : > { %v5443_v12 = vpop.f32.mrf.mxu1  ;;  %v2248_v6 = vpop.f32.mrf.mxu0 }
 0x15f   : > { %v7112_v22 = vadd.f32 %v5440_v23, %v2331_v18  ;;  %v2329_v3 = vadd.f32 %v2248_v6, %v7042_v8 }
 0x160   : > { %v2659_v10 = vpop.f32.mrf.mxu1  ;;  %v5403_v14 = vpop.f32.mrf.mxu0 }
 0x161   : > { %v7121_v33 = vadd.f32 %v2646_v11, %v2329_v3  ;;  %v2334_v60 = vadd.f32 %v5403_v14, %v7045_v17 }
 0x162   : > { %v5444_v15 = vpop.f32.mrf.mxu1  ;;  %v2261_v58 = vpop.f32.mrf.mxu0 }
 0x163   : > { %v7124_v41 = vadd.f32 %v5443_v12, %v2334_v60  ;;  %v2332_v8 = vadd.f32 %v2261_v58, %v7048_v46 }
 0x164   : > { %v2662_v49 = vpop.f32.mrf.mxu1  ;;  %v5404_v26 = vpop.f32.mrf.mxu0 }
 0x165   : > { %v7127_v4 = vadd.f32 %v2659_v10, %v2332_v8  ;;  %v2335_v45 = vadd.f32 %v5404_v26, %v7051_v55 }
 0x166   : > { %v5447_v29 = vpop.f32.mrf.mxu1  ;;  %v2264_v59 = vpop.f32.mrf.mxu0 }
 0x167   : > { %v7130_v54 = vadd.f32 %v5444_v15, %v2335_v45  ;;  %v2333_v40 = vadd.f32 %v2264_v59, %v7054_v31 }
 0x168   : > { %v2675_v36 = vpop.f32.mrf.mxu1  ;;  %v5407_v17 = vpop.f32.mrf.mxu0 }
 0x169   : > { %v7133_v34 = vadd.f32 %v2662_v49, %v2333_v40  ;;  %v2338_v0 = vadd.f32 %v5407_v17, %v7057_v16 }
 0x16a   : > { %v5448_v30 = vpop.f32.mrf.mxu1  ;;  %v2277_v46 = vpop.f32.mrf.mxu0 }
 0x16b   : > { %v7136_v43 = vadd.f32 %v5447_v29, %v2338_v0  ;;  %v2336_v2 = vadd.f32 %v2277_v46, %v7060_v21 }
 0x16c   : > { %v5408_v9 = vpop.f32.mrf.mxu0  ;;  %v2678_v55 = vpop.f32.mrf.mxu1 }
 0x16d   : > { %v7139_v5 = vadd.f32 %v2675_v36, %v2336_v2  ;;  %v2339_v62 = vadd.f32 %v5408_v9, %v7063_v53 }
 0x16e   : > { %v2280_v56 = vpop.f32.mrf.mxu0  ;;  %v5451_v48 = vpop.f32.mrf.mxu1 }
 0x16f   : > { %v7142_v31 = vadd.f32 %v5448_v30, %v2339_v62  ;;  %v2337_v28 = vadd.f32 %v2280_v56, %v7066_v42 }
 0x170   : > { %v5411_v27 = vpop.f32.mrf.mxu0  ;;  %v2691_v23 = vpop.f32.mrf.mxu1 }
 0x171   : > { %v7145_v16 = vadd.f32 %v2678_v55, %v2337_v28  ;;  %v2342_v44 = vadd.f32 %v5411_v27, %v7069_v13 }
 0x172   : > { %v2293_v20 = vpop.f32.mrf.mxu0  ;;  %v5452_v11 = vpop.f32.mrf.mxu1 }
 0x173   : > { %v7148_v21 = vadd.f32 %v5451_v48, %v2342_v44  ;;  %v2340_v57 = vadd.f32 %v2293_v20, %v7072_v47 }
 0x174   : > { %v5412_v25 = vpop.f32.mrf.mxu0  ;;  %v2694_v6 = vpop.f32.mrf.mxu1 }
 0x175   : > { %v7151_v53 = vadd.f32 %v2691_v23, %v2340_v57  ;;  %v2343_v24 = vadd.f32 %v5412_v25, %v7075_v37 }
 0x176   : > { %v2296_v18 = vpop.f32.mrf.mxu0  ;;  %v5455_v10 = vpop.f32.mrf.mxu1 }
 0x177   : > { %v7154_v42 = vadd.f32 %v5452_v11, %v2343_v24  ;;  %v2341_v12 = vadd.f32 %v2296_v18, %v7078_v50 }
 0x178   : > { %v5415_v13 = vpop.f32.mrf.mxu0  ;;  %v2707_v47 = vpop.f32.mrf.mxu1 }
 0x179   : > { %7376 = vst [vmem:[#allocation2_spill] sm:$0xff] %v7154_v42  ;;  %v7157_v3 = vadd.f32 %v2694_v6, %v2341_v12  ;;  %v2346_v14 = vadd.f32 %v5415_v13, %v7081_v32 }
 0x17a   : > { %v2309_v61 = vpop.f32.mrf.mxu0  ;;  %v5456_v37 = vpop.f32.mrf.mxu1 }
 0x17b   : > { %7377 = vst [vmem:[#allocation3_spill] sm:$0xff] %v7157_v3  ;;  %v7160_v60 = vadd.f32 %v5455_v10, %v2346_v14  ;;  %v2344_v15 = vadd.f32 %v2309_v61, %v7084_v52 }
 0x17c   : > { %v5416_v58 = vpop.f32.mrf.mxu0  ;;  %v2710_v29 = vpop.f32.mrf.mxu1 }
 0x17d   : > { %7378 = vst [vmem:[#allocation4_spill] sm:$0xff] %v7160_v60  ;;  %v7163_v8 = vadd.f32 %v2707_v47, %v2344_v15  ;;  %v2347_v49 = vadd.f32 %v5416_v58, %v7087_v51 }
 0x17e   : > { %v2312_v50 = vpop.f32.mrf.mxu0 }
 0x17f   : > { %7379 = vst [vmem:[#allocation5_spill] sm:$0xff] %v7163_v8  ;;  %v7166_v26 = vadd.f32 %v5456_v37, %v2347_v49  ;;  %v2345_v45 = vadd.f32 %v2312_v50, %v7090_v35  ;;  %v4052_v50 = vlaneseq }
 0x180   : > { %v5475_v59 = vpop.f32.mrf.mxu0 }
 0x181   : > { %7380 = vst [vmem:[#allocation6_spill] sm:$0xff] %v7166_v26  ;;  %v7169_v32 = vadd.f32 %v2710_v29, %v2345_v45  ;;  %v4053_v8 = vshrl.u32 %v4052_v50, 7 }
 0x182   : > { %v2945_v40 = vpop.f32.mrf.mxu0  ;;  %v5515_v36 = vpop.f32.mrf.mxu1 }
 0x183   : > { %7381 = vst [vmem:[#allocation7_spill] sm:$0xff] %v7169_v32 }
 0x184   : > { %v5476_v17 = vpop.f32.mrf.mxu0  ;;  %v3535_v0 = vpop.f32.mrf.mxu1 }
 0x186   : > { %v2948_v52 = vpop.f32.mrf.mxu0  ;;  %v5516_v30 = vpop.f32.mrf.mxu1 }
 0x188   : > { %v5479_v46 = vpop.f32.mrf.mxu0  ;;  %v3538_v2 = vpop.f32.mrf.mxu1 }
 0x189   : > { %v3046_v50 = vadd.f32 %v5479_v46, %v7105_v7 }
 0x18a   : > { %v2961_v9 = vpop.f32.mrf.mxu0  ;;  %v5519_v55 = vpop.f32.mrf.mxu1 }
 0x18c   : > { %v5480_v51 = vpop.f32.mrf.mxu0  ;;  %v3551_v62 = vpop.f32.mrf.mxu1 }
 0x18e   : > { %v2964_v56 = vpop.f32.mrf.mxu0  ;;  %v5520_v28 = vpop.f32.mrf.mxu1 }
 0x190   : > { %v5483_v27 = vpop.f32.mrf.mxu0  ;;  %v3554_v35 = vpop.f32.mrf.mxu1 }
 0x192   : > { %v2977_v48 = vpop.f32.mrf.mxu0 }
 0x194   : > { %v5484_v44 = vpop.f32.mrf.mxu0  ;;  %v5523_v20 = vpop.f32.mrf.mxu1 }
 0x195   : > { %v3051_v7 = vadd.f32 %v5484_v44, %v7130_v54 }
 0x196   : > { %v2980_v23 = vpop.f32.mrf.mxu0  ;;  %v3567_v57 = vpop.f32.mrf.mxu1 }
 0x198   : > { %v5487_v25 = vpop.f32.mrf.mxu0  ;;  %v5524_v11 = vpop.f32.mrf.mxu1 }
 0x19a   : > { %v2993_v24 = vpop.f32.mrf.mxu0  ;;  %v7171_v18 = vpop.f32.mrf.mxu1 }
 0x19c   : > { %v5488_v12 = vpop.f32.mrf.mxu0  ;;  %v7173_v6 = vpop.f32.mrf.mxu1 }
 0x19e   : > { %v2996_v13 = vpop.f32.mrf.mxu0  ;;  %v7175_v10 = vpop.f32.mrf.mxu1 }
 0x1a0   : > { %v5491_v14 = vpop.f32.mrf.mxu0  ;;  %v7177_v61 = vpop.f32.mrf.mxu1 }
 0x1a2   : > { %v7179_v47 = vpop.f32.mrf.mxu0  ;;  %v7181_v15 = vpop.f32.mrf.mxu1 }
 0x1a4   : > { %v7183_v58 = vpop.f32.mrf.mxu0  ;;  %v7185_v37 = vpop.f32.mrf.mxu1 }
 0x1a5   : > { %7382 = vst [vmem:[#allocation8_spill] sm:$0xff] %v7183_v58  ;;  %7383 = vst [vmem:[#allocation9_spill] sm:$0xff] %v7185_v37  ;;  %v3042_v58 = vadd.f32 %v5475_v59, %v7093_v19  ;;  %v7204_v37 = vadd.s32 8, %v4053_v8  ;;  %v3045_v59 = vadd.f32 %v2964_v56, %v7121_v33 }
 0x1a6   : > { %v7187_v49 = vpop.f32.mrf.mxu0  ;;  %v7189_v45 = vpop.f32.mrf.mxu1 }
 0x1a7   : > { %7384 = vst [vmem:[#allocation10_spill] sm:$0xff] %v7187_v49  ;;  %7385 = vst [vmem:[#allocation11_spill] sm:$0xff] %v7189_v45  ;;  %v3040_v49 = vadd.f32 %v2945_v40, %v7096_v38  ;;  %v3043_v45 = vadd.f32 %v5476_v17, %v7099_v63  ;;  %v3632_v8 = vadd.f32 %v5515_v36, %v3042_v58  ;;  %vm4056_vm6 = vcmp.lt.s32.totalorder %v7204_v37, 12 }
 0x1a8   : > { %v7191_v29 = vpop.f32.mrf.mxu0  ;;  %v7193_v32 = vpop.f32.mrf.mxu1  ;;  %v3050_v38 = vadd.f32 %v5483_v27, %v7124_v41  ;;  %v3049_v36 = vadd.f32 %v2980_v23, %v7133_v34  ;;  %v3054_v41 = vadd.f32 %v5487_v25, %v7136_v43  ;;  %v7237_v34 = vadd.f32 %v5524_v11, %v3051_v7 }
 0x1a9   : > { %7386 = vst [vmem:[#allocation12_spill] sm:$0xff] %v7191_v29  ;;  %7387 = vst [vmem:[#allocation13_spill] sm:$0xff] %v7193_v32  ;;  %v3041_v32 = vadd.f32 %v2948_v52, %v7102_v1  ;;  %v3630_v63 = vadd.f32 %v3535_v0, %v3040_v49  ;;  %v3633_v40 = vadd.f32 %v5516_v30, %v3043_v45 }
 0x1aa   : > { %v7195_v26 = vpop.f32.mrf.mxu0  ;;  %v7197_v60 = vpop.f32.mrf.mxu1  ;;  %v3048_v1 = vadd.f32 %v2977_v48, %v7127_v4  ;;  %v7223_v52 = vadd.f32 %v5519_v55, %v3046_v50  ;;  %v3052_v0 = vadd.f32 %v2993_v24, %v7139_v5  ;;  %v3055_v30 = vadd.f32 %v5488_v12, %v7142_v31 }
 0x1ab   : > { %7388 = vst [vmem:[#allocation14_spill] sm:$0xff] %v7195_v26  ;;  %7389 = vst [vmem:[#allocation15_spill] sm:$0xff] %v7197_v60  ;;  %v3044_v26 = vadd.f32 %v2961_v9, %v7108_v39  ;;  %v3631_v17 = vadd.f32 %v3538_v2, %v3041_v32  ;;  %v3635_v9 = vadd.f32 %v3554_v35, %v3045_v59 }
 0x1ac   : > { %v7199_v3 = vpop.f32.mrf.mxu0  ;;  %v3053_v32 = vadd.f32 %v2996_v13, %v7145_v16  ;;  %v7240_v5 = vadd.f32 %v7171_v18, %v3049_v36  ;;  %v3058_v31 = vadd.f32 %v5491_v14, %v7148_v21  ;;  %v3642_v27 = vadd.f32 %v7175_v10, %v3052_v0  ;;  %v7392_v25 = vld [vmem:[#allocation8_spill] sm:$0xff] }
 0x1ad   : > { %7390 = vst [vmem:[#allocation16_spill] sm:$0xff] %v7199_v3  ;;  %v7208_v29 = vpop.f32.mrf.mxu1  ;;  %v3047_v3 = vadd.f32 %v5480_v51, %v7112_v22  ;;  %v3634_v46 = vadd.f32 %v3551_v62, %v3044_v26  ;;  %v7232_v51 = vadd.f32 %v5523_v20, %v3050_v38  ;;  %v7235_v26 = vadd.f32 %v3567_v57, %v3048_v1  ;;  %v7391_v57 = vld [vmem:[#allocation2_spill] sm:$0xff] }
 0x1ae   : > { %v7202_v42 = vpop.f32.mrf.mxu0  ;;  %v3645_v35 = vadd.f32 %v7177_v61, %v3055_v30  ;;  %v3643_v21 = vadd.f32 %v7181_v15, %v3053_v32  ;;  %v3056_v23 = vadd.f32 %v7179_v47, %v7151_v53  ;;  %v3059_v11 = vadd.f32 %v7392_v25, %v7391_v57  ;;  %v7393_v61 = vld [vmem:[#allocation9_spill] sm:$0xff]  ;;  %v7394_v15 = vld [vmem:[#allocation3_spill] sm:$0xff]  ;;  %v7395_v49 = vld [vmem:[#allocation10_spill] sm:$0xff] }
 0x1af   : > { %v7214_v60 = vpop.f32.mrf.mxu1  ;;  %v3637_v33 = vadd.f32 %v5520_v28, %v3047_v3  ;;  %v3644_v28 = vadd.f32 %v7173_v6, %v3054_v41  ;;  %v3648_v58 = vadd.f32 %v7393_v61, %v3058_v31  ;;  %v3057_v45 = vadd.f32 %v7395_v49, %v7394_v15  ;;  %v7401_v57 = vld [vmem:[#allocation5_spill] sm:$0xff] }
 0x1b0   : > { %v5555_v19 = vpop.f32.mrf.mxu0 }
 0x1b1   : > { %v7221_v39 = vpop.f32.mrf.mxu1  ;;  %v4030_v3 = vadd.f32 %v5555_v19, %v3632_v8 }
 0x1b2   : > { %v3933_v22 = vpop.f32.mrf.mxu0  ;;  %v7402_v25 = vld [vmem:[#allocation14_spill] sm:$0xff] }
 0x1b3   : > { %v7230_v4 = vpop.f32.mrf.mxu1  ;;  %v4028_v43 = vadd.f32 %v3933_v22, %v3630_v63  ;;  %v4236_v50 = vmul.f32 %v4030_v3, %v4030_v3 }
 0x1b4   : > { %v5556_v54 = vpop.f32.mrf.mxu0 }
 0x1b5   : > { %v4031_v2 = vadd.f32 %v5556_v54, %v3633_v40  ;;  %v5567_v55 = vpop.f32.mrf.mxu1  ;;  %v4234_v18 = vmul.f32 %v4028_v43, %v4028_v43 }
 0x1b6   : > { %v3936_v62 = vpop.f32.mrf.mxu0  ;;  %v7264_v47 = vadd.f32 %v5567_v55, %v3644_v28 }
 0x1b7   : > { %v4064_v16 = vsel %vm4056_vm6, %v4031_v2, 0.0  ;;  %v4029_v56 = vadd.f32 %v3936_v62, %v3631_v17  ;;  %v3981_v48 = vpop.f32.mrf.mxu1 }
 0x1b8   : > { %v4974_v44 = vpack.c.bf16 %v4064_v16, %v4030_v3  ;;  %v5559_v20 = vpop.f32.mrf.mxu0  ;;  %v4237_v40 = vmul.f32 %v4064_v16, %v4064_v16  ;;  %v7271_v17 = vadd.f32 %v3981_v48, %v3642_v27  ;;  %v7397_v27 = vld [vmem:[#allocation13_spill] sm:$0xff]  ;;  %v7399_v48 = vld [vmem:[#allocation12_spill] sm:$0xff]  ;;  %v4248_v37 = vmul.f32 %v7264_v47, %v7264_v47 }
 0x1b9   : > { %v4062_v24 = vsel %vm4056_vm6, %v4029_v56, 0.0  ;;  %v5568_v12 = vpop.f32.mrf.mxu1  ;;  %v4034_v32 = vadd.f32 %v5559_v20, %v7223_v52  ;;  %v7396_v56 = vld [vmem:[#allocation11_spill] sm:$0xff]  ;;  %v7398_v52 = vld [vmem:[#allocation4_spill] sm:$0xff] }
 0x1ba   : > { %5026 = vst [vmem:[%s7246_s9 + $0x8] sm:$0xff] %v4974_v44   ;;  %v4969_v6 = vpack.c.bf16 %v4062_v24, %v4028_v43  ;;  %v4205_v13 = vadd.f32 %v4062_v24, %v4028_v43  ;;  %v4235_v10 = vmul.f32 %v4062_v24, %v4062_v24  ;;  %v3949_v14 = vpop.f32.mrf.mxu0  ;;  %v4043_v53 = vadd.f32 %v5568_v12, %v3645_v35 }
 0x1bb   : > { %v3984_v59 = vpop.f32.mrf.mxu1  ;;  %v4032_v38 = vadd.f32 %v3949_v14, %v3634_v46  ;;  %v3646_v28 = vadd.f32 %v7396_v56, %v3056_v23  ;;  %v3649_v35 = vadd.f32 %v7397_v27, %v3059_v11  ;;  %v3062_v44 = vadd.f32 %v7399_v48, %v7398_v52  ;;  %v7403_v23 = vld [vmem:[#allocation6_spill] sm:$0xff] }
 0x1bc   : > { %4970 = vst [vmem:[%s7246_s9] sm:$0xff] %v4969_v6   ;;  %v4206_v19 = vadd.f32 %v4205_v13, %v4030_v3  ;;  %v4258_v8 = vadd.f32 %v4235_v10, %v4234_v18  ;;  %v5560_v63 = vpop.f32.mrf.mxu0  ;;  %v7269_v1 = vsel %vm4056_vm6, %v4043_v53, 0.0  ;;  %v4041_v7 = vadd.f32 %v3984_v59, %v3643_v21  ;;  %v7400_v21 = vld [vmem:[#allocation15_spill] sm:$0xff]  ;;  %v7404_v10 = vld [vmem:[#allocation16_spill] sm:$0xff] }
 0x1bd   : > { %v4035_v22 = vadd.f32 %v5560_v63, %v3637_v33  ;;  %v5004_v36 = vpack.c.bf16 %v7269_v1, %v7264_v47  ;;  %v5571_v0 = vpop.f32.mrf.mxu1  ;;  %v4238_v43 = vmul.f32 %v4032_v38, %v4032_v38  ;;  %v3060_v24 = vadd.f32 %v7402_v25, %v7401_v57 }
 0x1be   : > { %v4259_v41 = vadd.f32 %v4258_v8, %v4236_v50  ;;  %v4207_v30 = vadd.f32 %v4206_v19, %v4064_v16  ;;  %v3952_v54 = vpop.f32.mrf.mxu0  ;;  %v7277_v46 = vsel %vm4056_vm6, %v4041_v7, 0.0  ;;  %v3063_v11 = vadd.f32 %v7404_v10, %v7403_v23 }
 0x1bf   : > { %v4068_v2 = vsel %vm4056_vm6, %v4035_v22, 0.0  ;;  %v4033_v33 = vadd.f32 %v3952_v54, %v3635_v9  ;;  %5032 = vst [vmem:[%s7246_s9 + $0x38] sm:$0xff] %v5004_v36   ;;  %v4999_v3 = vpack.c.bf16 %v7277_v46, %v7271_v17  ;;  %v3997_v31 = vpop.f32.mrf.mxu1  ;;  %v3647_v9 = vadd.f32 %v7400_v21, %v3057_v45 }
 0x1c0   : > { %v4208_v55 = vadd.f32 %v4207_v30, %v4032_v38  ;;  %v4260_v62 = vadd.f32 %v4259_v41, %v4237_v40  ;;  %v5563_v16 = vpop.f32.mrf.mxu0  ;;  %v4984_v20 = vpack.c.bf16 %v4068_v2, %v4034_v32  ;;  %v4240_v49 = vmul.f32 %v4034_v32, %v4034_v32 }
 0x1c1   : > { %5031 = vst [vmem:[%s7246_s9 + $0x30] sm:$0xff] %v4999_v3   ;;  %v5572_v12 = vpop.f32.mrf.mxu1  ;;  %v4066_v6 = vsel %vm4056_vm6, %v4033_v33, 0.0  ;;  %v7298_v45 = vadd.f32 %v5571_v0, %v3648_v58  ;;  %v7300_v50 = vadd.f32 %v3997_v31, %v3646_v28  ;;  %v4038_v22 = vadd.f32 %v5563_v16, %v7232_v51  ;;  %v7405_v0 = vld [vmem:[#allocation7_spill] sm:$0xff] }
 0x1c2   : > { %v4261_v18 = vadd.f32 %v4260_v62, %v4238_v43  ;;  %v3965_v13 = vpop.f32.mrf.mxu0  ;;  %5028 = vst [vmem:[%s7246_s9 + $0x18] sm:$0xff] %v4984_v20   ;;  %v4047_v14 = vadd.f32 %v5572_v12, %v3649_v35  ;;  %v4979_v61 = vpack.c.bf16 %v4066_v6, %v4032_v38  ;;  %v4209_v15 = vadd.f32 %v4208_v55, %v4066_v6 }
 0x1c3   : > { %v4239_v53 = vmul.f32 %v4066_v6, %v4066_v6  ;;  %v4000_v19 = vpop.f32.mrf.mxu1  ;;  %v4036_v41 = vadd.f32 %v3965_v13, %v7235_v26  ;;  %v3061_v30 = vadd.f32 %v7202_v42, %v7405_v0  ;;  %v4241_v3 = vmul.f32 %v4068_v2, %v4068_v2 }
 0x1c4   : > { %v5564_v8 = vpop.f32.mrf.mxu0  ;;  %v7304_v59 = vsel %vm4056_vm6, %v4047_v14, 0.0  ;;  %5027 = vst [vmem:[%s7246_s9 + $0x10] sm:$0xff] %v4979_v61   ;;  %v4210_v63 = vadd.f32 %v4209_v15, %v4034_v32  ;;  %v4045_v40 = vadd.f32 %v4000_v19, %v3647_v9  ;;  %v3653_v26 = vadd.f32 %v7221_v39, %v3063_v11 }
 0x1c5   : > { %v4039_v7 = vadd.f32 %v5564_v8, %v7237_v34  ;;  %v5014_v38 = vpack.c.bf16 %v7304_v59, %v7298_v45  ;;  %v4262_v58 = vadd.f32 %v4261_v18, %v4239_v53  ;;  %v5575_v36 = vpop.f32.mrf.mxu1  ;;  %v3652_v42 = vadd.f32 %v7208_v29, %v3062_v44 }
 0x1c6   : > { %v4078_v54 = vsel %vm4056_vm6, %v4045_v40, 0.0  ;;  %v4211_v32 = vadd.f32 %v4210_v63, %v4068_v2  ;;  %v3968_v33 = vpop.f32.mrf.mxu0  ;;  %v4242_v16 = vmul.f32 %v4036_v41, %v4036_v41  ;;  %v3650_v2 = vadd.f32 %v7214_v60, %v3060_v24 }
 0x1c7   : > { %v4072_v34 = vsel %vm4056_vm6, %v4039_v7, 0.0  ;;  %5034 = vst [vmem:[%s7246_s9 + $0x48] sm:$0xff] %v5014_v38   ;;  %v4263_v55 = vadd.f32 %v4262_v58, %v4240_v49  ;;  %v5009_v51 = vpack.c.bf16 %v4078_v54, %v7300_v50  ;;  %v4013_v43 = vpop.f32.mrf.mxu1  ;;  %v4037_v27 = vadd.f32 %v3968_v33, %v7240_v5 }
 0x1c8   : > { %v4994_v62 = vpack.c.bf16 %v4072_v34, %v4038_v22  ;;  %v4212_v31 = vadd.f32 %v4211_v32, %v4036_v41  ;;  %v3651_v52 = vadd.f32 %v7230_v4, %v3061_v30  ;;  %v4050_v48 = vadd.f32 %v5575_v36, %v3652_v42 }
 0x1c9   : > { %5033 = vst [vmem:[%s7246_s9 + $0x40] sm:$0xff] %v5009_v51   ;;  %v4264_v56 = vadd.f32 %v4263_v55, %v4241_v3  ;;  %v5576_v28 = vpop.f32.mrf.mxu1  ;;  %v4070_v39 = vsel %vm4056_vm6, %v4037_v27, 0.0  ;;  %v4244_v60 = vmul.f32 %v4038_v22, %v4038_v22  ;;  %v4048_v24 = vadd.f32 %v4013_v43, %v3650_v2 }
 0x1ca   : > { %5030 = vst [vmem:[%s7246_s9 + $0x28] sm:$0xff] %v4994_v62   ;;  %v4051_v35 = vadd.f32 %v5576_v28, %v3653_v26  ;;  %v4989_v21 = vpack.c.bf16 %v4070_v39, %v4036_v41  ;;  %v4213_v9 = vadd.f32 %v4212_v31, %v4070_v39  ;;  %v4243_v57 = vmul.f32 %v4070_v39, %v4070_v39 }
 0x1cb   : > { %v4265_v20 = vadd.f32 %v4264_v56, %v4242_v16  ;;  %v4016_v29 = vpop.f32.mrf.mxu1  ;;  %v4245_v6 = vmul.f32 %v4072_v34, %v4072_v34  ;;  %v4246_v11 = vmul.f32 %v7271_v17, %v7271_v17  ;;  %v4247_v15 = vmul.f32 %v7277_v46, %v7277_v46 }
 0x1cc   : > { %v4084_v44 = vsel %vm4056_vm6, %v4051_v35, 0.0  ;;  %v4049_v25 = vadd.f32 %v4016_v29, %v3651_v52  ;;  %5029 = vst [vmem:[%s7246_s9 + $0x20] sm:$0xff] %v4989_v21   ;;  %v4214_v4 = vadd.f32 %v4213_v9, %v4038_v22  ;;  %v4249_v63 = vmul.f32 %v7269_v1, %v7269_v1  ;;  %v4289_v21 = vld [vmem:[%s7118_s6] sm:$0x3] }
 0x1cd   : > { %v5024_v5 = vpack.c.bf16 %v4084_v44, %v4050_v48  ;;  %v4266_v18 = vadd.f32 %v4265_v20, %v4243_v57  ;;  %v4250_v7 = vmul.f32 %v7300_v50, %v7300_v50  ;;  %v4252_v41 = vmul.f32 %v7298_v45, %v7298_v45 }
 0x1ce   : > { %v4082_v12 = vsel %vm4056_vm6, %v4049_v25, 0.0  ;;  %v4215_v13 = vadd.f32 %v4214_v4, %v4072_v34  ;;  %v4253_v30 = vmul.f32 %v7304_v59, %v7304_v59  ;;  %v4254_v34 = vmul.f32 %v4048_v24, %v4048_v24 }
 0x1cf   : > { %5036 = vst [vmem:[%s7246_s9 + $0x58] sm:$0xff] %v5024_v5   ;;  %v4267_v23 = vadd.f32 %v4266_v18, %v4244_v60  ;;  %v5019_v10 = vpack.c.bf16 %v4082_v12, %v4048_v24  ;;  %v4255_v55 = vmul.f32 %v4082_v12, %v4082_v12  ;;  %v4257_v26 = vmul.f32 %v4084_v44, %v4084_v44 }
 0x1d0   : > { %v4216_v14 = vadd.f32 %v4215_v13, %v7271_v17 }
 0x1d1   : > { %v4268_v61 = vadd.f32 %v4267_v23, %v4245_v6  ;;  %5035 = vst [vmem:[%s7246_s9 + $0x50] sm:$0xff] %v5019_v10  }
 0x1d2   : > { %v4217_v49 = vadd.f32 %v4216_v14, %v7277_v46  ;;  %v4251_v46 = vmul.f32 %v4078_v54, %v4078_v54 }
 0x1d3   : > { %v4269_v53 = vadd.f32 %v4268_v61, %v4246_v11 }
 0x1d4   : > { %v4218_v19 = vadd.f32 %v4217_v49, %v7264_v47 }
 0x1d5   : > { %v4270_v8 = vadd.f32 %v4269_v53, %v4247_v15 }
 0x1d6   : > { %v4219_v17 = vadd.f32 %v4218_v19, %v7269_v1 }
 0x1d7   : > { %v4271_v40 = vadd.f32 %v4270_v8, %v4248_v37 }
 0x1d8   : > { %v4220_v38 = vadd.f32 %v4219_v17, %v7300_v50 }
 0x1d9   : > { %v4272_v58 = vadd.f32 %v4271_v40, %v4249_v63 }
 0x1da   : > { %v4221_v22 = vadd.f32 %v4220_v38, %v4078_v54  ;;  %v4256_v54 = vmul.f32 %v4050_v48, %v4050_v48 }
 0x1db   : > { %v4273_v36 = vadd.f32 %v4272_v58, %v4250_v7 }
 0x1dc   : > { %v4222_v47 = vadd.f32 %v4221_v22, %v7298_v45 }
 0x1dd   : > { %v4274_v0 = vadd.f32 %v4273_v36, %v4251_v46 }
 0x1de   : > { %v4223_v1 = vadd.f32 %v4222_v47, %v7304_v59 }
 0x1df   : > { %v4275_v32 = vadd.f32 %v4274_v0, %v4252_v41 }
 0x1e0   : > { %v4224_v33 = vadd.f32 %v4223_v1, %v4048_v24 }
 0x1e1   : > { %v4276_v3 = vadd.f32 %v4275_v32, %v4253_v30 }
 0x1e2   : > { %v4225_v50 = vadd.f32 %v4224_v33, %v4082_v12 }
 0x1e3   : > { %v4277_v51 = vadd.f32 %v4276_v3, %v4254_v34 }
 0x1e4   : > { %v4226_v43 = vadd.f32 %v4225_v50, %v4050_v48 }
 0x1e5   : > { %v4278_v62 = vadd.f32 %v4277_v51, %v4255_v55 }
 0x1e6   : > { %v4227_v31 = vadd.f32 %v4226_v43, %v4084_v44 }
 0x1e7   : > { %v4279_v45 = vadd.f32 %v4278_v62, %v4256_v54 }
 0x1e8   : > { %v4228_v42 = vrot.slane %v4227_v31, 4 }
 0x1e9   : > { %v4280_v16 = vadd.f32 %v4279_v45, %v4257_v26 }
 0x1ea   : > { %v4229_v56 = vadd.f32 %v4228_v42, %v4227_v31 }
 0x1eb   : > { %v4281_v28 = vrot.slane %v4280_v16, 4 }
 0x1ec   : > { %v4230_v59 = vrot.slane %v4229_v56, 2 }
 0x1ed   : > { %v4282_v27 = vadd.f32 %v4281_v28, %v4280_v16 }
 0x1ee   : > { %v4231_v2 = vadd.f32 %v4230_v59, %v4229_v56 }
 0x1ef   : > { %v4283_v35 = vrot.slane %v4282_v27, 2 }
 0x1f0   : > { %v4232_v52 = vrot.slane %v4231_v2, 1 }
 0x1f1   : > { %v4284_v20 = vadd.f32 %v4283_v35, %v4282_v27 }
 0x1f2   : > { %v4233_v29 = vadd.f32 %v4232_v52, %v4231_v2 }
 0x1f3   : > { %v4285_v39 = vrot.slane %v4284_v20, 1 }
 0x1f5   : > { %v4286_v48 = vadd.f32 %v4285_v39, %v4284_v20 }
 0x1f7   : > { %v4288_v9 = vsel %vm4287_vm7, %v4233_v29, %v4286_v48 }
 0x1f8   : > { %v4290_v44 = vadd.f32 %v4289_v21, %v4288_v9 }
 0x1fa   : > { %4291 = vst [vmem:[%s7118_s6] sm:$0x3] %v4290_v44 }
 0x1fb PF: > { %s14_s14 = sadd.s32 1, %s5750_s14   ;;  %s7406_s12 = smov %s5746_s13 }
 0x1fc   : > { %p11_p5 = scmp.ge.s32.totalorder %s14_s14, 4   ;;  %s7407_s13 = smov %s7409_s15 }
 0x1fe   :  { %13 = sbr.rel (!%p11_p5) target bundleno = 2 (0x2), region = 85 }

// kernel: conv3block_forward.6
= control target key start
LH: loop header
LB: loop body
LE: loop exit
PB: predicated region body
PF: predicated region fallthrough
CT: control target
= control target key end

     0   :  { %s6430_s12 = smov 0   ;;  %s6432_s13 = smov 0   ;;  %s8772_s0 = inlined_call_operand.vmem [shape: bf16[2,16,32,128], index: 0, kind: input, shape index: {}]   ;;  %s8773_s1 = inlined_call_operand.vmem [shape: bf16[9,128,128], index: 1, kind: input, shape index: {}]   ;;  %s8774_s2 = inlined_call_operand.vmem [shape: bf16[2,14,16,128], index: 2, kind: output, shape index: {0}]   ;;  %s8775_s3 = inlined_call_operand.vmem [shape: f32[2,8,128], index: 3, kind: output, shape index: {1}]  }
   0x1   :  { %s6434_s14 = smov 0  }
   0x2 LB: > { %s26_s15 = sadd.s32 1, %s6403_s13  ;;  %p4950_p0 = scmp.ge.s32.totalorder %s6407_s14, 1  ;;  %s6407_s14 = sphi %s6434_s14, %s14_s14   ;;  %s6403_s13 = sphi %s6432_s13, %s8906_s13   ;;  %s6399_s12 = sphi %s6430_s12, %s8905_s12  }
   0x3   : > { %p28_p1 = scmp.ge.s32.totalorder %s26_s15, 2  ;;  %p154_p2 = scmp.lt.s32.totalorder %s6407_s14, 3 }
   0x5   : > { %s8908_s15 = smov (%p28_p1, %s26_s15), 0  ;;  %p155_p3 = pnand %p4950_p0, %p154_p2 }
   0x7   : > { %158 = sbr.rel (%p155_p3) target bundleno = 533 (0x215), region = 28 }
   0xc   : > { %v6269_v0 = vld [vmem:[%s8773_s1 + $0x78] sm:$0xff]   ;;  %p187_p4 = scmp.lt.s32.totalorder %s6399_s12, 1  ;;  %v6270_v1 = vld [vmem:[%s8773_s1 + $0x70] sm:$0xff]   ;;  %v6271_v2 = vld [vmem:[%s8773_s1 + $0x68] sm:$0xff]   ;;  %vm275_vm0 = vsmask.f32 3328 }
   0xd   : > { %5831 = vmatprep.subr.bf16.mxu0 %v6269_v0  ;;  %6227 = vmatprep.subr.bf16.mxu1 %v6269_v0  ;;  %v6272_v3 = vld [vmem:[%s8773_s1 + $0x60] sm:$0xff]   ;;  %vm276_vm1 = vsmask.f32 7440  ;;  %v6273_v17 = vld [vmem:[%s8773_s1 + $0x58] sm:$0xff]   ;;  %v6274_v33 = vld [vmem:[%s8773_s1 + $0x50] sm:$0xff]   ;;  %vm1199_vm3 = vcmask 1042432  }
   0xe   : > { %s8910_s12 = smov (!%p187_p4, %s6399_s12), 1  ;;  %5832 = vmatpush3.bf16.msra.mxu0 %v6269_v0  ;;  %6235 = vmatpush3.bf16.msra.mxu1 %v6269_v0  ;;  %vm6496_vm2 = vmor %vm275_vm0, %vm276_vm1  ;;  %v6275_v53 = vld [vmem:[%s8773_s1 + $0x48] sm:$0xff]   ;;  %vm1200_vm4 = vcmask 1046532   ;;  %vm4813_vm7 = vcmask 1040384  }
   0xf   : > { %5833 = vmatprep.subr.bf16.mxu0 %v6270_v1  ;;  %6228 = vmatprep.subr.bf16.mxu1 %v6270_v1  ;;  %s5521_s22 = sshll.u32 %s8910_s12, 8  ;;  %vm6789_vm5 = vmor %vm1199_vm3, %vm1200_vm4  ;;  %s6243_s8 = smul.u32 112, %s8910_s12 }
  0x10   : > { %s6463_s25 = scalar_lea.vmem %s8772_s0, %s5521_s22 }
  0x11   : > { %v6469_v4 = vld [vmem:[%s6463_s25] sm:$0xf]  ;;  %v6472_v5 = vld [vmem:[%s6463_s25 + $0x4] sm:$0xf]  ;;  %v6475_v6 = vld [vmem:[%s6463_s25 + $0x8] sm:$0x1]  ;;  %s8658_s10 = scalar_lea.vmem %s8774_s2, %s6243_s8 }
  0x12   : > { %5834 = vmatpush3.bf16.msra.mxu0 %v6270_v1  ;;  %6236 = vmatpush3.bf16.msra.mxu1 %v6270_v1  ;;  %v279_v7 = vshrl.u32 %v6469_v4, 16  ;;  %v282_v8 = vshll.u32 %v6469_v4, 16  ;;  %v288_v9 = vshll.u32 %v6472_v5, 16  ;;  %v292_v10 = vshrl.u32 %v6472_v5, 16  ;;  %v233_v12 = vld [vmem:[%s6463_s25 + $0x80] sm:$0xf] }
  0x13   : > { %5835 = vmatprep.subr.bf16.mxu0 %v6271_v2  ;;  %6229 = vmatprep.subr.bf16.mxu1 %v6271_v2  ;;  %v298_v11 = vshll.u32 %v6475_v6, 16  ;;  %v234_v15 = vld [vmem:[%s6463_s25 + $0x84] sm:$0xf]  ;;  %v6485_v16 = vld [vmem:[%s6463_s25 + $0x88] sm:$0x1]  ;;  %v471_v21 = vshrl.u32 %v233_v12, 16 }
  0x14   : > { %v281_v13 = vrot.slane %v279_v7, 4  ;;  %v284_v14 = vrot.slane %v282_v8, 5  ;;  %v290_v18 = vrot.slane %v288_v9, 5  ;;  %v294_v19 = vrot.slane %v292_v10, 4  ;;  %v6492_v26 = vld [vmem:[%s6463_s25 + $0x10] sm:$0xf] }
  0x15   : > { %v474_v23 = vshll.u32 %v233_v12, 16  ;;  %v480_v24 = vshll.u32 %v234_v15, 16  ;;  %v484_v25 = vshrl.u32 %v234_v15, 16  ;;  %v300_v29 = vrot.slane %v298_v11, 5  ;;  %v6502_v32 = vld [vmem:[%s6463_s25 + $0x14] sm:$0xf] }
  0x16   : > { %5836 = vmatpush3.bf16.msra.mxu0 %v6271_v2  ;;  %6237 = vmatpush3.bf16.msra.mxu1 %v6271_v2  ;;  %v285_v22 = vor.u32 %v284_v14, %v281_v13  ;;  %v295_v28 = vor.u32 %v294_v19, %v290_v18  ;;  %v473_v30 = vrot.slane %v471_v21, 4  ;;  %v490_v31 = vshll.u32 %v6485_v16, 16  ;;  %v6508_v40 = vld [vmem:[%s6463_s25 + $0x18] sm:$0x1]  ;;  %v6516_v47 = vld [vmem:[%s6463_s25 + $0x90] sm:$0xf] }
  0x17   : > { %5837 = vmatprep.subr.bf16.mxu0 %v6272_v3  ;;  %6230 = vmatprep.subr.bf16.mxu1 %v6272_v3  ;;  %v476_v35 = vrot.slane %v474_v23, 5  ;;  %v482_v36 = vrot.slane %v480_v24, 5  ;;  %v486_v37 = vrot.slane %v484_v25, 4  ;;  %v303_v41 = vshrl.u32 %v6492_v26, 16  ;;  %v6522_v52 = vld [vmem:[%s6463_s25 + $0x94] sm:$0xf] }
  0x18   : > { %v286_v34 = vrot.slane %v285_v22, 4  ;;  %v296_v38 = vrot.slane %v295_v28, 4  ;;  %v492_v39 = vrot.slane %v490_v31, 5  ;;  %v306_v42 = vshll.u32 %v6492_v26, 16  ;;  %v6529_v61 = vld [vmem:[%s6463_s25 + $0x98] sm:$0x1] }
  0x19   : > { %v477_v44 = vor.u32 %v476_v35, %v473_v30  ;;  %v487_v45 = vor.u32 %v486_v37, %v482_v36  ;;  %v312_v46 = vshll.u32 %v6502_v32, 16  ;;  %v305_v49 = vrot.slane %v303_v41, 4  ;;  %v6540_v13 = vld [vmem:[%s6463_s25 + $0x20] sm:$0xf]  ;;  %v6549_v19 = vld [vmem:[%s6463_s25 + $0x24] sm:$0xf] }
  0x1a   : > { %5838 = vmatpush3.bf16.msra.mxu0 %v6272_v3  ;;  %6238 = vmatpush3.bf16.msra.mxu1 %v6272_v3  ;;  %v291_v43 = vsel %vm6496_vm2, %v286_v34, %v290_v18  ;;  %v301_v48 = vsel %vm6496_vm2, %v296_v38, %v300_v29  ;;  %v308_v50 = vrot.slane %v306_v42, 5  ;;  %v316_v51 = vshrl.u32 %v6502_v32, 16  ;;  %v6276_v14 = vld [vmem:[%s8773_s1 + $0x40] sm:$0xff]   ;;  %v6554_v25 = vld [vmem:[%s6463_s25 + $0x28] sm:$0x1]  ;;  %v6277_v31 = vld [vmem:[%s8773_s1 + $0x38] sm:$0xff]  }
  0x1b   : > { %5839 = vmatprep.subr.bf16.mxu0 %v6273_v17  ;;  %6231 = vmatprep.subr.bf16.mxu1 %v6273_v17  ;;  %v4971_v54 = vcombine.low %v291_v43, %v301_v48  ;;  %v478_v55 = vrot.slane %v477_v44, 4  ;;  %v488_v56 = vrot.slane %v487_v45, 4  ;;  %v314_v57 = vrot.slane %v312_v46, 5  ;;  %v6571_v42 = vld [vmem:[%s6463_s25 + $0x34] sm:$0xf] }
  0x1c   : > { %v309_v58 = vor.u32 %v308_v50, %v305_v49  ;;  %v318_v59 = vrot.slane %v316_v51, 4  ;;  %v322_v60 = vshll.u32 %v6508_v40, 16  ;;  %v495_v0 = vshrl.u32 %v6516_v47, 16  ;;  %v6576_v48 = vld [vmem:[%s6463_s25 + $0x38] sm:$0x1] }
  0x1d   : > { %5847 = vmatprep.mubr.bf16.mxu0 %v4971_v54  ;;  %v483_v62 = vsel %vm6496_vm2, %v478_v55, %v482_v36  ;;  %v493_v63 = vsel %vm6496_vm2, %v488_v56, %v492_v39  ;;  %v498_v1 = vshll.u32 %v6516_v47, 16  ;;  %v504_v11 = vshll.u32 %v6522_v52, 16  ;;  %v6568_v36 = vld [vmem:[%s6463_s25 + $0x30] sm:$0xf]  ;;  %v6758_v20 = vld [vmem:[%s6463_s25 + $0x74] sm:$0xf] }
  0x1e   : > { %5840 = vmatpush3.bf16.msra.mxu0 %v6273_v17  ;;  %6239 = vmatpush3.bf16.msra.mxu1 %v6273_v17  ;;  %v4979_v2 = vcombine.low %v483_v62, %v493_v63  ;;  %v310_v3 = vrot.slane %v309_v58, 4  ;;  %v319_v7 = vor.u32 %v318_v59, %v314_v57  ;;  %v324_v8 = vrot.slane %v322_v60, 5  ;;  %v6587_v63 = vld [vmem:[%s6463_s25 + $0xa0] sm:$0xf] }
  0x1f   : > { %5841 = vmatprep.subr.bf16.mxu0 %v6274_v33  ;;  %6232 = vmatprep.subr.bf16.mxu1 %v6274_v33  ;;  %v497_v9 = vrot.slane %v495_v0, 4  ;;  %v500_v10 = vrot.slane %v498_v1, 5  ;;  %v508_v12 = vshrl.u32 %v6522_v52, 16  ;;  %v514_v18 = vshll.u32 %v6529_v61, 16  ;;  %v6279_v1 = vld [vmem:[%s8773_s1 + $0x30] sm:$0xff]  }
  0x20   : > { %v315_v15 = vsel %vm6496_vm2, %v310_v3, %v314_v57  ;;  %v320_v17 = vrot.slane %v319_v7, 4  ;;  %5863 = vmatprep.mubr.bf16.mxu1 %v4979_v2  ;;  %v506_v23 = vrot.slane %v504_v11, 5  ;;  %v327_v28 = vshrl.u32 %v6540_v13, 16  ;;  %v6280_v2 = vld [vmem:[%s8773_s1 + $0xb0] sm:$0xff]  }
  0x21   : > { %v501_v22 = vor.u32 %v500_v10, %v497_v9  ;;  %v510_v24 = vrot.slane %v508_v12, 4  ;;  %v516_v30 = vrot.slane %v514_v18, 5  ;;  %v330_v34 = vshll.u32 %v6540_v13, 16  ;;  %v6596_v9 = vld [vmem:[%s6463_s25 + $0xa4] sm:$0xf] }
  0x22   : > { %5842 = vmatpush3.bf16.msra.mxu0 %v6274_v33  ;;  %6240 = vmatpush3.bf16.msra.mxu1 %v6274_v33  ;;  %v325_v29 = vsel %vm6496_vm2, %v320_v17, %v324_v8  ;;  %v6278_v33 = vld [vmem:[%s8773_s1 + $0xb8] sm:$0xff]   ;;  %v336_v35 = vshll.u32 %v6549_v19, 16  ;;  %v329_v41 = vrot.slane %v327_v28, 4  ;;  %v340_v45 = vshrl.u32 %v6549_v19, 16 }
  0x23   : > { %5843 = vmatprep.subr.bf16.mxu0 %v6275_v53  ;;  %6233 = vmatprep.subr.bf16.mxu1 %v6275_v53  ;;  %v4972_v37 = vcombine.low %v315_v15, %v325_v29  ;;  %v502_v38 = vrot.slane %v501_v22, 4  ;;  %v511_v39 = vor.u32 %v510_v24, %v506_v23  ;;  %v332_v43 = vrot.slane %v330_v34, 5  ;;  %v6608_v24 = vld [vmem:[%s6463_s25 + $0xb0] sm:$0xf]  ;;  %v6281_v34 = vld [vmem:[%s8773_s1 + $0x28] sm:$0xff]  }
  0x24   : > { %v338_v44 = vrot.slane %v336_v35, 5  ;;  %v346_v46 = vshll.u32 %v6554_v25, 16  ;;  %v351_v51 = vshrl.u32 %v6568_v36, 16  ;;  %v342_v55 = vrot.slane %v340_v45, 4 }
  0x25   : > { %v507_v49 = vsel %vm6496_vm2, %v502_v38, %v506_v23  ;;  %v512_v50 = vrot.slane %v511_v39, 4  ;;  %v333_v54 = vor.u32 %v332_v43, %v329_v41  ;;  %v360_v57 = vshll.u32 %v6571_v42, 16  ;;  %v6623_v43 = vld [vmem:[%s6463_s25 + $0xb8] sm:$0x1] }
  0x26   : > { %5844 = vmatpush3.bf16.msra.mxu0 %v6275_v53  ;;  %6241 = vmatpush3.bf16.msra.mxu1 %v6275_v53  ;;  %v354_v53 = vshll.u32 %v6568_v36, 16  ;;  %v348_v56 = vrot.slane %v346_v46, 5  ;;  %v353_v59 = vrot.slane %v351_v51, 4  ;;  %v364_v62 = vshrl.u32 %v6571_v42, 16 }
  0x27   : > { %5845 = vmatprep.subr.bf16.mxu0 %v6276_v14  ;;  %6234 = vmatprep.subr.bf16.mxu1 %v6276_v14  ;;  %v517_v58 = vsel %vm6496_vm2, %v512_v50, %v516_v30  ;;  %v334_v3 = vrot.slane %v333_v54, 4  ;;  %v343_v7 = vor.u32 %v342_v55, %v338_v44  ;;  %v362_v8 = vrot.slane %v360_v57, 5 }
  0x28   : > { %v356_v60 = vrot.slane %v354_v53, 5  ;;  %v4980_v0 = vcombine.low %v507_v49, %v517_v58  ;;  %v366_v11 = vrot.slane %v364_v62, 4  ;;  %v370_v12 = vshll.u32 %v6576_v48, 16 }
  0x29   : > { %v519_v15 = vshrl.u32 %v6587_v63, 16  ;;  %v339_v17 = vsel %vm6496_vm2, %v334_v3, %v338_v44  ;;  %v344_v18 = vrot.slane %v343_v7, 4  ;;  %v522_v22 = vshll.u32 %v6587_v63, 16  ;;  %v6644_v7 = vld [vmem:[%s6463_s25 + $0x44] sm:$0xf] }
  0x2a   : > { %5846 = vmatpush3.bf16.msra.mxu0 %v6276_v14  ;;  %6242 = vmatpush3.bf16.msra.mxu1 %v6276_v14  ;;  %v357_v10 = vor.u32 %v356_v60, %v353_v59  ;;  %v6600_v14 = vld [vmem:[%s6463_s25 + $0xa8] sm:$0x1]  ;;  %v528_v23 = vshll.u32 %v6596_v9, 16  ;;  %v367_v29 = vor.u32 %v366_v11, %v362_v8  ;;  %v372_v30 = vrot.slane %v370_v12, 5  ;;  %v6635_v59 = vld [vmem:[%s6463_s25 + $0x40] sm:$0xf] }
  0x2b   : > { %5875 = vmatprep.subr.bf16.mxu1 %v6277_v31  ;;  %5919 = vmatprep.subr.bf16.mxu0 %v6278_v33  ;;  %v521_v35 = vrot.slane %v519_v15, 4  ;;  %v349_v38 = vsel %vm6496_vm2, %v344_v18, %v348_v56  ;;  %v532_v41 = vshrl.u32 %v6596_v9, 16  ;;  %v538_v49 = vshll.u32 %v6600_v14, 16  ;;  %v6648_v15 = vld [vmem:[%s6463_s25 + $0x48] sm:$0x1] }
  0x2c   : > { %v358_v28 = vrot.slane %v357_v10, 4  ;;  %v530_v39 = vrot.slane %v528_v23, 5  ;;  %v4973_v44 = vcombine.low %v339_v17, %v349_v38  ;;  %v368_v46 = vrot.slane %v367_v29, 4 }
  0x2d   : > { %5848 = vmatmul.mubr.bf16.vlgmr.msra.gmra.mxu0 %v4972_v37  ;;  %5864 = vmatmul.mubr.bf16.vlgmr.msra.gmra.mxu1 %v4980_v0  ;;  %v6614_v37 = vld [vmem:[%s6463_s25 + $0xb4] sm:$0xf]  ;;  %v534_v51 = vrot.slane %v532_v41, 4  ;;  %v543_v53 = vshrl.u32 %v6608_v24, 16  ;;  %v546_v54 = vshll.u32 %v6608_v24, 16  ;;  %v540_v56 = vrot.slane %v538_v49, 5 }
  0x2e   : > { %5876 = vmatpush3.bf16.msra.mxu1 %v6277_v31  ;;  %5920 = vmatpush3.bf16.msra.mxu0 %v6278_v33  ;;  %v6282_v31 = vld [vmem:[%s8773_s1 + $0xa8] sm:$0xff]   ;;  %v524_v33 = vrot.slane %v522_v22, 5  ;;  %v363_v45 = vsel %vm6496_vm2, %v358_v28, %v362_v8  ;;  %v373_v55 = vsel %vm6496_vm2, %v368_v46, %v372_v30  ;;  %v552_v57 = vshll.u32 %v6614_v37, 16  ;;  %v6655_v28 = vld [vmem:[%s6463_s25 + $0x50] sm:$0xf] }
  0x2f   : > { %5877 = vmatprep.subr.bf16.mxu1 %v6279_v1  ;;  %5921 = vmatprep.subr.bf16.mxu0 %v6280_v2  ;;  %v556_v58 = vshrl.u32 %v6614_v37, 16  ;;  %v4974_v60 = vcombine.low %v363_v45, %v373_v55  ;;  %v535_v0 = vor.u32 %v534_v51, %v530_v39  ;;  %v545_v3 = vrot.slane %v543_v53, 4  ;;  %v6286_v51 = vld [vmem:[%s8773_s1 + $0x98] sm:$0xff]  }
  0x30   : > { %v525_v50 = vor.u32 %v524_v33, %v521_v35  ;;  %5851 = vmatprep.mubr.bf16.mxu0 %v4973_v44  ;;  %v548_v8 = vrot.slane %v546_v54, 5  ;;  %v554_v10 = vrot.slane %v552_v57, 5  ;;  %v562_v12 = vshll.u32 %v6623_v43, 16  ;;  %v6659_v33 = vld [vmem:[%s6463_s25 + $0x54] sm:$0xf] }
  0x31   : > { %v558_v11 = vrot.slane %v556_v58, 4  ;;  %v536_v18 = vrot.slane %v535_v0, 4  ;;  %v375_v22 = vshrl.u32 %v6635_v59, 16  ;;  %v378_v23 = vshll.u32 %v6635_v59, 16 }
  0x32   : > { %5878 = vmatpush3.bf16.msra.mxu1 %v6279_v1  ;;  %5922 = vmatpush3.bf16.msra.mxu0 %v6280_v2  ;;  %v526_v62 = vrot.slane %v525_v50, 4  ;;  %v6283_v1 = vld [vmem:[%s8773_s1 + $0x20] sm:$0xff]   ;;  %v549_v29 = vor.u32 %v548_v8, %v545_v3  ;;  %v564_v35 = vrot.slane %v562_v12, 5  ;;  %v384_v38 = vshll.u32 %v6644_v7, 16 }
  0x33   : > { %5879 = vmatprep.subr.bf16.mxu1 %v6281_v34  ;;  %v6284_v2 = vld [vmem:[%s8773_s1 + $0xa0] sm:$0xff]   ;;  %5923 = vmatprep.subr.bf16.mxu0 %v6282_v31  ;;  %v559_v30 = vor.u32 %v558_v11, %v554_v10  ;;  %v541_v41 = vsel %vm6496_vm2, %v536_v18, %v540_v56  ;;  %v380_v44 = vrot.slane %v378_v23, 5  ;;  %v388_v45 = vshrl.u32 %v6644_v7, 16  ;;  %v6288_v18 = vld [vmem:[%s8773_s1 + $0x90] sm:$0xff]  }
  0x34   : > { %v531_v17 = vsel %vm6496_vm2, %v526_v62, %v530_v39  ;;  %v377_v39 = vrot.slane %v375_v22, 4  ;;  %v550_v46 = vrot.slane %v549_v29, 4  ;;  %v386_v50 = vrot.slane %v384_v38, 5  ;;  %v6682_v3 = vld [vmem:[%s6463_s25 + $0xc0] sm:$0xf] }
  0x35   : > { %5852 = vmatmul.mubr.bf16.gmra.mxu0 %v4974_v60  ;;  %v560_v49 = vrot.slane %v559_v30, 4  ;;  %v390_v54 = vrot.slane %v388_v45, 4  ;;  %v394_v55 = vshll.u32 %v6648_v15, 16  ;;  %v399_v56 = vshrl.u32 %v6655_v28, 16  ;;  %v6677_v60 = vld [vmem:[%s6463_s25 + $0x58] sm:$0x1] }
  0x36   : > { %5880 = vmatpush3.bf16.msra.mxu1 %v6281_v34  ;;  %5924 = vmatpush3.bf16.msra.mxu0 %v6282_v31  ;;  %v6285_v34 = vld [vmem:[%s8773_s1 + $0x18] sm:$0xff]   ;;  %v4981_v31 = vcombine.low %v531_v17, %v541_v41  ;;  %v381_v53 = vor.u32 %v380_v44, %v377_v39  ;;  %v555_v57 = vsel %vm6496_vm2, %v550_v46, %v554_v10  ;;  %v402_v62 = vshll.u32 %v6655_v28, 16  ;;  %v6685_v10 = vld [vmem:[%s6463_s25 + $0xc4] sm:$0xf]  ;;  %v6695_v30 = vld [vmem:[%s6463_s25 + $0xc8] sm:$0x1] }
  0x37   : > { %5881 = vmatprep.subr.bf16.mxu1 %v6283_v1  ;;  %5925 = vmatprep.subr.bf16.mxu0 %v6284_v2  ;;  %v565_v58 = vsel %vm6496_vm2, %v560_v49, %v564_v35  ;;  %v408_v0 = vshll.u32 %v6659_v33, 16  ;;  %8788 = vst [vmem:[#allocation2_spill] sm:$0xff] %v6682_v3  ;;  %v391_v12 = vor.u32 %v390_v54, %v386_v50  ;;  %v396_v17 = vrot.slane %v394_v55, 5  ;;  %v6702_v44 = vld [vmem:[%s6463_s25 + $0xd0] sm:$0xf] }
  0x38   : > { %5867 = vmatprep.mubr.bf16.mxu1 %v4981_v31  ;;  %v4982_v8 = vcombine.low %v555_v57, %v565_v58  ;;  %v382_v11 = vrot.slane %v381_v53, 4  ;;  %v401_v22 = vrot.slane %v399_v56, 4  ;;  %v404_v23 = vrot.slane %v402_v62, 5  ;;  %8789 = vst [vmem:[#allocation3_spill] sm:$0xff] %v6702_v44  ;;  %v6707_v53 = vld [vmem:[%s6463_s25 + $0xd4] sm:$0xf] }
  0x39   : > { %v410_v29 = vrot.slane %v408_v0, 5  ;;  %v392_v38 = vrot.slane %v391_v12, 4  ;;  %v418_v41 = vshll.u32 %v6677_v60, 16  ;;  %v567_v39 = vshrl.u32 %v6682_v3, 16 }
  0x3a   : > { %5882 = vmatpush3.bf16.msra.mxu1 %v6283_v1  ;;  %5926 = vmatpush3.bf16.msra.mxu0 %v6284_v2  ;;  %v6287_v1 = vld [vmem:[%s8773_s1 + $0x10] sm:$0xff]   ;;  %v412_v2 = vshrl.u32 %v6659_v33, 16  ;;  %v387_v35 = vsel %vm6496_vm2, %v382_v11, %v386_v50  ;;  %v405_v45 = vor.u32 %v404_v23, %v401_v22  ;;  %v570_v46 = vshll.u32 %v6682_v3, 16  ;;  %v6289_v50 = vld [vmem:[%s8773_s1 + $0x8] sm:$0xff]  }
  0x3b   : > { %5883 = vmatprep.subr.bf16.mxu1 %v6285_v34  ;;  %5927 = vmatprep.subr.bf16.mxu0 %v6286_v51  ;;  %v576_v49 = vshll.u32 %v6685_v10, 16  ;;  %v397_v54 = vsel %vm6496_vm2, %v392_v38, %v396_v17  ;;  %v420_v55 = vrot.slane %v418_v41, 5  ;;  %v569_v56 = vrot.slane %v567_v39, 4  ;;  %v6723_v38 = vld [vmem:[%s6463_s25 + $0xd8] sm:$0x1] }
  0x3c   : > { %5868 = vmatmul.mubr.bf16.gmra.mxu1 %v4982_v8  ;;  %v414_v31 = vrot.slane %v412_v2, 4  ;;  %v580_v57 = vshrl.u32 %v6685_v10, 16  ;;  %v4975_v58 = vcombine.low %v387_v35, %v397_v54  ;;  %v406_v62 = vrot.slane %v405_v45, 4  ;;  %8790 = vst [vmem:[#allocation4_spill] sm:$0xff] %v6723_v38  ;;  %v6727_v41 = vld [vmem:[%s6463_s25 + $0x60] sm:$0xf] }
  0x3d   : > { %v572_v8 = vrot.slane %v570_v46, 5  ;;  %v578_v11 = vrot.slane %v576_v49, 5  ;;  %v591_v17 = vshrl.u32 %v6702_v44, 16  ;;  %v594_v35 = vshll.u32 %v6702_v44, 16  ;;  %v6731_v49 = vld [vmem:[%s6463_s25 + $0x64] sm:$0xf] }
  0x3e   : > { %5884 = vmatpush3.bf16.msra.mxu1 %v6285_v34  ;;  %5928 = vmatpush3.bf16.msra.mxu0 %v6286_v51  ;;  %v6290_v34 = vld [vmem:[%s8773_s1 + $0x88] sm:$0xff]   ;;  %v415_v0 = vor.u32 %v414_v31, %v410_v29  ;;  %v582_v12 = vrot.slane %v580_v57, 4  ;;  %v586_v51 = vshll.u32 %v6695_v30, 16  ;;  %v411_v22 = vsel %vm6496_vm2, %v406_v62, %v410_v29  ;;  %v6291_v29 = vld [vmem:[%s8773_s1] sm:$0xff]  }
  0x3f   : > { %5885 = vmatprep.subr.bf16.mxu1 %v6287_v1  ;;  %5929 = vmatprep.subr.bf16.mxu0 %v6288_v18  ;;  %v573_v2 = vor.u32 %v572_v8, %v569_v56  ;;  %v593_v31 = vrot.slane %v591_v17, 4  ;;  %v600_v46 = vshll.u32 %v6707_v53, 16  ;;  %v596_v56 = vrot.slane %v594_v35, 5 }
  0x40   : > { %5855 = vmatprep.mubr.bf16.mxu0 %v4975_v58  ;;  %v416_v23 = vrot.slane %v415_v0, 4  ;;  %v583_v39 = vor.u32 %v582_v12, %v578_v11  ;;  %v588_v45 = vrot.slane %v586_v51, 5  ;;  %v604_v57 = vshrl.u32 %v6707_v53, 16  ;;  %v6740_v58 = vld [vmem:[%s6463_s25 + $0x68] sm:$0x1] }
  0x41   : > { %v574_v54 = vrot.slane %v573_v2, 4  ;;  %v602_v8 = vrot.slane %v600_v46, 5  ;;  %v610_v12 = vshll.u32 %v6723_v38, 16  ;;  %v6747_v51 = vld [vmem:[%s6463_s25 + $0x70] sm:$0xf]  ;;  %v423_v35 = vshrl.u32 %v6727_v41, 16 }
  0x42   : > { %5886 = vmatpush3.bf16.msra.mxu1 %v6287_v1  ;;  %5930 = vmatpush3.bf16.msra.mxu0 %v6288_v18  ;;  %v421_v1 = vsel %vm6496_vm2, %v416_v23, %v420_v55  ;;  %v6292_v18 = vld [vmem:[%s8773_s1 + $0x80] sm:$0xff]   ;;  %v584_v0 = vrot.slane %v583_v39, 4  ;;  %v6752_v55 = vld [vmem:[%s8773_s1 + $0xf8] sm:$0xff]   ;;  %v597_v23 = vor.u32 %v596_v56, %v593_v31  ;;  %v606_v2 = vrot.slane %v604_v57, 4 }
  0x43   : > { %5887 = vmatprep.subr.bf16.mxu1 %v6289_v50  ;;  %5931 = vmatprep.subr.bf16.mxu0 %v6290_v34  ;;  %v4976_v62 = vcombine.low %v411_v22, %v421_v1  ;;  %v579_v17 = vsel %vm6496_vm2, %v574_v54, %v578_v11  ;;  %v612_v39 = vrot.slane %v610_v12, 5  ;;  %v426_v46 = vshll.u32 %v6727_v41, 16  ;;  %v6767_v11 = vld [vmem:[%s8773_s1 + $0x138] sm:$0xff]  }
  0x44   : > { %v589_v22 = vsel %vm6496_vm2, %v584_v0, %v588_v45  ;;  %v432_v1 = vshll.u32 %v6731_v49, 16  ;;  %v598_v54 = vrot.slane %v597_v23, 4  ;;  %v607_v56 = vor.u32 %v606_v2, %v602_v8  ;;  %v6772_v12 = vld [vmem:[%s6463_s25 + $0x78] sm:$0x1] }
  0x45   : > { %5856 = vmatmul.mubr.bf16.gmra.mxu0 %v4976_v62  ;;  %v4983_v31 = vcombine.low %v579_v17, %v589_v22  ;;  %v428_v57 = vrot.slane %v426_v46, 5  ;;  %v436_v45 = vshrl.u32 %v6731_v49, 16  ;;  %v442_v0 = vshll.u32 %v6740_v58, 16 }
  0x46   : > { %5888 = vmatpush3.bf16.msra.mxu1 %v6289_v50  ;;  %v425_v50 = vrot.slane %v423_v35, 4  ;;  %5932 = vmatpush3.bf16.msra.mxu0 %v6290_v34  ;;  %v434_v62 = vrot.slane %v432_v1, 5  ;;  %v603_v21 = vsel %vm6496_vm2, %v598_v54, %v602_v8  ;;  %v608_v3 = vrot.slane %v607_v56, 4  ;;  %v1157_v54 = vld [vmem:[%s6463_s25] sm:$0xe] }
  0x47   : > { %5889 = vmatprep.subr.bf16.mxu1 %v6291_v29  ;;  %5933 = vmatprep.subr.bf16.mxu0 %v6292_v18  ;;  %v447_v17 = vshrl.u32 %v6747_v51, 16  ;;  %v450_v23 = vshll.u32 %v6747_v51, 16  ;;  %v438_v2 = vrot.slane %v436_v45, 4  ;;  %v444_v35 = vrot.slane %v442_v0, 5 }
  0x48   : > { %5871 = vmatprep.mubr.bf16.mxu1 %v4983_v31  ;;  %v429_v34 = vor.u32 %v428_v57, %v425_v50  ;;  %v456_v22 = vshll.u32 %v6758_v20, 16  ;;  %v613_v46 = vsel %vm6496_vm2, %v608_v3, %v612_v39  ;;  %v460_v8 = vshrl.u32 %v6758_v20, 16  ;;  %v1158_v50 = vld [vmem:[%s6463_s25 + $0x10] sm:$0xe] }
  0x49   : > { %v449_v1 = vrot.slane %v447_v17, 4  ;;  %v452_v31 = vrot.slane %v450_v23, 5  ;;  %v4984_v56 = vcombine.low %v603_v21, %v613_v46  ;;  %v466_v0 = vshll.u32 %v6772_v12, 16 }
  0x4a   : > { %5890 = vmatpush3.bf16.msra.mxu1 %v6291_v29  ;;  %5934 = vmatpush3.bf16.msra.mxu0 %v6292_v18  ;;  %v430_v38 = vrot.slane %v429_v34, 4  ;;  %v439_v29 = vor.u32 %v438_v2, %v434_v62  ;;  %v458_v44 = vrot.slane %v456_v22, 5  ;;  %v462_v45 = vrot.slane %v460_v8, 4  ;;  %v1159_v8 = vld [vmem:[%s6463_s25 + $0x20] sm:$0xe] }
  0x4b   : > { %5963 = vmatprep.subr.bf16.mxu1 %v6752_v55  ;;  %6007 = vmatprep.subr.bf16.mxu0 %v6767_v11  ;;  %v453_v57 = vor.u32 %v452_v31, %v449_v1  ;;  %v5015_v18 = vrot.slane %v1157_v54, 9  ;;  %v1214_v21 = vrot.slane %v6508_v40, 5  ;;  %v1204_v23 = vrot.slane %v6472_v5, 5 }
  0x4c   : > { %5872 = vmatmul.mubr.bf16.gmra.mxu1 %v4984_v56  ;;  %v435_v39 = vsel %vm6496_vm2, %v430_v38, %v434_v62  ;;  %v440_v17 = vrot.slane %v439_v29, 4  ;;  %v463_v2 = vor.u32 %v462_v45, %v458_v44  ;;  %v468_v22 = vrot.slane %v466_v0, 5 }
  0x4d   : > { %v454_v34 = vrot.slane %v453_v57, 4  ;;  %v8793_v46 = vcombine.low %v6469_v4, %v6472_v5  ;;  %v1211_v1 = vrot.slane %v6502_v32, 5  ;;  %v1205_v31 = vsel %vm6789_vm5, %v5015_v18, %v1204_v23  ;;  %v1160_v5 = vld [vmem:[%s6463_s25 + $0x30] sm:$0xe] }
  0x4e   : > { %v445_v40 = vsel %vm6496_vm2, %v440_v17, %v444_v35  ;;  %v1206_v38 = vrot.slane %v1204_v23, 4  ;;  %v5016_v62 = vrot.slane %v1158_v50, 9  ;;  %v464_v29 = vrot.slane %v463_v2, 4  ;;  %v6298_v23 = vld [vmem:[%s8773_s1 + $0xf0] sm:$0xff]  }
  0x4f   : > { %5891 = vmatprep.mubr.bf16.mxu1 %v8793_v46  ;;  %v4977_v54 = vcombine.low %v435_v39, %v445_v40  ;;  %v459_v56 = vsel %vm6496_vm2, %v454_v34, %v458_v44  ;;  %v4994_v4 = vcombine.low %v6492_v26, %v6502_v32  ;;  %v8794_v57 = vrot.slane %v6475_v6, 5  ;;  %v1161_v34 = vld [vmem:[%s6463_s25 + $0x40] sm:$0xe]  ;;  %v1162_v40 = vld [vmem:[%s6463_s25 + $0x50] sm:$0xe] }
  0x50   : > { %v1213_v45 = vrot.slane %v1211_v1, 4  ;;  %v5017_v0 = vrot.slane %v1159_v8, 9  ;;  %v1218_v50 = vrot.slane %v6549_v19, 5  ;;  %v469_v44 = vsel %vm6496_vm2, %v464_v29, %v468_v22  ;;  %v1163_v8 = vld [vmem:[%s6463_s25 + $0x60] sm:$0xe] }
  0x51   : > { %v1208_v35 = vsel %vm6789_vm5, %v1206_v38, %v8794_v57  ;;  %5859 = vmatprep.mubr.bf16.mxu0 %v4977_v54  ;;  %v1221_v39 = vrot.slane %v6554_v25, 5  ;;  %v4978_v17 = vcombine.low %v459_v56, %v469_v44  ;;  %v1212_v26 = vsel %vm6789_vm5, %v5016_v62, %v1211_v1  ;;  %v6301_v38 = vld [vmem:[%s8773_s1 + $0xe8] sm:$0xff]   ;;  %v6300_v44 = vld [vmem:[%s8773_s1 + $0x130] sm:$0xff]  }
  0x52   : > { %v5045_v18 = vcombine.low %v1205_v31, %v1208_v35  ;;  %v4995_v6 = vcombine.low %v6540_v13, %v6549_v19  ;;  %v1220_v32 = vrot.slane %v1218_v50, 4  ;;  %v1215_v2 = vsel %vm6789_vm5, %v1213_v45, %v1214_v21 }
  0x53   : > { %v5018_v22 = vrot.slane %v1160_v5, 9  ;;  %v1225_v46 = vrot.slane %v6571_v42, 5  ;;  %v1228_v25 = vrot.slane %v6576_v48, 5  ;;  %5860 = vmatmul.mubr.bf16.gmra.mxu0 %v4978_v17  ;;  %v1219_v13 = vsel %vm6789_vm5, %v5017_v0, %v1218_v50  ;;  %v6847_v5 = vld [vmem:[%s6463_s25 + $0x70] sm:$0xe] }
  0x54   : > { %5892 = vmatmul.mubr.bf16.vlgmr.msra.gmra.mxu1 %v4994_v4  ;;  %v1222_v19 = vsel %vm6789_vm5, %v1220_v32, %v1221_v39  ;;  %v5019_v1 = vrot.slane %v1161_v34, 9  ;;  %v1232_v31 = vrot.slane %v6644_v7, 5  ;;  %5935 = vmatprep.mubr.bf16.mxu0 %v5045_v18  ;;  %v1235_v48 = vrot.slane %v6648_v15, 5  ;;  %v6305_v39 = vld [vmem:[%s8773_s1 + $0xe0] sm:$0xff]  }
  0x55   : > { %5964 = vmatpush3.bf16.msra.mxu1 %v6752_v55  ;;  %v1227_v21 = vrot.slane %v1225_v46, 4  ;;  %5895 = vmatprep.mubr.bf16.mxu1 %v4995_v6  ;;  %v5046_v54 = vcombine.low %v1212_v26, %v1215_v2  ;;  %v5047_v56 = vcombine.low %v1219_v13, %v1222_v19  ;;  %v4996_v29 = vcombine.low %v6568_v36, %v6571_v42 }
  0x56   : > { %5965 = vmatprep.subr.bf16.mxu1 %v6298_v23  ;;  %v1234_v62 = vrot.slane %v1232_v31, 4  ;;  %v1239_v4 = vrot.slane %v6659_v33, 5  ;;  %v6851_v15 = vsel %vm6789_vm5, %v5018_v22, %v1225_v46  ;;  %v5020_v57 = vrot.slane %v1162_v40, 9 }
  0x57   : > { %v6855_v55 = vsel %vm6789_vm5, %v1227_v21, %v1228_v25  ;;  %v1246_v35 = vrot.slane %v6731_v49, 5  ;;  %v6860_v36 = vsel %vm6789_vm5, %v5019_v1, %v1232_v31  ;;  %v1242_v0 = vrot.slane %v6677_v60, 5  ;;  %v1167_v25 = vld [vmem:[%s6463_s25 + $0xa0] sm:$0xe]  ;;  %v1168_v1 = vld [vmem:[%s6463_s25 + $0xb0] sm:$0xe] }
  0x58   : > { %v6864_v42 = vsel %vm6789_vm5, %v1234_v62, %v1235_v48  ;;  %v1241_v45 = vrot.slane %v1239_v4, 4  ;;  %v1263_v50 = vrot.slane %v6485_v16, 5  ;;  %v4997_v18 = vcombine.low %v6635_v59, %v6644_v7  ;;  %v6913_v31 = vld [vmem:[%s6463_s25 + $0x80] sm:$0xf]  ;;  %v6916_v21 = vld [vmem:[%s6463_s25 + $0x84] sm:$0xf] }
  0x59   : > { %5966 = vmatpush3.bf16.msra.mxu1 %v6298_v23  ;;  %v5021_v17 = vrot.slane %v1163_v8, 9  ;;  %v1249_v26 = vrot.slane %v6740_v58, 5  ;;  %v5048_v60 = vcombine.low %v6851_v15, %v6855_v55  ;;  %v4998_v6 = vcombine.low %v6655_v28, %v6659_v33  ;;  %v1166_v23 = vld [vmem:[%s6463_s25 + $0x90] sm:$0xe]  ;;  %v6304_v33 = vld [vmem:[%s8773_s1 + $0x128] sm:$0xff]   ;;  %v6321_v16 = vld [vmem:[%s8773_s1 + $0xc0] sm:$0xff]  }
  0x5a   : > { %5967 = vmatprep.subr.bf16.mxu1 %v6301_v38  ;;  %v4999_v32 = vcombine.low %v6727_v41, %v6731_v49  ;;  %v5049_v59 = vcombine.low %v6860_v36, %v6864_v42  ;;  %v6888_v7 = vsel %vm6789_vm5, %v5020_v57, %v1239_v4  ;;  %v1248_v58 = vrot.slane %v1246_v35, 4  ;;  %v1170_v42 = vld [vmem:[%s6463_s25 + $0xd0] sm:$0xe]  ;;  %v6994_v41 = vld [vmem:[%s6463_s25 + $0x14] sm:$0xf] }
  0x5b   : > { %5936 = vmatmul.mubr.bf16.vlgmr.msra.gmra.mxu0 %v5046_v54  ;;  %v5022_v34 = vrot.slane %v6847_v5, 9  ;;  %v6894_v28 = vsel %vm6789_vm5, %v1241_v45, %v1242_v0  ;;  %v1253_v2 = vrot.slane %v6758_v20, 5  ;;  %v1256_v22 = vrot.slane %v6772_v12, 5  ;;  %v6309_v45 = vld [vmem:[%s8773_s1 + $0xd8] sm:$0xff]   ;;  %v7037_v49 = vld [vmem:[%s6463_s25 + $0x24] sm:$0xf] }
  0x5c   : > { %5896 = vmatmul.mubr.bf16.gmra.mxu1 %v4996_v29  ;;  %6008 = vmatpush3.bf16.msra.mxu0 %v6767_v11  ;;  %v5002_v46 = vcombine.low %v6516_v47, %v6522_v52  ;;  %v6906_v11 = vsel %vm6789_vm5, %v5021_v17, %v1246_v35  ;;  %v5000_v40 = vcombine.low %v6747_v51, %v6758_v20  ;;  %v5024_v13 = vrot.slane %v1166_v23, 9 }
  0x5d   : > { %5939 = vmatprep.mubr.bf16.mxu0 %v5047_v56  ;;  %6009 = vmatprep.subr.bf16.mxu0 %v6300_v44  ;;  %v1267_v19 = vrot.slane %v6522_v52, 5  ;;  %v5001_v48 = vcombine.low %v6913_v31, %v6916_v21  ;;  %v1270_v62 = vrot.slane %v6529_v61, 5  ;;  %v5003_v8 = vcombine.low %v6587_v63, %v6596_v9  ;;  %v1169_v61 = vld [vmem:[%s6463_s25 + $0xc0] sm:$0xe] }
  0x5e   : > { %5899 = vmatprep.mubr.bf16.mxu1 %v4997_v18  ;;  %5968 = vmatpush3.bf16.msra.mxu1 %v6301_v38  ;;  %v5025_v54 = vrot.slane %v1167_v25, 9  ;;  %v5050_v56 = vcombine.low %v6888_v7, %v6894_v28  ;;  %v6307_v38 = vld [vmem:[%s8773_s1 + $0x120] sm:$0xff]   ;;  %v1260_v29 = vrot.slane %v6916_v21, 5  ;;  %v6936_v55 = vsel %vm6789_vm5, %v1248_v58, %v1249_v26  ;;  %v7057_v7 = vld [vmem:[%s6463_s25 + $0x28] sm:$0x1] }
  0x5f   : > { %5969 = vmatprep.subr.bf16.mxu1 %v6305_v39  ;;  %v6931_v4 = vsel %vm6789_vm5, %v5024_v13, %v1267_v19  ;;  %v1269_v15 = vrot.slane %v1267_v19, 4  ;;  %v1274_v57 = vrot.slane %v6596_v9, 5  ;;  %v1277_v35 = vrot.slane %v6600_v14, 5 }
  0x60   : > { %6010 = vmatpush3.bf16.msra.mxu0 %v6300_v44  ;;  %v5004_v36 = vcombine.low %v6608_v24, %v6614_v37  ;;  %v5026_v44 = vrot.slane %v1168_v1, 9  ;;  %v1281_v18 = vrot.slane %v6614_v37, 5  ;;  %v1284_v17 = vrot.slane %v6623_v43, 5  ;;  %v6313_v43 = vld [vmem:[%s8773_s1 + $0xd0] sm:$0xff]   ;;  %v8795_v1 = vld [vmem:[#allocation3_spill] sm:$0xff] }
  0x61   : > { %6011 = vmatprep.subr.bf16.mxu0 %v6304_v33  ;;  %v6948_v0 = vsel %vm6789_vm5, %v1269_v15, %v1270_v62  ;;  %v1255_v14 = vrot.slane %v1253_v2, 4  ;;  %v6958_v23 = vsel %vm6789_vm5, %v5025_v54, %v1274_v57  ;;  %v1276_v58 = vrot.slane %v1274_v57, 4  ;;  %v5133_v15 = vld [vmem:[%s6463_s25 + $0x10] sm:$0xf]  ;;  %v5136_v62 = vld [vmem:[%s6463_s25 + $0x20] sm:$0xf] }
  0x62   : > { %5970 = vmatpush3.bf16.msra.mxu1 %v6305_v39  ;;  %v5054_v26 = vcombine.low %v6931_v4, %v6948_v0  ;;  %v6965_v39 = vsel %vm6789_vm5, %v5026_v44, %v1281_v18  ;;  %v1283_v25 = vrot.slane %v1281_v18, 4  ;;  %v5027_v13 = vrot.slane %v1169_v61, 9  ;;  %v7159_v0 = vld [vmem:[%s6463_s25 + $0x58] sm:$0x1]  ;;  %v5148_v37 = vld [vmem:[%s6463_s25 + $0x60] sm:$0xf] }
  0x63   : > { %5940 = vmatmul.mubr.bf16.gmra.mxu0 %v5048_v60  ;;  %v1288_v19 = vrot.slane %v6685_v10, 5  ;;  %v6970_v60 = vsel %vm6789_vm5, %v1276_v58, %v1277_v35  ;;  %v5028_v54 = vrot.slane %v1170_v42, 9  ;;  %5971 = vmatprep.subr.bf16.mxu1 %v6309_v45  ;;  %v8796_v42 = vld [vmem:[#allocation4_spill] sm:$0xff]  ;;  %v1991_v18 = vshrl.u32 %v5133_v15, 16 }
  0x64   : > { %5900 = vmatmul.mubr.bf16.gmra.mxu1 %v4998_v6  ;;  %5943 = vmatprep.mubr.bf16.mxu0 %v5049_v59  ;;  %v1291_v6 = vrot.slane %v6695_v30, 5  ;;  %v6310_v59 = vld [vmem:[%s8773_s1 + $0x118] sm:$0xff]   ;;  %v5055_v61 = vcombine.low %v6958_v23, %v6970_v60  ;;  %v6987_v30 = vsel %vm6789_vm5, %v1283_v25, %v1284_v17  ;;  %v1298_v44 = vrot.slane %v8796_v42, 5 }
  0x65   : > { %6012 = vmatpush3.bf16.msra.mxu0 %v6304_v33  ;;  %5903 = vmatprep.mubr.bf16.mxu1 %v4999_v32  ;;  %v1165_v33 = vld [vmem:[%s6463_s25 + $0x80] sm:$0xe]  ;;  %v6991_v57 = vsel %vm6789_vm5, %v5027_v13, %v1288_v19  ;;  %v1290_v35 = vrot.slane %v1288_v19, 4  ;;  %v1295_v32 = vrot.slane %v6707_v53, 5  ;;  %v1994_v58 = vshll.u32 %v5133_v15, 16 }
  0x66   : > { %6013 = vmatprep.subr.bf16.mxu0 %v6307_v38  ;;  %5972 = vmatpush3.bf16.msra.mxu1 %v6309_v45  ;;  %v2000_v25 = vshll.u32 %v6994_v41, 16  ;;  %v2004_v13 = vshrl.u32 %v6994_v41, 16  ;;  %v5051_v19 = vcombine.low %v6906_v11, %v6936_v55  ;;  %v6314_v45 = vld [vmem:[%s8773_s1 + $0x110] sm:$0xff]   ;;  %v5023_v11 = vrot.slane %v1165_v33, 9  ;;  %v7023_v55 = vld [vmem:[%s6463_s25 + $0x18] sm:$0x1] }
  0x67   : > { %v7002_v17 = vsel %vm6789_vm5, %v1290_v35, %v1291_v6  ;;  %5973 = vmatprep.subr.bf16.mxu1 %v6313_v43  ;;  %v6317_v6 = vld [vmem:[%s8773_s1 + $0xc8] sm:$0xff]   ;;  %v7018_v35 = vsel %vm6789_vm5, %v5028_v54, %v1295_v32  ;;  %v1297_v42 = vrot.slane %v1295_v32, 4  ;;  %v1254_v15 = vsel %vm6789_vm5, %v5022_v34, %v1253_v2 }
  0x68   : > { %v1993_v32 = vrot.slane %v1991_v18, 4  ;;  %v1996_v33 = vrot.slane %v1994_v58, 5  ;;  %v1257_v5 = vsel %vm6789_vm5, %v1255_v14, %v1256_v22  ;;  %v7051_v2 = vrot.slane %v2000_v25, 5  ;;  %v5139_v14 = vld [vmem:[%s6463_s25 + $0x30] sm:$0xf]  ;;  %v7085_v18 = vld [vmem:[%s8773_s1 + $0x178] sm:$0xff]  }
  0x69   : > { %6014 = vmatpush3.bf16.msra.mxu0 %v6307_v38  ;;  %v1262_v38 = vrot.slane %v1260_v29, 4  ;;  %v7034_v54 = vsel %vm6789_vm5, %v1297_v42, %v1298_v44  ;;  %v2006_v44 = vrot.slane %v2004_v13, 4  ;;  %v1261_v20 = vsel %vm6789_vm5, %v5023_v11, %v1260_v29  ;;  %v7092_v25 = vld [vmem:[%s6463_s25 + $0x34] sm:$0xf] }
  0x6a   : > { %6015 = vmatprep.subr.bf16.mxu0 %v6310_v59  ;;  %v5058_v34 = vcombine.low %v7018_v35, %v7034_v54  ;;  %5974 = vmatpush3.bf16.msra.mxu1 %v6313_v43  ;;  %v2010_v12 = vshll.u32 %v7023_v55, 16  ;;  %v2015_v28 = vshrl.u32 %v5136_v62, 16  ;;  %v5052_v22 = vcombine.low %v1254_v15, %v1257_v5  ;;  %v7122_v5 = vld [vmem:[%s6463_s25 + $0x38] sm:$0x1]  ;;  %v5157_v54 = vld [vmem:[%s6463_s25 + $0x90] sm:$0xf] }
  0x6b   : > { %5944 = vmatmul.mubr.bf16.gmra.mxu0 %v5050_v56  ;;  %v1264_v51 = vsel %vm6789_vm5, %v1262_v38, %v1263_v50  ;;  %5975 = vmatprep.subr.bf16.mxu1 %v6317_v6  ;;  %v2018_v31 = vshll.u32 %v5136_v62, 16  ;;  %v2024_v50 = vshll.u32 %v7037_v49, 16  ;;  %v1997_v21 = vor.u32 %v1996_v33, %v1993_v32  ;;  %v5142_v32 = vld [vmem:[%s6463_s25 + $0x40] sm:$0xf]  ;;  %v7114_v33 = vld [vmem:[%s8773_s1 + $0x1b8] sm:$0xff]  }
  0x6c   : > { %5904 = vmatmul.mubr.bf16.gmra.mxu1 %v5000_v40  ;;  %5947 = vmatprep.mubr.bf16.mxu0 %v5051_v19  ;;  %v6318_v40 = vld [vmem:[%s8773_s1 + $0x108] sm:$0xff]   ;;  %v2028_v56 = vshrl.u32 %v7037_v49, 16  ;;  %v2034_v29 = vshll.u32 %v7057_v7, 16  ;;  %v5053_v43 = vcombine.low %v1261_v20, %v1264_v51  ;;  %v7087_v62 = vrot.slane %v2010_v12, 5  ;;  %v8797_v12 = vld [vmem:[#allocation2_spill] sm:$0xff] }
  0x6d   : > { %5907 = vmatprep.mubr.bf16.mxu1 %v5001_v48  ;;  %6016 = vmatpush3.bf16.msra.mxu0 %v6310_v59  ;;  %v2007_v48 = vor.u32 %v2006_v44, %v7051_v2  ;;  %v6322_v59 = vld [vmem:[%s8773_s1 + $0x100] sm:$0xff]   ;;  %v7089_v58 = vrot.slane %v2015_v28, 4  ;;  %v7094_v13 = vrot.slane %v2018_v31, 5  ;;  %v7096_v19 = vrot.slane %v2024_v50, 5  ;;  %v7133_v31 = vld [vmem:[%s6463_s25 + $0x54] sm:$0xf] }
  0x6e   : > { %6017 = vmatprep.subr.bf16.mxu0 %v6314_v45  ;;  %5976 = vmatpush3.bf16.msra.mxu1 %v6317_v6  ;;  %v2039_v15 = vshrl.u32 %v5139_v14, 16  ;;  %v2042_v42 = vshll.u32 %v5139_v14, 16  ;;  %v2030_v11 = vrot.slane %v2028_v56, 4  ;;  %v7105_v38 = vrot.slane %v2034_v29, 5 }
  0x6f   : > { %5977 = vmatprep.subr.bf16.mxu1 %v6321_v16  ;;  %v7103_v6 = vrot.slane %v2007_v48, 4  ;;  %v2048_v47 = vshll.u32 %v7092_v25, 16  ;;  %v2052_v52 = vshrl.u32 %v7092_v25, 16  ;;  %v2066_v44 = vshll.u32 %v5142_v32, 16  ;;  %v7139_v48 = vld [vmem:[%s6463_s25 + $0x48] sm:$0x1] }
  0x70   : > { %v2041_v63 = vrot.slane %v2039_v15, 4  ;;  %v2044_v9 = vrot.slane %v2042_v42, 5  ;;  %v5005_v28 = vcombine.low %v8797_v12, %v6685_v10  ;;  %v2021_v50 = vor.u32 %v7094_v13, %v7089_v58 }
  0x71   : > { %6018 = vmatpush3.bf16.msra.mxu0 %v6314_v45  ;;  %v7101_v45 = vrot.slane %v1997_v21, 4  ;;  %v2031_v21 = vor.u32 %v2030_v11, %v7096_v19  ;;  %v2058_v14 = vshll.u32 %v7122_v5, 16  ;;  %v2068_v13 = vrot.slane %v2066_v44, 5 }
  0x72   : > { %6019 = vmatprep.subr.bf16.mxu0 %v6318_v40  ;;  %5978 = vmatpush3.bf16.msra.mxu1 %v6321_v16  ;;  %v5145_v16 = vld [vmem:[%s6463_s25 + $0x50] sm:$0xf]  ;;  %v2045_v10 = vor.u32 %v2044_v9, %v2041_v63  ;;  %v2082_v4 = vshll.u32 %v7139_v48, 16  ;;  %v2013_v23 = vsel %vm6496_vm2, %v7103_v6, %v7087_v62  ;;  %v2106_v62 = vshll.u32 %v7159_v0, 16  ;;  %v7181_v6 = vld [vmem:[%s6463_s25 + $0x68] sm:$0x1] }
  0x73   : > { %5948 = vmatmul.mubr.bf16.gmra.mxu0 %v5052_v22  ;;  %6051 = vmatprep.subr.bf16.mxu1 %v7085_v18  ;;  %v7129_v22 = vrot.slane %v2048_v47, 5  ;;  %v2087_v56 = vshrl.u32 %v5145_v16, 16  ;;  %v2090_v29 = vshll.u32 %v5145_v16, 16  ;;  %v2022_v47 = vrot.slane %v2021_v50, 4 }
  0x74   : > { %5908 = vmatmul.mubr.bf16.gmra.mxu1 %v5002_v46  ;;  %5951 = vmatprep.mubr.bf16.mxu0 %v5053_v43  ;;  %v7119_v46 = vld [vmem:[%s6463_s25 + $0x44] sm:$0xf]  ;;  %v2096_v43 = vshll.u32 %v7133_v31, 16  ;;  %v2046_v44 = vrot.slane %v2045_v10, 4  ;;  %v2111_v12 = vshrl.u32 %v5148_v37, 16  ;;  %v2114_v50 = vshll.u32 %v5148_v37, 16 }
  0x75   : > { %5911 = vmatprep.mubr.bf16.mxu1 %v5003_v8  ;;  %6020 = vmatpush3.bf16.msra.mxu0 %v6318_v40  ;;  %v2063_v8 = vshrl.u32 %v5142_v32, 16  ;;  %v2072_v20 = vshll.u32 %v7119_v46, 16  ;;  %v2076_v51 = vshrl.u32 %v7119_v46, 16  ;;  %v2054_v40 = vrot.slane %v2052_v52, 4 }
  0x76   : > { %6021 = vmatprep.subr.bf16.mxu0 %v6322_v59  ;;  %v2092_v24 = vrot.slane %v2090_v29, 5  ;;  %v2003_v32 = vsel %vm6496_vm2, %v7101_v45, %v7051_v2  ;;  %v7171_v60 = vrot.slane %v2096_v43, 5  ;;  %v2032_v52 = vrot.slane %v2031_v21, 4 }
  0x77   : > { %v2065_v58 = vrot.slane %v2063_v8, 4  ;;  %v7151_v15 = vrot.slane %v2072_v20, 5  ;;  %v2078_v42 = vrot.slane %v2076_v51, 4  ;;  %v2055_v11 = vor.u32 %v2054_v40, %v7129_v22  ;;  %v7175_v8 = vld [vmem:[%s6463_s25 + $0x64] sm:$0xf] }
  0x78   : > { %v2060_v2 = vrot.slane %v2058_v14, 5  ;;  %v7177_v45 = vrot.slane %v2082_v4, 5  ;;  %v5191_v40 = vcombine.low %v2003_v32, %v2013_v23  ;;  %v2120_v21 = vshll.u32 %v7175_v8, 16  ;;  %v6327_v32 = vld [vmem:[%s6463_s25 + $0x30] sm:$0xff]  }
  0x79   : > { %6022 = vmatpush3.bf16.msra.mxu0 %v6322_v59  ;;  %v2100_v59 = vshrl.u32 %v7133_v31, 16  ;;  %v2069_v63 = vor.u32 %v2068_v13, %v2065_v58  ;;  %v2079_v9 = vor.u32 %v2078_v42, %v7151_v15  ;;  %v2056_v20 = vrot.slane %v2055_v11, 4  ;;  %v6324_v13 = vld [vmem:[%s6463_s25 + $0x20] sm:$0xff]  }
  0x7a   : > { %6095 = vmatprep.subr.bf16.mxu0 %v7114_v33  ;;  %v8798_v29 = vcombine.low %v6965_v39, %v6987_v30  ;;  %v8799_v10 = vcombine.low %v8795_v1, %v6707_v53  ;;  %v2027_v14 = vsel %vm6496_vm2, %v2022_v47, %v7096_v19  ;;  %v2037_v43 = vsel %vm6496_vm2, %v2032_v52, %v7105_v38  ;;  %v6328_v47 = vld [vmem:[%s8773_s1 + $0x170] sm:$0xff]  }
  0x7b   : > { %5952 = vmatmul.mubr.bf16.gmra.mxu0 %v5054_v26  ;;  %v2089_v26 = vrot.slane %v2087_v56, 4  ;;  %v7187_v56 = vld [vmem:[%s6463_s25 + $0x74] sm:$0xf]  ;;  %v7203_v58 = vrot.slane %v2079_v9, 4  ;;  %v8800_v39 = vcombine.low %v6991_v57, %v7002_v17  ;;  %v2124_v53 = vshrl.u32 %v7175_v8, 16 }
  0x7c   : > { %5912 = vmatmul.mubr.bf16.gmra.mxu1 %v5004_v36  ;;  %5955 = vmatprep.mubr.bf16.mxu0 %v5055_v61  ;;  %v6323_v36 = vld [vmem:[%s6463_s25 + $0x10] sm:$0xff]   ;;  %v2102_v61 = vrot.slane %v2100_v59, 4  ;;  %v7201_v59 = vrot.slane %v2069_v63, 4  ;;  %v2130_v1 = vshll.u32 %v7181_v6, 16  ;;  %v7213_v38 = vrot.slane %v2106_v62, 5 }
  0x7d   : > { %5915 = vmatprep.mubr.bf16.mxu1 %v5005_v28  ;;  %v2093_v51 = vor.u32 %v2092_v24, %v2089_v26  ;;  %v5151_v28 = vld [vmem:[%s6463_s25 + $0x70] sm:$0xf]  ;;  %v2144_v11 = vshll.u32 %v7187_v56, 16  ;;  %v2148_v4 = vshrl.u32 %v7187_v56, 16  ;;  %v5154_v57 = vld [vmem:[%s6463_s25 + $0x80] sm:$0xf]  ;;  %v2051_v23 = vsel %vm6496_vm2, %v2046_v44, %v7129_v22 }
  0x7e   : > { %v2103_v16 = vor.u32 %v2102_v61, %v7171_v60  ;;  %v2135_v30 = vshrl.u32 %v5151_v28, 16  ;;  %v2138_v19 = vshll.u32 %v5151_v28, 16  ;;  %v7220_v26 = vrot.slane %v2111_v12, 4  ;;  %v7247_v22 = vld [vmem:[%s6463_s25 + $0x78] sm:$0x1] }
  0x7f   : > { %v7211_v42 = vrot.slane %v2093_v51, 4  ;;  %v7222_v24 = vrot.slane %v2114_v50, 5  ;;  %v7224_v37 = vrot.slane %v2120_v21, 5  ;;  %v2061_v61 = vsel %vm6496_vm2, %v2056_v20, %v2060_v2  ;;  %v7256_v21 = vld [vmem:[%s6463_s25 + $0x88] sm:$0x1] }
  0x80   : > { %v7218_v17 = vrot.slane %v2103_v16, 4  ;;  %v2159_v52 = vshrl.u32 %v5154_v57, 16  ;;  %v2162_v63 = vshll.u32 %v5154_v57, 16  ;;  %v7238_v9 = vrot.slane %v2124_v53, 4 }
  0x81   : > { %v7240_v51 = vrot.slane %v2130_v1, 5  ;;  %v7242_v62 = vrot.slane %v2135_v30, 4  ;;  %v7244_v12 = vrot.slane %v2138_v19, 5  ;;  %v7249_v44 = vrot.slane %v2144_v11, 5  ;;  %v6329_v1 = vld [vmem:[%s6463_s25 + $0x40] sm:$0xff]   ;;  %v6330_v11 = vld [vmem:[%s8773_s1 + $0x1b0] sm:$0xff]  }
  0x82   : > { %v7251_v20 = vrot.slane %v2148_v4, 4  ;;  %v5192_v16 = vcombine.low %v2027_v14, %v2037_v43  ;;  %v5193_v50 = vcombine.low %v2051_v23, %v2061_v61  ;;  %v7272_v14 = vld [vmem:[%s8773_s1 + $0x168] sm:$0xff]   ;;  %v7274_v43 = vrot.slane %v2159_v52, 4  ;;  %v6332_v4 = vld [vmem:[%s6463_s25 + $0x50] sm:$0xff]  }
  0x83   : > { %5956 = vmatmul.mubr.bf16.gmra.mxu0 %v8798_v29  ;;  %v2075_v29 = vsel %vm6496_vm2, %v7201_v59, %v7151_v15  ;;  %v2164_v35 = vrot.slane %v2162_v63, 5  ;;  %v2099_v15 = vsel %vm6496_vm2, %v7211_v42, %v7171_v60  ;;  %v7290_v59 = vld [vmem:[%s6463_s25 + $0x98] sm:$0x1]  ;;  %v2117_v30 = vor.u32 %v7222_v24, %v7220_v26  ;;  %v7312_v24 = vld [vmem:[%s6463_s25 + $0xa4] sm:$0xf] }
  0x84   : > { %5916 = vmatmul.mubr.bf16.gmra.mxu1 %v8799_v10  ;;  %5959 = vmatprep.mubr.bf16.mxu0 %v8800_v39  ;;  %v2085_v10 = vsel %vm6496_vm2, %v7203_v58, %v7177_v45  ;;  %v2109_v45 = vsel %vm6496_vm2, %v7218_v17, %v7213_v38  ;;  %v2183_v58 = vshrl.u32 %v5157_v54, 16  ;;  %v2186_v39 = vshll.u32 %v5157_v54, 16  ;;  %v5160_v38 = vld [vmem:[%s6463_s25 + $0xa0] sm:$0xf] }
  0x85   : > { %5979 = vmatprep.mubr.bf16.mxu1 %v6323_v36  ;;  %v7227_v36 = vld [vmem:[%s6463_s25 + $0x84] sm:$0xf]  ;;  %v2127_v19 = vor.u32 %v7238_v9, %v7224_v37  ;;  %v2154_v42 = vshll.u32 %v7247_v22, 16  ;;  %v2178_v57 = vshll.u32 %v7256_v21, 16  ;;  %v2202_v26 = vshll.u32 %v7290_v59, 16 }
  0x86   : > { %v2168_v2 = vshll.u32 %v7227_v36, 16  ;;  %v2172_v28 = vshrl.u32 %v7227_v36, 16  ;;  %v2185_v17 = vrot.slane %v2183_v58, 4  ;;  %v2207_v52 = vshrl.u32 %v5160_v38, 16 }
  0x87   : > { %v2210_v63 = vshll.u32 %v5160_v38, 16  ;;  %v7316_v9 = vcombine.low %v2075_v29, %v2085_v10  ;;  %v2216_v58 = vshll.u32 %v7312_v24, 16  ;;  %v5195_v29 = vcombine.low %v2099_v15, %v2109_v45 }
  0x88   : > { %v2209_v54 = vrot.slane %v2207_v52, 4  ;;  %v7328_v10 = vrot.slane %v2117_v30, 4 }
  0x8b   : > { %5960 = vmatmul.mubr.bf16.gmra.mxu0 %v5058_v34  ;;  %v7278_v34 = vld [vmem:[%s6463_s25 + $0x94] sm:$0xf] }
  0x8c   : > { %5980 = vmatmul.mubr.bf16.vlgmr.msra.gmra.mxu1 %v6324_v13  ;;  %6023 = vmatprep.mubr.bf16.mxu0 %v5191_v40  ;;  %v7292_v40 = vrot.slane %v2168_v2, 5  ;;  %v2192_v53 = vshll.u32 %v7278_v34, 16  ;;  %v2196_v60 = vshrl.u32 %v7278_v34, 16  ;;  %v2141_v13 = vor.u32 %v7244_v12, %v7242_v62 }
  0x8d   : > { %6052 = vmatpush3.bf16.msra.mxu1 %v7085_v18  ;;  %5983 = vmatprep.mubr.bf16.mxu1 %v6327_v32  ;;  %v2174_v18 = vrot.slane %v2172_v28, 4  ;;  %v2188_v32 = vrot.slane %v2186_v39, 5  ;;  %v2151_v62 = vor.u32 %v7251_v20, %v7249_v44  ;;  %v2165_v12 = vor.u32 %v2164_v35, %v7274_v43  ;;  %v7324_v28 = vld [vmem:[%s6463_s25 + $0xa8] sm:$0x1]  ;;  %v6335_v43 = vld [vmem:[%s8773_s1 + $0x160] sm:$0xff]  }
  0x8e   : > { %6053 = vmatprep.subr.bf16.mxu1 %v6328_v47  ;;  %v7314_v23 = vrot.slane %v2192_v53, 5  ;;  %v2198_v61 = vrot.slane %v2196_v60, 4  ;;  %8801 = vst [vmem:[#allocation3_spill] sm:$0xff] %v7324_v28  ;;  %v2220_v39 = vshrl.u32 %v7312_v24, 16  ;;  %v7330_v53 = vrot.slane %v2127_v19, 4  ;;  %v6334_v20 = vld [vmem:[%s8773_s1 + $0x1a8] sm:$0xff]  }
  0x8f   : > { %v2175_v2 = vor.u32 %v2174_v18, %v7292_v40  ;;  %v7338_v35 = vrot.slane %v2154_v42, 5  ;;  %v2189_v15 = vor.u32 %v2188_v32, %v2185_v17  ;;  %v2226_v18 = vshll.u32 %v7324_v28, 16  ;;  %v5163_v60 = vld [vmem:[%s6463_s25 + $0xb0] sm:$0xf] }
  0x90   : > { %v2199_v45 = vor.u32 %v2198_v61, %v7314_v23  ;;  %v7348_v30 = vrot.slane %v2165_v12, 4  ;;  %v7352_v42 = vrot.slane %v2178_v57, 5  ;;  %v7361_v17 = vrot.slane %v2216_v58, 5  ;;  %v6336_v32 = vld [vmem:[%s6463_s25 + $0x70] sm:$0xff]   ;;  %v6337_v57 = vld [vmem:[%s8773_s1 + $0x1a0] sm:$0xff]  }
  0x91   : > { %6054 = vmatpush3.bf16.msra.mxu1 %v6328_v47  ;;  %v2212_v47 = vrot.slane %v2210_v63, 5  ;;  %v7350_v19 = vrot.slane %v2175_v2, 4  ;;  %v2231_v61 = vshrl.u32 %v5163_v60, 16  ;;  %v2234_v52 = vshll.u32 %v5163_v60, 16  ;;  %v6339_v63 = vld [vmem:[%s8773_s1 + $0x158] sm:$0xff]  }
  0x92   : > { %6055 = vmatprep.subr.bf16.mxu1 %v7272_v14  ;;  %v7374_v12 = vrot.slane %v2199_v45, 4  ;;  %v7376_v2 = vrot.slane %v2226_v18, 5  ;;  %v2123_v58 = vsel %vm6496_vm2, %v7328_v10, %v7224_v37  ;;  %v2133_v45 = vsel %vm6496_vm2, %v7330_v53, %v7240_v51  ;;  %v7401_v37 = vld [vmem:[%s8773_s1 + $0x150] sm:$0xff]   ;;  %v6340_v51 = vld [vmem:[%s8773_s1 + $0x198] sm:$0xff]  }
  0x93   : > { %6024 = vmatmul.mubr.bf16.vlgmr.msra.gmra.mxu0 %v5192_v16  ;;  %v7341_v16 = vrot.slane %v2141_v13, 4  ;;  %v7359_v13 = vrot.slane %v2202_v26, 5  ;;  %v2213_v38 = vor.u32 %v2212_v47, %v2209_v54  ;;  %v5166_v54 = vld [vmem:[%s6463_s25 + $0xc0] sm:$0xf]  ;;  %v2233_v53 = vrot.slane %v2231_v61, 4 }
  0x94   : > { %5984 = vmatmul.mubr.bf16.gmra.mxu1 %v6329_v1  ;;  %6096 = vmatpush3.bf16.msra.mxu0 %v7114_v33  ;;  %v7346_v1 = vrot.slane %v2151_v62, 4  ;;  %v7355_v33 = vld [vmem:[%s6463_s25 + $0xb4] sm:$0xf]  ;;  %v7372_v62 = vrot.slane %v2189_v15, 4  ;;  %v2255_v60 = vshrl.u32 %v5166_v54, 16  ;;  %v2258_v10 = vshll.u32 %v5166_v54, 16 }
  0x95   : > { %6027 = vmatprep.mubr.bf16.mxu0 %v5193_v50  ;;  %6097 = vmatprep.subr.bf16.mxu0 %v6330_v11  ;;  %8802 = vst [vmem:[#allocation4_spill] sm:$0xff] %v7355_v33  ;;  %v6333_v50 = vld [vmem:[%s6463_s25 + $0x60] sm:$0xff]   ;;  %v2244_v26 = vshrl.u32 %v7355_v33, 16  ;;  %v7395_v18 = vrot.slane %v2213_v38, 4  ;;  %v7418_v61 = vld [vmem:[%s6463_s25 + $0xc8] sm:$0x1] }
  0x96   : > { %5987 = vmatprep.mubr.bf16.mxu1 %v6332_v4  ;;  %6056 = vmatpush3.bf16.msra.mxu1 %v7272_v14  ;;  %v2222_v4 = vrot.slane %v2220_v39, 4  ;;  %v2240_v14 = vshll.u32 %v7355_v33, 16  ;;  %v7388_v39 = vld [vmem:[%s6463_s25 + $0xc4] sm:$0xf]  ;;  %8805 = vst [vmem:[#allocation6_spill] sm:$0xff] %v7418_v61 }
  0x97   : > { %6057 = vmatprep.subr.bf16.mxu1 %v6335_v43  ;;  %8804 = vst [vmem:[#allocation5_spill] sm:$0xff] %v7388_v39  ;;  %v2268_v54 = vshrl.u32 %v7388_v39, 16  ;;  %v5169_v15 = vld [vmem:[%s6463_s25 + $0xd0] sm:$0xf] }
  0x98   : > { %6098 = vmatpush3.bf16.msra.mxu0 %v6330_v11  ;;  %v7385_v11 = vld [vmem:[%s6463_s25 + $0xb8] sm:$0x1]  ;;  %v2223_v47 = vor.u32 %v2222_v4, %v7361_v17  ;;  %v7407_v38 = vrot.slane %v2240_v14, 5  ;;  %v2246_v4 = vrot.slane %v2244_v26, 4  ;;  %v2264_v14 = vshll.u32 %v7388_v39, 16 }
  0x99   : > { %6099 = vmatprep.subr.bf16.mxu0 %v6334_v20  ;;  %8803 = vst [vmem:[#allocation2_spill] sm:$0xff] %v7385_v11  ;;  %v5196_v26 = vcombine.low %v2123_v58, %v2133_v45  ;;  %v2250_v33 = vshll.u32 %v7385_v11, 16 }
  0x9a   : > { %6058 = vmatpush3.bf16.msra.mxu1 %v6335_v43  ;;  %v2236_v43 = vrot.slane %v2234_v52, 5  ;;  %v2257_v52 = vrot.slane %v2255_v60, 4  ;;  %v2282_v60 = vshll.u32 %v5169_v15, 16 }
  0x9b   : > { %6028 = vmatmul.mubr.bf16.gmra.mxu0 %v7316_v9  ;;  %v2147_v9 = vsel %vm6496_vm2, %v7341_v16, %v7249_v44  ;;  %6059 = vmatprep.subr.bf16.mxu1 %v6339_v63  ;;  %v6341_v44 = vld [vmem:[%s6463_s25 + $0x90] sm:$0xff]   ;;  %v7425_v16 = vrot.slane %v2223_v47, 4 }
  0x9c   : > { %5988 = vmatmul.mubr.bf16.gmra.mxu1 %v6333_v50  ;;  %6031 = vmatprep.mubr.bf16.mxu0 %v5195_v29  ;;  %v2157_v50 = vsel %vm6496_vm2, %v7346_v1, %v7338_v35  ;;  %v6338_v29 = vld [vmem:[%s6463_s25 + $0x80] sm:$0xff]   ;;  %v7429_v35 = vld [vmem:[%s6463_s25 + $0xd4] sm:$0xf]  ;;  %v2279_v1 = vshrl.u32 %v5169_v15, 16  ;;  %v2237_v45 = vor.u32 %v2236_v43, %v2233_v53  ;;  %v7454_v53 = vld [vmem:[%s6463_s25 + $0xd8] sm:$0x1] }
  0x9d   : > { %6100 = vmatpush3.bf16.msra.mxu0 %v6334_v20  ;;  %5991 = vmatprep.mubr.bf16.mxu1 %v6336_v32  ;;  %v2260_v20 = vrot.slane %v2258_v10, 5  ;;  %8806 = vst [vmem:[#allocation7_spill] sm:$0xff] %v7429_v35  ;;  %v5197_v28 = vcombine.low %v2147_v9, %v2157_v50  ;;  %v2171_v32 = vsel %vm6496_vm2, %v7348_v30, %v7292_v40  ;;  %v2288_v58 = vshll.u32 %v7429_v35, 16  ;;  %v6344_v15 = vld [vmem:[%s8773_s1 + $0x190] sm:$0xff]   ;;  %v6347_v30 = vld [vmem:[%s8773_s1 + $0x148] sm:$0xff]  }
  0x9e   : > { %6101 = vmatprep.subr.bf16.mxu0 %v6337_v57  ;;  %6060 = vmatpush3.bf16.msra.mxu1 %v6339_v63  ;;  %v2292_v47 = vshrl.u32 %v7429_v35, 16  ;;  %v2247_v10 = vor.u32 %v2246_v4, %v7407_v38  ;;  %v7442_v9 = vrot.slane %v2264_v14, 5  ;;  %v2274_v40 = vshll.u32 %v7418_v61, 16  ;;  %v5172_v63 = vld [vmem:[%s6463_s25 + $0xe0] sm:$0xf] }
  0x9f   : > { %6061 = vmatprep.subr.bf16.mxu1 %v7401_v37  ;;  %v2261_v50 = vor.u32 %v2260_v20, %v2257_v52  ;;  %v2270_v35 = vrot.slane %v2268_v54, 4  ;;  %v2281_v43 = vrot.slane %v2279_v1, 4  ;;  %v7457_v4 = vld [vmem:[%s6463_s25 + $0xe4] sm:$0xf]  ;;  %v2284_v14 = vrot.slane %v2282_v60, 5 }
  0xa0   : > { %v7459_v61 = vrot.slane %v2288_v58, 5  ;;  %v2294_v11 = vrot.slane %v2292_v47, 4  ;;  %v2303_v39 = vshrl.u32 %v5172_v63, 16  ;;  %v2306_v52 = vshll.u32 %v5172_v63, 16  ;;  %v7493_v58 = vld [vmem:[%s6463_s25 + $0xe8] sm:$0x1] }
  0xa1   : > { %6102 = vmatpush3.bf16.msra.mxu0 %v6337_v57  ;;  %v2181_v57 = vsel %vm6496_vm2, %v7350_v19, %v7352_v42  ;;  %v2195_v19 = vsel %vm6496_vm2, %v7372_v62, %v7314_v23  ;;  %v2205_v42 = vsel %vm6496_vm2, %v7374_v12, %v7359_v13  ;;  %v2312_v20 = vshll.u32 %v7457_v4, 16  ;;  %v6342_v47 = vld [vmem:[%s6463_s25 + $0xa0] sm:$0xff]  }
  0xa2   : > { %6103 = vmatprep.subr.bf16.mxu0 %v6340_v51  ;;  %v7470_v54 = vrot.slane %v2237_v45, 4  ;;  %v7472_v1 = vrot.slane %v2247_v10, 4  ;;  %6062 = vmatpush3.bf16.msra.mxu1 %v7401_v37  ;;  %v7479_v13 = vrot.slane %v2261_v50, 4  ;;  %v7481_v62 = vrot.slane %v2274_v40, 5  ;;  %v6345_v45 = vld [vmem:[%s6463_s25 + $0xb0] sm:$0xff]  }
  0xa3   : > { %6032 = vmatmul.mubr.bf16.gmra.mxu0 %v5196_v26  ;;  %v2252_v26 = vrot.slane %v2250_v33, 5  ;;  %v2298_v12 = vshll.u32 %v7454_v53, 16  ;;  %v2316_v33 = vshrl.u32 %v7457_v4, 16  ;;  %v2271_v37 = vor.u32 %v2270_v35, %v7442_v9  ;;  %6063 = vmatprep.subr.bf16.mxu1 %v6347_v30 }
  0xa4   : > { %5992 = vmatmul.mubr.bf16.gmra.mxu1 %v6338_v29  ;;  %6035 = vmatprep.mubr.bf16.mxu0 %v5197_v28  ;;  %v8807_v29 = vrot.slane %v6994_v41, 5  ;;  %v6348_v28 = vld [vmem:[%s8773_s1 + $0x188] sm:$0xff]   ;;  %v2285_v60 = vor.u32 %v2284_v14, %v2281_v43  ;;  %v2295_v10 = vor.u32 %v2294_v11, %v7459_v61  ;;  %v2305_v40 = vrot.slane %v2303_v39, 4  ;;  %v7510_v11 = vld [vmem:[%s8773_s1 + $0x1f8] sm:$0xff]  }
  0xa5   : > { %5995 = vmatprep.mubr.bf16.mxu1 %v6341_v44  ;;  %6104 = vmatpush3.bf16.msra.mxu0 %v6340_v51  ;;  %v6351_v44 = vld [vmem:[%s8773_s1 + $0x140] sm:$0xff]   ;;  %v5198_v51 = vcombine.low %v2171_v32, %v2181_v57  ;;  %v2308_v63 = vrot.slane %v2306_v52, 5  ;;  %v7498_v50 = vrot.slane %v2312_v20, 5  ;;  %v5213_v57 = vld [vmem:[%s6463_s25 + $0x10] sm:$0xe]  ;;  %v2318_v35 = vrot.slane %v2316_v33, 4 }
  0xa6   : > { %v7476_v23 = vrot.slane %v8807_v29, 4  ;;  %6105 = vmatprep.subr.bf16.mxu0 %v6344_v15  ;;  %v5199_v29 = vcombine.low %v2195_v19, %v2205_v42  ;;  %v6352_v32 = vld [vmem:[%s8773_s1 + $0x180] sm:$0xff]   ;;  %6064 = vmatpush3.bf16.msra.mxu1 %v6347_v30  ;;  %v2322_v43 = vshll.u32 %v7493_v58, 16  ;;  %v7505_v14 = vrot.slane %v2271_v37, 4 }
  0xa7   : > { %6065 = vmatprep.subr.bf16.mxu1 %v6351_v44  ;;  %v2286_v39 = vrot.slane %v2285_v60, 4  ;;  %v2296_v19 = vrot.slane %v2295_v10, 4  ;;  %v2309_v30 = vor.u32 %v2308_v63, %v2305_v40  ;;  %v2219_v42 = vsel %vm6496_vm2, %v7395_v18, %v7361_v17  ;;  %v6346_v17 = vld [vmem:[%s6463_s25 + $0xc0] sm:$0xff]   ;;  %v6349_v60 = vld [vmem:[%s6463_s25 + $0xd0] sm:$0xff]  }
  0xa8   : > { %v2229_v52 = vsel %vm6496_vm2, %v7425_v16, %v7376_v2  ;;  %v5227_v20 = vrot.slane %v5213_v57, 9  ;;  %v2685_v33 = vrot.slane %v7037_v49, 5  ;;  %v2319_v18 = vor.u32 %v2318_v35, %v7498_v50  ;;  %v5214_v2 = vld [vmem:[%s6463_s25 + $0x20] sm:$0xe]  ;;  %v7536_v16 = vld [vmem:[%s8773_s1 + $0x238] sm:$0xff]  }
  0xa9   : > { %6106 = vmatpush3.bf16.msra.mxu0 %v6344_v15  ;;  %v2300_v15 = vrot.slane %v2298_v12, 5  ;;  %v2243_v12 = vsel %vm6496_vm2, %v7470_v54, %v7407_v38  ;;  %v7530_v37 = vrot.slane %v2322_v43, 5  ;;  %v5215_v38 = vld [vmem:[%s6463_s25 + $0x30] sm:$0xe]  ;;  %v5200_v54 = vcombine.low %v2219_v42, %v2229_v52  ;;  %v6350_v52 = vld [vmem:[%s6463_s25 + $0xe0] sm:$0xff]  }
  0xaa   : > { %6107 = vmatprep.subr.bf16.mxu0 %v6348_v28  ;;  %6066 = vmatpush3.bf16.msra.mxu1 %v6351_v44  ;;  %v5228_v44 = vrot.slane %v5214_v2, 9  ;;  %v5229_v10 = vrot.slane %v5215_v38, 9  ;;  %v2692_v40 = vrot.slane %v7092_v25, 5  ;;  %v2695_v63 = vrot.slane %v7122_v5, 5  ;;  %v7557_v35 = vld [vmem:[%s6463_s25 + $0x50] sm:$0xe] }
  0xab   : > { %6036 = vmatmul.mubr.bf16.gmra.mxu0 %v5198_v51  ;;  %v2253_v51 = vsel %vm6496_vm2, %v7472_v1, %v2252_v26  ;;  %6139 = vmatprep.subr.bf16.mxu1 %v7510_v11  ;;  %v7541_v1 = vrot.slane %v2309_v30, 4  ;;  %v2688_v26 = vrot.slane %v7057_v7, 5  ;;  %v2699_v57 = vrot.slane %v7119_v46, 5  ;;  %v7560_v25 = vld [vmem:[%s6463_s25 + $0x60] sm:$0xe] }
  0xac   : > { %5996 = vmatmul.mubr.bf16.gmra.mxu1 %v6342_v47  ;;  %6039 = vmatprep.mubr.bf16.mxu0 %v5199_v29  ;;  %v2687_v47 = vrot.slane %v2685_v33, 4  ;;  %v5216_v29 = vld [vmem:[%s6463_s25 + $0x40] sm:$0xe]  ;;  %v2706_v7 = vrot.slane %v7133_v31, 5  ;;  %v2277_v46 = vsel %vm6496_vm2, %v7505_v14, %v7481_v62  ;;  %v2291_v5 = vsel %vm6496_vm2, %v2286_v39, %v7459_v61  ;;  %v5219_v2 = vld [vmem:[%s6463_s25 + $0x70] sm:$0xe] }
  0xad   : > { %5999 = vmatprep.mubr.bf16.mxu1 %v6345_v45  ;;  %6108 = vmatpush3.bf16.msra.mxu0 %v6348_v28  ;;  %v5201_v28 = vcombine.low %v2243_v12, %v2253_v51  ;;  %v2320_v45 = vrot.slane %v2319_v18, 4  ;;  %v8808_v43 = vrot.slane %v7023_v55, 5  ;;  %v8809_v30 = vrot.slane %v6994_v41, 5  ;;  %v8813_v31 = vld [vmem:[#allocation2_spill] sm:$0xff] }
  0xae   : > { %6109 = vmatprep.subr.bf16.mxu0 %v6352_v32  ;;  %v2694_v62 = vrot.slane %v2692_v40, 4  ;;  %v2713_v14 = vrot.slane %v7175_v8, 5  ;;  %v5230_v61 = vrot.slane %v5216_v29, 9  ;;  %v2701_v39 = vrot.slane %v2699_v57, 4 }
  0xaf   : > { %v2679_v42 = vsel %vm6789_vm5, %v5227_v20, %v8809_v30  ;;  %v2702_v55 = vrot.slane %v7139_v48, 5  ;;  %v2709_v12 = vrot.slane %v7159_v0, 5  ;;  %v5231_v51 = vrot.slane %v7557_v35, 9 }
  0xb0   : > { %v2708_v41 = vrot.slane %v2706_v7, 4  ;;  %v5232_v20 = vrot.slane %v7560_v25, 9  ;;  %v2715_v18 = vrot.slane %v2713_v14, 4  ;;  %v2716_v48 = vrot.slane %v7181_v6, 5 }
  0xb1   : > { %6110 = vmatpush3.bf16.msra.mxu0 %v6352_v32  ;;  %v2267_v32 = vsel %vm6496_vm2, %v7479_v13, %v7442_v9  ;;  %v2682_v9 = vsel %vm6789_vm5, %v7476_v23, %v8808_v43  ;;  %v2301_v13 = vsel %vm6496_vm2, %v2296_v19, %v2300_v15  ;;  %v2315_v0 = vsel %vm6496_vm2, %v7541_v1, %v7498_v50  ;;  %v8810_v43 = vld [vmem:[#allocation3_spill] sm:$0xff] }
  0xb2   : > { %6183 = vmatprep.subr.bf16.mxu0 %v7536_v16  ;;  %v5202_v23 = vcombine.low %v2267_v32, %v2277_v46  ;;  %v5203_v19 = vcombine.low %v2291_v5, %v2301_v13  ;;  %v5257_v15 = vcombine.low %v2679_v42, %v2682_v9  ;;  %v2727_v38 = vrot.slane %v7227_v36, 5  ;;  %v8811_v13 = vld [vmem:[#allocation4_spill] sm:$0xff] }
  0xb3   : > { %6040 = vmatmul.mubr.bf16.gmra.mxu0 %v5200_v54  ;;  %v2686_v6 = vsel %vm6789_vm5, %v5228_v44, %v2685_v33  ;;  %v2689_v50 = vsel %vm6789_vm5, %v2687_v47, %v2688_v26  ;;  %v5220_v54 = vld [vmem:[%s6463_s25 + $0x80] sm:$0xe]  ;;  %v5233_v36 = vrot.slane %v5219_v2, 9  ;;  %v2730_v1 = vrot.slane %v7256_v21, 5  ;;  %v5221_v33 = vld [vmem:[%s6463_s25 + $0x90] sm:$0xe] }
  0xb4   : > { %6000 = vmatmul.mubr.bf16.gmra.mxu1 %v6346_v17  ;;  %6043 = vmatprep.mubr.bf16.mxu0 %v5201_v28  ;;  %v2720_v17 = vrot.slane %v7187_v56, 5  ;;  %v2325_v56 = vsel %vm6496_vm2, %v2320_v45, %v7530_v37  ;;  %v2734_v28 = vrot.slane %v7278_v34, 5  ;;  %v2693_v37 = vsel %vm6789_vm5, %v5229_v10, %v2692_v40  ;;  %v6353_v44 = vld [vmem:[%s6463_s25 + $0x20] sm:$0xff]   ;;  %v6358_v21 = vld [vmem:[%s8773_s1 + $0x1f0] sm:$0xff]  }
  0xb5   : > { %6003 = vmatprep.mubr.bf16.mxu1 %v6349_v60  ;;  %v2723_v60 = vrot.slane %v7247_v22, 5  ;;  %v2696_v49 = vsel %vm6789_vm5, %v2694_v62, %v2695_v63  ;;  %v5234_v26 = vrot.slane %v5220_v54, 9  ;;  %v2729_v47 = vrot.slane %v2727_v38, 4  ;;  %v5222_v34 = vld [vmem:[%s6463_s25 + $0xa0] sm:$0xe] }
  0xb6   : > { %v2722_v22 = vrot.slane %v2720_v17, 4  ;;  %v2737_v45 = vrot.slane %v7290_v59, 5  ;;  %v2741_v29 = vrot.slane %v7312_v24, 5  ;;  %v5204_v32 = vcombine.low %v2315_v0, %v2325_v56  ;;  %v5223_v59 = vld [vmem:[%s6463_s25 + $0xb0] sm:$0xe]  ;;  %v8815_v0 = vld [vmem:[#allocation7_spill] sm:$0xff] }
  0xb7   : > { %v5258_v35 = vcombine.low %v2686_v6, %v2689_v50  ;;  %v2700_v10 = vsel %vm6789_vm5, %v5230_v61, %v2699_v57  ;;  %v2703_v40 = vsel %vm6789_vm5, %v2701_v39, %v2702_v55  ;;  %v5235_v63 = vrot.slane %v5221_v33, 9  ;;  %v7633_v57 = vld [vmem:[%s8773_s1 + $0x1e8] sm:$0xff]   ;;  %v5224_v61 = vld [vmem:[%s6463_s25 + $0xc0] sm:$0xe]  ;;  %v8812_v39 = vld [vmem:[#allocation5_spill] sm:$0xff] }
  0xb8   : > { %v2736_v25 = vrot.slane %v2734_v28, 4  ;;  %v5259_v46 = vcombine.low %v2693_v37, %v2696_v49  ;;  %v5236_v5 = vrot.slane %v5222_v34, 9  ;;  %v2743_v24 = vrot.slane %v2741_v29, 4  ;;  %v6354_v6 = vld [vmem:[%s6463_s25 + $0x30] sm:$0xff]   ;;  %v6357_v50 = vld [vmem:[%s6463_s25 + $0x40] sm:$0xff]  }
  0xb9   : > { %v2744_v9 = vrot.slane %v8810_v43, 5  ;;  %v2748_v30 = vrot.slane %v8811_v13, 5  ;;  %v5260_v42 = vcombine.low %v2700_v10, %v2703_v40  ;;  %v2707_v62 = vsel %vm6789_vm5, %v5231_v51, %v2706_v7  ;;  %v8814_v7 = vld [vmem:[#allocation6_spill] sm:$0xff]  ;;  %v7751_v43 = vld [vmem:[%s6463_s25 + $0x28] sm:$0x1] }
  0xba   : > { %v2755_v55 = vrot.slane %v8812_v39, 5  ;;  %v2758_v51 = vrot.slane %v8814_v7, 5  ;;  %v2762_v56 = vrot.slane %v8815_v0, 5  ;;  %v6369_v0 = vld [vmem:[%s8773_s1 + $0x1d8] sm:$0xff]  }
  0xbb   : > { %6044 = vmatmul.mubr.bf16.gmra.mxu0 %v5202_v23  ;;  %v2710_v23 = vsel %vm6789_vm5, %v2708_v41, %v2709_v12  ;;  %v7658_v12 = vsel %vm6789_vm5, %v5233_v36, %v2720_v17  ;;  %v2750_v8 = vrot.slane %v2748_v30, 4  ;;  %v5238_v41 = vrot.slane %v5224_v61, 9  ;;  %v6362_v61 = vld [vmem:[%s6463_s25 + $0x60] sm:$0xff]  }
  0xbc   : > { %6004 = vmatmul.mubr.bf16.gmra.mxu1 %v6350_v52  ;;  %6047 = vmatprep.mubr.bf16.mxu0 %v5203_v19  ;;  %v5237_v52 = vrot.slane %v5223_v59, 9  ;;  %v7648_v19 = vsel %vm6789_vm5, %v5232_v20, %v2713_v14  ;;  %v7662_v14 = vsel %vm6789_vm5, %v2722_v22, %v2723_v60  ;;  %v7666_v20 = vsel %vm6789_vm5, %v5234_v26, %v2727_v38  ;;  %v5225_v38 = vld [vmem:[%s6463_s25 + $0xd0] sm:$0xe]  ;;  %v5226_v26 = vld [vmem:[%s6463_s25 + $0xe0] sm:$0xe] }
  0xbd   : > { %6067 = vmatprep.mubr.bf16.mxu1 %v5257_v15  ;;  %v2751_v15 = vrot.slane %v8813_v31, 5  ;;  %v2757_v2 = vrot.slane %v2755_v55, 4  ;;  %v7676_v17 = vsel %vm6789_vm5, %v5235_v63, %v2734_v28  ;;  %v7684_v60 = vsel %vm6789_vm5, %v5236_v5, %v2741_v29  ;;  %v6360_v28 = vld [vmem:[%s8773_s1 + $0x230] sm:$0xff]  }
  0xbe   : > { %v7690_v54 = vsel %vm6789_vm5, %v2743_v24, %v2744_v9  ;;  %v5239_v36 = vrot.slane %v5225_v38, 9  ;;  %v2764_v22 = vrot.slane %v2762_v56, 4  ;;  %v5261_v37 = vcombine.low %v2707_v62, %v2710_v23  ;;  %v6359_v59 = vld [vmem:[%s6463_s25 + $0x50] sm:$0xff]   ;;  %v7748_v24 = vld [vmem:[%s6463_s25 + $0x24] sm:$0xf] }
  0xbf   : > { %v5263_v33 = vcombine.low %v7658_v12, %v7662_v14  ;;  %v2769_v29 = vrot.slane %v7457_v4, 5  ;;  %v5266_v4 = vcombine.low %v7684_v60, %v7690_v54  ;;  %v5240_v63 = vrot.slane %v5226_v26, 9  ;;  %v5425_v62 = vld [vmem:[%s6463_s25 + $0x20] sm:$0xe]  ;;  %v5426_v26 = vld [vmem:[%s6463_s25 + $0x30] sm:$0xe] }
  0xc0   : > { %v7734_v10 = vsel %vm6789_vm5, %v5239_v36, %v2762_v56  ;;  %v3484_v31 = vshll.u32 %v7751_v43, 16 }
  0xc1   : > { %v7775_v36 = vsel %vm6789_vm5, %v5240_v63, %v2769_v29 }
  0xc3   : > { %6048 = vmatmul.mubr.bf16.gmra.mxu0 %v5204_v32  ;;  %v6364_v32 = vld [vmem:[%s8773_s1 + $0x228] sm:$0xff]  }
  0xc4   : > { %6068 = vmatmul.mubr.bf16.vlgmr.msra.gmra.mxu1 %v5258_v35  ;;  %6111 = vmatprep.mubr.bf16.mxu0 %v6353_v44  ;;  %v7703_v44 = vsel %vm6789_vm5, %v5237_v52, %v2748_v30  ;;  %v6365_v35 = vld [vmem:[%s8773_s1 + $0x1e0] sm:$0xff]   ;;  %v3474_v30 = vshll.u32 %v7748_v24, 16  ;;  %v4152_v52 = vrot.slane %v7748_v24, 5 }
  0xc5   : > { %6140 = vmatpush3.bf16.msra.mxu1 %v7510_v11  ;;  %6071 = vmatprep.mubr.bf16.mxu1 %v5259_v46  ;;  %v7654_v11 = vsel %vm6789_vm5, %v2715_v18, %v2716_v48  ;;  %v7672_v18 = vsel %vm6789_vm5, %v2729_v47, %v2730_v1  ;;  %v7680_v48 = vsel %vm6789_vm5, %v2736_v25, %v2737_v45  ;;  %v2765_v1 = vrot.slane %v7454_v53, 5  ;;  %v5345_v46 = vld [vmem:[%s6463_s25 + $0x20] sm:$0xf] }
  0xc6   : > { %6141 = vmatprep.subr.bf16.mxu1 %v6358_v21  ;;  %v5262_v49 = vcombine.low %v7648_v19, %v7654_v11  ;;  %v7708_v53 = vsel %vm6789_vm5, %v2750_v8, %v2751_v15  ;;  %v7712_v47 = vsel %vm6789_vm5, %v5238_v41, %v2755_v55  ;;  %v7716_v45 = vsel %vm6789_vm5, %v2757_v2, %v2758_v51  ;;  %v5348_v15 = vld [vmem:[%s6463_s25 + $0x30] sm:$0xf]  ;;  %v5349_v41 = vld [vmem:[%s6463_s25 + $0x34] sm:$0xf]  ;;  %v6367_v2 = vld [vmem:[%s8773_s1 + $0x220] sm:$0xff]  }
  0xc7   : > { %v5265_v34 = vcombine.low %v7676_v17, %v7680_v48  ;;  %v7738_v40 = vsel %vm6789_vm5, %v2764_v22, %v2765_v1  ;;  %v2772_v25 = vrot.slane %v7493_v58, 5  ;;  %v5268_v5 = vcombine.low %v7712_v47, %v7716_v45  ;;  %v7779_v1 = vld [vmem:[%s6463_s25 + $0x38] sm:$0x1] }
  0xc8   : > { %v3465_v9 = vshrl.u32 %v5345_v46, 16  ;;  %v3468_v13 = vshll.u32 %v5345_v46, 16  ;;  %v2771_v58 = vrot.slane %v2769_v29, 4  ;;  %v5269_v39 = vcombine.low %v7734_v10, %v7738_v40 }
  0xc9   : > { %6142 = vmatpush3.bf16.msra.mxu1 %v6358_v21  ;;  %v5264_v21 = vcombine.low %v7666_v20, %v7672_v18  ;;  %v5439_v51 = vrot.slane %v5425_v62, 9  ;;  %v4155_v8 = vrot.slane %v7751_v43, 5  ;;  %v3489_v38 = vshrl.u32 %v5348_v15, 16  ;;  %v5351_v43 = vld [vmem:[%s6463_s25 + $0x40] sm:$0xf]  ;;  %v6378_v18 = vld [vmem:[%s8773_s1 + $0x208] sm:$0xff]  }
  0xca   : > { %6143 = vmatprep.subr.bf16.mxu1 %v7633_v57  ;;  %v3467_v55 = vrot.slane %v3465_v9, 4  ;;  %v3470_v23 = vrot.slane %v3468_v13, 5  ;;  %v7792_v29 = vsel %vm6789_vm5, %v2771_v58, %v2772_v25  ;;  %v7798_v19 = vrot.slane %v3484_v31, 5  ;;  %v6370_v25 = vld [vmem:[%s8773_s1 + $0x218] sm:$0xff]   ;;  %v7825_v62 = vld [vmem:[%s6463_s25 + $0x48] sm:$0x1] }
  0xcb   : > { %6112 = vmatmul.mubr.bf16.vlgmr.msra.gmra.mxu0 %v6354_v6  ;;  %v4154_v6 = vrot.slane %v4152_v52, 4  ;;  %v3491_v46 = vrot.slane %v3489_v38, 4  ;;  %v3508_v9 = vshll.u32 %v7779_v1, 16  ;;  %v5440_v13 = vrot.slane %v5426_v26, 9 }
  0xcc   : > { %6072 = vmatmul.mubr.bf16.gmra.mxu1 %v5260_v42  ;;  %6184 = vmatpush3.bf16.msra.mxu0 %v7536_v16  ;;  %v5267_v16 = vcombine.low %v7703_v44, %v7708_v53  ;;  %v3478_v42 = vshrl.u32 %v7748_v24, 16  ;;  %v3471_v56 = vor.u32 %v3470_v23, %v3467_v55  ;;  %v4159_v58 = vrot.slane %v5349_v41, 5 }
  0xcd   : > { %6115 = vmatprep.mubr.bf16.mxu0 %v6357_v50  ;;  %6185 = vmatprep.subr.bf16.mxu0 %v6360_v28  ;;  %v3492_v50 = vshll.u32 %v5348_v15, 16  ;;  %v7817_v12 = vsel %vm6789_vm5, %v5439_v51, %v4152_v52  ;;  %v7821_v14 = vsel %vm6789_vm5, %v4154_v6, %v4155_v8  ;;  %v4162_v31 = vrot.slane %v7779_v1, 5  ;;  %v6366_v15 = vld [vmem:[%s6463_s25 + $0x80] sm:$0xff]  }
  0xce   : > { %6075 = vmatprep.mubr.bf16.mxu1 %v5261_v37  ;;  %6144 = vmatpush3.bf16.msra.mxu1 %v7633_v57  ;;  %v7763_v57 = vrot.slane %v3474_v30, 5  ;;  %v3480_v7 = vrot.slane %v3478_v42, 4  ;;  %v3502_v37 = vshrl.u32 %v5349_v41, 16  ;;  %v7794_v63 = vrot.slane %v3471_v56, 4  ;;  %v7811_v30 = vld [vmem:[%s6463_s25 + $0x44] sm:$0xf] }
  0xcf   : > { %6145 = vmatprep.subr.bf16.mxu1 %v6365_v35  ;;  %v3494_v24 = vrot.slane %v3492_v50, 5  ;;  %v5270_v42 = vcombine.low %v7775_v36, %v7792_v29  ;;  %v4161_v52 = vrot.slane %v4159_v58, 4  ;;  %v3513_v51 = vshrl.u32 %v5351_v43, 16  ;;  %v5354_v50 = vld [vmem:[%s6463_s25 + $0x50] sm:$0xf] }
  0xd0   : > { %6186 = vmatpush3.bf16.msra.mxu0 %v6360_v28  ;;  %v3481_v22 = vor.u32 %v3480_v7, %v7763_v57  ;;  %v3498_v28 = vshll.u32 %v5349_v41, 16  ;;  %v3477_v55 = vsel %vm6496_vm2, %v7794_v63, %v7763_v57  ;;  %v3516_v8 = vshll.u32 %v5351_v43, 16  ;;  %v5427_v41 = vld [vmem:[%s6463_s25 + $0x40] sm:$0xe]  ;;  %v7861_v63 = vld [vmem:[%s6463_s25 + $0x54] sm:$0xf] }
  0xd1   : > { %6187 = vmatprep.subr.bf16.mxu0 %v6364_v32  ;;  %v3522_v57 = vshll.u32 %v7811_v30, 16  ;;  %v3510_v56 = vrot.slane %v3508_v9, 5  ;;  %v3526_v6 = vshrl.u32 %v7811_v30, 16  ;;  %v3532_v38 = vshll.u32 %v7825_v62, 16 }
  0xd2   : > { %6146 = vmatpush3.bf16.msra.mxu1 %v6365_v35  ;;  %v7788_v35 = vld [vmem:[%s8773_s1 + $0x1d0] sm:$0xff]   ;;  %v7800_v11 = vrot.slane %v3498_v28, 5  ;;  %v3518_v26 = vrot.slane %v3516_v8, 5  ;;  %v4166_v43 = vrot.slane %v7811_v30, 5  ;;  %v4169_v20 = vrot.slane %v7825_v62, 5 }
  0xd3   : > { %6116 = vmatmul.mubr.bf16.gmra.mxu0 %v6359_v59  ;;  %v7796_v59 = vrot.slane %v3481_v22, 4  ;;  %6147 = vmatprep.subr.bf16.mxu1 %v6369_v0  ;;  %v6377_v22 = vld [vmem:[%s8773_s1 + $0x1c8] sm:$0xff]   ;;  %v3540_v17 = vshll.u32 %v5354_v50, 16  ;;  %v3546_v48 = vshll.u32 %v7861_v63, 16  ;;  %v6368_v30 = vld [vmem:[%s6463_s25 + $0x90] sm:$0xff]   ;;  %v4173_v54 = vrot.slane %v7861_v63, 5 }
  0xd4   : > { %6076 = vmatmul.mubr.bf16.gmra.mxu1 %v5262_v49  ;;  %6119 = vmatprep.mubr.bf16.mxu0 %v6362_v61  ;;  %v3504_v49 = vrot.slane %v3502_v37, 4  ;;  %v6363_v61 = vld [vmem:[%s6463_s25 + $0x70] sm:$0xff]   ;;  %v3515_v37 = vrot.slane %v3513_v51, 4  ;;  %v4168_v9 = vrot.slane %v4166_v43, 4 }
  0xd5   : > { %6188 = vmatpush3.bf16.msra.mxu0 %v6364_v32  ;;  %6079 = vmatprep.mubr.bf16.mxu1 %v5263_v33  ;;  %v3495_v32 = vor.u32 %v3494_v24, %v3491_v46  ;;  %v3487_v7 = vsel %vm6496_vm2, %v7796_v59, %v7798_v19  ;;  %v7868_v46 = vsel %vm6789_vm5, %v4161_v52, %v4162_v31  ;;  %v3524_v24 = vrot.slane %v3522_v57, 5  ;;  %v6371_v52 = vld [vmem:[%s6463_s25 + $0xa0] sm:$0xff]   ;;  %v5428_v57 = vld [vmem:[%s6463_s25 + $0x50] sm:$0xe] }
  0xd6   : > { %6189 = vmatprep.subr.bf16.mxu0 %v6367_v2  ;;  %v3505_v33 = vor.u32 %v3504_v49, %v7800_v11  ;;  %6148 = vmatpush3.bf16.msra.mxu1 %v6369_v0  ;;  %v6374_v0 = vld [vmem:[%s8773_s1 + $0x210] sm:$0xff]   ;;  %v3528_v59 = vrot.slane %v3526_v6, 4  ;;  %v3534_v19 = vrot.slane %v3532_v38, 5  ;;  %v5441_v49 = vrot.slane %v5427_v41, 9  ;;  %v5357_v41 = vld [vmem:[%s6463_s25 + $0x60] sm:$0xf] }
  0xd7   : > { %v7832_v23 = vrot.slane %v3495_v32, 4  ;;  %6149 = vmatprep.subr.bf16.mxu1 %v7788_v35  ;;  %v3537_v32 = vshrl.u32 %v5354_v50, 16  ;;  %v7893_v31 = vcombine.low %v3477_v55, %v3487_v7  ;;  %v7909_v7 = vsel %vm6789_vm5, %v4168_v9, %v4169_v20  ;;  %v7913_v38 = vld [vmem:[%s6463_s25 + $0x64] sm:$0xf] }
  0xd8   : > { %v3506_v28 = vrot.slane %v3505_v33, 4  ;;  %v7899_v51 = vsel %vm6789_vm5, %v5441_v49, %v4166_v43  ;;  %v3574_v53 = vshrl.u32 %v7913_v38, 16  ;;  %v6375_v9 = vld [vmem:[%s6463_s25 + $0xc0] sm:$0xff]  }
  0xd9   : > { %6190 = vmatpush3.bf16.msra.mxu0 %v6367_v2  ;;  %v7848_v2 = vsel %vm6789_vm5, %v5440_v13, %v4159_v58  ;;  %v3501_v1 = vsel %vm6496_vm2, %v7832_v23, %v7800_v11  ;;  %v3519_v11 = vor.u32 %v3518_v26, %v3515_v37  ;;  %v7886_v13 = vld [vmem:[%s6463_s25 + $0x58] sm:$0x1]  ;;  %v3550_v58 = vshrl.u32 %v7861_v63, 16 }
  0xda   : > { %6191 = vmatprep.subr.bf16.mxu0 %v6370_v25  ;;  %6150 = vmatpush3.bf16.msra.mxu1 %v7788_v35  ;;  %v3511_v35 = vsel %vm6496_vm2, %v3506_v28, %v3510_v56  ;;  %v3539_v62 = vrot.slane %v3537_v32, 4  ;;  %v7890_v23 = vrot.slane %v3546_v48, 5  ;;  %v3556_v6 = vshll.u32 %v7886_v13, 16  ;;  %v5360_v32 = vld [vmem:[%s6463_s25 + $0x70] sm:$0xf] }
  0xdb   : > { %6120 = vmatmul.mubr.bf16.gmra.mxu0 %v6363_v61  ;;  %6151 = vmatprep.subr.bf16.mxu1 %v6377_v22  ;;  %v3542_v61 = vrot.slane %v3540_v17, 5  ;;  %v3552_v8 = vrot.slane %v3550_v58, 4  ;;  %v7918_v50 = vcombine.low %v3501_v1, %v3511_v35  ;;  %v5442_v26 = vrot.slane %v5428_v57, 9 }
  0xdc   : > { %6080 = vmatmul.mubr.bf16.gmra.mxu1 %v5264_v21  ;;  %6123 = vmatprep.mubr.bf16.mxu0 %v6366_v15  ;;  %v3529_v21 = vor.u32 %v3528_v59, %v3524_v24  ;;  %v5469_v15 = vcombine.low %v7817_v12, %v7821_v14  ;;  %v3561_v59 = vshrl.u32 %v5357_v41, 16  ;;  %v5471_v60 = vcombine.low %v7899_v51, %v7909_v7 }
  0xdd   : > { %6083 = vmatprep.mubr.bf16.mxu1 %v5265_v34  ;;  %6192 = vmatpush3.bf16.msra.mxu0 %v6370_v25  ;;  %v6381_v34 = vld [vmem:[%s8773_s1 + $0x1c0] sm:$0xff]   ;;  %v3520_v25 = vrot.slane %v3519_v11, 4  ;;  %v3543_v28 = vor.u32 %v3542_v61, %v3539_v62  ;;  %v3553_v37 = vor.u32 %v3552_v8, %v7890_v23  ;;  %v7938_v11 = vrot.slane %v3556_v6, 5  ;;  %v7961_v8 = vld [vmem:[%s6463_s25 + $0x78] sm:$0x1] }
  0xde   : > { %6193 = vmatprep.subr.bf16.mxu0 %v6374_v0  ;;  %v3530_v33 = vrot.slane %v3529_v21, 4  ;;  %6152 = vmatpush3.bf16.msra.mxu1 %v6377_v22  ;;  %v5470_v22 = vcombine.low %v7848_v2, %v7868_v46  ;;  %v3563_v49 = vrot.slane %v3561_v59, 4  ;;  %v4176_v20 = vrot.slane %v7886_v13, 5  ;;  %v5430_v59 = vld [vmem:[%s6463_s25 + $0x70] sm:$0xe] }
  0xdf   : > { %v3525_v56 = vsel %vm6496_vm2, %v3520_v25, %v3524_v24  ;;  %6153 = vmatprep.subr.bf16.mxu1 %v6381_v34  ;;  %v7927_v24 = vld [vmem:[%s6463_s25 + $0x68] sm:$0x1]  ;;  %v3544_v43 = vrot.slane %v3543_v28, 4  ;;  %v3554_v17 = vrot.slane %v3553_v37, 4  ;;  %v7950_v48 = vsel %vm6789_vm5, %v5442_v26, %v4173_v54  ;;  %v7953_v25 = vld [vmem:[%s6463_s25 + $0x74] sm:$0xf] }
  0xe0   : > { %v3535_v55 = vsel %vm6496_vm2, %v3530_v33, %v3534_v19  ;;  %v3564_v19 = vshll.u32 %v5357_v41, 16  ;;  %v3580_v63 = vshll.u32 %v7927_v24, 16  ;;  %v3576_v35 = vrot.slane %v3574_v53, 4  ;;  %v5435_v2 = vld [vmem:[%s6463_s25 + $0xc0] sm:$0xe] }
  0xe1   : > { %6194 = vmatpush3.bf16.msra.mxu0 %v6374_v0  ;;  %v6382_v0 = vld [vmem:[%s8773_s1 + $0x200] sm:$0xff]   ;;  %v7932_v1 = vcombine.low %v3525_v56, %v3535_v55  ;;  %v4175_v58 = vrot.slane %v4173_v54, 4  ;;  %v4180_v33 = vrot.slane %v7913_v38, 5  ;;  %v3585_v57 = vshrl.u32 %v5360_v32, 16 }
  0xe2   : > { %6195 = vmatprep.subr.bf16.mxu0 %v6378_v18  ;;  %6154 = vmatpush3.bf16.msra.mxu1 %v6381_v34  ;;  %v3566_v44 = vrot.slane %v3564_v19, 5  ;;  %v3588_v41 = vshll.u32 %v5360_v32, 16  ;;  %v4183_v55 = vrot.slane %v7927_v24, 5  ;;  %v3594_v6 = vshll.u32 %v7953_v25, 16  ;;  %v5363_v19 = vld [vmem:[%s6463_s25 + $0x80] sm:$0xf] }
  0xe3   : > { %6124 = vmatmul.mubr.bf16.gmra.mxu0 %v6368_v30  ;;  %v3582_v30 = vrot.slane %v3580_v63, 5  ;;  %v4182_v56 = vrot.slane %v4180_v33, 4  ;;  %v3598_v28 = vshrl.u32 %v7953_v25, 16  ;;  %v3587_v26 = vrot.slane %v3585_v57, 4 }
  0xe4   : > { %6084 = vmatmul.mubr.bf16.gmra.mxu1 %v5266_v4  ;;  %6127 = vmatprep.mubr.bf16.mxu0 %v6371_v52  ;;  %v3570_v4 = vshll.u32 %v7913_v38, 16  ;;  %v3567_v34 = vor.u32 %v3566_v44, %v3563_v49  ;;  %v3590_v24 = vrot.slane %v3588_v41, 5  ;;  %v3559_v47 = vsel %vm6496_vm2, %v3554_v17, %v7938_v11  ;;  %v8001_v49 = vld [vmem:[%s6463_s25 + $0x84] sm:$0xf] }
  0xe5   : > { %6087 = vmatprep.mubr.bf16.mxu1 %v5267_v16  ;;  %6196 = vmatpush3.bf16.msra.mxu0 %v6378_v18  ;;  %v5429_v16 = vld [vmem:[%s6463_s25 + $0x60] sm:$0xe]  ;;  %v6372_v18 = vld [vmem:[%s6463_s25 + $0xb0] sm:$0xff]   ;;  %v7981_v45 = vrot.slane %v3594_v6, 5  ;;  %v7991_v10 = vsel %vm6789_vm5, %v4175_v58, %v4176_v20  ;;  %v8007_v53 = vsel %vm6789_vm5, %v4182_v56, %v4183_v55  ;;  %v4187_v32 = vrot.slane %v7953_v25, 5 }
  0xe6   : > { %6197 = vmatprep.subr.bf16.mxu0 %v6382_v0  ;;  %v7943_v21 = vrot.slane %v3570_v4, 5  ;;  %v5443_v13 = vrot.slane %v5429_v16, 9  ;;  %v3568_v61 = vrot.slane %v3567_v34, 4  ;;  %v3591_v11 = vor.u32 %v3590_v24, %v3587_v26  ;;  %v6376_v20 = vld [vmem:[%s6463_s25 + $0xd0] sm:$0xff]   ;;  %v6379_v34 = vld [vmem:[%s6463_s25 + $0xe0] sm:$0xff]  }
  0xe7   : > { %v3612_v17 = vshll.u32 %v5363_v19, 16  ;;  %v3622_v57 = vshrl.u32 %v8001_v49, 16  ;;  %v4190_v55 = vrot.slane %v7961_v8, 5  ;;  %v5378_v56 = vld [vmem:[%s6463_s25 + $0xd0] sm:$0xf] }
  0xe8   : > { %v3577_v52 = vor.u32 %v3576_v35, %v7943_v21  ;;  %v3573_v40 = vsel %vm6496_vm2, %v3568_v61, %v7943_v21  ;;  %v3592_v63 = vrot.slane %v3591_v11, 4  ;;  %v5365_v61 = vld [vmem:[%s6463_s25 + $0x88] sm:$0x1] }
  0xe9   : > { %6198 = vmatpush3.bf16.msra.mxu0 %v6382_v0  ;;  %v3549_v0 = vsel %vm6496_vm2, %v3544_v43, %v7890_v23  ;;  %v3604_v23 = vshll.u32 %v7961_v8, 16  ;;  %v5444_v43 = vrot.slane %v5430_v59, 9  ;;  %v3614_v25 = vrot.slane %v3612_v17, 5 }
  0xea   : > { %v3578_v37 = vrot.slane %v3577_v52, 4  ;;  %v8015_v35 = vcombine.low %v3549_v0, %v3559_v47  ;;  %v5366_v0 = vld [vmem:[%s6463_s25 + $0x90] sm:$0xf]  ;;  %v3597_v26 = vsel %vm6496_vm2, %v3592_v63, %v7981_v45  ;;  %v4189_v8 = vrot.slane %v4187_v32, 4  ;;  %v8046_v47 = vld [vmem:[%s6463_s25 + $0x94] sm:$0xf] }
  0xeb   : > { %6128 = vmatmul.mubr.bf16.gmra.mxu0 %v6372_v18  ;;  %v3609_v18 = vshrl.u32 %v5363_v19, 16  ;;  %v3606_v58 = vrot.slane %v3604_v23, 5  ;;  %v8043_v24 = vsel %vm6789_vm5, %v5444_v43, %v4187_v32  ;;  %v3624_v59 = vrot.slane %v3622_v57, 4  ;;  %v6380_v63 = vld [vmem:[%s6463_s25 + $0xf0] sm:$0xff]  }
  0xec   : > { %6088 = vmatmul.mubr.bf16.gmra.mxu1 %v5268_v5  ;;  %6131 = vmatprep.mubr.bf16.mxu0 %v6375_v9  ;;  %v3600_v5 = vrot.slane %v3598_v28, 4  ;;  %v3583_v44 = vsel %vm6496_vm2, %v3578_v37, %v3582_v30  ;;  %v3618_v30 = vshll.u32 %v8001_v49, 16  ;;  %v5431_v28 = vld [vmem:[%s6463_s25 + $0x80] sm:$0xe]  ;;  %v3633_v11 = vshrl.u32 %v5366_v0, 16 }
  0xed   : > { %v7957_v62 = vpop.f32.mrf.mxu0  ;;  %6091 = vmatprep.mubr.bf16.mxu1 %v5269_v39  ;;  %v7985_v54 = vpop.f32.mrf.mxu1  ;;  %v7998_v39 = vsel %vm6789_vm5, %v5443_v13, %v4180_v33  ;;  %v5472_v33 = vcombine.low %v7950_v48, %v7991_v10  ;;  %v3611_v52 = vrot.slane %v3609_v18, 4  ;;  %v8024_v41 = vcombine.low %v3573_v40, %v3583_v44  ;;  %v8056_v40 = vld [vmem:[%s6463_s25 + $0x98] sm:$0x1] }
  0xee   : > { %v3601_v16 = vor.u32 %v3600_v5, %v7981_v45  ;;  %v8029_v6 = vrot.slane %v3618_v30, 5  ;;  %v4194_v5 = vrot.slane %v8001_v49, 5  ;;  %v5445_v19 = vrot.slane %v5431_v28, 9 }
  0xef   : > { %v7969_v38 = vpop.f32.mrf.mxu0  ;;  %v8018_v13 = vpop.f32.mrf.mxu1  ;;  %v3615_v29 = vor.u32 %v3614_v25, %v3611_v52  ;;  %v3636_v44 = vshll.u32 %v5366_v0, 16  ;;  %v4197_v43 = vrot.slane %v5365_v61, 5  ;;  %v8067_v18 = vsel %vm6789_vm5, %v4189_v8, %v4190_v55  ;;  %v5369_v52 = vld [vmem:[%s6463_s25 + $0xa0] sm:$0xf]  ;;  %v8079_v55 = vld [vmem:[%s6463_s25 + $0xa4] sm:$0xf] }
  0xf0   : > { %v3602_v9 = vrot.slane %v3601_v16, 4  ;;  %v3625_v23 = vor.u32 %v3624_v59, %v8029_v6  ;;  %v4196_v16 = vrot.slane %v4194_v5, 4  ;;  %v3635_v17 = vrot.slane %v3633_v11, 4  ;;  %v5432_v59 = vld [vmem:[%s6463_s25 + $0x90] sm:$0xe] }
  0xf1   : > { %v7987_v4 = vpop.f32.mrf.mxu0  ;;  %v8052_v45 = vpop.f32.mrf.mxu1  ;;  %v3616_v57 = vrot.slane %v3615_v29, 4  ;;  %v8075_v0 = vsel %vm6789_vm5, %v5445_v19, %v4194_v5  ;;  %v4204_v11 = vrot.slane %v8056_v40, 5  ;;  %v4201_v19 = vrot.slane %v8046_v47, 5 }
  0xf2   : > { %v3607_v36 = vsel %vm6496_vm2, %v3602_v9, %v3606_v58  ;;  %v3626_v28 = vrot.slane %v3625_v23, 4  ;;  %v8083_v8 = vsel %vm6789_vm5, %v4196_v16, %v4197_v43  ;;  %v3660_v16 = vshll.u32 %v5369_v52, 16  ;;  %v8097_v43 = vld [vmem:[%s6463_s25 + $0xa8] sm:$0x1] }
  0xf3   : > { %v8011_v21 = vpop.f32.mrf.mxu0  ;;  %6132 = vmatmul.mubr.bf16.gmra.mxu0 %v6376_v20  ;;  %v3646_v20 = vshrl.u32 %v8046_v47, 16  ;;  %v8063_v49 = vcombine.low %v3597_v26, %v3607_v36  ;;  %v8071_v25 = vpop.f32.mrf.mxu1  ;;  %v4203_v12 = vrot.slane %v4201_v19, 4  ;;  %v8818_v48 = vcombine.low %v7998_v39, %v8007_v53 }
  0xf4   : > { %6092 = vmatmul.mubr.bf16.gmra.mxu1 %v5270_v42  ;;  %6135 = vmatprep.mubr.bf16.mxu0 %v6379_v34  ;;  %v3628_v42 = vshll.u32 %v5365_v61, 16  ;;  %v3638_v34 = vrot.slane %v3636_v44, 5  ;;  %v3652_v61 = vshll.u32 %v8056_v40, 16  ;;  %v3657_v44 = vshrl.u32 %v5369_v52, 16  ;;  %v8113_v52 = vld [vmem:[%s6463_s25 + $0xb4] sm:$0xf] }
  0xf5   : > { %v8036_v37 = vpop.f32.mrf.mxu0  ;;  %6155 = vmatprep.mubr.bf16.mxu1 %v7893_v31  ;;  %v3642_v31 = vshll.u32 %v8046_v47, 16  ;;  %v3648_v30 = vrot.slane %v3646_v20, 4  ;;  %v3670_v20 = vshrl.u32 %v8079_v55, 16  ;;  %v3729_v39 = vshrl.u32 %v5378_v56, 16 }
  0xf6   : > { %v3630_v9 = vrot.slane %v3628_v42, 5  ;;  %v3639_v26 = vor.u32 %v3638_v34, %v3635_v17  ;;  %v3654_v42 = vrot.slane %v3652_v61, 5  ;;  %v3659_v14 = vrot.slane %v3657_v44, 4 }
  0xf7   : > { %v8061_v32 = vpop.f32.mrf.mxu0  ;;  %v3644_v58 = vrot.slane %v3642_v31, 5  ;;  %v3666_v31 = vshll.u32 %v8079_v55, 16  ;;  %v3662_v34 = vrot.slane %v3660_v16, 5  ;;  %v3672_v61 = vrot.slane %v3670_v20, 4 }
  0xf8   : > { %v3640_v23 = vrot.slane %v3639_v26, 4  ;;  %v3631_v17 = vsel %vm6496_vm2, %v3626_v28, %v3630_v9  ;;  %v3676_v28 = vshll.u32 %v8097_v43, 16  ;;  %v8132_v44 = vsel %vm6789_vm5, %v4203_v12, %v4204_v11 }
  0xf9   : > { %v3649_v36 = vor.u32 %v3648_v30, %v3644_v58  ;;  %v8089_v5 = vpop.f32.mrf.mxu0  ;;  %v8110_v30 = vrot.slane %v3666_v31, 5  ;;  %v3663_v16 = vor.u32 %v3662_v34, %v3659_v14  ;;  %v3732_v53 = vshll.u32 %v5378_v56, 16 }
  0xfb   : > { %6136 = vmatmul.mubr.bf16.gmra.mxu0 %v6380_v63  ;;  %v3650_v40 = vrot.slane %v3649_v36, 4  ;;  %v3621_v63 = vsel %vm6496_vm2, %v3616_v57, %v8029_v6  ;;  %v3645_v57 = vsel %vm6496_vm2, %v3640_v23, %v3644_v58  ;;  %v3673_v31 = vor.u32 %v3672_v61, %v8110_v30 }
  0xfc   : > { %6156 = vmatmul.mubr.bf16.vlgmr.msra.gmra.mxu1 %v7918_v50  ;;  %v8087_v29 = vpop.f32.mrf.mxu1  ;;  %6199 = vmatprep.mubr.bf16.mxu0 %v5469_v15  ;;  %v5446_v50 = vrot.slane %v5432_v59, 9  ;;  %v5433_v15 = vld [vmem:[%s6463_s25 + $0xa0] sm:$0xe]  ;;  %v8117_v59 = vpop.f32.mrf.mxu0  ;;  %v3690_v23 = vshll.u32 %v8113_v52, 16  ;;  %v8138_v47 = vrot.slane %v3663_v16, 4 }
  0xfd   : > { %6159 = vmatprep.mubr.bf16.mxu1 %v7932_v1  ;;  %v5372_v1 = vld [vmem:[%s6463_s25 + $0xb0] sm:$0xf]  ;;  %v3655_v9 = vsel %vm6496_vm2, %v3650_v40, %v3654_v42  ;;  %v5447_v20 = vrot.slane %v5433_v15, 9  ;;  %v5409_v42 = vcombine.low %v3621_v63, %v3631_v17  ;;  %v8160_v46 = vrot.slane %v3673_v31, 4  ;;  %v5375_v17 = vld [vmem:[%s6463_s25 + $0xc0] sm:$0xf] }
  0xfe   : > { %v8115_v26 = vpop.f32.mrf.mxu1  ;;  %v8128_v36 = vsel %vm6789_vm5, %v5446_v50, %v4201_v19  ;;  %v3681_v6 = vshrl.u32 %v5372_v1, 16  ;;  %v3684_v58 = vshll.u32 %v5372_v1, 16  ;;  %v8136_v40 = vcombine.low %v3645_v57, %v3655_v9  ;;  %v5374_v50 = vld [vmem:[%s6463_s25 + $0xb8] sm:$0x1] }
  0xff   : > { %v4208_v19 = vrot.slane %v8079_v55, 5  ;;  %v8150_v15 = vrot.slane %v3690_v23, 5  ;;  %v3694_v1 = vshrl.u32 %v8113_v52, 16  ;;  %v5434_v55 = vld [vmem:[%s6463_s25 + $0xb0] sm:$0xe]  ;;  %v3700_v7 = vshll.u32 %v5374_v50, 16 }
 0x100   : > { %v8145_v11 = vpop.f32.mrf.mxu1  ;;  %v3683_v14 = vrot.slane %v3681_v6, 4  ;;  %v3686_v63 = vrot.slane %v3684_v58, 5  ;;  %v5448_v57 = vrot.slane %v5434_v55, 9  ;;  %v4215_v9 = vrot.slane %v8113_v52, 5 }
 0x101   : > { %8816 = vst [vmem:[#allocation3_spill] sm:$0xff] %v8145_v11  ;;  %v8168_v34 = vsel %vm6789_vm5, %v5447_v20, %v4208_v19  ;;  %v3696_v51 = vrot.slane %v3694_v1, 4  ;;  %v4210_v6 = vrot.slane %v4208_v19, 4  ;;  %v4218_v31 = vrot.slane %v5374_v50, 5  ;;  %v8184_v20 = vld [vmem:[%s6463_s25 + $0xc8] sm:$0x1] }
 0x102   : > { %v3687_v61 = vor.u32 %v3686_v63, %v3683_v14  ;;  %v3705_v58 = vshrl.u32 %v5375_v17, 16  ;;  %v3708_v23 = vshll.u32 %v5375_v17, 16  ;;  %v4217_v63 = vrot.slane %v4215_v9, 4 }
 0x103   : > { %6200 = vmatmul.mubr.bf16.vlgmr.msra.gmra.mxu0 %v5470_v22  ;;  %v8162_v22 = vrot.slane %v3676_v28, 5  ;;  %v3697_v16 = vor.u32 %v3696_v51, %v8150_v15  ;;  %v3702_v19 = vrot.slane %v3700_v7, 5  ;;  %v4225_v56 = vrot.slane %v8184_v20, 5 }
 0x104   : > { %6160 = vmatmul.mubr.bf16.gmra.mxu1 %v8015_v35  ;;  %6203 = vmatprep.mubr.bf16.mxu0 %v5471_v60  ;;  %v4211_v35 = vrot.slane %v8097_v43, 5  ;;  %v8171_v60 = vld [vmem:[%s6463_s25 + $0xc4] sm:$0xf]  ;;  %v8178_v43 = vpop.f32.mrf.mxu1  ;;  %v3688_v14 = vrot.slane %v3687_v61, 4  ;;  %v3707_v1 = vrot.slane %v3705_v58, 4  ;;  %v3710_v55 = vrot.slane %v3708_v23, 5 }
 0x105   : > { %v8147_v12 = vpop.f32.mrf.mxu0  ;;  %6163 = vmatprep.mubr.bf16.mxu1 %v8024_v41  ;;  %v3669_v41 = vsel %vm6496_vm2, %v8138_v47, %v8110_v30  ;;  %v3714_v47 = vshll.u32 %v8171_v60, 16  ;;  %v3718_v30 = vshrl.u32 %v8171_v60, 16  ;;  %v3698_v52 = vrot.slane %v3697_v16, 4  ;;  %v8214_v23 = vld [vmem:[%s6463_s25 + $0xd4] sm:$0xf] }
 0x106   : > { %v3679_v50 = vsel %vm6496_vm2, %v8160_v46, %v8162_v22  ;;  %v3724_v61 = vshll.u32 %v8184_v20, 16  ;;  %v8207_v46 = vsel %vm6789_vm5, %v4210_v6, %v4211_v35  ;;  %v8211_v22 = vsel %vm6789_vm5, %v5448_v57, %v4215_v9  ;;  %v8232_v9 = vld [vmem:[%s6463_s25 + $0xd8] sm:$0x1] }
 0x107   : > { %v8180_v28 = vpop.f32.mrf.mxu0  ;;  %v8193_v51 = vrot.slane %v3714_v47, 5  ;;  %v3720_v17 = vrot.slane %v3718_v30, 4  ;;  %v3711_v58 = vor.u32 %v3710_v55, %v3707_v1  ;;  %v3693_v10 = vsel %vm6496_vm2, %v3688_v14, %v8150_v15 }
 0x108   : > { %v3703_v6 = vsel %vm6496_vm2, %v3698_v52, %v3702_v19  ;;  %v5449_v57 = vrot.slane %v5435_v2, 9  ;;  %v3726_v47 = vrot.slane %v3724_v61, 5  ;;  %v4222_v15 = vrot.slane %v8171_v60, 5 }
 0x109   : > { %v8202_v16 = vpop.f32.mrf.mxu0  ;;  %v3731_v1 = vrot.slane %v3729_v39, 4  ;;  %v3734_v52 = vrot.slane %v3732_v53, 5  ;;  %v3742_v2 = vshrl.u32 %v8214_v23, 16  ;;  %v5411_v19 = vcombine.low %v3669_v41, %v3679_v50  ;;  %v8252_v53 = vld [vmem:[%s6463_s25 + $0xe4] sm:$0xf] }
 0x10a   : > { %v3748_v60 = vshll.u32 %v8232_v9, 16  ;;  %v8259_v50 = vsel %vm6789_vm5, %v5449_v57, %v4222_v15  ;;  %v8272_v57 = vld [vmem:[%s6463_s25 + $0xd0] sm:$0xe]  ;;  %v8823_v20 = vcombine.low %v8075_v0, %v8083_v8 }
 0x10b   : > { %6204 = vmatmul.mubr.bf16.gmra.mxu0 %v5472_v33  ;;  %v8224_v33 = vsel %vm6789_vm5, %v4217_v63, %v4218_v31  ;;  %v3738_v31 = vshll.u32 %v8214_v23, 16  ;;  %v8236_v14 = vpop.f32.mrf.mxu0  ;;  %v3744_v39 = vrot.slane %v3742_v2, 4 }
 0x10c   : > { %v8200_v7 = vpop.f32.mrf.mxu1  ;;  %6164 = vmatmul.mubr.bf16.gmra.mxu1 %v8063_v49  ;;  %6207 = vmatprep.mubr.bf16.mxu0 %v8818_v48  ;;  %v3721_v49 = vor.u32 %v3720_v17, %v8193_v51  ;;  %v5381_v17 = vld [vmem:[%s6463_s25 + $0xe0] sm:$0xf] }
 0x10d   : > { %8817 = vst [vmem:[#allocation4_spill] sm:$0xff] %v8200_v7  ;;  %6167 = vmatprep.mubr.bf16.mxu1 %v5409_v42  ;;  %v3712_v42 = vrot.slane %v3711_v58, 4  ;;  %v8243_v55 = vrot.slane %v3738_v31, 5  ;;  %v5412_v58 = vcombine.low %v3693_v10, %v3703_v6  ;;  %v4224_v31 = vrot.slane %v4222_v15, 4 }
 0x10e   : > { %v8227_v35 = vpop.f32.mrf.mxu1  ;;  %v3722_v30 = vrot.slane %v3721_v49, 4  ;;  %v3735_v49 = vor.u32 %v3734_v52, %v3731_v1  ;;  %v8822_v6 = vcombine.low %v8043_v24, %v8067_v18  ;;  %v3753_v15 = vshrl.u32 %v5381_v17, 16 }
 0x10f   : > { %8819 = vst [vmem:[#allocation5_spill] sm:$0xff] %v8227_v35  ;;  %v3717_v41 = vsel %vm6496_vm2, %v3712_v42, %v8193_v51  ;;  %v3745_v42 = vor.u32 %v3744_v39, %v8243_v55  ;;  %v3756_v52 = vshll.u32 %v5381_v17, 16  ;;  %v3750_v18 = vrot.slane %v3748_v60, 5  ;;  %v8304_v17 = vld [vmem:[%s6463_s25 + $0xf4] sm:$0xf] }
 0x110   : > { %v8238_v63 = vpop.f32.mrf.mxu1  ;;  %v3727_v51 = vsel %vm6496_vm2, %v3722_v30, %v3726_v47  ;;  %v3736_v24 = vrot.slane %v3735_v49, 4  ;;  %v3755_v48 = vrot.slane %v3753_v15, 4 }
 0x111   : > { %8820 = vst [vmem:[#allocation2_spill] sm:$0xff] %v8238_v63  ;;  %v3746_v39 = vrot.slane %v3745_v42, 4  ;;  %v4232_v42 = vrot.slane %v8232_v9, 5  ;;  %v3786_v9 = vshll.u32 %v8304_v17, 16 }
 0x112   : > { %v8247_v61 = vpop.f32.mrf.mxu1 }
 0x113   : > { %8821 = vst [vmem:[#allocation6_spill] sm:$0xff] %v8247_v61  ;;  %v8262_v10 = vpop.f32.mrf.mxu0  ;;  %6208 = vmatmul.mubr.bf16.gmra.mxu0 %v8822_v6  ;;  %v8279_v6 = vld [vmem:[%s6463_s25 + $0xe8] sm:$0x1]  ;;  %v3758_v61 = vrot.slane %v3756_v52, 5  ;;  %v5384_v52 = vld [vmem:[%s6463_s25 + $0xf0] sm:$0xf] }
 0x114   : > { %v5893_v1 = vpop.f32.mrf.mxu1  ;;  %6168 = vmatmul.mubr.bf16.gmra.mxu1 %v8136_v40  ;;  %6211 = vmatprep.mubr.bf16.mxu0 %v8823_v20  ;;  %v3762_v40 = vshll.u32 %v8252_v53, 16  ;;  %v3772_v15 = vshll.u32 %v8279_v6, 16 }
 0x115   : > { %v1055_v2 = vadd.f32 %v5893_v1, %v7957_v62  ;;  %6171 = vmatprep.mubr.bf16.mxu1 %v5411_v19  ;;  %v8282_v47 = vpop.f32.mrf.mxu0  ;;  %v8288_v62 = vsel %vm6789_vm5, %v4224_v31, %v4225_v56  ;;  %v3766_v19 = vshrl.u32 %v8252_v53, 16  ;;  %v5413_v1 = vcombine.low %v3717_v41, %v3727_v51 }
 0x116   : > { %v1046_v30 = vpop.f32.mrf.mxu1  ;;  %v3764_v8 = vrot.slane %v3762_v40, 5  ;;  %v3759_v20 = vor.u32 %v3758_v61, %v3755_v48  ;;  %v3741_v56 = vsel %vm6496_vm2, %v3736_v24, %v8243_v55  ;;  %v3751_v31 = vsel %vm6496_vm2, %v3746_v39, %v3750_v18 }
 0x117   : > { %v1047_v0 = vadd.f32 %v1046_v30, %v7969_v38  ;;  %v8291_v60 = vpop.f32.mrf.mxu0  ;;  %v3768_v40 = vrot.slane %v3766_v19, 4  ;;  %v5437_v30 = vld [vmem:[%s6463_s25 + $0xe0] sm:$0xe]  ;;  %v8824_v61 = vrot.slane %v8214_v23, 5  ;;  %v3777_v24 = vshrl.u32 %v5384_v52, 16 }
 0x118   : > { %v5894_v49 = vpop.f32.mrf.mxu1  ;;  %v3780_v18 = vshll.u32 %v5384_v52, 16  ;;  %v8825_v19 = vcombine.low %v8128_v36, %v8132_v44  ;;  %v5414_v7 = vcombine.low %v3741_v56, %v3751_v31  ;;  %v5451_v11 = vrot.slane %v5437_v30, 9  ;;  %v8324_v36 = vld [vmem:[%s6463_s25 + $0xf8] sm:$0x1] }
 0x119   : > { %v1058_v38 = vadd.f32 %v5894_v49, %v7987_v4  ;;  %v8306_v41 = vpop.f32.mrf.mxu0  ;;  %v4231_v48 = vrot.slane %v8824_v61, 4  ;;  %v3760_v4 = vrot.slane %v3759_v20, 4  ;;  %v3774_v49 = vrot.slane %v3772_v15, 5 }
 0x11a   : > { %v1049_v51 = vpop.f32.mrf.mxu1  ;;  %v3769_v55 = vor.u32 %v3768_v40, %v3764_v8  ;;  %v4236_v61 = vrot.slane %v8252_v53, 5  ;;  %v3779_v44 = vrot.slane %v3777_v24, 4  ;;  %v3782_v31 = vrot.slane %v3780_v18, 5 }
 0x11b   : > { %v1050_v63 = vadd.f32 %v1049_v51, %v8011_v21  ;;  %v5937_v39 = vpop.f32.mrf.mxu0  ;;  %6212 = vmatmul.mubr.bf16.gmra.mxu0 %v8825_v19  ;;  %v8826_v21 = vcombine.low %v8168_v34, %v8207_v46  ;;  %v3765_v53 = vsel %vm6496_vm2, %v3760_v4, %v3764_v8  ;;  %v3788_v40 = vrot.slane %v3786_v9, 5 }
 0x11c   : > { %v5897_v35 = vpop.f32.mrf.mxu1  ;;  %6172 = vmatmul.mubr.bf16.gmra.mxu1 %v5412_v58  ;;  %v8317_v20 = vadd.f32 %v5937_v39, %v1055_v2  ;;  %v3770_v52 = vrot.slane %v3769_v55, 4  ;;  %v3790_v2 = vshrl.u32 %v8304_v17, 16  ;;  %v4239_v46 = vrot.slane %v8279_v6, 5 }
 0x11d   : > { %6215 = vmatprep.mubr.bf16.mxu0 %v8826_v21  ;;  %v1071_v15 = vadd.f32 %v5897_v35, %v8036_v37  ;;  %6175 = vmatprep.mubr.bf16.mxu1 %v5413_v1  ;;  %v1455_v58 = vpop.f32.mrf.mxu0  ;;  %v4238_v51 = vrot.slane %v4236_v61, 4  ;;  %v3783_v55 = vor.u32 %v3782_v31, %v3779_v44  ;;  %v3796_v8 = vshll.u32 %v8324_v36, 16 }
 0x11e   : > { %v1062_v56 = vpop.f32.mrf.mxu1  ;;  %v8329_v30 = vadd.f32 %v1455_v58, %v1047_v0  ;;  %v3775_v37 = vsel %vm6496_vm2, %v3770_v52, %v3774_v49  ;;  %v3792_v24 = vrot.slane %v3790_v2, 4  ;;  %v5479_v0 = vcombine.low %v8259_v50, %v8288_v62 }
 0x11f   : > { %v1063_v34 = vadd.f32 %v1062_v56, %v8061_v32  ;;  %v5938_v35 = vpop.f32.mrf.mxu0  ;;  %v5415_v32 = vcombine.low %v3765_v53, %v3775_v37  ;;  %v3784_v49 = vrot.slane %v3783_v55, 4  ;;  %v3798_v6 = vrot.slane %v3796_v8, 5 }
 0x120   : > { %v5898_v1 = vpop.f32.mrf.mxu1  ;;  %v8336_v4 = vadd.f32 %v5938_v35, %v1058_v38  ;;  %v3793_v9 = vor.u32 %v3792_v24, %v3788_v40  ;;  %v8827_v44 = vrot.slane %v8214_v23, 5  ;;  %v8828_v38 = vrot.slane %v8272_v57, 9 }
 0x121   : > { %v1074_v18 = vadd.f32 %v5898_v1, %v8089_v5  ;;  %v1458_v39 = vpop.f32.mrf.mxu0  ;;  %v8829_v50 = vcombine.low %v8211_v22, %v8224_v33  ;;  %v4240_v23 = vsel %vm6789_vm5, %v4238_v51, %v4239_v46  ;;  %v3789_v22 = vsel %vm6496_vm2, %v3784_v49, %v3788_v40 }
 0x122   : > { %v1065_v19 = vpop.f32.mrf.mxu1  ;;  %v8341_v21 = vadd.f32 %v1458_v39, %v1050_v63  ;;  %v4230_v5 = vsel %vm6789_vm5, %v8828_v38, %v8827_v44  ;;  %v4233_v63 = vsel %vm6789_vm5, %v4231_v48, %v4232_v42  ;;  %v3794_v57 = vrot.slane %v3793_v9, 4 }
 0x123   : > { %v1066_v52 = vadd.f32 %v1065_v19, %v8117_v59  ;;  %v5941_v58 = vpop.f32.mrf.mxu0  ;;  %6216 = vmatmul.mubr.bf16.gmra.mxu0 %v8829_v50  ;;  %v4237_v59 = vsel %vm6789_vm5, %v5451_v11, %v4236_v61  ;;  %v4243_v33 = vrot.slane %v8304_v17, 5  ;;  %v5480_v2 = vcombine.low %v4230_v5, %v4233_v63 }
 0x124   : > { %v5901_v62 = vpop.f32.mrf.mxu1  ;;  %6176 = vmatmul.mubr.bf16.gmra.mxu1 %v5414_v7  ;;  %v8359_v56 = vadd.f32 %v5941_v58, %v1071_v15  ;;  %6219 = vmatprep.mubr.bf16.mxu0 %v5479_v0  ;;  %v5438_v7 = vld [vmem:[%s6463_s25 + $0xf0] sm:$0xe]  ;;  %v3799_v11 = vsel %vm6496_vm2, %v3794_v57, %v3798_v6  ;;  %v4246_v51 = vrot.slane %v8324_v36, 5  ;;  %s4954_s25 = sshll.u32 %s8910_s12, 3 }
 0x125   : > { %v1087_v53 = vadd.f32 %v5901_v62, %v8147_v12  ;;  %6179 = vmatprep.mubr.bf16.mxu1 %v5415_v32  ;;  %v1471_v42 = vpop.f32.mrf.mxu0  ;;  %v5481_v12 = vcombine.low %v4237_v59, %v4240_v23  ;;  %v5416_v46 = vcombine.low %v3789_v22, %v3799_v11  ;;  %v5452_v35 = vrot.slane %v5438_v7, 9  ;;  %s8512_s7 = scalar_lea.vmem %s8775_s3, %s4954_s25 }
 0x126   : > { %v1078_v48 = vpop.f32.mrf.mxu1  ;;  %v8368_v61 = vadd.f32 %v1471_v42, %v1063_v34  ;;  %v4245_v17 = vrot.slane %v4243_v33, 4 }
 0x127   : > { %v1079_v15 = vadd.f32 %v1078_v48, %v8180_v28  ;;  %v5942_v31 = vpop.f32.mrf.mxu0 }
 0x128   : > { %v5902_v37 = vpop.f32.mrf.mxu1  ;;  %v8371_v1 = vadd.f32 %v5942_v31, %v1074_v18  ;;  %v4247_v36 = vsel %vm6789_vm5, %v4245_v17, %v4246_v51 }
 0x129   : > { %v1090_v40 = vadd.f32 %v5902_v37, %v8202_v16  ;;  %v1474_v55 = vpop.f32.mrf.mxu0  ;;  %v4244_v16 = vsel %vm6789_vm5, %v5452_v35, %v4243_v33 }
 0x12a   : > { %v1081_v27 = vpop.f32.mrf.mxu1  ;;  %v8375_v24 = vadd.f32 %v1474_v55, %v1066_v52  ;;  %v5482_v9 = vcombine.low %v4244_v16, %v4247_v36 }
 0x12b   : > { %v1082_v34 = vadd.f32 %v1081_v27, %v8236_v14  ;;  %v5945_v28 = vpop.f32.mrf.mxu0  ;;  %6220 = vmatmul.mubr.bf16.gmra.mxu0 %v5480_v2 }
 0x12c   : > { %v5905_v8 = vpop.f32.mrf.mxu1  ;;  %6180 = vmatmul.mubr.bf16.gmra.mxu1 %v5416_v46  ;;  %v8378_v0 = vadd.f32 %v5945_v28, %v1087_v53  ;;  %6223 = vmatprep.mubr.bf16.mxu0 %v5481_v12 }
 0x12d   : > { %v1103_v18 = vadd.f32 %v5905_v8, %v8262_v10  ;;  %v1487_v32 = vpop.f32.mrf.mxu0  ;;  %v8830_v8 = vld [vmem:[#allocation3_spill] sm:$0xff] }
 0x12e   : > { %v1094_v39 = vpop.f32.mrf.mxu1  ;;  %v8385_v19 = vadd.f32 %v1487_v32, %v1079_v15 }
 0x12f   : > { %v1095_v14 = vadd.f32 %v1094_v39, %v8282_v47  ;;  %v5946_v49 = vpop.f32.mrf.mxu0 }
 0x130   : > { %v5906_v6 = vpop.f32.mrf.mxu1  ;;  %v8388_v52 = vadd.f32 %v5946_v49, %v1090_v40 }
 0x131   : > { %v1106_v44 = vadd.f32 %v5906_v6, %v8291_v60  ;;  %v1490_v10 = vpop.f32.mrf.mxu0 }
 0x132   : > { %v1097_v38 = vpop.f32.mrf.mxu1  ;;  %v8391_v5 = vadd.f32 %v1490_v10, %v1082_v34 }
 0x133   : > { %v1098_v3 = vadd.f32 %v1097_v38, %v8306_v41  ;;  %v5949_v58 = vpop.f32.mrf.mxu0  ;;  %6224 = vmatmul.mubr.bf16.gmra.mxu0 %v5482_v9 }
 0x134   : > { %v5909_v50 = vpop.f32.mrf.mxu1  ;;  %v8394_v62 = vadd.f32 %v5949_v58, %v1103_v18  ;;  %v8831_v18 = vld [vmem:[#allocation4_spill] sm:$0xff] }
 0x135   : > { %v1503_v63 = vpop.f32.mrf.mxu0  ;;  %v1119_v60 = vadd.f32 %v5909_v50, %v7985_v54 }
 0x136   : > { %v1110_v47 = vpop.f32.mrf.mxu1  ;;  %v8396_v59 = vadd.f32 %v1503_v63, %v1095_v14 }
 0x137   : > { %v5950_v23 = vpop.f32.mrf.mxu0  ;;  %v1111_v41 = vadd.f32 %v1110_v47, %v8018_v13 }
 0x138   : > { %v5910_v57 = vpop.f32.mrf.mxu1  ;;  %v8398_v53 = vadd.f32 %v5950_v23, %v1106_v44 }
 0x139   : > { %v1506_v22 = vpop.f32.mrf.mxu0  ;;  %v1122_v15 = vadd.f32 %v5910_v57, %v8052_v45 }
 0x13a   : > { %v1113_v7 = vpop.f32.mrf.mxu1  ;;  %v8401_v33 = vadd.f32 %v1506_v22, %v1098_v3  ;;  %v8834_v3 = vld [vmem:[#allocation6_spill] sm:$0xff] }
 0x13b   : > { %v5953_v42 = vpop.f32.mrf.mxu0  ;;  %v1114_v12 = vadd.f32 %v1113_v7, %v8071_v25 }
 0x13c   : > { %v5913_v48 = vpop.f32.mrf.mxu1  ;;  %v8404_v11 = vadd.f32 %v5953_v42, %v1119_v60 }
 0x13d   : > { %v1519_v31 = vpop.f32.mrf.mxu0  ;;  %v1135_v40 = vadd.f32 %v5913_v48, %v8087_v29  ;;  %v8832_v29 = vld [vmem:[#allocation5_spill] sm:$0xff] }
 0x13e   : > { %v1126_v2 = vpop.f32.mrf.mxu1  ;;  %v8407_v37 = vadd.f32 %v1519_v31, %v1111_v41 }
 0x13f   : > { %v5954_v46 = vpop.f32.mrf.mxu0  ;;  %v1127_v55 = vadd.f32 %v1126_v2, %v8115_v26  ;;  %v8833_v26 = vld [vmem:[#allocation2_spill] sm:$0xff] }
 0x140   : > { %v5914_v54 = vpop.f32.mrf.mxu1  ;;  %v8410_v35 = vadd.f32 %v5954_v46, %v1122_v15 }
 0x141   : > { %v1522_v17 = vpop.f32.mrf.mxu0  ;;  %v1138_v25 = vadd.f32 %v5914_v54, %v8830_v8 }
 0x142   : > { %v1129_v13 = vpop.f32.mrf.mxu1  ;;  %v8413_v51 = vadd.f32 %v1522_v17, %v1114_v12 }
 0x143   : > { %v1130_v45 = vadd.f32 %v1129_v13, %v8178_v43  ;;  %v5957_v27 = vpop.f32.mrf.mxu0 }
 0x144   : > { %v5917_v34 = vpop.f32.mrf.mxu1  ;;  %v8417_v28 = vadd.f32 %v5957_v27, %v1135_v40 }
 0x145   : > { %v1151_v16 = vadd.f32 %v5917_v34, %v8831_v18  ;;  %v1535_v36 = vpop.f32.mrf.mxu0 }
 0x146   : > { %v1142_v32 = vpop.f32.mrf.mxu1  ;;  %v8421_v39 = vadd.f32 %v1535_v36, %v1127_v55 }
 0x147   : > { %v1143_v14 = vadd.f32 %v1142_v32, %v8832_v29  ;;  %v5958_v49 = vpop.f32.mrf.mxu0 }
 0x148   : > { %v5918_v9 = vpop.f32.mrf.mxu1  ;;  %v8424_v6 = vadd.f32 %v5958_v49, %v1138_v25 }
 0x149   : > { %v1154_v43 = vadd.f32 %v5918_v9, %v8833_v26  ;;  %v1538_v44 = vpop.f32.mrf.mxu0 }
 0x14a   : > { %v1145_v10 = vpop.f32.mrf.mxu1  ;;  %v8427_v38 = vadd.f32 %v1538_v44, %v1130_v45 }
 0x14b   : > { %v1146_v58 = vadd.f32 %v1145_v10, %v8834_v3  ;;  %v5961_v50 = vpop.f32.mrf.mxu0 }
 0x14c   : > { %v5981_v63 = vpop.f32.mrf.mxu1  ;;  %v8430_v47 = vadd.f32 %v5961_v50, %v1151_v16 }
 0x14d   : > { %v1922_v23 = vadd.f32 %v5981_v63, %v8317_v20  ;;  %v1551_v57 = vpop.f32.mrf.mxu0 }
 0x14e   : > { %v1809_v60 = vpop.f32.mrf.mxu1  ;;  %v8433_v22 = vadd.f32 %v1551_v57, %v1143_v14 }
 0x14f   : > { %v1920_v7 = vadd.f32 %v1809_v60, %v8329_v30  ;;  %v5962_v41 = vpop.f32.mrf.mxu0 }
 0x150   : > { %v5982_v42 = vpop.f32.mrf.mxu1  ;;  %v8436_v48 = vadd.f32 %v5962_v41, %v1154_v43 }
 0x151   : > { %v1923_v15 = vadd.f32 %v5982_v42, %v8336_v4  ;;  %v1554_v31 = vpop.f32.mrf.mxu0 }
 0x152   : > { %v1812_v2 = vpop.f32.mrf.mxu1  ;;  %v8439_v12 = vadd.f32 %v1554_v31, %v1146_v58 }
 0x153   : > { %v1921_v46 = vadd.f32 %v1812_v2, %v8341_v21  ;;  %v6025_v54 = vpop.f32.mrf.mxu0 }
 0x154   : > { %v5985_v20 = vpop.f32.mrf.mxu1  ;;  %v8442_v40 = vadd.f32 %v6025_v54, %v1922_v23 }
 0x155   : > { %v1926_v17 = vadd.f32 %v5985_v20, %v8359_v56  ;;  %v2481_v13 = vpop.f32.mrf.mxu0 }
 0x156   : > { %v1825_v30 = vpop.f32.mrf.mxu1  ;;  %v8445_v55 = vadd.f32 %v2481_v13, %v1920_v7 }
 0x157   : > { %v1924_v45 = vadd.f32 %v1825_v30, %v8368_v61  ;;  %v6026_v27 = vpop.f32.mrf.mxu0 }
 0x158   : > { %v5986_v4 = vpop.f32.mrf.mxu1  ;;  %v8448_v34 = vadd.f32 %v6026_v27, %v1923_v15 }
 0x159   : > { %v1927_v8 = vadd.f32 %v5986_v4, %v8371_v1  ;;  %v2484_v25 = vpop.f32.mrf.mxu0 }
 0x15a   : > { %v1828_v21 = vpop.f32.mrf.mxu1  ;;  %v8451_v18 = vadd.f32 %v2484_v25, %v1921_v46 }
 0x15b   : > { %v1925_v16 = vadd.f32 %v1828_v21, %v8375_v24  ;;  %v6029_v36 = vpop.f32.mrf.mxu0 }
 0x15c   : > { %v5989_v56 = vpop.f32.mrf.mxu1  ;;  %v8454_v32 = vadd.f32 %v6029_v36, %v1926_v17 }
 0x15d   : > { %v1930_v29 = vadd.f32 %v5989_v56, %v8378_v0  ;;  %v2497_v14 = vpop.f32.mrf.mxu0 }
 0x15e   : > { %v1841_v61 = vpop.f32.mrf.mxu1  ;;  %v8457_v49 = vadd.f32 %v2497_v14, %v1924_v45 }
 0x15f   : > { %v1928_v9 = vadd.f32 %v1841_v61, %v8385_v19  ;;  %v6030_v26 = vpop.f32.mrf.mxu0 }
 0x160   : > { %v5990_v1 = vpop.f32.mrf.mxu1  ;;  %v8460_v43 = vadd.f32 %v6030_v26, %v1927_v8 }
 0x161   : > { %v1931_v44 = vadd.f32 %v5990_v1, %v8388_v52  ;;  %v2500_v10 = vpop.f32.mrf.mxu0 }
 0x162   : > { %v1844_v24 = vpop.f32.mrf.mxu1  ;;  %v8463_v3 = vadd.f32 %v2500_v10, %v1925_v16 }
 0x163   : > { %v1929_v58 = vadd.f32 %v1844_v24, %v8391_v5  ;;  %v6033_v50 = vpop.f32.mrf.mxu0 }
 0x164   : > { %v5993_v0 = vpop.f32.mrf.mxu1  ;;  %v8466_v63 = vadd.f32 %v6033_v50, %v1930_v29 }
 0x165   : > { %v1934_v23 = vadd.f32 %v5993_v0, %v8394_v62  ;;  %v2513_v57 = vpop.f32.mrf.mxu0 }
 0x166   : > { %v1857_v19 = vpop.f32.mrf.mxu1  ;;  %v8469_v60 = vadd.f32 %v2513_v57, %v1928_v9 }
 0x167   : > { %v1932_v7 = vadd.f32 %v1857_v19, %v8396_v59  ;;  %v6034_v41 = vpop.f32.mrf.mxu0 }
 0x168   : > { %v5994_v52 = vpop.f32.mrf.mxu1  ;;  %v8472_v42 = vadd.f32 %v6034_v41, %v1931_v44  ;;  %v6409_v41 = vmov 0.0  }
 0x169   : > { %v1935_v15 = vadd.f32 %v5994_v52, %v8398_v53  ;;  %v2516_v31 = vpop.f32.mrf.mxu0  ;;  %212 = vst [vmem:[%s8512_s7] sm:$0xff] %v6409_v41 }
 0x16a   : > { %v1860_v5 = vpop.f32.mrf.mxu1  ;;  %v8475_v2 = vadd.f32 %v2516_v31, %v1929_v58 }
 0x16b   : > { %v1933_v46 = vadd.f32 %v1860_v5, %v8401_v33  ;;  %v6037_v54 = vpop.f32.mrf.mxu0 }
 0x16c   : > { %v5997_v62 = vpop.f32.mrf.mxu1  ;;  %v8478_v20 = vadd.f32 %v6037_v54, %v1934_v23 }
 0x16d   : > { %v1938_v17 = vadd.f32 %v5997_v62, %v8404_v11  ;;  %v2529_v13 = vpop.f32.mrf.mxu0 }
 0x16e   : > { %v1873_v59 = vpop.f32.mrf.mxu1  ;;  %v8481_v30 = vadd.f32 %v2529_v13, %v1932_v7 }
 0x16f   : > { %v1936_v45 = vadd.f32 %v1873_v59, %v8407_v37  ;;  %v6038_v27 = vpop.f32.mrf.mxu0 }
 0x170   : > { %v5998_v53 = vpop.f32.mrf.mxu1  ;;  %v8484_v4 = vadd.f32 %v6038_v27, %v1935_v15 }
 0x171   : > { %v1939_v8 = vadd.f32 %v5998_v53, %v8410_v35  ;;  %v2532_v25 = vpop.f32.mrf.mxu0 }
 0x172   : > { %v1876_v33 = vpop.f32.mrf.mxu1  ;;  %v8487_v21 = vadd.f32 %v2532_v25, %v1933_v46 }
 0x173   : > { %v1937_v16 = vadd.f32 %v1876_v33, %v8413_v51  ;;  %v6041_v36 = vpop.f32.mrf.mxu0 }
 0x174   : > { %v6001_v11 = vpop.f32.mrf.mxu1  ;;  %v8490_v56 = vadd.f32 %v6041_v36, %v1938_v17 }
 0x175   : > { %v1942_v29 = vadd.f32 %v6001_v11, %v8417_v28  ;;  %v2545_v14 = vpop.f32.mrf.mxu0 }
 0x176   : > { %v1889_v37 = vpop.f32.mrf.mxu1  ;;  %v8493_v61 = vadd.f32 %v2545_v14, %v1936_v45 }
 0x177   : > { %v1940_v9 = vadd.f32 %v1889_v37, %v8421_v39  ;;  %v6042_v35 = vpop.f32.mrf.mxu0 }
 0x178   : > { %v6002_v26 = vpop.f32.mrf.mxu1  ;;  %v8496_v1 = vadd.f32 %v6042_v35, %v1939_v8 }
 0x179   : > { %v1943_v44 = vadd.f32 %v6002_v26, %v8424_v6  ;;  %v2548_v51 = vpop.f32.mrf.mxu0 }
 0x17a   : > { %8835 = vst [vmem:[#allocation7_spill] sm:$0xff] %v8496_v1  ;;  %v1892_v10 = vpop.f32.mrf.mxu1  ;;  %v8499_v24 = vadd.f32 %v2548_v51, %v1937_v16 }
 0x17b   : > { %v1941_v58 = vadd.f32 %v1892_v10, %v8427_v38  ;;  %v6045_v28 = vpop.f32.mrf.mxu0 }
 0x17c   : > { %8836 = vst [vmem:[#allocation3_spill] sm:$0xff] %v8499_v24  ;;  %v6005_v50 = vpop.f32.mrf.mxu1  ;;  %v8502_v0 = vadd.f32 %v6045_v28, %v1942_v29 }
 0x17d   : > { %v1946_v23 = vadd.f32 %v6005_v50, %v8430_v47  ;;  %v2561_v57 = vpop.f32.mrf.mxu0 }
 0x17e   : > { %8837 = vst [vmem:[#allocation4_spill] sm:$0xff] %v8502_v0  ;;  %v1905_v39 = vpop.f32.mrf.mxu1  ;;  %v8506_v19 = vadd.f32 %v2561_v57, %v1940_v9 }
 0x17f   : > { %v1944_v7 = vadd.f32 %v1905_v39, %v8433_v22  ;;  %v6046_v6 = vpop.f32.mrf.mxu0 }
 0x180   : > { %8838 = vst [vmem:[#allocation5_spill] sm:$0xff] %v8506_v19  ;;  %v6006_v38 = vpop.f32.mrf.mxu1  ;;  %v8515_v52 = vadd.f32 %v6046_v6, %v1943_v44 }
 0x181   : > { %v1947_v47 = vadd.f32 %v6006_v38, %v8436_v48  ;;  %v2564_v15 = vpop.f32.mrf.mxu0 }
 0x182   : > { %8839 = vst [vmem:[#allocation2_spill] sm:$0xff] %v8515_v52  ;;  %v1908_v31 = vpop.f32.mrf.mxu1  ;;  %v8518_v5 = vadd.f32 %v2564_v15, %v1941_v58 }
 0x183   : > { %v1945_v22 = vadd.f32 %v1908_v31, %v8439_v12  ;;  %v6049_v46 = vpop.f32.mrf.mxu0 }
 0x184   : > { %8840 = vst [vmem:[#allocation6_spill] sm:$0xff] %v8518_v5  ;;  %v8521_v54 = vpop.f32.mrf.mxu1  ;;  %v8523_v62 = vadd.f32 %v6049_v46, %v1946_v23 }
 0x185   : > { %v2577_v17 = vpop.f32.mrf.mxu0 }
 0x186   : > { %8841 = vst [vmem:[#allocation8_spill] sm:$0xff] %v8523_v62  ;;  %v8525_v13 = vpop.f32.mrf.mxu1  ;;  %v8527_v59 = vadd.f32 %v2577_v17, %v1944_v7 }
 0x187   : > { %v6050_v45 = vpop.f32.mrf.mxu0 }
 0x188   : > { %8842 = vst [vmem:[#allocation9_spill] sm:$0xff] %v8527_v59  ;;  %v6070_v27 = vpop.f32.mrf.mxu1  ;;  %v8529_v53 = vadd.f32 %v6050_v45, %v1947_v47 }
 0x189   : > { %v2580_v48 = vpop.f32.mrf.mxu0 }
 0x18a   : > { %8843 = vst [vmem:[#allocation10_spill] sm:$0xff] %v8529_v53  ;;  %v2932_v8 = vpop.f32.mrf.mxu1  ;;  %v8531_v25 = vadd.f32 %v2580_v48, %v1945_v22 }
 0x18b   : > { %v8533_v33 = vpop.f32.mrf.mxu0 }
 0x18c   : > { %8844 = vst [vmem:[#allocation11_spill] sm:$0xff] %v8531_v25  ;;  %v8535_v12 = vpop.f32.mrf.mxu1 }
 0x18d   : > { %v3283_v16 = vpop.f32.mrf.mxu0 }
 0x18e   : > { %v8537_v36 = vpop.f32.mrf.mxu1 }
 0x18f   : > { %v6114_v11 = vpop.f32.mrf.mxu0 }
 0x190   : > { %v8539_v29 = vpop.f32.mrf.mxu1 }
 0x191   : > { %v3286_v14 = vpop.f32.mrf.mxu0 }
 0x192   : > { %v8541_v37 = vpop.f32.mrf.mxu1 }
 0x193   : > { %v8543_v9 = vpop.f32.mrf.mxu0 }
 0x194   : > { %v8545_v35 = vpop.f32.mrf.mxu1 }
 0x195   : > { %v8547_v26 = vpop.f32.mrf.mxu0 }
 0x196   : > { %v8549_v44 = vpop.f32.mrf.mxu1 }
 0x197   : > { %v8551_v51 = vpop.f32.mrf.mxu0 }
 0x198   : > { %v8553_v10 = vpop.f32.mrf.mxu1 }
 0x199   : > { %v8555_v58 = vpop.f32.mrf.mxu0 }
 0x19a   : > { %v8557_v28 = vpop.f32.mrf.mxu1 }
 0x19b   : > { %v8559_v50 = vpop.f32.mrf.mxu0 }
 0x19c   : > { %v8561_v23 = vpop.f32.mrf.mxu1 }
 0x19d   : > { %v8563_v57 = vpop.f32.mrf.mxu0 }
 0x19e   : > { %v8565_v39 = vpop.f32.mrf.mxu1 }
 0x19f   : > { %v8567_v7 = vpop.f32.mrf.mxu0 }
 0x1a0   : > { %v8569_v6 = vpop.f32.mrf.mxu1 }
 0x1a1   : > { %v8571_v38 = vpop.f32.mrf.mxu0 }
 0x1a2   : > { %v8573_v41 = vpop.f32.mrf.mxu1 }
 0x1a3   : > { %v8575_v47 = vpop.f32.mrf.mxu0 }
 0x1a4   : > { %v8577_v15 = vpop.f32.mrf.mxu1 }
 0x1a5   : > { %v8579_v31 = vpop.f32.mrf.mxu0 }
 0x1a6   : > { %v8581_v22 = vpop.f32.mrf.mxu1 }
 0x1a7   : > { %8845 = vst [vmem:[#allocation12_spill] sm:$0xff] %v8581_v22  ;;  %v8583_v46 = vpop.f32.mrf.mxu0 }
 0x1a8   : > { %8846 = vst [vmem:[#allocation13_spill] sm:$0xff] %v8583_v46  ;;  %v8585_v17 = vpop.f32.mrf.mxu1 }
 0x1a9   : > { %8847 = vst [vmem:[#allocation14_spill] sm:$0xff] %v8585_v17  ;;  %v8587_v45 = vpop.f32.mrf.mxu0 }
 0x1aa   : > { %8848 = vst [vmem:[#allocation15_spill] sm:$0xff] %v8587_v45  ;;  %v8589_v48 = vpop.f32.mrf.mxu1 }
 0x1ab   : > { %8849 = vst [vmem:[#allocation16_spill] sm:$0xff] %v8589_v48  ;;  %v8591_v25 = vpop.f32.mrf.mxu0 }
 0x1ac   : > { %8850 = vst [vmem:[#allocation17_spill] sm:$0xff] %v8591_v25  ;;  %v8593_v53 = vpop.f32.mrf.mxu1 }
 0x1ad   : > { %8851 = vst [vmem:[#allocation18_spill] sm:$0xff] %v8593_v53  ;;  %v8595_v59 = vpop.f32.mrf.mxu0 }
 0x1ae   : > { %8852 = vst [vmem:[#allocation19_spill] sm:$0xff] %v8595_v59  ;;  %v8597_v62 = vpop.f32.mrf.mxu1 }
 0x1af   : > { %8853 = vst [vmem:[#allocation20_spill] sm:$0xff] %v8597_v62  ;;  %v8599_v5 = vpop.f32.mrf.mxu0 }
 0x1b0   : > { %8854 = vst [vmem:[#allocation21_spill] sm:$0xff] %v8599_v5  ;;  %v8601_v52 = vpop.f32.mrf.mxu1 }
 0x1b1   : > { %8855 = vst [vmem:[#allocation22_spill] sm:$0xff] %v8601_v52  ;;  %v8603_v19 = vpop.f32.mrf.mxu0 }
 0x1b2   : > { %8856 = vst [vmem:[#allocation23_spill] sm:$0xff] %v8603_v19  ;;  %v8605_v0 = vpop.f32.mrf.mxu1 }
 0x1b3   : > { %8857 = vst [vmem:[#allocation24_spill] sm:$0xff] %v8605_v0  ;;  %v8607_v24 = vpop.f32.mrf.mxu0  ;;  %v4542_v0 = vlaneseq }
 0x1b4   : > { %8858 = vst [vmem:[#allocation25_spill] sm:$0xff] %v8607_v24  ;;  %v8609_v17 = vpop.f32.mrf.mxu1 }
 0x1b5   : > { %8859 = vst [vmem:[#allocation26_spill] sm:$0xff] %v8609_v17  ;;  %v8611_v48 = vpop.f32.mrf.mxu0  ;;  %v3043_v17 = vadd.f32 %v6070_v27, %v8448_v34 }
 0x1b6   : > { %8860 = vst [vmem:[#allocation27_spill] sm:$0xff] %v8611_v48  ;;  %v8613_v1 = vpop.f32.mrf.mxu1  ;;  %v4543_v48 = vshrl.u32 %v4542_v0, 7 }
 0x1b7   : > { %8861 = vst [vmem:[#allocation28_spill] sm:$0xff] %v8613_v1  ;;  %v8615_v53 = vpop.f32.mrf.mxu0  ;;  %v3042_v1 = vadd.f32 %v8521_v54, %v8442_v40 }
 0x1b8   : > { %8862 = vst [vmem:[#allocation29_spill] sm:$0xff] %v8615_v53  ;;  %v8617_v59 = vpop.f32.mrf.mxu1  ;;  %v3040_v53 = vadd.f32 %v8525_v13, %v8445_v55  ;;  %v8638_v22 = vadd.s32 8, %v4543_v48  ;;  %v3046_v13 = vadd.f32 %v8535_v12, %v8454_v32 }
 0x1b9   : > { %8863 = vst [vmem:[#allocation30_spill] sm:$0xff] %v8617_v59  ;;  %v8619_v62 = vpop.f32.mrf.mxu0  ;;  %v3396_v46 = vadd.f32 %v8533_v33, %v3042_v1  ;;  %v3047_v1 = vadd.f32 %v8539_v29, %v8460_v43 }
 0x1ba   : > { %8864 = vst [vmem:[#allocation31_spill] sm:$0xff] %v8619_v62  ;;  %v8621_v5 = vpop.f32.mrf.mxu1  ;;  %v3394_v34 = vadd.f32 %v3283_v16, %v3040_v53  ;;  %vm4546_vm6 = vcmp.lt.s32.totalorder %v8638_v22, 14 }
 0x1bb   : > { %8865 = vst [vmem:[#allocation32_spill] sm:$0xff] %v8621_v5  ;;  %v8623_v52 = vpop.f32.mrf.mxu0  ;;  %v3041_v5 = vadd.f32 %v2932_v8, %v8451_v18  ;;  %v3044_v18 = vadd.f32 %v8537_v36, %v8457_v49  ;;  %v3401_v43 = vadd.f32 %v8551_v51, %v3047_v1  ;;  %v3050_v36 = vadd.f32 %v8545_v35, %v8466_v63 }
 0x1bc   : > { %8866 = vst [vmem:[#allocation33_spill] sm:$0xff] %v8623_v52  ;;  %v6157_v19 = vpop.f32.mrf.mxu1  ;;  %v3054_v1 = vadd.f32 %v8561_v23, %v8478_v20 }
 0x1bd   : > { %v8625_v25 = vpop.f32.mrf.mxu0  ;;  %v3395_v54 = vadd.f32 %v3286_v14, %v3041_v5  ;;  %v4068_v0 = vadd.f32 %v6157_v19, %v3396_v46  ;;  %v3398_v49 = vadd.f32 %v8547_v26, %v3044_v18 }
 0x1be   : > { %8867 = vst [vmem:[#allocation34_spill] sm:$0xff] %v8625_v25  ;;  %v3955_v24 = vpop.f32.mrf.mxu1  ;;  %v3397_v25 = vadd.f32 %v6114_v11, %v3043_v17 }
 0x1bf   : > { %v8632_v59 = vpop.f32.mrf.mxu0  ;;  %v4066_v8 = vadd.f32 %v3955_v24, %v3394_v34 }
 0x1c0   : > { %8868 = vst [vmem:[#allocation35_spill] sm:$0xff] %v8632_v59  ;;  %v6158_v62 = vpop.f32.mrf.mxu1 }
 0x1c1   : > { %v8635_v52 = vpop.f32.mrf.mxu0  ;;  %v4069_v55 = vadd.f32 %v6158_v62, %v3397_v25  ;;  %v3045_v62 = vadd.f32 %v8541_v37, %v8463_v3  ;;  %v3400_v25 = vadd.f32 %v8543_v9, %v3046_v13 }
 0x1c2   : > { %8869 = vst [vmem:[#allocation36_spill] sm:$0xff] %v8635_v52  ;;  %v3958_v45 = vpop.f32.mrf.mxu1 }
 0x1c3   : > { %v6201_v27 = vpop.f32.mrf.mxu0  ;;  %v4067_v53 = vadd.f32 %v3958_v45, %v3395_v54  ;;  %v3399_v26 = vadd.f32 %v8555_v58, %v3045_v62 }
 0x1c4   : > { %v6161_v40 = vpop.f32.mrf.mxu1  ;;  %v4516_v24 = vadd.f32 %v6201_v27, %v4068_v0 }
 0x1c5   : > { %v4403_v52 = vpop.f32.mrf.mxu0  ;;  %v4072_v35 = vadd.f32 %v6161_v40, %v3400_v25 }
 0x1c6   : > { %v3971_v59 = vpop.f32.mrf.mxu1  ;;  %v4514_v19 = vadd.f32 %v4403_v52, %v4066_v8  ;;  %v3048_v52 = vadd.f32 %v8549_v44, %v8469_v60  ;;  %v3404_v60 = vadd.f32 %v8559_v50, %v3050_v36  ;;  %v3049_v44 = vadd.f32 %v8557_v28, %v8475_v2 }
 0x1c7   : > { %v6202_v33 = vpop.f32.mrf.mxu0  ;;  %v4070_v37 = vadd.f32 %v3971_v59, %v3398_v49  ;;  %v3051_v59 = vadd.f32 %v8553_v10, %v8472_v42  ;;  %v4754_v54 = vmul.f32 %v4516_v24, %v4516_v24  ;;  %v3052_v50 = vadd.f32 %v8565_v39, %v8481_v30 }
 0x1c8   : > { %v6162_v5 = vpop.f32.mrf.mxu1  ;;  %v4517_v32 = vadd.f32 %v6202_v33, %v4069_v55  ;;  %v4752_v46 = vmul.f32 %v4514_v19, %v4514_v19  ;;  %v3402_v8 = vadd.f32 %v8563_v57, %v3048_v52 }
 0x1c9   : > { %v4406_v12 = vpop.f32.mrf.mxu0  ;;  %v4073_v51 = vadd.f32 %v6162_v5, %v3401_v43  ;;  %v3405_v62 = vadd.f32 %v8567_v7, %v3051_v59 }
 0x1ca   : > { %v3974_v16 = vpop.f32.mrf.mxu1  ;;  %v4554_v3 = vsel %vm4546_vm6, %v4517_v32, 0.0  ;;  %v4515_v11 = vadd.f32 %v4406_v12, %v4067_v53 }
 0x1cb   : > { %v5558_v29 = vpack.c.bf16 %v4554_v3, %v4516_v24  ;;  %v6205_v14 = vpop.f32.mrf.mxu0  ;;  %v4071_v58 = vadd.f32 %v3974_v16, %v3399_v26  ;;  %v4755_v10 = vmul.f32 %v4554_v3, %v4554_v3 }
 0x1cc   : > { %v6165_v9 = vpop.f32.mrf.mxu1  ;;  %v4552_v63 = vsel %vm4546_vm6, %v4515_v11, 0.0  ;;  %v4520_v2 = vadd.f32 %v6205_v14, %v4072_v35  ;;  %v3408_v14 = vadd.f32 %v8575_v47, %v3054_v1  ;;  %v8870_v47 = vld [vmem:[#allocation12_spill] sm:$0xff] }
 0x1cd   : > { %5620 = vst [vmem:[%s8658_s10 + $0x8] sm:$0xff] %v5558_v29   ;;  %v5553_v17 = vpack.c.bf16 %v4552_v63, %v4514_v19  ;;  %v4719_v45 = vadd.f32 %v4552_v63, %v4514_v19  ;;  %v4753_v48 = vmul.f32 %v4552_v63, %v4552_v63  ;;  %v4419_v34 = vpop.f32.mrf.mxu0  ;;  %v3403_v19 = vadd.f32 %v8571_v38, %v3049_v44  ;;  %v8871_v44 = vld [vmem:[#allocation13_spill] sm:$0xff] }
 0x1ce   : > { %v3987_v27 = vpop.f32.mrf.mxu1  ;;  %v4518_v13 = vadd.f32 %v4419_v34, %v4070_v37  ;;  %v4076_v16 = vadd.f32 %v6165_v9, %v3404_v60  ;;  %v3055_v37 = vadd.f32 %v8569_v6, %v8484_v4  ;;  %v3053_v38 = vadd.f32 %v8573_v41, %v8487_v21 }
 0x1cf   : > { %5554 = vst [vmem:[%s8658_s10] sm:$0xff] %v5553_v17   ;;  %v4720_v40 = vadd.f32 %v4719_v45, %v4516_v24  ;;  %v4780_v55 = vadd.f32 %v4753_v48, %v4752_v46  ;;  %v6206_v18 = vpop.f32.mrf.mxu0  ;;  %v4074_v25 = vadd.f32 %v3987_v27, %v3402_v8  ;;  %v4758_v63 = vmul.f32 %v4520_v2, %v4520_v2 }
 0x1d0   : > { %v6166_v0 = vpop.f32.mrf.mxu1  ;;  %v4521_v42 = vadd.f32 %v6206_v18, %v4073_v51  ;;  %v4756_v20 = vmul.f32 %v4518_v13, %v4518_v13  ;;  %v3406_v45 = vadd.f32 %v8579_v31, %v3052_v50  ;;  %v3058_v48 = vadd.f32 %v8577_v15, %v8490_v56 }
 0x1d1   : > { %v4781_v53 = vadd.f32 %v4780_v55, %v4754_v54  ;;  %v4721_v28 = vadd.f32 %v4720_v40, %v4554_v3  ;;  %v4422_v33 = vpop.f32.mrf.mxu0  ;;  %v4077_v43 = vadd.f32 %v6166_v0, %v3405_v62  ;;  %v3056_v34 = vadd.f32 %v8870_v47, %v8493_v61  ;;  %v8872_v0 = vld [vmem:[#allocation15_spill] sm:$0xff]  ;;  %v8873_v62 = vld [vmem:[#allocation17_spill] sm:$0xff] }
 0x1d2   : > { %v3990_v5 = vpop.f32.mrf.mxu1  ;;  %v4558_v32 = vsel %vm4546_vm6, %v4521_v42, 0.0  ;;  %v4519_v57 = vadd.f32 %v4422_v33, %v4071_v58  ;;  %v3409_v58 = vadd.f32 %v8871_v44, %v3055_v37  ;;  %v3407_v8 = vadd.f32 %v8872_v0, %v3053_v38  ;;  %v8882_v37 = vld [vmem:[#allocation20_spill] sm:$0xff]  ;;  %v8884_v44 = vld [vmem:[#allocation23_spill] sm:$0xff] }
 0x1d3   : > { %v4722_v49 = vadd.f32 %v4721_v28, %v4518_v13  ;;  %v4782_v23 = vadd.f32 %v4781_v53, %v4755_v10  ;;  %v5568_v24 = vpack.c.bf16 %v4558_v32, %v4520_v2  ;;  %v6209_v30 = vpop.f32.mrf.mxu0  ;;  %v4075_v26 = vadd.f32 %v3990_v5, %v3403_v19 }
 0x1d4   : > { %v6169_v39 = vpop.f32.mrf.mxu1  ;;  %v4556_v12 = vsel %vm4546_vm6, %v4519_v57, 0.0  ;;  %v4759_v6 = vmul.f32 %v4558_v32, %v4558_v32  ;;  %v4524_v21 = vadd.f32 %v6209_v30, %v4076_v16  ;;  %v8874_v57 = vld [vmem:[#allocation7_spill] sm:$0xff] }
 0x1d5   : > { %v4783_v7 = vadd.f32 %v4782_v23, %v4756_v20  ;;  %5622 = vst [vmem:[%s8658_s10 + $0x18] sm:$0xff] %v5568_v24   ;;  %v5563_v36 = vpack.c.bf16 %v4556_v12, %v4518_v13  ;;  %v4723_v3 = vadd.f32 %v4722_v49, %v4556_v12  ;;  %v4757_v11 = vmul.f32 %v4556_v12, %v4556_v12  ;;  %v4435_v52 = vpop.f32.mrf.mxu0  ;;  %v8876_v20 = vld [vmem:[#allocation3_spill] sm:$0xff]  ;;  %v8877_v23 = vld [vmem:[#allocation16_spill] sm:$0xff] }
 0x1d6   : > { %v4003_v29 = vpop.f32.mrf.mxu1  ;;  %v4522_v51 = vadd.f32 %v4435_v52, %v4074_v25  ;;  %v4080_v50 = vadd.f32 %v6169_v39, %v3408_v14  ;;  %v8875_v25 = vld [vmem:[#allocation14_spill] sm:$0xff]  ;;  %v3057_v24 = vadd.f32 %v8877_v23, %v8876_v20  ;;  %v4762_v19 = vmul.f32 %v4524_v21, %v4524_v21  ;;  %v8881_v14 = vld [vmem:[#allocation5_spill] sm:$0xff]  ;;  %v8891_v23 = vld [vmem:[#allocation8_spill] sm:$0xff] }
 0x1d7   : > { %5621 = vst [vmem:[%s8658_s10 + $0x10] sm:$0xff] %v5563_v36   ;;  %v4724_v9 = vadd.f32 %v4723_v3, %v4520_v2  ;;  %v4784_v35 = vadd.f32 %v4783_v7, %v4757_v11  ;;  %v6210_v46 = vpop.f32.mrf.mxu0  ;;  %v4078_v40 = vadd.f32 %v4003_v29, %v3406_v45  ;;  %v3059_v49 = vadd.f32 %v8875_v25, %v8874_v57  ;;  %v8878_v36 = vld [vmem:[#allocation19_spill] sm:$0xff]  ;;  %v8879_v11 = vld [vmem:[#allocation4_spill] sm:$0xff]  ;;  %v8880_v52 = vld [vmem:[#allocation18_spill] sm:$0xff] }
 0x1d8   : > { %v6170_v17 = vpop.f32.mrf.mxu1  ;;  %v4525_v4 = vadd.f32 %v6210_v46, %v4077_v43  ;;  %v4760_v56 = vmul.f32 %v4522_v51, %v4522_v51  ;;  %v3410_v3 = vadd.f32 %v8878_v36, %v3056_v34  ;;  %v3062_v29 = vadd.f32 %v8880_v52, %v8879_v11  ;;  %v8883_v45 = vld [vmem:[#allocation21_spill] sm:$0xff] }
 0x1d9   : > { %v4785_v27 = vadd.f32 %v4784_v35, %v4758_v63  ;;  %v4725_v41 = vadd.f32 %v4724_v9, %v4558_v32  ;;  %v4438_v60 = vpop.f32.mrf.mxu0  ;;  %v4081_v42 = vadd.f32 %v6170_v17, %v3409_v58  ;;  %v3412_v32 = vadd.f32 %v8873_v62, %v3058_v48 }
 0x1da   : > { %v4006_v59 = vpop.f32.mrf.mxu1  ;;  %v4562_v54 = vsel %vm4546_vm6, %v4525_v4, 0.0  ;;  %v4523_v31 = vadd.f32 %v4438_v60, %v4075_v26  ;;  %v3060_v38 = vadd.f32 %v8882_v37, %v8881_v14  ;;  %v3413_v48 = vadd.f32 %v8883_v45, %v3059_v49  ;;  %v8890_v49 = vld [vmem:[#allocation27_spill] sm:$0xff] }
 0x1db   : > { %v4726_v55 = vadd.f32 %v4725_v41, %v4522_v51  ;;  %v4786_v15 = vadd.f32 %v4785_v27, %v4759_v6  ;;  %v5578_v13 = vpack.c.bf16 %v4562_v54, %v4524_v21  ;;  %v6213_v61 = vpop.f32.mrf.mxu0  ;;  %v4079_v30 = vadd.f32 %v4006_v59, %v3407_v8  ;;  %v8885_v8 = vld [vmem:[#allocation25_spill] sm:$0xff]  ;;  %v8896_v45 = vld [vmem:[#allocation31_spill] sm:$0xff] }
 0x1dc   : > { %v6173_v18 = vpop.f32.mrf.mxu1  ;;  %v4560_v1 = vsel %vm4546_vm6, %v4523_v31, 0.0  ;;  %v4763_v63 = vmul.f32 %v4562_v54, %v4562_v54  ;;  %v4528_v35 = vadd.f32 %v6213_v61, %v4080_v50  ;;  %v3411_v58 = vadd.f32 %v8884_v44, %v3057_v24  ;;  %v8886_v50 = vld [vmem:[#allocation2_spill] sm:$0xff] }
 0x1dd   : > { %v4787_v10 = vadd.f32 %v4786_v15, %v4760_v56  ;;  %5624 = vst [vmem:[%s8658_s10 + $0x28] sm:$0xff] %v5578_v13   ;;  %v5573_v53 = vpack.c.bf16 %v4560_v1, %v4522_v51  ;;  %v4727_v2 = vadd.f32 %v4726_v55, %v4560_v1  ;;  %v4761_v28 = vmul.f32 %v4560_v1, %v4560_v1  ;;  %v4451_v33 = vpop.f32.mrf.mxu0  ;;  %v8892_v24 = vld [vmem:[#allocation26_spill] sm:$0xff] }
 0x1de   : > { %v4019_v5 = vpop.f32.mrf.mxu1  ;;  %v4526_v16 = vadd.f32 %v4451_v33, %v4078_v40  ;;  %v4084_v31 = vadd.f32 %v6173_v18, %v3412_v32  ;;  %v3416_v1 = vadd.f32 %v8885_v8, %v3062_v29  ;;  %v3414_v20 = vadd.f32 %v8890_v49, %v3060_v38  ;;  %v8895_v29 = vld [vmem:[#allocation29_spill] sm:$0xff] }
 0x1df   : > { %5623 = vst [vmem:[%s8658_s10 + $0x20] sm:$0xff] %v5573_v53   ;;  %v4728_v39 = vadd.f32 %v4727_v2, %v4524_v21  ;;  %v4788_v12 = vadd.f32 %v4787_v10, %v4761_v28  ;;  %v6214_v43 = vpop.f32.mrf.mxu0  ;;  %v4082_v4 = vadd.f32 %v4019_v5, %v3410_v3  ;;  %v8888_v53 = vld [vmem:[#allocation6_spill] sm:$0xff]  ;;  %v8889_v2 = vld [vmem:[#allocation24_spill] sm:$0xff]  ;;  %v4766_v5 = vmul.f32 %v4528_v35, %v4528_v35 }
 0x1e0   : > { %v6174_v7 = vpop.f32.mrf.mxu1  ;;  %v4529_v26 = vadd.f32 %v6214_v43, %v4081_v42  ;;  %v4764_v27 = vmul.f32 %v4526_v16, %v4526_v16  ;;  %v8887_v42 = vld [vmem:[#allocation22_spill] sm:$0xff]  ;;  %v3061_v28 = vadd.f32 %v8889_v2, %v8888_v53 }
 0x1e1   : > { %v4789_v9 = vadd.f32 %v4788_v12, %v4762_v19  ;;  %v4729_v51 = vadd.f32 %v4728_v39, %v4562_v54  ;;  %v4454_v46 = vpop.f32.mrf.mxu0  ;;  %v4085_v40 = vadd.f32 %v6174_v7, %v3413_v48  ;;  %v3063_v10 = vadd.f32 %v8887_v42, %v8886_v50  ;;  %v8893_v19 = vld [vmem:[#allocation9_spill] sm:$0xff]  ;;  %v8894_v39 = vld [vmem:[#allocation28_spill] sm:$0xff]  ;;  %v8901_v42 = vld [vmem:[#allocation11_spill] sm:$0xff] }
 0x1e2   : > { %v4022_v17 = vpop.f32.mrf.mxu1  ;;  %v4566_v47 = vsel %vm4546_vm6, %v4529_v26, 0.0  ;;  %v4527_v34 = vadd.f32 %v4454_v46, %v4079_v30  ;;  %v3066_v30 = vadd.f32 %v8892_v24, %v8891_v23  ;;  %v3064_v12 = vadd.f32 %v8894_v39, %v8893_v19 }
 0x1e3   : > { %v4730_v6 = vadd.f32 %v4729_v51, %v4526_v16  ;;  %v4790_v21 = vadd.f32 %v4789_v9, %v4763_v63  ;;  %v5588_v41 = vpack.c.bf16 %v4566_v47, %v4528_v35  ;;  %v6217_v60 = vpop.f32.mrf.mxu0  ;;  %v4083_v33 = vadd.f32 %v4022_v17, %v3411_v58  ;;  %v8897_v58 = vld [vmem:[#allocation10_spill] sm:$0xff] }
 0x1e4   : > { %v6177_v59 = vpop.f32.mrf.mxu1  ;;  %v4564_v54 = vsel %vm4546_vm6, %v4527_v34, 0.0  ;;  %v4767_v43 = vmul.f32 %v4566_v47, %v4566_v47  ;;  %v4532_v36 = vadd.f32 %v6217_v60, %v4084_v31  ;;  %v3417_v14 = vadd.f32 %v8895_v29, %v3063_v10  ;;  %v8902_v10 = vld [vmem:[#allocation32_spill] sm:$0xff] }
 0x1e5   : > { %v4791_v55 = vadd.f32 %v4790_v21, %v4764_v27  ;;  %5626 = vst [vmem:[%s8658_s10 + $0x38] sm:$0xff] %v5588_v41   ;;  %v5583_v56 = vpack.c.bf16 %v4564_v54, %v4526_v16  ;;  %v4731_v15 = vadd.f32 %v4730_v6, %v4564_v54  ;;  %v4765_v13 = vmul.f32 %v4564_v54, %v4564_v54  ;;  %v4467_v61 = vpop.f32.mrf.mxu0  ;;  %v8898_v54 = vld [vmem:[#allocation30_spill] sm:$0xff] }
 0x1e6   : > { %v4035_v0 = vpop.f32.mrf.mxu1  ;;  %v4530_v32 = vadd.f32 %v4467_v61, %v4082_v4  ;;  %v3415_v48 = vadd.f32 %v8896_v45, %v3061_v28  ;;  %v4088_v34 = vadd.f32 %v6177_v59, %v3416_v1  ;;  %v3067_v31 = vadd.f32 %v8898_v54, %v8897_v58  ;;  %v8899_v59 = vld [vmem:[#allocation33_spill] sm:$0xff]  ;;  %v8900_v1 = vld [vmem:[#allocation34_spill] sm:$0xff] }
 0x1e7   : > { %5625 = vst [vmem:[%s8658_s10 + $0x30] sm:$0xff] %v5583_v56   ;;  %v4732_v18 = vadd.f32 %v4731_v15, %v4528_v35  ;;  %v4792_v62 = vadd.f32 %v4791_v55, %v4765_v13  ;;  %v6218_v57 = vpop.f32.mrf.mxu0  ;;  %v4086_v26 = vadd.f32 %v4035_v0, %v3414_v20  ;;  %v4770_v55 = vmul.f32 %v4532_v36, %v4532_v36 }
 0x1e8   : > { %v6178_v25 = vpop.f32.mrf.mxu1  ;;  %v4533_v16 = vadd.f32 %v6218_v57, %v4085_v40  ;;  %v4768_v9 = vmul.f32 %v4530_v32, %v4530_v32  ;;  %v3420_v8 = vadd.f32 %v8899_v59, %v3066_v30  ;;  %v3418_v50 = vadd.f32 %v8900_v1, %v3064_v12 }
 0x1e9   : > { %v4793_v7 = vadd.f32 %v4792_v62, %v4766_v5  ;;  %v4733_v3 = vadd.f32 %v4732_v18, %v4566_v47  ;;  %v4470_v11 = vpop.f32.mrf.mxu0  ;;  %v4089_v4 = vadd.f32 %v6178_v25, %v3417_v14  ;;  %v3065_v53 = vadd.f32 %v8902_v10, %v8901_v42 }
 0x1ea   : > { %v4038_v52 = vpop.f32.mrf.mxu1  ;;  %v4570_v37 = vsel %vm4546_vm6, %v4533_v16, 0.0  ;;  %v4531_v38 = vadd.f32 %v4470_v11, %v4083_v33  ;;  %v8904_v16 = vld [vmem:[#allocation36_spill] sm:$0xff] }
 0x1eb   : > { %v4734_v63 = vadd.f32 %v4733_v3, %v4530_v32  ;;  %v4794_v35 = vadd.f32 %v4793_v7, %v4767_v43  ;;  %v5598_v51 = vpack.c.bf16 %v4570_v37, %v4532_v36  ;;  %v6221_v46 = vpop.f32.mrf.mxu0  ;;  %v4087_v40 = vadd.f32 %v4038_v52, %v3415_v48 }
 0x1ec   : > { %v6181_v17 = vpop.f32.mrf.mxu1  ;;  %v4568_v47 = vsel %vm4546_vm6, %v4531_v38, 0.0  ;;  %v4771_v28 = vmul.f32 %v4570_v37, %v4570_v37  ;;  %v4536_v5 = vadd.f32 %v6221_v46, %v4088_v34  ;;  %v3419_v43 = vadd.f32 %v8904_v16, %v3065_v53 }
 0x1ed   : > { %v4795_v6 = vadd.f32 %v4794_v35, %v4768_v9  ;;  %5628 = vst [vmem:[%s8658_s10 + $0x48] sm:$0xff] %v5598_v51   ;;  %v5593_v27 = vpack.c.bf16 %v4568_v47, %v4530_v32  ;;  %v4735_v21 = vadd.f32 %v4734_v63, %v4568_v47  ;;  %v4769_v41 = vmul.f32 %v4568_v47, %v4568_v47  ;;  %v4483_v60 = vpop.f32.mrf.mxu0  ;;  %v8903_v32 = vld [vmem:[#allocation35_spill] sm:$0xff] }
 0x1ee   : > { %v4051_v44 = vpop.f32.mrf.mxu1  ;;  %v4534_v13 = vadd.f32 %v4483_v60, %v4086_v26  ;;  %v3421_v57 = vadd.f32 %v8903_v32, %v3067_v31  ;;  %v4774_v26 = vmul.f32 %v4536_v5, %v4536_v5 }
 0x1ef   : > { %5627 = vst [vmem:[%s8658_s10 + $0x40] sm:$0xff] %v5593_v27   ;;  %v4736_v56 = vadd.f32 %v4735_v21, %v4532_v36  ;;  %v4796_v15 = vadd.f32 %v4795_v6, %v4769_v41  ;;  %v6222_v61 = vpop.f32.mrf.mxu0  ;;  %v4090_v20 = vadd.f32 %v4051_v44, %v3418_v50  ;;  %v4092_v36 = vadd.f32 %v6181_v17, %v3420_v8 }
 0x1f0   : > { %v6182_v0 = vpop.f32.mrf.mxu1  ;;  %v4537_v2 = vadd.f32 %v6222_v61, %v4089_v4  ;;  %v4772_v24 = vmul.f32 %v4534_v13, %v4534_v13 }
 0x1f1   : > { %v4797_v33 = vadd.f32 %v4796_v15, %v4770_v55  ;;  %v4737_v18 = vadd.f32 %v4736_v56, %v4570_v37  ;;  %v4486_v62 = vpop.f32.mrf.mxu0  ;;  %v4093_v3 = vadd.f32 %v6182_v0, %v3421_v57 }
 0x1f2   : > { %v4574_v25 = vsel %vm4546_vm6, %v4537_v2, 0.0  ;;  %v4535_v49 = vadd.f32 %v4486_v62, %v4087_v40  ;;  %v4054_v12 = vpop.f32.mrf.mxu1  ;;  %v4815_v62 = vld [vmem:[%s8512_s7] sm:$0x3] }
 0x1f3   : > { %v4738_v23 = vadd.f32 %v4737_v18, %v4534_v13  ;;  %v4798_v30 = vadd.f32 %v4797_v33, %v4771_v28  ;;  %v5608_v19 = vpack.c.bf16 %v4574_v25, %v4536_v5  ;;  %v6225_v39 = vpop.f32.mrf.mxu0  ;;  %v4091_v38 = vadd.f32 %v4054_v12, %v3419_v43 }
 0x1f4   : > { %v4572_v7 = vsel %vm4546_vm6, %v4535_v49, 0.0  ;;  %v4775_v45 = vmul.f32 %v4574_v25, %v4574_v25  ;;  %v4540_v47 = vadd.f32 %v6225_v39, %v4092_v36 }
 0x1f5   : > { %v4799_v11 = vadd.f32 %v4798_v30, %v4772_v24  ;;  %5630 = vst [vmem:[%s8658_s10 + $0x58] sm:$0xff] %v5608_v19   ;;  %v5603_v52 = vpack.c.bf16 %v4572_v7, %v4534_v13  ;;  %v4739_v29 = vadd.f32 %v4738_v23, %v4572_v7  ;;  %v4773_v14 = vmul.f32 %v4572_v7, %v4572_v7  ;;  %v4499_v37 = vpop.f32.mrf.mxu0 }
 0x1f6   : > { %v4538_v35 = vadd.f32 %v4499_v37, %v4090_v20  ;;  %v4778_v55 = vmul.f32 %v4540_v47, %v4540_v47 }
 0x1f7   : > { %5629 = vst [vmem:[%s8658_s10 + $0x50] sm:$0xff] %v5603_v52   ;;  %v4740_v63 = vadd.f32 %v4739_v29, %v4536_v5  ;;  %v4800_v9 = vadd.f32 %v4799_v11, %v4773_v14  ;;  %v6226_v51 = vpop.f32.mrf.mxu0 }
 0x1f8   : > { %v4541_v46 = vadd.f32 %v6226_v51, %v4093_v3  ;;  %v4776_v21 = vmul.f32 %v4538_v35, %v4538_v35 }
 0x1f9   : > { %v4801_v48 = vadd.f32 %v4800_v9, %v4774_v26  ;;  %v4741_v17 = vadd.f32 %v4740_v63, %v4574_v25  ;;  %v4502_v34 = vpop.f32.mrf.mxu0 }
 0x1fa   : > { %v4578_v4 = vsel %vm4546_vm6, %v4541_v46, 0.0  ;;  %v4539_v6 = vadd.f32 %v4502_v34, %v4091_v38 }
 0x1fb   : > { %v4742_v27 = vadd.f32 %v4741_v17, %v4538_v35  ;;  %v4802_v41 = vadd.f32 %v4801_v48, %v4775_v45  ;;  %v5618_v60 = vpack.c.bf16 %v4578_v4, %v4540_v47  ;;  %v4779_v13 = vmul.f32 %v4578_v4, %v4578_v4 }
 0x1fc   : > { %v4576_v44 = vsel %vm4546_vm6, %v4539_v6, 0.0 }
 0x1fd   : > { %v4803_v58 = vadd.f32 %v4802_v41, %v4776_v21  ;;  %5632 = vst [vmem:[%s8658_s10 + $0x68] sm:$0xff] %v5618_v60   ;;  %v5613_v54 = vpack.c.bf16 %v4576_v44, %v4538_v35  ;;  %v4743_v31 = vadd.f32 %v4742_v27, %v4576_v44  ;;  %v4777_v40 = vmul.f32 %v4576_v44, %v4576_v44 }
 0x1ff   : > { %5631 = vst [vmem:[%s8658_s10 + $0x60] sm:$0xff] %v5613_v54   ;;  %v4744_v56 = vadd.f32 %v4743_v31, %v4540_v47  ;;  %v4804_v15 = vadd.f32 %v4803_v58, %v4777_v40 }
 0x201   : > { %v4745_v61 = vadd.f32 %v4744_v56, %v4578_v4  ;;  %v4805_v0 = vadd.f32 %v4804_v15, %v4778_v55 }
 0x203   : > { %v4746_v59 = vrot.slane %v4745_v61, 4  ;;  %v4806_v8 = vadd.f32 %v4805_v0, %v4779_v13 }
 0x205   : > { %v4747_v1 = vadd.f32 %v4746_v59, %v4745_v61  ;;  %v4807_v50 = vrot.slane %v4806_v8, 4 }
 0x207   : > { %v4748_v22 = vrot.slane %v4747_v1, 2  ;;  %v4808_v42 = vadd.f32 %v4807_v50, %v4806_v8 }
 0x209   : > { %v4749_v10 = vadd.f32 %v4748_v22, %v4747_v1  ;;  %v4809_v53 = vrot.slane %v4808_v42, 2 }
 0x20b   : > { %v4750_v2 = vrot.slane %v4749_v10, 1  ;;  %v4810_v28 = vadd.f32 %v4809_v53, %v4808_v42 }
 0x20d   : > { %v4811_v33 = vrot.slane %v4810_v28, 1  ;;  %v4751_v5 = vadd.f32 %v4750_v2, %v4749_v10 }
 0x20f   : > { %v4812_v18 = vadd.f32 %v4811_v33, %v4810_v28 }
 0x211   : > { %v4814_v32 = vsel %vm4813_vm7, %v4751_v5, %v4812_v18 }
 0x212   : > { %v4816_v57 = vadd.f32 %v4815_v62, %v4814_v32 }
 0x214   : > { %4817 = vst [vmem:[%s8512_s7] sm:$0x3] %v4816_v57 }
 0x215 PF: > { %s14_s14 = sadd.s32 1, %s6407_s14   ;;  %s8905_s12 = smov %s6403_s13 }
 0x216   : > { %p11_p5 = scmp.ge.s32.totalorder %s14_s14, 4   ;;  %s8906_s13 = smov %s8908_s15 }
 0x218   :  { %13 = sbr.rel (!%p11_p5) target bundleno = 2 (0x2), region = 85 }

// kernel: conv3block_forward.10
= control target key start
LH: loop header
LB: loop body
LE: loop exit
PB: predicated region body
PF: predicated region fallthrough
CT: control target
= control target key end

     0   :  { %s5119_s12 = smov 0   ;;  %s5121_s13 = smov 0   ;;  %s6476_s0 = inlined_call_operand.vmem [shape: bf16[2,12,32,128], index: 0, kind: input, shape index: {}]   ;;  %s6477_s1 = inlined_call_operand.vmem [shape: bf16[9,128,128], index: 1, kind: input, shape index: {}]   ;;  %s6478_s2 = inlined_call_operand.vmem [shape: bf16[2,10,16,128], index: 2, kind: output, shape index: {0}]   ;;  %s6479_s3 = inlined_call_operand.vmem [shape: f32[2,8,128], index: 3, kind: output, shape index: {1}]  }
   0x1   :  { %s5123_s14 = smov 0  }
   0x2 LB: > { %s26_s15 = sadd.s32 1, %s5092_s13  ;;  %p3898_p0 = scmp.ge.s32.totalorder %s5096_s14, 1  ;;  %s5096_s14 = sphi %s5123_s14, %s14_s14   ;;  %s5092_s13 = sphi %s5121_s13, %s6517_s13   ;;  %s5088_s12 = sphi %s5119_s12, %s6516_s12  }
   0x3   : > { %p28_p1 = scmp.ge.s32.totalorder %s26_s15, 2  ;;  %p154_p2 = scmp.lt.s32.totalorder %s5096_s14, 3 }
   0x5   : > { %s6519_s15 = smov (%p28_p1, %s26_s15), 0  ;;  %p155_p3 = pnand %p3898_p0, %p154_p2 }
   0x7   : > { %158 = sbr.rel (%p155_p3) target bundleno = 468 (0x1d4), region = 28 }
   0xc   : > { %v4972_v0 = vld [vmem:[%s6477_s1 + $0x78] sm:$0xff]   ;;  %p187_p4 = scmp.lt.s32.totalorder %s5088_s12, 1  ;;  %v4974_v2 = vld [vmem:[%s6477_s1 + $0x70] sm:$0xff]   ;;  %v4976_v4 = vld [vmem:[%s6477_s1 + $0x68] sm:$0xff]   ;;  %vm263_vm0 = vsmask.f32 3328 }
   0xd   : > { %v4973_v1 = vld [vmem:[%s6477_s1 + $0x38] sm:$0xff]   ;;  %4605 = vmatprep.subr.bf16.mxu0 %v4972_v0  ;;  %v4975_v3 = vld [vmem:[%s6477_s1 + $0x30] sm:$0xff]   ;;  %v4977_v5 = vld [vmem:[%s6477_s1 + $0x28] sm:$0xff]   ;;  %vm264_vm1 = vsmask.f32 7440  ;;  %vm975_vm3 = vcmask 1042432  }
   0xe   : > { %4641 = vmatprep.subr.bf16.mxu1 %v4973_v1  ;;  %4606 = vmatpush3.bf16.msra.mxu0 %v4972_v0  ;;  %s6521_s12 = smov (!%p187_p4, %s5088_s12), 1  ;;  %v4978_v6 = vld [vmem:[%s6477_s1 + $0x60] sm:$0xff]   ;;  %v4980_v8 = vld [vmem:[%s6477_s1 + $0x58] sm:$0xff]   ;;  %v4982_v10 = vld [vmem:[%s6477_s1 + $0x50] sm:$0xff]   ;;  %vm976_vm4 = vcmask 1046532   ;;  %vm3761_vm7 = vcmask 1040384  }
   0xf   : > { %4642 = vmatpush3.bf16.msra.mxu1 %v4973_v1  ;;  %4607 = vmatprep.subr.bf16.mxu0 %v4974_v2  ;;  %v4979_v7 = vld [vmem:[%s6477_s1 + $0x20] sm:$0xff]   ;;  %s4945_s5 = smul.u32 192, %s6521_s12  ;;  %v4981_v9 = vld [vmem:[%s6477_s1 + $0x18] sm:$0xff]   ;;  %v4983_v11 = vld [vmem:[%s6477_s1 + $0x10] sm:$0xff]  }
  0x10   : > { %4643 = vmatprep.subr.bf16.mxu1 %v4975_v3  ;;  %v4984_v17 = vld [vmem:[%s6477_s1 + $0x48] sm:$0xff]   ;;  %v4986_v37 = vld [vmem:[%s6477_s1 + $0x40] sm:$0xff]   ;;  %vm5217_vm2 = vmor %vm263_vm0, %vm264_vm1  ;;  %s4946_s7 = smul.u32 80, %s6521_s12 }
  0x11   : > { %s5173_s16 = scalar_lea.vmem %s6476_s0, %s4945_s5  ;;  %v4985_v32 = vld [vmem:[%s6477_s1 + $0x8] sm:$0xff]   ;;  %v4987_v52 = vld [vmem:[%s6477_s1] sm:$0xff]   ;;  %vm5445_vm5 = vmor %vm975_vm3, %vm976_vm4 }
  0x12   : > { %4608 = vmatpush3.bf16.msra.mxu0 %v4974_v2  ;;  %v217_v12 = vld [vmem:[%s5173_s16] sm:$0xf]  ;;  %v5183_v13 = vld [vmem:[%s5173_s16 + $0x4] sm:$0xf]  ;;  %v5186_v14 = vld [vmem:[%s5173_s16 + $0x8] sm:$0x1]  ;;  %s6392_s9 = scalar_lea.vmem %s6478_s2, %s4946_s7 }
  0x13   : > { %4644 = vmatpush3.bf16.msra.mxu1 %v4975_v3  ;;  %4609 = vmatprep.subr.bf16.mxu0 %v4976_v4  ;;  %v267_v15 = vshrl.u32 %v217_v12, 16  ;;  %v270_v16 = vshll.u32 %v217_v12, 16  ;;  %v276_v18 = vshll.u32 %v5183_v13, 16  ;;  %v280_v19 = vshrl.u32 %v5183_v13, 16  ;;  %v5196_v22 = vld [vmem:[%s5173_s16 + $0x10] sm:$0xf] }
  0x14   : > { %4645 = vmatprep.subr.bf16.mxu1 %v4977_v5  ;;  %v286_v20 = vshll.u32 %v5186_v14, 16  ;;  %v983_v21 = vrot.slane %v5186_v14, 5  ;;  %v3936_v25 = vcombine.low %v217_v12, %v5183_v13  ;;  %v5200_v26 = vld [vmem:[%s5173_s16 + $0x14] sm:$0xf]  ;;  %v5203_v27 = vld [vmem:[%s5173_s16 + $0x18] sm:$0x1] }
  0x15   : > { %v269_v23 = vrot.slane %v267_v15, 4  ;;  %v272_v24 = vrot.slane %v270_v16, 5  ;;  %v278_v28 = vrot.slane %v276_v18, 5  ;;  %v282_v29 = vrot.slane %v280_v19, 4  ;;  %v5226_v50 = vld [vmem:[%s5173_s16 + $0x20] sm:$0xf] }
  0x16   : > { %4610 = vmatpush3.bf16.msra.mxu0 %v4976_v4  ;;  %v288_v30 = vrot.slane %v286_v20, 5  ;;  %v291_v31 = vshrl.u32 %v5196_v22, 16  ;;  %4657 = vmatprep.mubr.bf16.mxu1 %v3936_v25  ;;  %v294_v34 = vshll.u32 %v5196_v22, 16  ;;  %v300_v35 = vshll.u32 %v5200_v26, 16  ;;  %v5229_v51 = vld [vmem:[%s5173_s16 + $0x24] sm:$0xf] }
  0x17   : > { %4646 = vmatpush3.bf16.msra.mxu1 %v4977_v5  ;;  %4611 = vmatprep.subr.bf16.mxu0 %v4978_v6  ;;  %v273_v33 = vor.u32 %v272_v24, %v269_v23  ;;  %v304_v36 = vshrl.u32 %v5200_v26, 16  ;;  %v283_v39 = vor.u32 %v282_v29, %v278_v28  ;;  %v310_v41 = vshll.u32 %v5203_v27, 16  ;;  %v5237_v56 = vld [vmem:[%s5173_s16 + $0x28] sm:$0x1]  ;;  %v5241_v58 = vld [vmem:[%s5173_s16 + $0x30] sm:$0xf] }
  0x18   : > { %4647 = vmatprep.subr.bf16.mxu1 %v4979_v7  ;;  %v293_v40 = vrot.slane %v291_v31, 4  ;;  %v990_v42 = vrot.slane %v5203_v27, 5  ;;  %v296_v44 = vrot.slane %v294_v34, 5  ;;  %v302_v45 = vrot.slane %v300_v35, 5  ;;  %v5249_v63 = vld [vmem:[%s5173_s16 + $0x34] sm:$0xf] }
  0x19   : > { %v274_v43 = vrot.slane %v273_v33, 4  ;;  %v306_v46 = vrot.slane %v304_v36, 4  ;;  %v284_v47 = vrot.slane %v283_v39, 4  ;;  %v312_v48 = vrot.slane %v310_v41, 5  ;;  %v4990_v3 = vld [vmem:[%s6477_s1 + $0xb8] sm:$0xff]   ;;  %v4991_v18 = vld [vmem:[%s6477_s1 + $0xb0] sm:$0xff]  }
  0x1a   : > { %4612 = vmatpush3.bf16.msra.mxu0 %v4978_v6  ;;  %v3937_v49 = vcombine.low %v5196_v22, %v5200_v26  ;;  %v297_v54 = vor.u32 %v296_v44, %v293_v40  ;;  %v315_v57 = vshrl.u32 %v5226_v50, 16  ;;  %v318_v60 = vshll.u32 %v5226_v50, 16  ;;  %v5255_v5 = vld [vmem:[%s5173_s16 + $0x38] sm:$0x1]  ;;  %v4996_v34 = vld [vmem:[%s6477_s1 + $0xf0] sm:$0xff]  }
  0x1b   : > { %4648 = vmatpush3.bf16.msra.mxu1 %v4979_v7  ;;  %4613 = vmatprep.subr.bf16.mxu0 %v4980_v8  ;;  %v279_v53 = vsel %vm5217_vm2, %v274_v43, %v278_v28  ;;  %v307_v55 = vor.u32 %v306_v46, %v302_v45  ;;  %v289_v59 = vsel %vm5217_vm2, %v284_v47, %v288_v30  ;;  %v324_v61 = vshll.u32 %v5229_v51, 16  ;;  %v4994_v16 = vld [vmem:[%s6477_s1 + $0xf8] sm:$0xff]   ;;  %v5281_v35 = vld [vmem:[%s5173_s16 + $0x40] sm:$0xf]  ;;  %v5284_v40 = vld [vmem:[%s5173_s16 + $0x44] sm:$0xf] }
  0x1c   : > { %4649 = vmatprep.subr.bf16.mxu1 %v4981_v9  ;;  %v328_v62 = vshrl.u32 %v5229_v51, 16  ;;  %v3918_v0 = vcombine.low %v279_v53, %v289_v59  ;;  %v298_v1 = vrot.slane %v297_v54, 4  ;;  %v317_v4 = vrot.slane %v315_v57, 4  ;;  %v5292_v46 = vld [vmem:[%s5173_s16 + $0x48] sm:$0x1]  ;;  %v5022_v27 = vld [vmem:[%s6477_s1 + $0x170] sm:$0xff]  }
  0x1d   : > { %v308_v2 = vrot.slane %v307_v55, 4  ;;  %v320_v6 = vrot.slane %v318_v60, 5  ;;  %v326_v7 = vrot.slane %v324_v61, 5  ;;  %v3938_v12 = vcombine.low %v5226_v50, %v5229_v51  ;;  %v4995_v53 = vld [vmem:[%s6477_s1 + $0xa8] sm:$0xff]   ;;  %v5302_v55 = vld [vmem:[%s5173_s16 + $0x50] sm:$0xf] }
  0x1e   : > { %4614 = vmatpush3.bf16.msra.mxu0 %v4980_v8  ;;  %v330_v8 = vrot.slane %v328_v62, 4  ;;  %4621 = vmatprep.mubr.bf16.mxu0 %v3918_v0  ;;  %v339_v15 = vshrl.u32 %v5241_v58, 16  ;;  %v342_v25 = vshll.u32 %v5241_v58, 16  ;;  %v348_v28 = vshll.u32 %v5249_v63, 16  ;;  %v5308_v60 = vld [vmem:[%s5173_s16 + $0x54] sm:$0xf] }
  0x1f   : > { %4650 = vmatpush3.bf16.msra.mxu1 %v4981_v9  ;;  %4615 = vmatprep.subr.bf16.mxu0 %v4982_v10  ;;  %v334_v9 = vshll.u32 %v5237_v56, 16  ;;  %v321_v19 = vor.u32 %v320_v6, %v317_v4  ;;  %v352_v29 = vshrl.u32 %v5249_v63, 16  ;;  %v3939_v33 = vcombine.low %v5241_v58, %v5249_v63 }
  0x20   : > { %4651 = vmatprep.subr.bf16.mxu1 %v4983_v11  ;;  %v331_v20 = vor.u32 %v330_v8, %v326_v7  ;;  %v341_v24 = vrot.slane %v339_v15, 4  ;;  %v344_v36 = vrot.slane %v342_v25, 5  ;;  %v363_v41 = vshrl.u32 %v5281_v35, 16  ;;  %v4998_v8 = vld [vmem:[%s6477_s1 + $0xa0] sm:$0xff]  }
  0x21   : > { %v336_v23 = vrot.slane %v334_v9, 5  ;;  %v322_v30 = vrot.slane %v321_v19, 4  ;;  %v354_v39 = vrot.slane %v352_v29, 4  ;;  %v366_v47 = vshll.u32 %v5281_v35, 16  ;;  %v5000_v9 = vld [vmem:[%s6477_s1 + $0xe8] sm:$0xff]   ;;  %v5002_v25 = vld [vmem:[%s6477_s1 + $0xe0] sm:$0xff]  }
  0x22   : > { %4616 = vmatpush3.bf16.msra.mxu0 %v4982_v10  ;;  %v303_v10 = vsel %vm5217_vm2, %v298_v1, %v302_v45  ;;  %v332_v31 = vrot.slane %v331_v20, 4  ;;  %v345_v50 = vor.u32 %v344_v36, %v341_v24  ;;  %v365_v54 = vrot.slane %v363_v41, 4  ;;  %v5313_v1 = vld [vmem:[%s5173_s16 + $0x58] sm:$0x1] }
  0x23   : > { %4652 = vmatpush3.bf16.msra.mxu1 %v4983_v11  ;;  %4617 = vmatprep.subr.bf16.mxu0 %v4984_v17  ;;  %v313_v11 = vsel %vm5217_vm2, %v308_v2, %v312_v48  ;;  %v327_v43 = vsel %vm5217_vm2, %v322_v30, %v326_v7  ;;  %v368_v57 = vrot.slane %v366_v47, 5  ;;  %v372_v59 = vshll.u32 %v5284_v40, 16  ;;  %v5359_v47 = vld [vmem:[%s5173_s16 + $0x70] sm:$0xf] }
  0x24   : > { %4653 = vmatprep.subr.bf16.mxu1 %v4985_v32  ;;  %v337_v44 = vsel %vm5217_vm2, %v332_v31, %v336_v23  ;;  %v376_v22 = vshrl.u32 %v5284_v40, 16  ;;  %v346_v61 = vrot.slane %v345_v50, 4  ;;  %v3940_v0 = vcombine.low %v5281_v35, %v5284_v40 }
  0x25   : > { %v3920_v48 = vcombine.low %v327_v43, %v337_v44  ;;  %v387_v2 = vshrl.u32 %v5302_v55, 16  ;;  %v374_v4 = vrot.slane %v372_v59, 5  ;;  %v390_v15 = vshll.u32 %v5302_v55, 16  ;;  %v5001_v44 = vld [vmem:[%s6477_s1 + $0x98] sm:$0xff]  }
  0x26   : > { %4618 = vmatpush3.bf16.msra.mxu0 %v4984_v17  ;;  %v3919_v17 = vcombine.low %v303_v10, %v313_v11  ;;  %v378_v6 = vrot.slane %v376_v22, 4  ;;  %v396_v20 = vshll.u32 %v5308_v60, 16  ;;  %v406_v24 = vshll.u32 %v5313_v1, 16 }
  0x27   : > { %4654 = vmatpush3.bf16.msra.mxu1 %v4985_v32  ;;  %4619 = vmatprep.subr.bf16.mxu0 %v4986_v37  ;;  %v358_v32 = vshll.u32 %v5255_v5, 16  ;;  %v392_v23 = vrot.slane %v390_v15, 5  ;;  %v3941_v31 = vcombine.low %v5302_v55, %v5308_v60  ;;  %v5005_v55 = vld [vmem:[%s6477_s1 + $0xd8] sm:$0xff]   ;;  %v5006_v15 = vld [vmem:[%s6477_s1 + $0x90] sm:$0xff]  }
  0x28   : > { %4655 = vmatprep.subr.bf16.mxu1 %v4987_v52  ;;  %v379_v19 = vor.u32 %v378_v6, %v374_v4  ;;  %v398_v30 = vrot.slane %v396_v20, 5 }
  0x29   : > { %v360_v45 = vrot.slane %v358_v32, 5  ;;  %v5338_v32 = vld [vmem:[%s5173_s16 + $0x60] sm:$0xf] }
  0x2a   : > { %4620 = vmatpush3.bf16.msra.mxu0 %v4986_v37  ;;  %v350_v37 = vrot.slane %v348_v28, 5  ;;  %v380_v29 = vrot.slane %v379_v19, 4  ;;  %v411_v41 = vshrl.u32 %v5338_v32, 16  ;;  %v414_v58 = vshll.u32 %v5338_v32, 16 }
  0x2b   : > { %4656 = vmatpush3.bf16.msra.mxu1 %v4987_v52  ;;  %4677 = vmatprep.subr.bf16.mxu0 %v4990_v3 }
  0x2c   : > { %4713 = vmatprep.subr.bf16.mxu1 %v4994_v16  ;;  %v355_v52 = vor.u32 %v354_v39, %v350_v37  ;;  %v351_v10 = vsel %vm5217_vm2, %v346_v61, %v350_v37  ;;  %v408_v37 = vrot.slane %v406_v24, 5  ;;  %v5347_v39 = vld [vmem:[%s5173_s16 + $0x68] sm:$0x1]  ;;  %v5369_v61 = vld [vmem:[%s5173_s16 + $0x78] sm:$0x1] }
  0x2d   : > { %4622 = vmatmul.mubr.bf16.vlgmr.msra.gmra.mxu0 %v3919_v17 }
  0x2e   : > { %4658 = vmatmul.mubr.bf16.vlgmr.msra.gmra.mxu1 %v3937_v49  ;;  %4678 = vmatpush3.bf16.msra.mxu0 %v4990_v3  ;;  %v382_v49 = vshll.u32 %v5292_v46, 16  ;;  %v356_v62 = vrot.slane %v355_v52, 4  ;;  %v369_v3 = vor.u32 %v368_v57, %v365_v54  ;;  %v5362_v54 = vld [vmem:[%s5173_s16 + $0x74] sm:$0xf]  ;;  %v416_v57 = vrot.slane %v414_v58, 5 }
  0x2f   : > { %4679 = vmatprep.subr.bf16.mxu0 %v4991_v18  ;;  %4661 = vmatprep.mubr.bf16.mxu1 %v3938_v12  ;;  %v389_v12 = vrot.slane %v387_v2, 4 }
  0x30   : > { %4625 = vmatprep.mubr.bf16.mxu0 %v3920_v48  ;;  %4714 = vmatpush3.bf16.msra.mxu1 %v4994_v16  ;;  %v384_v7 = vrot.slane %v382_v49, 5  ;;  %v361_v11 = vsel %vm5217_vm2, %v356_v62, %v360_v45  ;;  %v370_v17 = vrot.slane %v369_v3, 4  ;;  %v430_v49 = vshll.u32 %v5347_v39, 16 }
  0x31   : > { %4715 = vmatprep.subr.bf16.mxu1 %v4996_v34  ;;  %v3921_v16 = vcombine.low %v351_v10, %v361_v11  ;;  %v393_v35 = vor.u32 %v392_v23, %v389_v12  ;;  %v435_v3 = vshrl.u32 %v5359_v47, 16  ;;  %v444_v12 = vshll.u32 %v5362_v54, 16  ;;  %v5007_v23 = vld [vmem:[%s6477_s1 + $0xd0] sm:$0xff]  }
  0x32   : > { %4680 = vmatpush3.bf16.msra.mxu0 %v4991_v18  ;;  %v400_v18 = vshrl.u32 %v5308_v60, 16  ;;  %v375_v28 = vsel %vm5217_vm2, %v370_v17, %v374_v4  ;;  %v385_v43 = vsel %vm5217_vm2, %v380_v29, %v384_v7  ;;  %v432_v7 = vrot.slane %v430_v49, 5  ;;  %v5008_v29 = vld [vmem:[%s6477_s1 + $0x88] sm:$0xff]  }
  0x33   : > { %4681 = vmatprep.subr.bf16.mxu0 %v4995_v53  ;;  %v3922_v48 = vcombine.low %v375_v28, %v385_v43  ;;  %v394_v50 = vrot.slane %v393_v35, 4  ;;  %v437_v11 = vrot.slane %v435_v3, 4  ;;  %v3943_v28 = vcombine.low %v5359_v47, %v5362_v54  ;;  %v233_v35 = vld [vmem:[%s5173_s16 + $0x80] sm:$0xf] }
  0x34   : > { %4716 = vmatpush3.bf16.msra.mxu1 %v4996_v34  ;;  %v5341_v34 = vld [vmem:[%s5173_s16 + $0x64] sm:$0xf]  ;;  %v402_v36 = vrot.slane %v400_v18, 4  ;;  %v446_v18 = vrot.slane %v444_v12, 5 }
  0x35   : > { %4626 = vmatmul.mubr.bf16.gmra.mxu0 %v3921_v16  ;;  %4717 = vmatprep.subr.bf16.mxu1 %v5000_v9  ;;  %v424_v45 = vshrl.u32 %v5341_v34, 16  ;;  %v399_v62 = vsel %vm5217_vm2, %v394_v50, %v398_v30  ;;  %v3942_v2 = vcombine.low %v5338_v32, %v5341_v34  ;;  %v462_v50 = vshll.u32 %v233_v35, 16 }
  0x36   : > { %4662 = vmatmul.mubr.bf16.gmra.mxu1 %v3939_v33  ;;  %4682 = vmatpush3.bf16.msra.mxu0 %v4995_v53  ;;  %v420_v33 = vshll.u32 %v5341_v34, 16  ;;  %v403_v52 = vor.u32 %v402_v36, %v398_v30  ;;  %v413_v53 = vrot.slane %v411_v41, 4  ;;  %v5399_v36 = vld [vmem:[%s5173_s16 + $0x84] sm:$0xf]  ;;  %v5011_v41 = vld [vmem:[%s6477_s1 + $0xc8] sm:$0xff]  }
  0x37   : > { %4665 = vmatprep.mubr.bf16.mxu1 %v3940_v0  ;;  %4683 = vmatprep.subr.bf16.mxu0 %v4998_v8  ;;  %v426_v22 = vrot.slane %v424_v45, 4  ;;  %v5408_v45 = vld [vmem:[%s5173_s16 + $0x90] sm:$0xf]  ;;  %v3944_v49 = vcombine.low %v233_v35, %v5399_v36 }
  0x38   : > { %4718 = vmatpush3.bf16.msra.mxu1 %v5000_v9  ;;  %v422_v59 = vrot.slane %v420_v33, 5  ;;  %4629 = vmatprep.mubr.bf16.mxu0 %v3922_v48  ;;  %v404_v0 = vrot.slane %v403_v52, 4  ;;  %v417_v4 = vor.u32 %v416_v57, %v413_v53  ;;  %v438_v9 = vshll.u32 %v5359_v47, 16  ;;  %v5411_v47 = vld [vmem:[%s5173_s16 + $0x94] sm:$0xf] }
  0x39   : > { %4719 = vmatprep.subr.bf16.mxu1 %v5002_v25  ;;  %v459_v33 = vshrl.u32 %v233_v35, 16  ;;  %v468_v52 = vshll.u32 %v5399_v36, 16  ;;  %v472_v53 = vshrl.u32 %v5399_v36, 16  ;;  %v5416_v57 = vld [vmem:[%s5173_s16 + $0x98] sm:$0x1] }
  0x3a   : > { %4684 = vmatpush3.bf16.msra.mxu0 %v4998_v8  ;;  %v427_v6 = vor.u32 %v426_v22, %v422_v59  ;;  %v409_v10 = vsel %vm5217_vm2, %v404_v0, %v408_v37  ;;  %v448_v8 = vshrl.u32 %v5362_v54, 16  ;;  %v418_v17 = vrot.slane %v417_v4, 4  ;;  %v5402_v37 = vld [vmem:[%s5173_s16 + $0x88] sm:$0x1] }
  0x3b   : > { %4685 = vmatprep.subr.bf16.mxu0 %v5001_v44  ;;  %v3923_v16 = vcombine.low %v399_v62, %v409_v10  ;;  %v440_v20 = vrot.slane %v438_v9, 5  ;;  %v461_v22 = vrot.slane %v459_v33, 4  ;;  %v464_v0 = vrot.slane %v462_v50, 5  ;;  %v5012_v10 = vld [vmem:[%s6477_s1 + $0x80] sm:$0xff]  }
  0x3c   : > { %4720 = vmatpush3.bf16.msra.mxu1 %v5002_v25  ;;  %v428_v19 = vrot.slane %v427_v6, 4  ;;  %v450_v24 = vrot.slane %v448_v8, 4  ;;  %v454_v25 = vshll.u32 %v5369_v61, 16  ;;  %v423_v30 = vsel %vm5217_vm2, %v418_v17, %v422_v59 }
  0x3d   : > { %4721 = vmatprep.subr.bf16.mxu1 %v5005_v55  ;;  %4630 = vmatmul.mubr.bf16.gmra.mxu0 %v3923_v16  ;;  %v441_v32 = vor.u32 %v440_v20, %v437_v11  ;;  %v474_v3 = vrot.slane %v472_v53, 4  ;;  %v486_v9 = vshll.u32 %v5408_v45, 16  ;;  %v465_v12 = vor.u32 %v464_v0, %v461_v22  ;;  %v5013_v16 = vld [vmem:[%s6477_s1 + $0xc0] sm:$0xff]  }
  0x3e   : > { %4666 = vmatmul.mubr.bf16.gmra.mxu1 %v3941_v31  ;;  %4686 = vmatpush3.bf16.msra.mxu0 %v5001_v44  ;;  %v433_v31 = vsel %vm5217_vm2, %v428_v19, %v432_v7  ;;  %v451_v44 = vor.u32 %v450_v24, %v446_v18  ;;  %v456_v58 = vrot.slane %v454_v25, 5  ;;  %v483_v7 = vshrl.u32 %v5408_v45, 16 }
  0x3f   : > { %4669 = vmatprep.mubr.bf16.mxu1 %v3942_v2  ;;  %v3924_v43 = vcombine.low %v423_v30, %v433_v31  ;;  %4687 = vmatprep.subr.bf16.mxu0 %v5006_v15  ;;  %v442_v48 = vrot.slane %v441_v32, 4  ;;  %v470_v2 = vrot.slane %v468_v52, 5  ;;  %v488_v19 = vrot.slane %v486_v9, 5  ;;  %v945_v30 = vld [vmem:[%s5173_s16] sm:$0xe]  ;;  %v5439_v31 = vld [vmem:[%s6477_s1 + $0x138] sm:$0xff]  }
  0x40   : > { %4722 = vmatpush3.bf16.msra.mxu1 %v5005_v55  ;;  %v452_v59 = vrot.slane %v451_v44, 4  ;;  %v478_v55 = vshll.u32 %v5402_v37, 16  ;;  %v485_v17 = vrot.slane %v483_v7, 4  ;;  %v496_v20 = vshrl.u32 %v5411_v47, 16  ;;  %v5020_v44 = vld [vmem:[%s6477_s1 + $0x178] sm:$0xff]  }
  0x41   : > { %4723 = vmatprep.subr.bf16.mxu1 %v5007_v23  ;;  %4633 = vmatprep.mubr.bf16.mxu0 %v3924_v43  ;;  %v447_v62 = vsel %vm5217_vm2, %v442_v48, %v446_v18  ;;  %v475_v8 = vor.u32 %v474_v3, %v470_v2  ;;  %v466_v18 = vrot.slane %v465_v12, 4  ;;  %v3945_v32 = vcombine.low %v5408_v45, %v5411_v47  ;;  %v946_v45 = vld [vmem:[%s5173_s16 + $0x10] sm:$0xe]  ;;  %v5015_v12 = vld [vmem:[%s5173_s16 + $0x20] sm:$0xff]  }
  0x42   : > { %4688 = vmatpush3.bf16.msra.mxu0 %v5006_v15  ;;  %v457_v4 = vsel %vm5217_vm2, %v452_v59, %v456_v58  ;;  %v480_v6 = vrot.slane %v478_v55, 5  ;;  %v492_v15 = vshll.u32 %v5411_v47, 16  ;;  %v3954_v43 = vrot.slane %v945_v30, 9 }
  0x43   : > { %4689 = vmatprep.subr.bf16.mxu0 %v5008_v29  ;;  %v3925_v11 = vcombine.low %v447_v62, %v457_v4  ;;  %v476_v24 = vrot.slane %v475_v8, 4  ;;  %v471_v58 = vsel %vm5217_vm2, %v466_v18, %v470_v2  ;;  %v987_v48 = vrot.slane %v5200_v26, 5  ;;  %v947_v4 = vld [vmem:[%s5173_s16 + $0x20] sm:$0xe] }
  0x44   : > { %4724 = vmatpush3.bf16.msra.mxu1 %v5007_v23  ;;  %v502_v23 = vshll.u32 %v5416_v57, 16  ;;  %v494_v25 = vrot.slane %v492_v15, 5  ;;  %v994_v26 = vrot.slane %v5229_v51, 5  ;;  %v3955_v2 = vrot.slane %v946_v45, 9  ;;  %v5023_v45 = vld [vmem:[%s5173_s16 + $0x50] sm:$0xff]  }
  0x45   : > { %4725 = vmatprep.subr.bf16.mxu1 %v5011_v41  ;;  %4634 = vmatmul.mubr.bf16.gmra.mxu0 %v3925_v11  ;;  %v481_v33 = vsel %vm5217_vm2, %v476_v24, %v480_v6  ;;  %v989_v3 = vrot.slane %v987_v48, 4  ;;  %v997_v9 = vrot.slane %v5237_v56, 5  ;;  %v1001_v51 = vrot.slane %v5249_v63, 5  ;;  %v949_v63 = vld [vmem:[%s5173_s16 + $0x40] sm:$0xe] }
  0x46   : > { %4670 = vmatmul.mubr.bf16.gmra.mxu1 %v3943_v28  ;;  %4690 = vmatpush3.bf16.msra.mxu0 %v5008_v29  ;;  %v489_v28 = vor.u32 %v488_v19, %v485_v17  ;;  %v498_v29 = vrot.slane %v496_v20, 4  ;;  %v3926_v50 = vcombine.low %v471_v58, %v481_v33  ;;  %v504_v59 = vrot.slane %v502_v23, 5  ;;  %v5018_v19 = vld [vmem:[%s5173_s16 + $0x30] sm:$0xff]   ;;  %v5019_v58 = vld [vmem:[%s5173_s16 + $0x40] sm:$0xff]  }
  0x47   : > { %4673 = vmatprep.mubr.bf16.mxu1 %v3944_v49  ;;  %4691 = vmatprep.subr.bf16.mxu0 %v5012_v10  ;;  %v5014_v49 = vld [vmem:[%s5173_s16 + $0x10] sm:$0xff]   ;;  %v996_v11 = vrot.slane %v994_v26, 4  ;;  %v1008_v8 = vrot.slane %v5284_v40, 5  ;;  %v988_v15 = vsel %vm5445_vm5, %v3955_v2, %v987_v48  ;;  %v991_v56 = vsel %vm5445_vm5, %v989_v3, %v990_v42  ;;  %v5025_v3 = vld [vmem:[%s5173_s16 + $0x60] sm:$0xff]  }
  0x48   : > { %4726 = vmatpush3.bf16.msra.mxu1 %v5011_v41  ;;  %v980_v41 = vrot.slane %v5183_v13, 5  ;;  %v490_v52 = vrot.slane %v489_v28, 4  ;;  %v499_v53 = vor.u32 %v498_v29, %v494_v25  ;;  %4637 = vmatprep.mubr.bf16.mxu0 %v3926_v50  ;;  %v1003_v20 = vrot.slane %v1001_v51, 4  ;;  %v5017_v42 = vld [vmem:[%s6477_s1 + $0x130] sm:$0xff]  }
  0x49   : > { %4727 = vmatprep.subr.bf16.mxu1 %v5013_v16  ;;  %v998_v17 = vsel %vm5445_vm5, %v996_v11, %v997_v9  ;;  %v3981_v23 = vcombine.low %v988_v15, %v991_v56  ;;  %v1004_v18 = vrot.slane %v5255_v5, 5  ;;  %v3958_v24 = vrot.slane %v949_v63, 9  ;;  %v950_v29 = vld [vmem:[%s5173_s16 + $0x50] sm:$0xe]  ;;  %v5021_v5 = vld [vmem:[%s6477_s1 + $0x128] sm:$0xff]   ;;  %v5027_v9 = vld [vmem:[%s6477_s1 + $0x118] sm:$0xff]  }
  0x4a   : > { %4692 = vmatpush3.bf16.msra.mxu0 %v5012_v10  ;;  %v981_v22 = vsel %vm5445_vm5, %v3954_v43, %v980_v41  ;;  %v982_v55 = vrot.slane %v980_v41, 4  ;;  %v495_v13 = vsel %vm5217_vm2, %v490_v52, %v494_v25  ;;  %v500_v62 = vrot.slane %v499_v53, 4  ;;  %v5026_v43 = vld [vmem:[%s6477_s1 + $0x168] sm:$0xff]   ;;  %v5028_v52 = vld [vmem:[%s6477_s1 + $0x160] sm:$0xff]   ;;  %v952_v53 = vld [vmem:[%s5173_s16 + $0x70] sm:$0xe] }
  0x4b   : > { %4749 = vmatprep.subr.bf16.mxu0 %v5439_v31  ;;  %v3956_v10 = vrot.slane %v947_v4, 9  ;;  %v1010_v25 = vrot.slane %v1008_v8, 4  ;;  %v1011_v30 = vrot.slane %v5292_v46, 5  ;;  %v951_v46 = vld [vmem:[%s5173_s16 + $0x60] sm:$0xe]  ;;  %v1022_v33 = vrot.slane %v5341_v34, 5 }
  0x4c   : > { %4728 = vmatpush3.bf16.msra.mxu1 %v5013_v16  ;;  %v984_v0 = vsel %vm5445_vm5, %v982_v55, %v983_v21  ;;  %v505_v6 = vsel %vm5217_vm2, %v500_v62, %v504_v59  ;;  %v948_v21 = vld [vmem:[%s5173_s16 + $0x30] sm:$0xe]  ;;  %v1009_v41 = vsel %vm5445_vm5, %v3958_v24, %v1008_v8  ;;  %v1018_v48 = vrot.slane %v5313_v1, 5  ;;  %v5037_v24 = vld [vmem:[%s6477_s1 + $0x148] sm:$0xff]  }
  0x4d   : > { %4785 = vmatprep.subr.bf16.mxu1 %v5020_v44  ;;  %v3980_v7 = vcombine.low %v981_v22, %v984_v0  ;;  %v3927_v14 = vcombine.low %v495_v13, %v505_v6  ;;  %v995_v16 = vsel %vm5445_vm5, %v3956_v10, %v994_v26  ;;  %v3957_v40 = vrot.slane %v948_v21, 9 }
  0x4e   : > { %4674 = vmatmul.mubr.bf16.gmra.mxu1 %v3945_v32  ;;  %v3982_v28 = vcombine.low %v995_v16, %v998_v17  ;;  %v1015_v32 = vrot.slane %v5308_v60, 5  ;;  %v1012_v34 = vsel %vm5445_vm5, %v1010_v25, %v1011_v30  ;;  %v3959_v50 = vrot.slane %v950_v29, 9  ;;  %v5033_v17 = vld [vmem:[%s6477_s1 + $0x150] sm:$0xff]   ;;  %v5030_v29 = vld [vmem:[%s5173_s16 + $0x80] sm:$0xff]  }
  0x4f   : > { %4729 = vmatprep.mubr.bf16.mxu1 %v5014_v49  ;;  %4638 = vmatmul.mubr.bf16.gmra.mxu0 %v3927_v14  ;;  %v1002_v60 = vsel %vm5445_vm5, %v3957_v40, %v1001_v51  ;;  %v1029_v59 = vrot.slane %v5362_v54, 5  ;;  %v3960_v22 = vrot.slane %v951_v46, 9  ;;  %v1025_v55 = vrot.slane %v5347_v39, 5  ;;  %v5024_v49 = vld [vmem:[%s6477_s1 + $0x120] sm:$0xff]   ;;  %v5031_v39 = vld [vmem:[%s6477_s1 + $0x158] sm:$0xff]  }
  0x50   : > { %4693 = vmatprep.mubr.bf16.mxu0 %v3980_v7  ;;  %v1024_v13 = vrot.slane %v1022_v33, 4  ;;  %v1032_v62 = vrot.slane %v5369_v61, 5  ;;  %v3984_v26 = vcombine.low %v1009_v41, %v1012_v34  ;;  %v3961_v0 = vrot.slane %v952_v53, 9  ;;  %v954_v14 = vld [vmem:[%s5173_s16 + $0x90] sm:$0xe] }
  0x51   : > { %v1036_v54 = vrot.slane %v5399_v36, 5  ;;  %v1031_v2 = vrot.slane %v1029_v59, 4  ;;  %v1039_v61 = vrot.slane %v5402_v37, 5  ;;  %v1016_v6 = vsel %vm5445_vm5, %v3959_v50, %v1015_v32  ;;  %v953_v36 = vld [vmem:[%s5173_s16 + $0x80] sm:$0xe] }
  0x52   : > { %v3962_v51 = vrot.slane %v953_v36, 9  ;;  %v1043_v37 = vrot.slane %v5411_v47, 5  ;;  %v1046_v10 = vrot.slane %v5416_v57, 5  ;;  %v1023_v11 = vsel %vm5445_vm5, %v3960_v22, %v1022_v33  ;;  %v4052_v25 = vld [vmem:[%s5173_s16 + $0x10] sm:$0xf]  ;;  %v5034_v33 = vld [vmem:[%s6477_s1 + $0x108] sm:$0xff]  }
  0x53   : > { %v1038_v4 = vrot.slane %v1036_v54, 4  ;;  %v1026_v21 = vsel %vm5445_vm5, %v1024_v13, %v1025_v55  ;;  %v5554_v8 = vsel %vm5445_vm5, %v3961_v0, %v1029_v59  ;;  %v3963_v15 = vrot.slane %v954_v14, 9  ;;  %v4053_v30 = vld [vmem:[%s5173_s16 + $0x14] sm:$0xf]  ;;  %v4116_v46 = vld [vmem:[%s5173_s16 + $0x10] sm:$0xe] }
  0x54   : > { %v5558_v56 = vsel %vm5445_vm5, %v1031_v2, %v1032_v62  ;;  %v5562_v47 = vsel %vm5445_vm5, %v3962_v51, %v1036_v54  ;;  %v1045_v63 = vrot.slane %v1043_v37, 4  ;;  %v3986_v40 = vcombine.low %v1023_v11, %v1026_v21  ;;  %v4056_v53 = vld [vmem:[%s5173_s16 + $0x24] sm:$0xf]  ;;  %v5035_v59 = vld [vmem:[%s5173_s16 + $0x90] sm:$0xff]   ;;  %v4117_v2 = vld [vmem:[%s5173_s16 + $0x20] sm:$0xe] }
  0x55   : > { %v5566_v57 = vsel %vm5445_vm5, %v1038_v4, %v1039_v61  ;;  %v2118_v41 = vrot.slane %v4053_v30, 5  ;;  %v1632_v54 = vshll.u32 %v4056_v53, 16  ;;  %v1636_v61 = vshrl.u32 %v4056_v53, 16  ;;  %v5038_v36 = vld [vmem:[%s6477_s1 + $0x100] sm:$0xff]  }
  0x56   : > { %4730 = vmatmul.mubr.bf16.vlgmr.msra.gmra.mxu1 %v5015_v12  ;;  %v5029_v12 = vld [vmem:[%s5173_s16 + $0x70] sm:$0xff]   ;;  %v4127_v21 = vrot.slane %v4117_v2, 9 }
  0x57   : > { %4733 = vmatprep.mubr.bf16.mxu1 %v5018_v19  ;;  %4786 = vmatpush3.bf16.msra.mxu1 %v5020_v44  ;;  %v1005_v44 = vsel %vm5445_vm5, %v1003_v20, %v1004_v18  ;;  %v5573_v19 = vsel %vm5445_vm5, %v3963_v15, %v1043_v37  ;;  %v5032_v20 = vld [vmem:[%s6477_s1 + $0x110] sm:$0xff]   ;;  %v1634_v37 = vrot.slane %v1632_v54, 5 }
  0x58   : > { %4787 = vmatprep.subr.bf16.mxu1 %v5022_v27  ;;  %4694 = vmatmul.mubr.bf16.vlgmr.msra.gmra.mxu0 %v3981_v23  ;;  %v3983_v1 = vcombine.low %v1002_v60, %v1005_v44  ;;  %v3987_v23 = vcombine.low %v5554_v8, %v5558_v56  ;;  %v4126_v44 = vrot.slane %v4116_v46, 9  ;;  %v4118_v46 = vld [vmem:[%s5173_s16 + $0x30] sm:$0xe] }
  0x59   : > { %4750 = vmatpush3.bf16.msra.mxu0 %v5439_v31  ;;  %4697 = vmatprep.mubr.bf16.mxu0 %v3982_v28  ;;  %v1017_v31 = vrot.slane %v1015_v32, 4  ;;  %v4054_v28 = vld [vmem:[%s5173_s16 + $0x18] sm:$0x1]  ;;  %v1599_v32 = vshrl.u32 %v4052_v25, 16 }
  0x5a   : > { %4751 = vmatprep.subr.bf16.mxu0 %v5017_v42  ;;  %v1618_v60 = vshll.u32 %v4054_v28, 16  ;;  %v5604_v55 = vsel %vm5445_vm5, %v4126_v44, %v2118_v41 }
  0x5b   : > { %4788 = vmatpush3.bf16.msra.mxu1 %v5022_v27  ;;  %v1019_v7 = vsel %vm5445_vm5, %v1017_v31, %v1018_v48  ;;  %v5580_v27 = vsel %vm5445_vm5, %v1045_v63, %v1046_v10  ;;  %v4055_v48 = vld [vmem:[%s5173_s16 + $0x20] sm:$0xf]  ;;  %v1601_v34 = vrot.slane %v1599_v32, 4  ;;  %v1638_v10 = vrot.slane %v1636_v61, 4 }
  0x5c   : > { %4789 = vmatprep.subr.bf16.mxu1 %v5026_v43  ;;  %v3985_v16 = vcombine.low %v1016_v6, %v1019_v7  ;;  %v3989_v18 = vcombine.low %v5573_v19, %v5580_v27  ;;  %v1620_v22 = vrot.slane %v1618_v60, 5  ;;  %v1623_v13 = vshrl.u32 %v4055_v48, 16  ;;  %v5036_v32 = vld [vmem:[%s5173_s16 + $0xa0] sm:$0xff]  }
  0x5d   : > { %4752 = vmatpush3.bf16.msra.mxu0 %v5017_v42  ;;  %v3988_v42 = vcombine.low %v5562_v47, %v5566_v57  ;;  %v1626_v0 = vshll.u32 %v4055_v48, 16  ;;  %v4062_v48 = vld [vmem:[%s5173_s16 + $0x44] sm:$0xf] }
  0x5e   : > { %4734 = vmatmul.mubr.bf16.gmra.mxu1 %v5019_v58  ;;  %4753 = vmatprep.subr.bf16.mxu0 %v5021_v5  ;;  %v1608_v58 = vshll.u32 %v4053_v30, 16  ;;  %v1625_v4 = vrot.slane %v1623_v13, 4 }
  0x5f   : > { %4737 = vmatprep.mubr.bf16.mxu1 %v5023_v45  ;;  %4790 = vmatpush3.bf16.msra.mxu1 %v5026_v43  ;;  %v1602_v43 = vshll.u32 %v4052_v25, 16  ;;  %v2121_v45 = vrot.slane %v4054_v28, 5  ;;  %v1628_v14 = vrot.slane %v1626_v0, 5  ;;  %v1639_v25 = vor.u32 %v1638_v10, %v1634_v37 }
  0x60   : > { %4698 = vmatmul.mubr.bf16.gmra.mxu0 %v3983_v1  ;;  %4791 = vmatprep.subr.bf16.mxu1 %v5028_v52  ;;  %v1610_v31 = vrot.slane %v1608_v58, 5  ;;  %v2120_v1 = vrot.slane %v2118_v41, 4 }
  0x61   : > { %4754 = vmatpush3.bf16.msra.mxu0 %v5021_v5  ;;  %4701 = vmatprep.mubr.bf16.mxu0 %v3984_v26  ;;  %v1612_v5 = vshrl.u32 %v4053_v30, 16  ;;  %v1604_v50 = vrot.slane %v1602_v43, 5  ;;  %v1629_v63 = vor.u32 %v1628_v14, %v1625_v4  ;;  %v5646_v43 = vld [vmem:[%s6477_s1 + $0x1b8] sm:$0xff]  }
  0x62   : > { %4755 = vmatprep.subr.bf16.mxu0 %v5024_v49 }
  0x63   : > { %4792 = vmatpush3.bf16.msra.mxu1 %v5028_v52  ;;  %v1614_v52 = vrot.slane %v1612_v5, 4  ;;  %v1605_v62 = vor.u32 %v1604_v50, %v1601_v34  ;;  %v1630_v8 = vrot.slane %v1629_v63, 4  ;;  %v1640_v5 = vrot.slane %v1639_v25, 4 }
  0x64   : > { %4793 = vmatprep.subr.bf16.mxu1 %v5031_v39 }
  0x65   : > { %4756 = vmatpush3.bf16.msra.mxu0 %v5024_v49  ;;  %v4057_v49 = vld [vmem:[%s5173_s16 + $0x28] sm:$0x1]  ;;  %v1615_v26 = vor.u32 %v1614_v52, %v1610_v31  ;;  %v1606_v7 = vrot.slane %v1605_v62, 4 }
  0x66   : > { %4738 = vmatmul.mubr.bf16.gmra.mxu1 %v5025_v3  ;;  %4757 = vmatprep.subr.bf16.mxu0 %v5027_v9  ;;  %v5613_v3 = vsel %vm5445_vm5, %v2120_v1, %v2121_v45  ;;  %v1642_v6 = vshll.u32 %v4057_v49, 16  ;;  %v2128_v30 = vrot.slane %v4057_v49, 5  ;;  %v4061_v45 = vld [vmem:[%s5173_s16 + $0x40] sm:$0xf]  ;;  %v5660_v1 = vld [vmem:[%s5173_s16 + $0x48] sm:$0x1] }
  0x67   : > { %4741 = vmatprep.mubr.bf16.mxu1 %v5029_v12  ;;  %4794 = vmatpush3.bf16.msra.mxu1 %v5031_v39  ;;  %v5039_v39 = vld [vmem:[%s6477_s1 + $0x140] sm:$0xff]   ;;  %v4152_v51 = vcombine.low %v5604_v55, %v5613_v3  ;;  %v1611_v12 = vsel %vm5217_vm2, %v1606_v7, %v1610_v31  ;;  %v4128_v55 = vrot.slane %v4118_v46, 9  ;;  %v1671_v0 = vshrl.u32 %v4061_v45, 16  ;;  %v5046_v46 = vld [vmem:[%s6477_s1 + $0x1e8] sm:$0xff]  }
  0x68   : > { %4702 = vmatmul.mubr.bf16.gmra.mxu0 %v3985_v16  ;;  %4795 = vmatprep.subr.bf16.mxu1 %v5033_v17  ;;  %v1644_v11 = vrot.slane %v1642_v6, 5  ;;  %v2125_v16 = vrot.slane %v4056_v53, 5  ;;  %v4119_v49 = vld [vmem:[%s5173_s16 + $0x40] sm:$0xe]  ;;  %v1674_v2 = vshll.u32 %v4061_v45, 16  ;;  %v1684_v3 = vshrl.u32 %v4062_v48, 16 }
  0x69   : > { %4758 = vmatpush3.bf16.msra.mxu0 %v5027_v9  ;;  %4705 = vmatprep.mubr.bf16.mxu0 %v3986_v40  ;;  %v1616_v9 = vrot.slane %v1615_v26, 4  ;;  %v4059_v40 = vld [vmem:[%s5173_s16 + $0x34] sm:$0xf]  ;;  %v4129_v10 = vrot.slane %v4119_v49, 9  ;;  %v2142_v25 = vrot.slane %v5660_v1, 5 }
  0x6a   : > { %4759 = vmatprep.subr.bf16.mxu0 %v5032_v20  ;;  %v5641_v56 = vsel %vm5445_vm5, %v4127_v21, %v2125_v16  ;;  %v1656_v57 = vshll.u32 %v4059_v40, 16  ;;  %v1645_v34 = vsel %vm5217_vm2, %v1640_v5, %v1644_v11  ;;  %v2132_v62 = vrot.slane %v4059_v40, 5  ;;  %v4065_v11 = vld [vmem:[%s5173_s16 + $0x54] sm:$0xf]  ;;  %v5699_v45 = vld [vmem:[%s5173_s16 + $0x64] sm:$0xf] }
  0x6b   : > { %4796 = vmatpush3.bf16.msra.mxu1 %v5033_v17  ;;  %v1621_v15 = vsel %vm5217_vm2, %v1616_v9, %v1620_v22  ;;  %v4058_v17 = vld [vmem:[%s5173_s16 + $0x30] sm:$0xf]  ;;  %v1676_v9 = vrot.slane %v1674_v2, 5  ;;  %v1686_v14 = vrot.slane %v1684_v3, 4  ;;  %v5048_v2 = vld [vmem:[%s6477_s1 + $0x1e0] sm:$0xff]  }
  0x6c   : > { %4797 = vmatprep.subr.bf16.mxu1 %v5037_v24  ;;  %v1647_v28 = vshrl.u32 %v4058_v17, 16  ;;  %v1650_v58 = vshll.u32 %v4058_v17, 16  ;;  %v1658_v31 = vrot.slane %v1656_v57, 5  ;;  %v2133_v61 = vsel %vm5445_vm5, %v4128_v55, %v2132_v62  ;;  %v5041_v17 = vld [vmem:[%s6477_s1 + $0x1b0] sm:$0xff]   ;;  %v5043_v55 = vld [vmem:[%s6477_s1 + $0x1a8] sm:$0xff]  }
  0x6d   : > { %4760 = vmatpush3.bf16.msra.mxu0 %v5032_v20  ;;  %v4098_v20 = vcombine.low %v1611_v12, %v1621_v15  ;;  %v2134_v6 = vrot.slane %v2132_v62, 4  ;;  %v1708_v57 = vshrl.u32 %v4065_v11, 16 }
  0x6e   : > { %4742 = vmatmul.mubr.bf16.gmra.mxu1 %v5030_v29  ;;  %4761 = vmatprep.subr.bf16.mxu0 %v5034_v33  ;;  %v5633_v29 = vld [vmem:[%s6477_s1 + $0x1f8] sm:$0xff]   ;;  %v1649_v47 = vrot.slane %v1647_v28, 4  ;;  %v1652_v44 = vrot.slane %v1650_v58, 5 }
  0x6f   : > { %4745 = vmatprep.mubr.bf16.mxu1 %v5035_v59  ;;  %4798 = vmatpush3.bf16.msra.mxu1 %v5037_v24  ;;  %v4060_v24 = vld [vmem:[%s5173_s16 + $0x38] sm:$0x1] }
  0x70   : > { %4706 = vmatmul.mubr.bf16.gmra.mxu0 %v3987_v23  ;;  %4799 = vmatprep.subr.bf16.mxu1 %v5039_v39  ;;  %v2127_v23 = vrot.slane %v2125_v16, 4  ;;  %v1666_v41 = vshll.u32 %v4060_v24, 16  ;;  %v1653_v59 = vor.u32 %v1652_v44, %v1649_v47  ;;  %v2135_v26 = vrot.slane %v4060_v24, 5  ;;  %v5044_v16 = vld [vmem:[%s6477_s1 + $0x1f0] sm:$0xff]  }
  0x71   : > { %4709 = vmatprep.mubr.bf16.mxu0 %v3988_v42  ;;  %4762 = vmatpush3.bf16.msra.mxu0 %v5034_v33  ;;  %v1660_v42 = vshrl.u32 %v4059_v40, 16  ;;  %v1635_v33 = vsel %vm5217_vm2, %v1630_v8, %v1634_v37  ;;  %v4064_v37 = vld [vmem:[%s5173_s16 + $0x50] sm:$0xf] }
  0x72   : > { %4763 = vmatprep.subr.bf16.mxu0 %v5038_v36  ;;  %v2129_v60 = vsel %vm5445_vm5, %v2127_v23, %v2128_v30  ;;  %v4099_v53 = vcombine.low %v1635_v33, %v1645_v34  ;;  %v1668_v22 = vrot.slane %v1666_v41, 5  ;;  %v1654_v54 = vrot.slane %v1653_v59, 4  ;;  %v4066_v30 = vld [vmem:[%s5173_s16 + $0x58] sm:$0x1]  ;;  %v4120_v23 = vld [vmem:[%s5173_s16 + $0x50] sm:$0xe] }
  0x73   : > { %4800 = vmatpush3.bf16.msra.mxu1 %v5039_v39  ;;  %v4153_v50 = vcombine.low %v5641_v56, %v2129_v60  ;;  %v1662_v52 = vrot.slane %v1660_v42, 4  ;;  %v1680_v39 = vshll.u32 %v4062_v48, 16  ;;  %v2136_v27 = vsel %vm5445_vm5, %v2134_v6, %v2135_v26  ;;  %v4067_v42 = vld [vmem:[%s5173_s16 + $0x60] sm:$0xf] }
  0x74   : > { %4857 = vmatprep.subr.bf16.mxu1 %v5633_v29  ;;  %v1659_v7 = vsel %vm5217_vm2, %v1654_v54, %v1658_v31  ;;  %v4154_v12 = vcombine.low %v2133_v61, %v2136_v27  ;;  %v1695_v24 = vshrl.u32 %v4064_v37, 16  ;;  %v1698_v8 = vshll.u32 %v4064_v37, 16  ;;  %v4121_v6 = vld [vmem:[%s5173_s16 + $0x60] sm:$0xe] }
  0x75   : > { %4764 = vmatpush3.bf16.msra.mxu0 %v5038_v36  ;;  %v1663_v13 = vor.u32 %v1662_v52, %v1658_v31  ;;  %v1673_v36 = vrot.slane %v1671_v0, 4  ;;  %v1704_v56 = vshll.u32 %v4065_v11, 16  ;;  %v1710_v34 = vrot.slane %v1708_v57, 4  ;;  %v5045_v27 = vld [vmem:[%s6477_s1 + $0x1a0] sm:$0xff]   ;;  %v5047_v57 = vld [vmem:[%s6477_s1 + $0x198] sm:$0xff]  }
  0x76   : > { %4746 = vmatmul.mubr.bf16.gmra.mxu1 %v5036_v32  ;;  %4821 = vmatprep.subr.bf16.mxu0 %v5646_v43  ;;  %v1697_v47 = vrot.slane %v1695_v24, 4  ;;  %v1700_v44 = vrot.slane %v1698_v8, 5  ;;  %v4130_v59 = vrot.slane %v4120_v23, 9  ;;  %v2149_v49 = vrot.slane %v4066_v30, 5  ;;  %v4073_v23 = vld [vmem:[%s5173_s16 + $0x80] sm:$0xf] }
  0x77   : > { %4801 = vmatprep.mubr.bf16.mxu1 %v4152_v51  ;;  %v1664_v4 = vrot.slane %v1663_v13, 4  ;;  %v1682_v51 = vrot.slane %v1680_v39, 5  ;;  %v1677_v15 = vor.u32 %v1676_v9, %v1673_v36  ;;  %v1706_v41 = vrot.slane %v1704_v56, 5  ;;  %v5708_v13 = vld [vmem:[%s5173_s16 + $0x68] sm:$0x1] }
  0x78   : > { %4710 = vmatmul.mubr.bf16.gmra.mxu0 %v3989_v18  ;;  %v1690_v18 = vshll.u32 %v5660_v1, 16  ;;  %v1701_v52 = vor.u32 %v1700_v44, %v1697_v47  ;;  %v1719_v62 = vshrl.u32 %v4067_v42, 16  ;;  %v1722_v54 = vshll.u32 %v4067_v42, 16 }
  0x79   : > { %4765 = vmatprep.mubr.bf16.mxu0 %v4098_v20  ;;  %v1669_v19 = vsel %vm5217_vm2, %v1664_v4, %v1668_v22  ;;  %v1687_v63 = vor.u32 %v1686_v14, %v1682_v51  ;;  %v2139_v20 = vrot.slane %v4062_v48, 5  ;;  %v1678_v28 = vrot.slane %v1677_v15, 4  ;;  %v4070_v14 = vld [vmem:[%s5173_s16 + $0x70] sm:$0xf] }
  0x7a   : > { %v4100_v21 = vcombine.low %v1659_v7, %v1669_v19  ;;  %v1692_v40 = vrot.slane %v1690_v18, 5  ;;  %v2146_v22 = vrot.slane %v4065_v11, 5  ;;  %v1702_v26 = vrot.slane %v1701_v52, 4  ;;  %v5730_v11 = vld [vmem:[%s5173_s16 + $0x74] sm:$0xf] }
  0x7b   : > { %v1688_v32 = vrot.slane %v1687_v63, 4  ;;  %v2140_v58 = vsel %vm5445_vm5, %v4129_v10, %v2139_v20  ;;  %v2141_v5 = vrot.slane %v2139_v20, 4  ;;  %v1683_v33 = vsel %vm5217_vm2, %v1678_v28, %v1682_v51 }
  0x7c   : > { %v2148_v0 = vrot.slane %v2146_v22, 4  ;;  %v1721_v3 = vrot.slane %v1719_v62, 4  ;;  %v1728_v4 = vshll.u32 %v5699_v45, 16  ;;  %v1732_v61 = vshrl.u32 %v5699_v45, 16 }
  0x7d   : > { %v1693_v60 = vsel %vm5217_vm2, %v1688_v32, %v1692_v40  ;;  %v2143_v48 = vsel %vm5445_vm5, %v2141_v5, %v2142_v25  ;;  %v1707_v36 = vsel %vm5217_vm2, %v1702_v26, %v1706_v41  ;;  %v1724_v9 = vrot.slane %v1722_v54, 5  ;;  %v4122_v40 = vld [vmem:[%s5173_s16 + $0x70] sm:$0xe] }
  0x7e   : > { %4802 = vmatmul.mubr.bf16.vlgmr.msra.gmra.mxu1 %v4153_v50  ;;  %v1714_v50 = vshll.u32 %v4066_v30, 16  ;;  %v4155_v31 = vcombine.low %v2140_v58, %v2143_v48  ;;  %v2150_v7 = vsel %vm5445_vm5, %v2148_v0, %v2149_v49  ;;  %v1738_v51 = vshll.u32 %v5708_v13, 16 }
  0x7f   : > { %4805 = vmatprep.mubr.bf16.mxu1 %v4154_v12  ;;  %4858 = vmatpush3.bf16.msra.mxu1 %v5633_v29  ;;  %v4101_v29 = vcombine.low %v1683_v33, %v1693_v60  ;;  %v1730_v18 = vrot.slane %v1728_v4, 5  ;;  %v1734_v10 = vrot.slane %v1732_v61, 4  ;;  %v1725_v15 = vor.u32 %v1724_v9, %v1721_v3 }
  0x80   : > { %4859 = vmatprep.subr.bf16.mxu1 %v5044_v16  ;;  %4766 = vmatmul.mubr.bf16.vlgmr.msra.gmra.mxu0 %v4099_v53  ;;  %v1711_v53 = vor.u32 %v1710_v34, %v1706_v41  ;;  %v1716_v1 = vrot.slane %v1714_v50, 5  ;;  %v1740_v63 = vrot.slane %v1738_v51, 5  ;;  %v2153_v25 = vrot.slane %v5699_v45, 5  ;;  %v5051_v45 = vld [vmem:[%s6477_s1 + $0x1d0] sm:$0xff]  }
  0x81   : > { %4822 = vmatpush3.bf16.msra.mxu0 %v5646_v43  ;;  %4769 = vmatprep.mubr.bf16.mxu0 %v4100_v21  ;;  %v2147_v43 = vsel %vm5445_vm5, %v4130_v59, %v2146_v22  ;;  %v5049_v21 = vld [vmem:[%s6477_s1 + $0x1d8] sm:$0xff]   ;;  %v1735_v20 = vor.u32 %v1734_v10, %v1730_v18  ;;  %v2156_v30 = vrot.slane %v5708_v13, 5  ;;  %v1743_v24 = vshrl.u32 %v4070_v14, 16  ;;  %v4075_v13 = vld [vmem:[%s5173_s16 + $0x88] sm:$0x1] }
  0x82   : > { %4823 = vmatprep.subr.bf16.mxu0 %v5041_v17  ;;  %v1712_v39 = vrot.slane %v1711_v53, 4  ;;  %v4156_v19 = vcombine.low %v2147_v43, %v2150_v7  ;;  %v1726_v28 = vrot.slane %v1725_v15, 4  ;;  %v1746_v32 = vshll.u32 %v4070_v14, 16 }
  0x83   : > { %4860 = vmatpush3.bf16.msra.mxu1 %v5044_v16  ;;  %v4131_v16 = vrot.slane %v4121_v6, 9  ;;  %v1752_v8 = vshll.u32 %v5730_v11, 16  ;;  %v1756_v56 = vshrl.u32 %v5730_v11, 16  ;;  %v1736_v58 = vrot.slane %v1735_v20, 4  ;;  %v4123_v6 = vld [vmem:[%s5173_s16 + $0x80] sm:$0xe] }
  0x84   : > { %4861 = vmatprep.subr.bf16.mxu1 %v5046_v46  ;;  %v1717_v37 = vsel %vm5217_vm2, %v1712_v39, %v1716_v1  ;;  %v2155_v47 = vrot.slane %v2153_v25, 4  ;;  %v1745_v42 = vrot.slane %v1743_v24, 4  ;;  %v1731_v33 = vsel %vm5217_vm2, %v1726_v28, %v1730_v18  ;;  %v5055_v24 = vld [vmem:[%s6477_s1 + $0x1c0] sm:$0xff]  }
  0x85   : > { %4824 = vmatpush3.bf16.msra.mxu0 %v5041_v17  ;;  %v4102_v12 = vcombine.low %v1707_v36, %v1717_v37  ;;  %v5736_v17 = vld [vmem:[%s5173_s16 + $0x78] sm:$0x1]  ;;  %v2154_v5 = vsel %vm5445_vm5, %v4131_v16, %v2153_v25  ;;  %v1748_v60 = vrot.slane %v1746_v32, 5  ;;  %v1754_v44 = vrot.slane %v1752_v8, 5  ;;  %v5052_v36 = vld [vmem:[%s6477_s1 + $0x188] sm:$0xff]  }
  0x86   : > { %4806 = vmatmul.mubr.bf16.gmra.mxu1 %v4155_v31  ;;  %4825 = vmatprep.subr.bf16.mxu0 %v5043_v55  ;;  %v1758_v41 = vrot.slane %v1756_v56, 4  ;;  %v2157_v48 = vsel %vm5445_vm5, %v2155_v47, %v2156_v30  ;;  %v1762_v34 = vshll.u32 %v5736_v17, 16  ;;  %v4132_v50 = vrot.slane %v4122_v40, 9  ;;  %v4076_v37 = vld [vmem:[%s5173_s16 + $0x90] sm:$0xf] }
  0x87   : > { %4862 = vmatpush3.bf16.msra.mxu1 %v5046_v46  ;;  %4809 = vmatprep.mubr.bf16.mxu1 %v4156_v19  ;;  %v5750_v46 = vld [vmem:[%s5173_s16 + $0x84] sm:$0xf]  ;;  %v4157_v52 = vcombine.low %v2154_v5, %v2157_v48  ;;  %v1749_v59 = vor.u32 %v1748_v60, %v1745_v42  ;;  %v2160_v1 = vrot.slane %v5730_v11, 5  ;;  %v2163_v49 = vrot.slane %v5736_v17, 5  ;;  %v5785_v19 = vld [vmem:[%s5173_s16 + $0x94] sm:$0xf] }
  0x88   : > { %4863 = vmatprep.subr.bf16.mxu1 %v5048_v2  ;;  %4770 = vmatmul.mubr.bf16.gmra.mxu0 %v4101_v29  ;;  %v1741_v29 = vsel %vm5217_vm2, %v1736_v58, %v1740_v63  ;;  %v1759_v22 = vor.u32 %v1758_v41, %v1754_v44  ;;  %v1764_v53 = vrot.slane %v1762_v34, 5  ;;  %v1767_v62 = vshrl.u32 %v4073_v23, 16  ;;  %v4124_v30 = vld [vmem:[%s5173_s16 + $0x90] sm:$0xe]  ;;  %v5054_v58 = vld [vmem:[%s6477_s1 + $0x180] sm:$0xff]  }
  0x89   : > { %4826 = vmatpush3.bf16.msra.mxu0 %v5043_v55  ;;  %4773 = vmatprep.mubr.bf16.mxu0 %v4102_v12  ;;  %v4103_v31 = vcombine.low %v1731_v33, %v1741_v29  ;;  %v5050_v55 = vld [vmem:[%s6477_s1 + $0x190] sm:$0xff]   ;;  %v1750_v26 = vrot.slane %v1749_v59, 4  ;;  %v1770_v0 = vshll.u32 %v4073_v23, 16  ;;  %v1776_v54 = vshll.u32 %v5750_v46, 16  ;;  %v4079_v23 = vld [vmem:[%s5173_s16 + $0xa0] sm:$0xf] }
  0x8a   : > { %4827 = vmatprep.subr.bf16.mxu0 %v5045_v27  ;;  %v1760_v43 = vrot.slane %v1759_v22, 4  ;;  %v2161_v39 = vsel %vm5445_vm5, %v4132_v50, %v2160_v1  ;;  %v2162_v3 = vrot.slane %v2160_v1, 4  ;;  %v1769_v4 = vrot.slane %v1767_v62, 4  ;;  %v4080_v34 = vld [vmem:[%s5173_s16 + $0xa4] sm:$0xf] }
  0x8b   : > { %4864 = vmatpush3.bf16.msra.mxu1 %v5048_v2  ;;  %v5053_v2 = vld [vmem:[%s6477_s1 + $0x1c8] sm:$0xff]   ;;  %v1780_v61 = vshrl.u32 %v5750_v46, 16  ;;  %v1755_v7 = vsel %vm5217_vm2, %v1750_v26, %v1754_v44  ;;  %v1772_v51 = vrot.slane %v1770_v0, 5  ;;  %v1778_v14 = vrot.slane %v1776_v54, 5  ;;  %v4125_v0 = vld [vmem:[%s5173_s16 + $0xa0] sm:$0xe] }
  0x8c   : > { %4865 = vmatprep.subr.bf16.mxu1 %v5049_v21  ;;  %v1765_v9 = vsel %vm5217_vm2, %v1760_v43, %v1764_v53  ;;  %v2164_v18 = vsel %vm5445_vm5, %v2162_v3, %v2163_v49  ;;  %v1786_v11 = vshll.u32 %v4075_v13, 16  ;;  %v4133_v63 = vrot.slane %v4123_v6, 9  ;;  %v4081_v22 = vld [vmem:[%s5173_s16 + $0xa8] sm:$0x1] }
  0x8d   : > { %4828 = vmatpush3.bf16.msra.mxu0 %v5045_v27  ;;  %v4104_v27 = vcombine.low %v1755_v7, %v1765_v9  ;;  %v1782_v10 = vrot.slane %v1780_v61, 4  ;;  %v4158_v12 = vcombine.low %v2161_v39, %v2164_v18  ;;  %v1773_v15 = vor.u32 %v1772_v51, %v1769_v4  ;;  %v4224_v4 = vld [vmem:[%s5173_s16 + $0x20] sm:$0xf]  ;;  %v5823_v61 = vld [vmem:[%s6477_s1 + $0x238] sm:$0xff]   ;;  %v5828_v51 = vld [vmem:[%s5173_s16 + $0x24] sm:$0xf] }
  0x8e   : > { %4829 = vmatprep.subr.bf16.mxu0 %v5047_v57  ;;  %4810 = vmatmul.mubr.bf16.gmra.mxu1 %v4157_v52  ;;  %v2167_v16 = vrot.slane %v5750_v46, 5  ;;  %v1788_v40 = vrot.slane %v1786_v11, 5  ;;  %v2170_v20 = vrot.slane %v4075_v13, 5  ;;  %v1791_v25 = vshrl.u32 %v4076_v37, 16 }
  0x8f   : > { %4866 = vmatpush3.bf16.msra.mxu1 %v5049_v21  ;;  %v5790_v21 = vld [vmem:[%s5173_s16 + $0x98] sm:$0x1]  ;;  %v1783_v17 = vor.u32 %v1782_v10, %v1778_v14  ;;  %4813 = vmatprep.mubr.bf16.mxu1 %v4158_v12  ;;  %v1774_v28 = vrot.slane %v1773_v15, 4  ;;  %v1794_v56 = vshll.u32 %v4076_v37, 16  ;;  %v1804_v42 = vshrl.u32 %v5785_v19, 16 }
  0x90   : > { %4867 = vmatprep.subr.bf16.mxu1 %v5051_v45  ;;  %4774 = vmatmul.mubr.bf16.gmra.mxu0 %v4103_v31  ;;  %v2168_v32 = vsel %vm5445_vm5, %v4133_v63, %v2167_v16  ;;  %v2169_v8 = vrot.slane %v2167_v16, 4  ;;  %v1793_v47 = vrot.slane %v1791_v25, 4  ;;  %v1810_v44 = vshll.u32 %v5790_v21, 16 }
  0x91   : > { %4830 = vmatpush3.bf16.msra.mxu0 %v5047_v57  ;;  %4777 = vmatprep.mubr.bf16.mxu0 %v4104_v27  ;;  %v1784_v5 = vrot.slane %v1783_v17, 4  ;;  %v1800_v57 = vshll.u32 %v5785_v19, 16  ;;  %v1779_v46 = vsel %vm5217_vm2, %v1774_v28, %v1778_v14  ;;  %v1796_v60 = vrot.slane %v1794_v56, 5 }
  0x92   : > { %4831 = vmatprep.subr.bf16.mxu0 %v5050_v55  ;;  %v2171_v33 = vsel %vm5445_vm5, %v2169_v8, %v2170_v20  ;;  %v1806_v48 = vrot.slane %v1804_v42, 4  ;;  %v1812_v52 = vrot.slane %v1810_v44, 5  ;;  %v4134_v59 = vrot.slane %v4124_v30, 9  ;;  %v5837_v20 = vld [vmem:[%s5173_s16 + $0x28] sm:$0x1] }
  0x93   : > { %4868 = vmatpush3.bf16.msra.mxu1 %v5051_v45  ;;  %v1789_v41 = vsel %vm5217_vm2, %v1784_v5, %v1788_v40  ;;  %v4159_v45 = vcombine.low %v2168_v32, %v2171_v33  ;;  %v1802_v29 = vrot.slane %v1800_v57, 5  ;;  %v1797_v31 = vor.u32 %v1796_v60, %v1793_v47  ;;  %v5056_v32 = vld [vmem:[%s5173_s16 + $0x20] sm:$0xff]   ;;  %v5850_v42 = vld [vmem:[%s5173_s16 + $0x34] sm:$0xf] }
  0x94   : > { %4869 = vmatprep.subr.bf16.mxu1 %v5053_v2  ;;  %v4105_v50 = vcombine.low %v1779_v46, %v1789_v41  ;;  %v2174_v53 = vrot.slane %v5785_v19, 5  ;;  %v2177_v1 = vrot.slane %v5790_v21, 5  ;;  %v1815_v49 = vshrl.u32 %v4079_v23, 16  ;;  %v5853_v46 = vld [vmem:[%s5173_s16 + $0x38] sm:$0x1] }
  0x95   : > { %4832 = vmatpush3.bf16.msra.mxu0 %v5050_v55  ;;  %v1807_v55 = vor.u32 %v1806_v48, %v1802_v29  ;;  %v1798_v13 = vrot.slane %v1797_v31, 4  ;;  %v1818_v62 = vshll.u32 %v4079_v23, 16  ;;  %v1824_v26 = vshll.u32 %v4080_v34, 16  ;;  %v4227_v23 = vld [vmem:[%s5173_s16 + $0x30] sm:$0xf] }
  0x96   : > { %4833 = vmatprep.subr.bf16.mxu0 %v5052_v36  ;;  %4814 = vmatmul.mubr.bf16.gmra.mxu1 %v4159_v45  ;;  %v1828_v43 = vshrl.u32 %v4080_v34, 16  ;;  %v2176_v39 = vrot.slane %v2174_v53, 4  ;;  %v1817_v3 = vrot.slane %v1815_v49, 4  ;;  %v1834_v19 = vshll.u32 %v4081_v22, 16 }
  0x97   : > { %4870 = vmatpush3.bf16.msra.mxu1 %v5053_v2  ;;  %v1808_v54 = vrot.slane %v1807_v55, 4  ;;  %v2175_v2 = vsel %vm5445_vm5, %v4134_v59, %v2174_v53  ;;  %v1803_v6 = vsel %vm5217_vm2, %v1798_v13, %v1802_v29  ;;  %v1826_v7 = vrot.slane %v1824_v26, 5  ;;  %v5862_v55 = vld [vmem:[%s5173_s16 + $0x44] sm:$0xf]  ;;  %v4233_v26 = vld [vmem:[%s5173_s16 + $0x50] sm:$0xf] }
  0x98   : > { %4871 = vmatprep.subr.bf16.mxu1 %v5055_v24  ;;  %4778 = vmatmul.mubr.bf16.gmra.mxu0 %v4105_v50  ;;  %v1830_v9 = vrot.slane %v1828_v43, 4  ;;  %v2178_v37 = vsel %vm5445_vm5, %v2176_v39, %v2177_v1  ;;  %v4135_v27 = vrot.slane %v4125_v0, 9  ;;  %v1836_v12 = vrot.slane %v1834_v19, 5  ;;  %v4230_v50 = vld [vmem:[%s5173_s16 + $0x40] sm:$0xf] }
  0x99   : > { %4834 = vmatpush3.bf16.msra.mxu0 %v5052_v36  ;;  %v1820_v36 = vrot.slane %v1818_v62, 5  ;;  %v1813_v14 = vsel %vm5217_vm2, %v1808_v54, %v1812_v52  ;;  %v4160_v10 = vcombine.low %v2175_v2, %v2178_v37  ;;  %v2181_v15 = vrot.slane %v4080_v34, 5  ;;  %v5866_v62 = vld [vmem:[%s5173_s16 + $0x48] sm:$0x1] }
  0x9a   : > { %4835 = vmatprep.subr.bf16.mxu0 %v5054_v58  ;;  %v4106_v18 = vcombine.low %v1803_v6, %v1813_v14  ;;  %v1831_v21 = vor.u32 %v1830_v9, %v1826_v7  ;;  %v2184_v63 = vrot.slane %v4081_v22, 5  ;;  %v2737_v16 = vshrl.u32 %v4224_v4, 16  ;;  %v5877_v14 = vld [vmem:[%s6477_s1 + $0x230] sm:$0xff]  }
  0x9b   : > { %4872 = vmatpush3.bf16.msra.mxu1 %v5055_v24  ;;  %v1821_v11 = vor.u32 %v1820_v36, %v1817_v3  ;;  %4817 = vmatprep.mubr.bf16.mxu1 %v4160_v10  ;;  %v2740_v25 = vshll.u32 %v4224_v4, 16  ;;  %v2746_v30 = vshll.u32 %v5828_v51, 16  ;;  %v2182_v24 = vsel %vm5445_vm5, %v4135_v27, %v2181_v15  ;;  %v5881_v27 = vld [vmem:[%s5173_s16 + $0x54] sm:$0xf] }
  0x9c   : > { %4929 = vmatprep.subr.bf16.mxu1 %v5823_v61  ;;  %4781 = vmatprep.mubr.bf16.mxu0 %v4106_v18  ;;  %v1832_v40 = vrot.slane %v1831_v21, 4  ;;  %v2183_v28 = vrot.slane %v2181_v15, 4  ;;  %v2739_v8 = vrot.slane %v2737_v16, 4  ;;  %v2750_v56 = vshrl.u32 %v5828_v51, 16  ;;  %v5886_v15 = vld [vmem:[%s5173_s16 + $0x58] sm:$0x1] }
  0x9d   : > { %4836 = vmatpush3.bf16.msra.mxu0 %v5054_v58  ;;  %v1822_v17 = vrot.slane %v1821_v11, 4  ;;  %v2742_v47 = vrot.slane %v2740_v25, 5  ;;  %v2748_v57 = vrot.slane %v2746_v30, 5  ;;  %v2756_v41 = vshll.u32 %v5837_v20, 16  ;;  %v5060_v11 = vld [vmem:[%s5173_s16 + $0x40] sm:$0xff]  }
  0x9e   : > { %4893 = vmatprep.subr.bf16.mxu0 %v5823_v61  ;;  %v1837_v5 = vsel %vm5217_vm2, %v1832_v40, %v1836_v12  ;;  %v2185_v60 = vsel %vm5445_vm5, %v2183_v28, %v2184_v63  ;;  %v2752_v44 = vrot.slane %v2750_v56, 4  ;;  %v2761_v48 = vshrl.u32 %v4227_v23, 16  ;;  %v4236_v63 = vld [vmem:[%s5173_s16 + $0x60] sm:$0xf] }
  0x9f   : > { %v1827_v58 = vsel %vm5217_vm2, %v1822_v17, %v1826_v7  ;;  %v4161_v45 = vcombine.low %v2182_v24, %v2185_v60  ;;  %v2743_v29 = vor.u32 %v2742_v47, %v2739_v8  ;;  %v2764_v34 = vshll.u32 %v4227_v23, 16  ;;  %v5057_v7 = vld [vmem:[%s5173_s16 + $0x30] sm:$0xff]  }
  0xa0   : > { %v4107_v33 = vcombine.low %v1827_v58, %v1837_v5  ;;  %v2753_v31 = vor.u32 %v2752_v44, %v2748_v57  ;;  %v2758_v52 = vrot.slane %v2756_v41, 5  ;;  %v2770_v59 = vshll.u32 %v5850_v42, 16  ;;  %v5898_v5 = vld [vmem:[%s6477_s1 + $0x228] sm:$0xff]   ;;  %v5902_v44 = vld [vmem:[%s5173_s16 + $0x64] sm:$0xf] }
  0xa1   : > { %v2774_v22 = vshrl.u32 %v5850_v42, 16  ;;  %4818 = vmatmul.mubr.bf16.gmra.mxu1 %v4161_v45  ;;  %v2744_v53 = vrot.slane %v2743_v29, 4  ;;  %v2763_v1 = vrot.slane %v2761_v48, 4  ;;  %v2766_v49 = vrot.slane %v2764_v34, 5  ;;  %v5905_v41 = vld [vmem:[%s5173_s16 + $0x68] sm:$0x1] }
  0xa2   : > { %4782 = vmatmul.mubr.bf16.gmra.mxu0 %v4107_v33  ;;  %v2780_v13 = vshll.u32 %v5853_v46, 16  ;;  %v2754_v43 = vrot.slane %v2753_v31, 4  ;;  %v2772_v0 = vrot.slane %v2770_v59, 5  ;;  %v2785_v2 = vshrl.u32 %v4230_v50, 16  ;;  %v5061_v45 = vld [vmem:[%s5173_s16 + $0x50] sm:$0xff]  }
  0xa3   : > { %4837 = vmatprep.mubr.bf16.mxu0 %v5056_v32  ;;  %v2776_v54 = vrot.slane %v2774_v22, 4  ;;  %v2749_v39 = vsel %vm5217_vm2, %v2744_v53, %v2748_v57  ;;  %v2767_v3 = vor.u32 %v2766_v49, %v2763_v1  ;;  %v2788_v6 = vshll.u32 %v4230_v50, 16  ;;  %v4239_v31 = vld [vmem:[%s5173_s16 + $0x70] sm:$0xf] }
  0xa4   : > { %v2782_v4 = vrot.slane %v2780_v13, 5  ;;  %v2759_v36 = vsel %vm5217_vm2, %v2754_v43, %v2758_v52  ;;  %v2787_v37 = vrot.slane %v2785_v2, 4  ;;  %v2794_v19 = vshll.u32 %v5862_v55, 16  ;;  %v5917_v43 = vld [vmem:[%s5173_s16 + $0x74] sm:$0xf] }
  0xa5   : > { %v2777_v9 = vor.u32 %v2776_v54, %v2772_v0  ;;  %v4270_v18 = vcombine.low %v2749_v39, %v2759_v36  ;;  %v2768_v10 = vrot.slane %v2767_v3, 4  ;;  %v2790_v21 = vrot.slane %v2788_v6, 5 }
  0xa6   : > { %v2798_v12 = vshrl.u32 %v5862_v55, 16  ;;  %v2796_v17 = vrot.slane %v2794_v19, 5  ;;  %v2804_v40 = vshll.u32 %v5866_v62, 16  ;;  %v2809_v25 = vshrl.u32 %v4233_v26, 16 }
  0xa7   : > { %v2778_v16 = vrot.slane %v2777_v9, 4  ;;  %4873 = vmatprep.mubr.bf16.mxu1 %v4270_v18  ;;  %v2773_v30 = vsel %vm5217_vm2, %v2768_v10, %v2772_v0  ;;  %v2791_v24 = vor.u32 %v2790_v21, %v2787_v37  ;;  %v2812_v32 = vshll.u32 %v4233_v26, 16  ;;  %v5935_v18 = vld [vmem:[%s5173_s16 + $0x78] sm:$0x1] }
  0xa8   : > { %v2800_v28 = vrot.slane %v2798_v12, 4  ;;  %v2806_v56 = vrot.slane %v2804_v40, 5  ;;  %v2811_v23 = vrot.slane %v2809_v25, 4  ;;  %v2818_v58 = vshll.u32 %v5881_v27, 16 }
  0xa9   : > { %v2783_v8 = vsel %vm5217_vm2, %v2778_v16, %v2782_v4  ;;  %v2792_v57 = vrot.slane %v2791_v24, 4  ;;  %v2814_v60 = vrot.slane %v2812_v32, 5  ;;  %v2822_v48 = vshrl.u32 %v5881_v27, 16  ;;  %v5063_v4 = vld [vmem:[%s5173_s16 + $0x60] sm:$0xff]  }
  0xaa   : > { %4838 = vmatmul.mubr.bf16.vlgmr.msra.gmra.mxu0 %v5057_v7  ;;  %v4271_v47 = vcombine.low %v2773_v30, %v2783_v8  ;;  %v2801_v33 = vor.u32 %v2800_v28, %v2796_v17  ;;  %v2820_v29 = vrot.slane %v2818_v58, 5  ;;  %v2828_v34 = vshll.u32 %v5886_v15, 16  ;;  %v5930_v7 = vld [vmem:[%s6477_s1 + $0x220] sm:$0xff]   ;;  %v5065_v28 = vld [vmem:[%s5173_s16 + $0x70] sm:$0xff]  }
  0xab   : > { %4894 = vmatpush3.bf16.msra.mxu0 %v5823_v61  ;;  %4841 = vmatprep.mubr.bf16.mxu0 %v5060_v11  ;;  %v2833_v50 = vshrl.u32 %v4236_v63, 16  ;;  %v2797_v52 = vsel %vm5217_vm2, %v2792_v57, %v2796_v17  ;;  %v2815_v22 = vor.u32 %v2814_v60, %v2811_v23  ;;  %v2836_v53 = vshll.u32 %v4236_v63, 16  ;;  %v4242_v11 = vld [vmem:[%s5173_s16 + $0x80] sm:$0xf]  ;;  %v5953_v23 = vld [vmem:[%s5173_s16 + $0x84] sm:$0xf] }
  0xac   : > { %4895 = vmatprep.subr.bf16.mxu0 %v5877_v14  ;;  %4874 = vmatmul.mubr.bf16.vlgmr.msra.gmra.mxu1 %v4271_v47  ;;  %v2802_v59 = vrot.slane %v2801_v33, 4  ;;  %v2824_v1 = vrot.slane %v2822_v48, 4  ;;  %v2830_v49 = vrot.slane %v2828_v34, 5  ;;  %v2842_v26 = vshll.u32 %v5902_v44, 16  ;;  %v5959_v60 = vld [vmem:[%s5173_s16 + $0x88] sm:$0x1] }
  0xad   : > { %4937 = vmatpush3.bf16.msra.mxu1 %v5823_v61  ;;  %v2835_v13 = vrot.slane %v2833_v50, 4  ;;  %v2816_v54 = vrot.slane %v2815_v22, 4  ;;  %v2838_v2 = vrot.slane %v2836_v53, 5  ;;  %v2846_v39 = vshrl.u32 %v5902_v44, 16  ;;  %v5067_v34 = vld [vmem:[%s5173_s16 + $0x80] sm:$0xff]  }
  0xae   : > { %v2807_v0 = vsel %vm5217_vm2, %v2802_v59, %v2806_v56  ;;  %4930 = vmatprep.subr.bf16.mxu1 %v5877_v14  ;;  %v2825_v61 = vor.u32 %v2824_v1, %v2820_v29  ;;  %v2844_v6 = vrot.slane %v2842_v26, 5  ;;  %v2852_v36 = vshll.u32 %v5905_v41, 16  ;;  %v5950_v56 = vld [vmem:[%s6477_s1 + $0x218] sm:$0xff]  }
  0xaf   : > { %4896 = vmatpush3.bf16.msra.mxu0 %v5877_v14  ;;  %v4272_v3 = vcombine.low %v2797_v52, %v2807_v0  ;;  %v2821_v9 = vsel %vm5217_vm2, %v2816_v54, %v2820_v29  ;;  %v2839_v37 = vor.u32 %v2838_v2, %v2835_v13  ;;  %v2848_v19 = vrot.slane %v2846_v39, 4  ;;  %v5964_v52 = vld [vmem:[%s5173_s16 + $0x94] sm:$0xf] }
  0xb0   : > { %4897 = vmatprep.subr.bf16.mxu0 %v5898_v5  ;;  %v2857_v10 = vshrl.u32 %v4239_v31, 16  ;;  %v2826_v21 = vrot.slane %v2825_v61, 4  ;;  %v2854_v12 = vrot.slane %v2852_v36, 5  ;;  %v2860_v63 = vshll.u32 %v4239_v31, 16  ;;  %v5976_v54 = vld [vmem:[%s6477_s1 + $0x210] sm:$0xff]  }
  0xb1   : > { %4877 = vmatprep.mubr.bf16.mxu1 %v4272_v3  ;;  %v2866_v16 = vshll.u32 %v5917_v43, 16  ;;  %4938 = vmatpush3.bf16.msra.mxu1 %v5877_v14  ;;  %v2840_v17 = vrot.slane %v2839_v37, 4  ;;  %v2849_v40 = vor.u32 %v2848_v19, %v2844_v6  ;;  %v2870_v30 = vshrl.u32 %v5917_v43, 16 }
  0xb2   : > { %4842 = vmatmul.mubr.bf16.gmra.mxu0 %v5061_v45  ;;  %v2859_v25 = vrot.slane %v2857_v10, 4  ;;  %v2831_v24 = vsel %vm5217_vm2, %v2826_v21, %v2830_v49  ;;  %v2862_v32 = vrot.slane %v2860_v63, 5  ;;  %v2876_v14 = vshll.u32 %v5935_v18, 16  ;;  %4931 = vmatprep.subr.bf16.mxu1 %v5898_v5  ;;  %v4245_v45 = vld [vmem:[%s5173_s16 + $0x90] sm:$0xf] }
  0xb3   : > { %4898 = vmatpush3.bf16.msra.mxu0 %v5898_v5  ;;  %4845 = vmatprep.mubr.bf16.mxu0 %v5063_v4  ;;  %v2868_v8 = vrot.slane %v2866_v16, 5  ;;  %v4273_v58 = vcombine.low %v2821_v9, %v2831_v24  ;;  %v2845_v47 = vsel %vm5217_vm2, %v2840_v17, %v2844_v6  ;;  %v2850_v57 = vrot.slane %v2849_v40, 4  ;;  %v5983_v6 = vld [vmem:[%s5173_s16 + $0x98] sm:$0x1]  ;;  %v4248_v21 = vld [vmem:[%s5173_s16 + $0xa0] sm:$0xf] }
  0xb4   : > { %4899 = vmatprep.subr.bf16.mxu0 %v5930_v7  ;;  %v2872_v33 = vrot.slane %v2870_v30, 4  ;;  %v2863_v29 = vor.u32 %v2862_v32, %v2859_v25  ;;  %v2878_v48 = vrot.slane %v2876_v14, 5  ;;  %v2881_v50 = vshrl.u32 %v4242_v11, 16  ;;  %v5068_v16 = vld [vmem:[%s5173_s16 + $0x90] sm:$0xff]   ;;  %v5996_v25 = vld [vmem:[%s6477_s1 + $0x208] sm:$0xff]  }
  0xb5   : > { %v2884_v31 = vshll.u32 %v4242_v11, 16  ;;  %4878 = vmatmul.mubr.bf16.gmra.mxu1 %v4273_v58  ;;  %v2855_v59 = vsel %vm5217_vm2, %v2850_v57, %v2854_v12  ;;  %v2890_v53 = vshll.u32 %v5953_v23, 16  ;;  %v2894_v1 = vshrl.u32 %v5953_v23, 16  ;;  %v5999_v30 = vld [vmem:[%s5173_s16 + $0xa4] sm:$0xf] }
  0xb6   : > { %v2873_v22 = vor.u32 %v2872_v33, %v2868_v8  ;;  %v4274_v49 = vcombine.low %v2845_v47, %v2855_v59  ;;  %v2864_v13 = vrot.slane %v2863_v29, 4  ;;  %4939 = vmatpush3.bf16.msra.mxu1 %v5898_v5  ;;  %v2883_v26 = vrot.slane %v2881_v50, 4  ;;  %v6009_v57 = vld [vmem:[%s5173_s16 + $0xa8] sm:$0x1]  ;;  %v4251_v33 = vld [vmem:[%s5173_s16 + $0xb0] sm:$0xf] }
  0xb7   : > { %4900 = vmatpush3.bf16.msra.mxu0 %v5930_v7  ;;  %v2886_v0 = vrot.slane %v2884_v31, 5  ;;  %4932 = vmatprep.subr.bf16.mxu1 %v5930_v7  ;;  %v2892_v39 = vrot.slane %v2890_v53, 5  ;;  %v2896_v3 = vrot.slane %v2894_v1, 4  ;;  %v2900_v61 = vshll.u32 %v5959_v60, 16  ;;  %v6017_v31 = vld [vmem:[%s5173_s16 + $0xb4] sm:$0xf] }
  0xb8   : > { %4901 = vmatprep.subr.bf16.mxu0 %v5950_v56  ;;  %v2874_v2 = vrot.slane %v2873_v22, 4  ;;  %4881 = vmatprep.mubr.bf16.mxu1 %v4274_v49  ;;  %v2869_v5 = vsel %vm5217_vm2, %v2864_v13, %v2868_v8  ;;  %v2905_v36 = vshrl.u32 %v4245_v45, 16  ;;  %v2908_v9 = vshll.u32 %v4245_v45, 16  ;;  %v6028_v49 = vld [vmem:[%s6477_s1 + $0x200] sm:$0xff]  }
  0xb9   : > { %v2887_v4 = vor.u32 %v2886_v0, %v2883_v26  ;;  %v2897_v19 = vor.u32 %v2896_v3, %v2892_v39  ;;  %v2902_v10 = vrot.slane %v2900_v61, 5  ;;  %v2914_v11 = vshll.u32 %v5964_v52, 16 }
  0xba   : > { %4846 = vmatmul.mubr.bf16.gmra.mxu0 %v5065_v28  ;;  %v2879_v37 = vsel %vm5217_vm2, %v2874_v2, %v2878_v48  ;;  %4940 = vmatpush3.bf16.msra.mxu1 %v5930_v7  ;;  %v2907_v17 = vrot.slane %v2905_v36, 4  ;;  %v2910_v40 = vrot.slane %v2908_v9, 5  ;;  %v2918_v7 = vshrl.u32 %v5964_v52, 16  ;;  %v6038_v9 = vld [vmem:[%s5173_s16 + $0xb8] sm:$0x1] }
  0xbb   : > { %4902 = vmatpush3.bf16.msra.mxu0 %v5950_v56  ;;  %4849 = vmatprep.mubr.bf16.mxu0 %v5067_v34  ;;  %v4275_v12 = vcombine.low %v2869_v5, %v2879_v37  ;;  %v2888_v63 = vrot.slane %v2887_v4, 4  ;;  %v2898_v24 = vrot.slane %v2897_v19, 4  ;;  %v2916_v28 = vrot.slane %v2914_v11, 5  ;;  %v5071_v34 = vld [vmem:[%s5173_s16 + $0xa0] sm:$0xff]  }
  0xbc   : > { %4903 = vmatprep.subr.bf16.mxu0 %v5976_v54  ;;  %v2924_v32 = vshll.u32 %v5983_v6, 16  ;;  %4933 = vmatprep.subr.bf16.mxu1 %v5950_v56  ;;  %v2911_v14 = vor.u32 %v2910_v40, %v2907_v17  ;;  %v3305_v58 = vrot.slane %v5964_v52, 5  ;;  %v3308_v47 = vrot.slane %v5983_v6, 5 }
  0xbd   : > { %v2893_v8 = vsel %vm5217_vm2, %v2888_v63, %v2892_v39  ;;  %4882 = vmatmul.mubr.bf16.gmra.mxu1 %v4275_v12  ;;  %v2903_v45 = vsel %vm5217_vm2, %v2898_v24, %v2902_v10  ;;  %v2920_v29 = vrot.slane %v2918_v7, 4  ;;  %v2929_v50 = vshrl.u32 %v4248_v21, 16  ;;  %v4288_v12 = vld [vmem:[%s5173_s16 + $0x20] sm:$0xe] }
  0xbe   : > { %v2926_v48 = vrot.slane %v2924_v32, 5  ;;  %v4276_v59 = vcombine.low %v2893_v8, %v2903_v45  ;;  %v2912_v22 = vrot.slane %v2911_v14, 4  ;;  %v6021_v53 = vrot.slane %v3305_v58, 4  ;;  %4941 = vmatpush3.bf16.msra.mxu1 %v5950_v56  ;;  %v4294_v8 = vld [vmem:[%s5173_s16 + $0x80] sm:$0xe] }
  0xbf   : > { %4904 = vmatpush3.bf16.msra.mxu0 %v5976_v54  ;;  %v2932_v1 = vshll.u32 %v4248_v21, 16  ;;  %v2921_v13 = vor.u32 %v2920_v29, %v2916_v28  ;;  %4934 = vmatprep.subr.bf16.mxu1 %v5976_v54  ;;  %v2931_v26 = vrot.slane %v2929_v50, 4  ;;  %v2938_v0 = vshll.u32 %v5999_v30, 16 }
  0xc0   : > { %4905 = vmatprep.subr.bf16.mxu0 %v5996_v25  ;;  %v2942_v2 = vshrl.u32 %v5999_v30, 16  ;;  %4885 = vmatprep.mubr.bf16.mxu1 %v4276_v59  ;;  %v2917_v56 = vsel %vm5217_vm2, %v2912_v22, %v2916_v28  ;;  %v2948_v3 = vshll.u32 %v6009_v57, 16  ;;  %v2953_v61 = vshrl.u32 %v4251_v33, 16  ;;  %v5072_v28 = vld [vmem:[%s5173_s16 + $0xb0] sm:$0xff]  }
  0xc1   : > { %v2934_v39 = vrot.slane %v2932_v1, 5  ;;  %v2922_v5 = vrot.slane %v2921_v13, 4  ;;  %v2940_v4 = vrot.slane %v2938_v0, 5  ;;  %v2956_v37 = vshll.u32 %v4251_v33, 16  ;;  %v4289_v22 = vld [vmem:[%s5173_s16 + $0x30] sm:$0xe] }
  0xc2   : > { %4850 = vmatmul.mubr.bf16.gmra.mxu0 %v5068_v16  ;;  %v2944_v36 = vrot.slane %v2942_v2, 4  ;;  %4942 = vmatpush3.bf16.msra.mxu1 %v5976_v54  ;;  %v2950_v10 = vrot.slane %v2948_v3, 5  ;;  %v2955_v11 = vrot.slane %v2953_v61, 4  ;;  %v2962_v21 = vshll.u32 %v6017_v31, 16 }
  0xc3   : > { %4853 = vmatprep.mubr.bf16.mxu0 %v5071_v34  ;;  %4906 = vmatpush3.bf16.msra.mxu0 %v5996_v25  ;;  %v2935_v19 = vor.u32 %v2934_v39, %v2931_v26  ;;  %v2927_v63 = vsel %vm5217_vm2, %v2922_v5, %v2926_v48  ;;  %v2958_v17 = vrot.slane %v2956_v37, 5  ;;  %v2966_v40 = vshrl.u32 %v6017_v31, 16  ;;  %v4295_v39 = vld [vmem:[%s5173_s16 + $0x90] sm:$0xe] }
  0xc4   : > { %4907 = vmatprep.subr.bf16.mxu0 %v6028_v49  ;;  %v2945_v16 = vor.u32 %v2944_v36, %v2940_v4  ;;  %4935 = vmatprep.subr.bf16.mxu1 %v5996_v25  ;;  %v4277_v24 = vcombine.low %v2917_v56, %v2927_v63  ;;  %v2964_v7 = vrot.slane %v2962_v21, 5  ;;  %v2972_v32 = vshll.u32 %v6038_v9, 16 }
  0xc5   : > { %v2936_v54 = vrot.slane %v2935_v19, 4  ;;  %v2959_v33 = vor.u32 %v2958_v17, %v2955_v11  ;;  %v2968_v45 = vrot.slane %v2966_v40, 4  ;;  %v4298_v29 = vrot.slane %v4288_v12, 9  ;;  %v4296_v17 = vld [vmem:[%s5173_s16 + $0xa0] sm:$0xe] }
  0xc6   : > { %v2946_v14 = vrot.slane %v2945_v16, 4  ;;  %4886 = vmatmul.mubr.bf16.gmra.mxu1 %v4277_v24  ;;  %v2974_v34 = vrot.slane %v2972_v32, 5  ;;  %v3256_v50 = vrot.slane %v5828_v51, 5  ;;  %v3259_v59 = vrot.slane %v5837_v20, 5  ;;  %v4291_v24 = vld [vmem:[%s5173_s16 + $0x50] sm:$0xe] }
  0xc7   : > { %4908 = vmatpush3.bf16.msra.mxu0 %v6028_v49  ;;  %v2941_v48 = vsel %vm5217_vm2, %v2936_v54, %v2940_v4  ;;  %v2960_v13 = vrot.slane %v2959_v33, 4  ;;  %v2969_v26 = vor.u32 %v2968_v45, %v2964_v7  ;;  %4943 = vmatpush3.bf16.msra.mxu1 %v5996_v25  ;;  %v4304_v0 = vrot.slane %v4294_v8, 9  ;;  %v4297_v32 = vld [vmem:[%s5173_s16 + $0xb0] sm:$0xe] }
  0xc8   : > { %v2951_v1 = vsel %vm5217_vm2, %v2946_v14, %v2950_v10  ;;  %4936 = vmatprep.subr.bf16.mxu1 %v6028_v49  ;;  %v3257_v56 = vsel %vm5445_vm5, %v4298_v29, %v3256_v50  ;;  %v3258_v51 = vrot.slane %v3256_v50, 4  ;;  %v3298_v20 = vrot.slane %v5953_v23, 5  ;;  %v4290_v23 = vld [vmem:[%s5173_s16 + $0x40] sm:$0xe] }
  0xc9   : > { %v4278_v2 = vcombine.low %v2941_v48, %v2951_v1  ;;  %v2965_v3 = vsel %vm5217_vm2, %v2960_v13, %v2964_v7  ;;  %v2970_v61 = vrot.slane %v2969_v26, 4  ;;  %v3301_v5 = vrot.slane %v5959_v60, 5  ;;  %v4292_v29 = vld [vmem:[%s5173_s16 + $0x60] sm:$0xe]  ;;  %v4293_v26 = vld [vmem:[%s5173_s16 + $0x70] sm:$0xe] }
  0xca   : > { %4854 = vmatmul.mubr.bf16.gmra.mxu0 %v5072_v28  ;;  %v4299_v25 = vrot.slane %v4289_v22, 9  ;;  %v3260_v4 = vsel %vm5445_vm5, %v3258_v51, %v3259_v59  ;;  %v3299_v36 = vsel %vm5445_vm5, %v4304_v0, %v3298_v20  ;;  %v3300_v37 = vrot.slane %v3298_v20, 4  ;;  %s3901_s16 = sshll.u32 %s6521_s12, 3 }
  0xcb   : > { %4889 = vmatprep.mubr.bf16.mxu1 %v4278_v2  ;;  %v3263_v19 = vrot.slane %v5850_v42, 5  ;;  %v2975_v10 = vsel %vm5217_vm2, %v2970_v61, %v2974_v34  ;;  %4944 = vmatpush3.bf16.msra.mxu1 %v6028_v49  ;;  %v4324_v60 = vcombine.low %v3257_v56, %v3260_v4  ;;  %v3266_v11 = vrot.slane %v5853_v46, 5  ;;  %s6212_s6 = scalar_lea.vmem %s6479_s3, %s3901_s16 }
  0xcc   : > { %v4305_v21 = vrot.slane %v4295_v39, 9  ;;  %v4279_v12 = vcombine.low %v2965_v3, %v2975_v10  ;;  %v3302_v63 = vsel %vm5445_vm5, %v3300_v37, %v3301_v5  ;;  %v3309_v46 = vsel %vm5445_vm5, %v6021_v53, %v3308_v47 }
  0xcd   : > { %v3264_v16 = vsel %vm5445_vm5, %v4299_v25, %v3263_v19  ;;  %v3265_v42 = vrot.slane %v3263_v19, 4  ;;  %4909 = vmatprep.mubr.bf16.mxu0 %v4324_v60  ;;  %v4330_v38 = vcombine.low %v3299_v36, %v3302_v63  ;;  %v4300_v40 = vrot.slane %v4290_v23, 9 }
  0xce   : > { %v3306_v49 = vsel %vm5445_vm5, %v4305_v21, %v3305_v58  ;;  %4890 = vmatmul.mubr.bf16.gmra.mxu1 %v4279_v12  ;;  %v3270_v7 = vrot.slane %v5862_v55, 5  ;;  %v3273_v52 = vrot.slane %v5866_v62, 5  ;;  %v4306_v6 = vrot.slane %v4296_v17, 9 }
  0xcf   : > { %v3267_v54 = vsel %vm5445_vm5, %v3265_v42, %v3266_v11  ;;  %v4331_v28 = vcombine.low %v3306_v49, %v3309_v46  ;;  %4921 = vmatprep.mubr.bf16.mxu1 %v4330_v38  ;;  %v3312_v8 = vrot.slane %v5999_v30, 5  ;;  %v3315_v47 = vrot.slane %v6009_v57, 5 }
  0xd0   : > { %v4325_v58 = vcombine.low %v3264_v16, %v3267_v54  ;;  %v3271_v53 = vsel %vm5445_vm5, %v4300_v40, %v3270_v7  ;;  %v3272_v14 = vrot.slane %v3270_v7, 4  ;;  %v4301_v33 = vrot.slane %v4291_v24, 9 }
  0xd1   : > { %v3277_v45 = vrot.slane %v5881_v27, 5  ;;  %v3313_v55 = vsel %vm5445_vm5, %v4306_v6, %v3312_v8  ;;  %v3314_v62 = vrot.slane %v3312_v8, 4  ;;  %v3280_v48 = vrot.slane %v5886_v15, 5 }
  0xd2   : > { %4910 = vmatmul.mubr.bf16.vlgmr.msra.gmra.mxu0 %v4325_v58  ;;  %v4307_v34 = vrot.slane %v4297_v32, 9  ;;  %v3274_v30 = vsel %vm5445_vm5, %v3272_v14, %v3273_v52  ;;  %v3319_v59 = vrot.slane %v6017_v31, 5  ;;  %v3322_v1 = vrot.slane %v6038_v9, 5 }
  0xd3   : > { %v3278_v57 = vsel %vm5445_vm5, %v4301_v33, %v3277_v45  ;;  %v3279_v50 = vrot.slane %v3277_v45, 4  ;;  %v4326_v22 = vcombine.low %v3271_v53, %v3274_v30  ;;  %v3316_v27 = vsel %vm5445_vm5, %v3314_v62, %v3315_v47 }
  0xd4   : > { %v4302_v13 = vrot.slane %v4292_v29, 9  ;;  %v4332_v0 = vcombine.low %v3313_v55, %v3316_v27  ;;  %v3321_v2 = vrot.slane %v3319_v59, 4  ;;  %v3284_v51 = vrot.slane %v5902_v44, 5 }
  0xd5   : > { %v3281_v15 = vsel %vm5445_vm5, %v3279_v50, %v3280_v48  ;;  %4913 = vmatprep.mubr.bf16.mxu0 %v4326_v22  ;;  %v3287_v20 = vrot.slane %v5905_v41, 5  ;;  %v4303_v31 = vrot.slane %v4293_v26, 9  ;;  %v3291_v39 = vrot.slane %v5917_v43, 5 }
  0xd6   : > { %v4327_v56 = vcombine.low %v3278_v57, %v3281_v15  ;;  %4922 = vmatmul.mubr.bf16.vlgmr.msra.gmra.mxu1 %v4331_v28  ;;  %v3294_v3 = vrot.slane %v5935_v18, 5  ;;  %v3320_v9 = vsel %vm5445_vm5, %v4307_v34, %v3319_v59  ;;  %v3323_v61 = vsel %vm5445_vm5, %v3321_v2, %v3322_v1 }
  0xd7   : > { %4925 = vmatprep.mubr.bf16.mxu1 %v4332_v0  ;;  %v3285_v5 = vsel %vm5445_vm5, %v4302_v13, %v3284_v51  ;;  %v3286_v25 = vrot.slane %v3284_v51, 4  ;;  %v3293_v44 = vrot.slane %v3291_v39, 4  ;;  %v4333_v4 = vcombine.low %v3320_v9, %v3323_v61 }
  0xd8   : > { %v3292_v18 = vsel %vm5445_vm5, %v4303_v31, %v3291_v39 }
  0xd9   : > { %v3288_v41 = vsel %vm5445_vm5, %v3286_v25, %v3287_v20  ;;  %v3295_v36 = vsel %vm5445_vm5, %v3293_v44, %v3294_v3 }
  0xda   : > { %4914 = vmatmul.mubr.bf16.gmra.mxu0 %v4327_v56  ;;  %v4328_v43 = vcombine.low %v3285_v5, %v3288_v41  ;;  %v4329_v37 = vcombine.low %v3292_v18, %v3295_v36 }
  0xdc   : > { %4917 = vmatprep.mubr.bf16.mxu0 %v4328_v43 }
  0xde   : > { %4926 = vmatmul.mubr.bf16.gmra.mxu1 %v4333_v4 }
  0xe2   : > { %4918 = vmatmul.mubr.bf16.gmra.mxu0 %v4329_v37 }
  0xed   : > { %v4623_v19 = vpop.f32.mrf.mxu0 }
  0xee   : > { %v4659_v23 = vpop.f32.mrf.mxu1 }
  0xef   : > { %v875_v10 = vadd.f32 %v4659_v23, %v4623_v19  ;;  %v645_v60 = vpop.f32.mrf.mxu0 }
  0xf0   : > { %v866_v11 = vpop.f32.mrf.mxu1 }
  0xf1   : > { %v867_v21 = vadd.f32 %v866_v11, %v645_v60  ;;  %v4624_v12 = vpop.f32.mrf.mxu0 }
  0xf2   : > { %v4660_v63 = vpop.f32.mrf.mxu1 }
  0xf3   : > { %v6134_v16 = vadd.f32 %v4660_v63, %v4624_v12  ;;  %v648_v42 = vpop.f32.mrf.mxu0 }
  0xf4   : > { %v869_v17 = vpop.f32.mrf.mxu1 }
  0xf5   : > { %v6136_v38 = vadd.f32 %v869_v17, %v648_v42  ;;  %v4627_v35 = vpop.f32.mrf.mxu0 }
  0xf6   : > { %v4663_v49 = vpop.f32.mrf.mxu1 }
  0xf7   : > { %v6138_v46 = vadd.f32 %v4663_v49, %v4627_v35  ;;  %v661_v40 = vpop.f32.mrf.mxu0 }
  0xf8   : > { %v882_v24 = vpop.f32.mrf.mxu1 }
  0xf9   : > { %v6140_v54 = vadd.f32 %v882_v24, %v661_v40  ;;  %v4628_v28 = vpop.f32.mrf.mxu0 }
  0xfa   : > { %v4664_v7 = vpop.f32.mrf.mxu1 }
  0xfb   : > { %v6142_v52 = vadd.f32 %v4664_v7, %v4628_v28  ;;  %v664_v32 = vpop.f32.mrf.mxu0 }
  0xfc   : > { %v885_v58 = vpop.f32.mrf.mxu1 }
  0xfd   : > { %v6144_v6 = vadd.f32 %v885_v58, %v664_v32  ;;  %v4631_v47 = vpop.f32.mrf.mxu0 }
  0xfe   : > { %v4667_v8 = vpop.f32.mrf.mxu1 }
  0xff   : > { %v6146_v53 = vadd.f32 %v4667_v8, %v4631_v47  ;;  %v677_v33 = vpop.f32.mrf.mxu0 }
 0x100   : > { %v898_v14 = vpop.f32.mrf.mxu1 }
 0x101   : > { %v6148_v45 = vadd.f32 %v898_v14, %v677_v33  ;;  %v4632_v55 = vpop.f32.mrf.mxu0 }
 0x102   : > { %v4668_v29 = vpop.f32.mrf.mxu1 }
 0x103   : > { %v6150_v62 = vadd.f32 %v4668_v29, %v4632_v55  ;;  %v680_v34 = vpop.f32.mrf.mxu0 }
 0x104   : > { %v901_v48 = vpop.f32.mrf.mxu1 }
 0x105   : > { %v6152_v30 = vadd.f32 %v901_v48, %v680_v34  ;;  %v4635_v50 = vpop.f32.mrf.mxu0 }
 0x106   : > { %v4671_v57 = vpop.f32.mrf.mxu1 }
 0x107   : > { %v6154_v59 = vadd.f32 %v4671_v57, %v4635_v50  ;;  %v693_v27 = vpop.f32.mrf.mxu0 }
 0x108   : > { %v914_v22 = vpop.f32.mrf.mxu1 }
 0x109   : > { %v6156_v1 = vadd.f32 %v914_v22, %v693_v27  ;;  %v4636_v26 = vpop.f32.mrf.mxu0 }
 0x10a   : > { %v4672_v13 = vpop.f32.mrf.mxu1 }
 0x10b   : > { %v6158_v0 = vadd.f32 %v4672_v13, %v4636_v26  ;;  %v696_v2 = vpop.f32.mrf.mxu0 }
 0x10c   : > { %v917_v15 = vpop.f32.mrf.mxu1 }
 0x10d   : > { %v6160_v56 = vadd.f32 %v917_v15, %v696_v2 }
 0x10e   : > { %v4675_v51 = vpop.f32.mrf.mxu1 }
 0x10f   : > { %v4639_v31 = vpop.f32.mrf.mxu0 }
 0x110   : > { %v930_v20 = vpop.f32.mrf.mxu1  ;;  %v6162_v39 = vadd.f32 %v4675_v51, %v4639_v31 }
 0x111   : > { %v709_v9 = vpop.f32.mrf.mxu0 }
 0x112   : > { %v4676_v3 = vpop.f32.mrf.mxu1  ;;  %v6164_v61 = vadd.f32 %v930_v20, %v709_v9 }
 0x113   : > { %v4640_v25 = vpop.f32.mrf.mxu0 }
 0x114   : > { %v933_v5 = vpop.f32.mrf.mxu1  ;;  %v6166_v44 = vadd.f32 %v4676_v3, %v4640_v25 }
 0x115   : > { %v712_v4 = vpop.f32.mrf.mxu0 }
 0x116   : > { %v4731_v41 = vpop.f32.mrf.mxu1  ;;  %v6168_v43 = vadd.f32 %v933_v5, %v712_v4 }
 0x118   : > { %v1469_v18 = vpop.f32.mrf.mxu1  ;;  %v4695_v36 = vpop.f32.mrf.mxu0 }
 0x119   : > { %v1268_v37 = vadd.f32 %v4695_v36, %v875_v10  ;;  %v5098_v36 = vmov 0.0  }
 0x11a   : > { %v4732_v19 = vpop.f32.mrf.mxu1  ;;  %v1187_v23 = vpop.f32.mrf.mxu0  ;;  %212 = vst [vmem:[%s6212_s6] sm:$0xff] %v5098_v36 }
 0x11b   : > { %v6170_v60 = vadd.f32 %v4731_v41, %v1268_v37  ;;  %v1266_v11 = vadd.f32 %v1187_v23, %v867_v21 }
 0x11c   : > { %v1472_v12 = vpop.f32.mrf.mxu1  ;;  %v4696_v63 = vpop.f32.mrf.mxu0 }
 0x11d   : > { %v6172_v42 = vadd.f32 %v1469_v18, %v1266_v11  ;;  %v1269_v17 = vadd.f32 %v4696_v63, %v6134_v16 }
 0x11e   : > { %v4735_v35 = vpop.f32.mrf.mxu1  ;;  %v1190_v49 = vpop.f32.mrf.mxu0 }
 0x11f   : > { %v6175_v40 = vadd.f32 %v4732_v19, %v1269_v17  ;;  %v1267_v24 = vadd.f32 %v1190_v49, %v6136_v38 }
 0x120   : > { %v1485_v28 = vpop.f32.mrf.mxu1  ;;  %v4699_v7 = vpop.f32.mrf.mxu0 }
 0x121   : > { %v6178_v10 = vadd.f32 %v1472_v12, %v1267_v24  ;;  %v1272_v32 = vadd.f32 %v4699_v7, %v6138_v46 }
 0x122   : > { %v4736_v58 = vpop.f32.mrf.mxu1  ;;  %v1203_v21 = vpop.f32.mrf.mxu0 }
 0x123   : > { %v6181_v8 = vadd.f32 %v4735_v35, %v1272_v32  ;;  %v1270_v47 = vadd.f32 %v1203_v21, %v6140_v54 }
 0x124   : > { %v1488_v14 = vpop.f32.mrf.mxu1  ;;  %v4700_v16 = vpop.f32.mrf.mxu0 }
 0x125   : > { %v6184_v33 = vadd.f32 %v1485_v28, %v1270_v47  ;;  %v1273_v29 = vadd.f32 %v4700_v16, %v6142_v52 }
 0x126   : > { %v4739_v55 = vpop.f32.mrf.mxu1  ;;  %v1206_v38 = vpop.f32.mrf.mxu0 }
 0x127   : > { %v6187_v48 = vadd.f32 %v4736_v58, %v1273_v29  ;;  %v1271_v34 = vadd.f32 %v1206_v38, %v6144_v6 }
 0x128   : > { %v1501_v57 = vpop.f32.mrf.mxu1  ;;  %v4703_v46 = vpop.f32.mrf.mxu0 }
 0x129   : > { %v6190_v50 = vadd.f32 %v1488_v14, %v1271_v34  ;;  %v1276_v22 = vadd.f32 %v4703_v46, %v6146_v53 }
 0x12a   : > { %v4740_v27 = vpop.f32.mrf.mxu1  ;;  %v1219_v54 = vpop.f32.mrf.mxu0 }
 0x12b   : > { %v6193_v13 = vadd.f32 %v4739_v55, %v1276_v22  ;;  %v1274_v26 = vadd.f32 %v1219_v54, %v6148_v45 }
 0x12c   : > { %v1504_v52 = vpop.f32.mrf.mxu1  ;;  %v4704_v15 = vpop.f32.mrf.mxu0 }
 0x12d   : > { %v6196_v2 = vadd.f32 %v1501_v57, %v1274_v26  ;;  %v1277_v51 = vadd.f32 %v4704_v15, %v6150_v62 }
 0x12e   : > { %v4743_v6 = vpop.f32.mrf.mxu1  ;;  %v1222_v20 = vpop.f32.mrf.mxu0 }
 0x12f   : > { %v6199_v31 = vadd.f32 %v4740_v27, %v1277_v51  ;;  %v1275_v3 = vadd.f32 %v1222_v20, %v6152_v30 }
 0x130   : > { %v1517_v53 = vpop.f32.mrf.mxu1  ;;  %v4707_v9 = vpop.f32.mrf.mxu0 }
 0x131   : > { %v6202_v5 = vadd.f32 %v1504_v52, %v1275_v3  ;;  %v1280_v25 = vadd.f32 %v4707_v9, %v6154_v59 }
 0x132   : > { %v4744_v41 = vpop.f32.mrf.mxu1  ;;  %v1235_v45 = vpop.f32.mrf.mxu0 }
 0x133   : > { %v6206_v4 = vadd.f32 %v4743_v6, %v1280_v25  ;;  %v1278_v18 = vadd.f32 %v1235_v45, %v6156_v1 }
 0x134   : > { %v1520_v62 = vpop.f32.mrf.mxu1  ;;  %v4708_v30 = vpop.f32.mrf.mxu0 }
 0x135   : > { %v6215_v37 = vadd.f32 %v1517_v53, %v1278_v18  ;;  %v1281_v59 = vadd.f32 %v4708_v30, %v6158_v0 }
 0x136   : > { %v4747_v19 = vpop.f32.mrf.mxu1  ;;  %v1238_v23 = vpop.f32.mrf.mxu0 }
 0x137   : > { %v6218_v11 = vadd.f32 %v4744_v41, %v1281_v59  ;;  %v1279_v1 = vadd.f32 %v1238_v23, %v6160_v56 }
 0x138   : > { %v1533_v12 = vpop.f32.mrf.mxu1  ;;  %v4711_v63 = vpop.f32.mrf.mxu0 }
 0x139   : > { %v6221_v17 = vadd.f32 %v1520_v62, %v1279_v1  ;;  %v1284_v35 = vadd.f32 %v4711_v63, %v6162_v39 }
 0x13a   : > { %v4748_v49 = vpop.f32.mrf.mxu1  ;;  %v1251_v24 = vpop.f32.mrf.mxu0 }
 0x13b   : > { %v6224_v28 = vadd.f32 %v4747_v19, %v1284_v35  ;;  %v1282_v7 = vadd.f32 %v1251_v24, %v6164_v61 }
 0x13c   : > { %v1536_v32 = vpop.f32.mrf.mxu1  ;;  %v4712_v0 = vpop.f32.mrf.mxu0 }
 0x13d   : > { %v6227_v58 = vadd.f32 %v1533_v12, %v1282_v7  ;;  %v1285_v21 = vadd.f32 %v4712_v0, %v6166_v44 }
 0x13e   : > { %v4803_v47 = vpop.f32.mrf.mxu1  ;;  %v1254_v56 = vpop.f32.mrf.mxu0 }
 0x13f   : > { %v6230_v14 = vadd.f32 %v4748_v49, %v1285_v21  ;;  %v1283_v16 = vadd.f32 %v1254_v56, %v6168_v43 }
 0x140   : > { %v2325_v29 = vpop.f32.mrf.mxu1  ;;  %v4767_v39 = vpop.f32.mrf.mxu0 }
 0x141   : > { %v6233_v55 = vadd.f32 %v1536_v32, %v1283_v16  ;;  %v2058_v38 = vadd.f32 %v4767_v39, %v6170_v60 }
 0x142   : > { %v4804_v34 = vpop.f32.mrf.mxu1  ;;  %v1977_v61 = vpop.f32.mrf.mxu0 }
 0x143   : > { %v6236_v57 = vadd.f32 %v4803_v47, %v2058_v38  ;;  %v2056_v46 = vadd.f32 %v1977_v61, %v6172_v42 }
 0x144   : > { %v2328_v22 = vpop.f32.mrf.mxu1  ;;  %v4768_v44 = vpop.f32.mrf.mxu0 }
 0x145   : > { %v6239_v27 = vadd.f32 %v2325_v29, %v2056_v46  ;;  %v2059_v54 = vadd.f32 %v4768_v44, %v6175_v40 }
 0x146   : > { %v4807_v26 = vpop.f32.mrf.mxu1  ;;  %v1980_v43 = vpop.f32.mrf.mxu0 }
 0x147   : > { %v6242_v52 = vadd.f32 %v4804_v34, %v2059_v54  ;;  %v2057_v15 = vadd.f32 %v1980_v43, %v6178_v10 }
 0x148   : > { %v2341_v51 = vpop.f32.mrf.mxu1  ;;  %v4771_v60 = vpop.f32.mrf.mxu0 }
 0x149   : > { %v6245_v6 = vadd.f32 %v2328_v22, %v2057_v15  ;;  %v2062_v20 = vadd.f32 %v4771_v60, %v6181_v8 }
 0x14a   : > { %v4808_v3 = vpop.f32.mrf.mxu1  ;;  %v1993_v42 = vpop.f32.mrf.mxu0 }
 0x14b   : > { %v6248_v53 = vadd.f32 %v4807_v26, %v2062_v20  ;;  %v2060_v9 = vadd.f32 %v1993_v42, %v6184_v33 }
 0x14c   : > { %v2344_v25 = vpop.f32.mrf.mxu1  ;;  %v4772_v40 = vpop.f32.mrf.mxu0 }
 0x14d   : > { %v6251_v41 = vadd.f32 %v2341_v51, %v2060_v9  ;;  %v2063_v45 = vadd.f32 %v4772_v40, %v6187_v48 }
 0x14e   : > { %v1996_v18 = vpop.f32.mrf.mxu0  ;;  %v4811_v30 = vpop.f32.mrf.mxu1 }
 0x14f   : > { %v6254_v10 = vadd.f32 %v4808_v3, %v2063_v45  ;;  %v2061_v62 = vadd.f32 %v1996_v18, %v6190_v50 }
 0x150   : > { %v4775_v36 = vpop.f32.mrf.mxu0  ;;  %v2357_v19 = vpop.f32.mrf.mxu1 }
 0x151   : > { %v6257_v8 = vadd.f32 %v2344_v25, %v2061_v62  ;;  %v2066_v59 = vadd.f32 %v4775_v36, %v6193_v13 }
 0x152   : > { %v2009_v23 = vpop.f32.mrf.mxu0  ;;  %v4812_v12 = vpop.f32.mrf.mxu1 }
 0x153   : > { %v6260_v33 = vadd.f32 %v4811_v30, %v2066_v59  ;;  %v2064_v1 = vadd.f32 %v2009_v23, %v6196_v2 }
 0x154   : > { %v4776_v63 = vpop.f32.mrf.mxu0  ;;  %v2360_v50 = vpop.f32.mrf.mxu1 }
 0x155   : > { %v6263_v48 = vadd.f32 %v2357_v19, %v2064_v1  ;;  %v2067_v35 = vadd.f32 %v4776_v63, %v6199_v31 }
 0x156   : > { %v2012_v49 = vpop.f32.mrf.mxu0  ;;  %v6271_v13 = vpop.f32.mrf.mxu1 }
 0x157   : > { %v6266_v24 = vadd.f32 %v4812_v12, %v2067_v35  ;;  %v2065_v7 = vadd.f32 %v2012_v49, %v6202_v5  ;;  %v3562_v49 = vlaneseq }
 0x158   : > { %v4779_v0 = vpop.f32.mrf.mxu0  ;;  %v6273_v21 = vpop.f32.mrf.mxu1 }
 0x159   : > { %6484 = vst [vmem:[#allocation2_spill] sm:$0xff] %v6266_v24  ;;  %v6269_v32 = vadd.f32 %v2360_v50, %v2065_v7 }
 0x15a   : > { %v2025_v2 = vpop.f32.mrf.mxu0  ;;  %v6275_v56 = vpop.f32.mrf.mxu1 }
 0x15b   : > { %6485 = vst [vmem:[#allocation3_spill] sm:$0xff] %v6269_v32  ;;  %v3563_v32 = vshrl.u32 %v3562_v49, 7 }
 0x15c   : > { %v4780_v47 = vpop.f32.mrf.mxu0  ;;  %v6277_v29 = vpop.f32.mrf.mxu1 }
 0x15e   : > { %v2028_v16 = vpop.f32.mrf.mxu0 }
 0x161   : > { %v6279_v39 = vpop.f32.mrf.mxu1 }
 0x162   : > { %v4783_v31 = vpop.f32.mrf.mxu0 }
 0x163   : > { %v6281_v34 = vpop.f32.mrf.mxu1 }
 0x164   : > { %v2041_v38 = vpop.f32.mrf.mxu0 }
 0x165   : > { %v6283_v61 = vpop.f32.mrf.mxu1 }
 0x166   : > { %v4784_v5 = vpop.f32.mrf.mxu0 }
 0x167   : > { %v6285_v22 = vpop.f32.mrf.mxu1 }
 0x168   : > { %v2044_v46 = vpop.f32.mrf.mxu0 }
 0x16a   : > { %v4839_v44 = vpop.f32.mrf.mxu0 }
 0x16c   : > { %v2607_v54 = vpop.f32.mrf.mxu0  ;;  %v6287_v26 = vpop.f32.mrf.mxu1 }
 0x16e   : > { %v4840_v43 = vpop.f32.mrf.mxu0  ;;  %v6289_v15 = vpop.f32.mrf.mxu1 }
 0x170   : > { %v2610_v51 = vpop.f32.mrf.mxu0  ;;  %v6291_v60 = vpop.f32.mrf.mxu1 }
 0x171   : > { %6486 = vst [vmem:[#allocation4_spill] sm:$0xff] %v6291_v60  ;;  %v2068_v60 = vadd.f32 %v2025_v2, %v6215_v37 }
 0x172   : > { %v4843_v20 = vpop.f32.mrf.mxu0  ;;  %v6293_v3 = vpop.f32.mrf.mxu1 }
 0x173   : > { %6487 = vst [vmem:[#allocation5_spill] sm:$0xff] %v6293_v3  ;;  %v2692_v2 = vadd.f32 %v4843_v20, %v6248_v53 }
 0x174   : > { %v2623_v42 = vpop.f32.mrf.mxu0 }
 0x175   : > { %v6295_v25 = vpop.f32.mrf.mxu1 }
 0x176   : > { %v4844_v9 = vpop.f32.mrf.mxu0  ;;  %6488 = vst [vmem:[#allocation6_spill] sm:$0xff] %v6295_v25 }
 0x177   : > { %v6297_v45 = vpop.f32.mrf.mxu1 }
 0x178   : > { %v2626_v40 = vpop.f32.mrf.mxu0  ;;  %6489 = vst [vmem:[#allocation7_spill] sm:$0xff] %v6297_v45 }
 0x179   : > { %v6299_v62 = vpop.f32.mrf.mxu1  ;;  %v2691_v53 = vadd.f32 %v2626_v40, %v6257_v8 }
 0x17a   : > { %v4847_v18 = vpop.f32.mrf.mxu0  ;;  %6490 = vst [vmem:[#allocation8_spill] sm:$0xff] %v6299_v62 }
 0x17b   : > { %v6301_v36 = vpop.f32.mrf.mxu1 }
 0x17c   : > { %v2639_v30 = vpop.f32.mrf.mxu0  ;;  %6491 = vst [vmem:[#allocation9_spill] sm:$0xff] %v6301_v36 }
 0x17d   : > { %v6303_v19 = vpop.f32.mrf.mxu1 }
 0x17e   : > { %v4848_v59 = vpop.f32.mrf.mxu0  ;;  %6492 = vst [vmem:[#allocation10_spill] sm:$0xff] %v6303_v19 }
 0x17f   : > { %v6305_v1 = vpop.f32.mrf.mxu1 }
 0x180   : > { %v2642_v23 = vpop.f32.mrf.mxu0  ;;  %6493 = vst [vmem:[#allocation11_spill] sm:$0xff] %v6305_v1  ;;  %v6321_v1 = vadd.s32 8, %v3563_v32  ;;  %v2073_v32 = vadd.f32 %v2044_v46, %v6233_v55  ;;  %v2689_v55 = vadd.f32 %v4840_v43, %v6242_v52  ;;  %v6501_v46 = vld [vmem:[#allocation4_spill] sm:$0xff] }
 0x181   : > { %v6307_v63 = vpop.f32.mrf.mxu1 }
 0x182   : > { %v4851_v12 = vpop.f32.mrf.mxu0  ;;  %6494 = vst [vmem:[#allocation12_spill] sm:$0xff] %v6307_v63  ;;  %v2070_v63 = vadd.f32 %v4779_v0, %v6206_v4  ;;  %v2688_v4 = vadd.f32 %v4839_v44, %v6236_v57  ;;  %vm3566_vm6 = vcmp.lt.s32.totalorder %v6321_v1, 10  ;;  %v2687_v57 = vadd.f32 %v2610_v51, %v6245_v6 }
 0x183   : > { %v6309_v50 = vpop.f32.mrf.mxu1  ;;  %v2693_v6 = vadd.f32 %v4844_v9, %v6254_v10  ;;  %v3197_v44 = vadd.f32 %v6501_v46, %v2689_v55  ;;  %v6504_v10 = vld [vmem:[#allocation3_spill] sm:$0xff]  ;;  %v6507_v40 = vld [vmem:[#allocation9_spill] sm:$0xff] }
 0x184   : > { %v2655_v35 = vpop.f32.mrf.mxu0  ;;  %6495 = vst [vmem:[#allocation13_spill] sm:$0xff] %v6309_v50  ;;  %v2071_v50 = vadd.f32 %v4780_v47, %v6218_v11  ;;  %v2418_v11 = vadd.f32 %v6271_v13, %v2070_v63  ;;  %v3196_v52 = vadd.f32 %v6287_v26, %v2688_v4  ;;  %v6503_v26 = vld [vmem:[#allocation6_spill] sm:$0xff]  ;;  %v2695_v8 = vadd.f32 %v2642_v23, %v6504_v10 }
 0x185   : > { %v6368_v43 = vadd.f32 %v6503_v26, %v2692_v2 }
 0x186   : > { %v4852_v7 = vpop.f32.mrf.mxu0  ;;  %v6311_v45 = vpop.f32.mrf.mxu1 }
 0x187   : > { %6496 = vst [vmem:[#allocation14_spill] sm:$0xff] %v6311_v45  ;;  %v2069_v45 = vadd.f32 %v2028_v16, %v6221_v17  ;;  %v2416_v17 = vadd.f32 %v6273_v21, %v2068_v60  ;;  %v6509_v23 = vld [vmem:[#allocation11_spill] sm:$0xff] }
 0x188   : > { %v2658_v62 = vpop.f32.mrf.mxu0  ;;  %v6313_v25 = vpop.f32.mrf.mxu1 }
 0x189   : > { %v2698_v20 = vadd.f32 %v2655_v35, %v2416_v17 }
 0x18a   : > { %v6315_v36 = vpop.f32.mrf.mxu0  ;;  %v6317_v19 = vpop.f32.mrf.mxu1 }
 0x18b   : > { %6497 = vst [vmem:[#allocation15_spill] sm:$0xff] %v6315_v36  ;;  %6498 = vst [vmem:[#allocation16_spill] sm:$0xff] %v6317_v19  ;;  %v2074_v36 = vadd.f32 %v4783_v31, %v6224_v28  ;;  %v2072_v19 = vadd.f32 %v2041_v38, %v6227_v58  ;;  %v2419_v28 = vadd.f32 %v6275_v56, %v2071_v50  ;;  %v6510_v50 = vld [vmem:[#allocation12_spill] sm:$0xff] }
 0x18c   : > { %v6319_v3 = vpop.f32.mrf.mxu0  ;;  %v6327_v24 = vpop.f32.mrf.mxu1  ;;  %v2686_v58 = vadd.f32 %v2607_v54, %v6239_v27  ;;  %v2690_v56 = vadd.f32 %v2623_v42, %v6251_v41  ;;  %v2421_v27 = vadd.f32 %v6285_v22, %v2073_v32  ;;  %v2696_v38 = vadd.f32 %v4847_v18, %v6260_v33  ;;  %v6502_v22 = vld [vmem:[#allocation5_spill] sm:$0xff]  ;;  %v6506_v42 = vld [vmem:[#allocation8_spill] sm:$0xff] }
 0x18d   : > { %6499 = vst [vmem:[#allocation17_spill] sm:$0xff] %v6319_v3  ;;  %v2075_v3 = vadd.f32 %v4784_v5, %v6230_v14  ;;  %v2417_v14 = vadd.f32 %v6277_v29, %v2069_v45  ;;  %v2422_v16 = vadd.f32 %v6279_v39, %v2074_v36  ;;  %v2420_v13 = vadd.f32 %v6281_v34, %v2072_v19  ;;  %v6500_v5 = vld [vmem:[#allocation2_spill] sm:$0xff] }
 0x18e   : > { %v6329_v49 = vpop.f32.mrf.mxu0  ;;  %v6336_v0 = vpop.f32.mrf.mxu1  ;;  %v3194_v39 = vadd.f32 %v6289_v15, %v2686_v58  ;;  %v2694_v34 = vadd.f32 %v2639_v30, %v6263_v48  ;;  %v2697_v41 = vadd.f32 %v4848_v59, %v6500_v5  ;;  %v3195_v54 = vadd.f32 %v6502_v22, %v2687_v57  ;;  %v6505_v15 = vld [vmem:[#allocation7_spill] sm:$0xff]  ;;  %v6508_v59 = vld [vmem:[#allocation10_spill] sm:$0xff] }
 0x18f   : > { %v2423_v21 = vadd.f32 %v6283_v61, %v2075_v3  ;;  %v3198_v60 = vadd.f32 %v6505_v15, %v2690_v56  ;;  %v2700_v33 = vadd.f32 %v4851_v12, %v2418_v11  ;;  %v2701_v48 = vadd.f32 %v4852_v7, %v2419_v28  ;;  %v6511_v7 = vld [vmem:[#allocation13_spill] sm:$0xff]  ;;  %v6512_v58 = vld [vmem:[#allocation14_spill] sm:$0xff] }
 0x190   : > { %v6338_v37 = vpop.f32.mrf.mxu0  ;;  %v6349_v47 = vpop.f32.mrf.mxu1  ;;  %v3201_v9 = vadd.f32 %v6506_v42, %v2693_v6  ;;  %v3199_v45 = vadd.f32 %v6507_v40, %v2691_v53  ;;  %v2699_v18 = vadd.f32 %v2658_v62, %v2417_v14  ;;  %v6378_v19 = vadd.f32 %v6508_v59, %v2696_v38 }
 0x191   : > { %v6381_v63 = vadd.f32 %v6509_v23, %v2694_v34  ;;  %v6384_v32 = vadd.f32 %v6510_v50, %v2697_v41  ;;  %v6387_v4 = vadd.f32 %v6511_v7, %v2695_v8  ;;  %v3208_v14 = vadd.f32 %v6512_v58, %v2700_v33 }
 0x192   : > { %v4911_v31 = vpop.f32.mrf.mxu0  ;;  %v6359_v29 = vpop.f32.mrf.mxu1  ;;  %v3206_v55 = vadd.f32 %v6313_v25, %v2698_v20  ;;  %v6513_v57 = vld [vmem:[#allocation16_spill] sm:$0xff]  ;;  %v6514_v6 = vld [vmem:[#allocation15_spill] sm:$0xff]  ;;  %v2705_v41 = vadd.f32 %v6329_v49, %v2423_v21  ;;  %v2703_v22 = vadd.f32 %v6338_v37, %v2421_v27 }
 0x193   : > { %v3544_v12 = vadd.f32 %v4911_v31, %v3196_v52  ;;  %v3209_v2 = vadd.f32 %v6513_v57, %v2701_v48  ;;  %v3207_v52 = vadd.f32 %v6327_v24, %v2699_v18  ;;  %v2704_v53 = vadd.f32 %v6514_v6, %v2422_v16 }
 0x194   : > { %v3463_v61 = vpop.f32.mrf.mxu0  ;;  %v6371_v51 = vpop.f32.mrf.mxu1 }
 0x195   : > { %v3542_v11 = vadd.f32 %v3463_v61, %v3194_v39  ;;  %v6515_v39 = vld [vmem:[#allocation17_spill] sm:$0xff] }
 0x196   : > { %v4912_v3 = vpop.f32.mrf.mxu0  ;;  %v4923_v30 = vpop.f32.mrf.mxu1  ;;  %v2702_v38 = vadd.f32 %v6515_v39, %v2420_v13  ;;  %v3718_v13 = vmul.f32 %v3544_v12, %v3544_v12 }
 0x197   : > { %v3545_v36 = vadd.f32 %v4912_v3, %v3197_v44  ;;  %v3716_v24 = vmul.f32 %v3542_v11, %v3542_v11 }
 0x198   : > { %v3466_v35 = vpop.f32.mrf.mxu0  ;;  %v3511_v17 = vpop.f32.mrf.mxu1 }
 0x199   : > { %v3574_v62 = vsel %vm3566_vm6, %v3545_v36, 0.0  ;;  %v3543_v28 = vadd.f32 %v3466_v35, %v3195_v54  ;;  %v6407_v54 = vadd.f32 %v4923_v30, %v3208_v14  ;;  %v6414_v15 = vadd.f32 %v3511_v17, %v3206_v55 }
 0x19a   : > { %v4392_v56 = vpack.c.bf16 %v3574_v62, %v3544_v12  ;;  %v4915_v31 = vpop.f32.mrf.mxu0  ;;  %v4924_v34 = vpop.f32.mrf.mxu1  ;;  %v3719_v48 = vmul.f32 %v3574_v62, %v3574_v62  ;;  %v3210_v55 = vadd.f32 %v6349_v47, %v2702_v38 }
 0x19b   : > { %v3572_v5 = vsel %vm3566_vm6, %v3543_v28, 0.0  ;;  %v3557_v61 = vadd.f32 %v4924_v34, %v3209_v2  ;;  %v3548_v59 = vadd.f32 %v4915_v31, %v6368_v43 }
 0x19c   : > { %4434 = vst [vmem:[%s6392_s9 + $0x8] sm:$0xff] %v4392_v56   ;;  %v4387_v25 = vpack.c.bf16 %v3572_v5, %v3542_v11  ;;  %v3691_v46 = vadd.f32 %v3572_v5, %v3542_v11  ;;  %v3479_v44 = vpop.f32.mrf.mxu0  ;;  %v3717_v16 = vmul.f32 %v3572_v5, %v3572_v5  ;;  %v3514_v26 = vpop.f32.mrf.mxu1 }
 0x19d   : > { %v6411_v10 = vsel %vm3566_vm6, %v3557_v61, 0.0  ;;  %v3555_v21 = vadd.f32 %v3514_v26, %v3207_v52  ;;  %v3546_v20 = vadd.f32 %v3479_v44, %v3198_v60  ;;  %v3212_v60 = vadd.f32 %v6336_v0, %v2704_v53 }
 0x19e   : > { %4388 = vst [vmem:[%s6392_s9] sm:$0xff] %v4387_v25   ;;  %v3692_v49 = vadd.f32 %v3691_v46, %v3544_v12  ;;  %v4916_v8 = vpop.f32.mrf.mxu0  ;;  %v4422_v37 = vpack.c.bf16 %v6411_v10, %v6407_v54  ;;  %v3736_v27 = vadd.f32 %v3717_v16, %v3716_v24  ;;  %v4927_v33 = vpop.f32.mrf.mxu1  ;;  %v3213_v12 = vadd.f32 %v6359_v29, %v2705_v41 }
 0x19f   : > { %v6420_v3 = vsel %vm3566_vm6, %v3555_v21, 0.0  ;;  %v3549_v40 = vadd.f32 %v4916_v8, %v3201_v9  ;;  %v3720_v11 = vmul.f32 %v3546_v20, %v3546_v20  ;;  %v3560_v57 = vadd.f32 %v4927_v33, %v3212_v60 }
 0x1a0   : > { %v3693_v42 = vadd.f32 %v3692_v49, %v3574_v62  ;;  %v3482_v18 = vpop.f32.mrf.mxu0  ;;  %4440 = vst [vmem:[%s6392_s9 + $0x38] sm:$0xff] %v4422_v37   ;;  %v3737_v30 = vadd.f32 %v3736_v27, %v3718_v13  ;;  %v4417_v36 = vpack.c.bf16 %v6420_v3, %v6414_v15  ;;  %v3527_v23 = vpop.f32.mrf.mxu1  ;;  %v3722_v52 = vmul.f32 %v3548_v59, %v3548_v59 }
 0x1a1   : > { %v3547_v50 = vadd.f32 %v3482_v18, %v3199_v45  ;;  %v3578_v7 = vsel %vm3566_vm6, %v3549_v40, 0.0  ;;  %v3211_v45 = vadd.f32 %v6371_v51, %v2703_v22  ;;  %v3558_v34 = vadd.f32 %v3527_v23, %v3210_v55 }
 0x1a2   : > { %v3694_v35 = vadd.f32 %v3693_v42, %v3546_v20  ;;  %v4919_v9 = vpop.f32.mrf.mxu0  ;;  %4439 = vst [vmem:[%s6392_s9 + $0x30] sm:$0xff] %v4417_v36   ;;  %v3738_v17 = vadd.f32 %v3737_v30, %v3719_v48  ;;  %v4402_v62 = vpack.c.bf16 %v3578_v7, %v3548_v59  ;;  %v4928_v28 = vpop.f32.mrf.mxu1  ;;  %v3723_v38 = vmul.f32 %v3578_v7, %v3578_v7 }
 0x1a3   : > { %v3576_v43 = vsel %vm3566_vm6, %v3547_v50, 0.0  ;;  %v3561_v0 = vadd.f32 %v4928_v28, %v3213_v12  ;;  %v3552_v16 = vadd.f32 %v4919_v9, %v6378_v19  ;;  %v3728_v36 = vmul.f32 %v6414_v15, %v6414_v15 }
 0x1a4   : > { %v4397_v58 = vpack.c.bf16 %v3576_v43, %v3546_v20  ;;  %v3695_v29 = vadd.f32 %v3694_v35, %v3576_v43  ;;  %v3495_v14 = vpop.f32.mrf.mxu0  ;;  %v3739_v2 = vadd.f32 %v3738_v17, %v3720_v11  ;;  %4436 = vst [vmem:[%s6392_s9 + $0x18] sm:$0xff] %v4402_v62   ;;  %v3721_v56 = vmul.f32 %v3576_v43, %v3576_v43  ;;  %v3530_v31 = vpop.f32.mrf.mxu1 }
 0x1a5   : > { %v3590_v6 = vsel %vm3566_vm6, %v3561_v0, 0.0  ;;  %v3559_v39 = vadd.f32 %v3530_v31, %v3211_v45  ;;  %v3550_v47 = vadd.f32 %v3495_v14, %v6381_v63  ;;  %v3726_v48 = vmul.f32 %v3552_v16, %v3552_v16 }
 0x1a6   : > { %4435 = vst [vmem:[%s6392_s9 + $0x10] sm:$0xff] %v4397_v58   ;;  %v3696_v53 = vadd.f32 %v3695_v29, %v3548_v59  ;;  %v4920_v51 = vpop.f32.mrf.mxu0  ;;  %v4432_v5 = vpack.c.bf16 %v3590_v6, %v3560_v57  ;;  %v3740_v41 = vadd.f32 %v3739_v2, %v3721_v56  ;;  %v3729_v23 = vmul.f32 %v6420_v3, %v6420_v3 }
 0x1a7   : > { %v3588_v61 = vsel %vm3566_vm6, %v3559_v39, 0.0  ;;  %v3553_v46 = vadd.f32 %v4920_v51, %v6384_v32  ;;  %v3724_v49 = vmul.f32 %v3550_v47, %v3550_v47  ;;  %v3730_v12 = vmul.f32 %v6407_v54, %v6407_v54 }
 0x1a8   : > { %v3697_v25 = vadd.f32 %v3696_v53, %v3578_v7  ;;  %v3498_v44 = vpop.f32.mrf.mxu0  ;;  %4442 = vst [vmem:[%s6392_s9 + $0x48] sm:$0xff] %v4432_v5   ;;  %v3741_v22 = vadd.f32 %v3740_v41, %v3722_v52  ;;  %v4427_v24 = vpack.c.bf16 %v3588_v61, %v3558_v34  ;;  %v3731_v9 = vmul.f32 %v6411_v10, %v6411_v10 }
 0x1a9   : > { %v3551_v26 = vadd.f32 %v3498_v44, %v6387_v4  ;;  %v3582_v63 = vsel %vm3566_vm6, %v3553_v46, 0.0  ;;  %v3732_v17 = vmul.f32 %v3558_v34, %v3558_v34  ;;  %v3733_v43 = vmul.f32 %v3588_v61, %v3588_v61 }
 0x1aa   : > { %v3698_v13 = vadd.f32 %v3697_v25, %v3550_v47  ;;  %4441 = vst [vmem:[%s6392_s9 + $0x40] sm:$0xff] %v4427_v24   ;;  %v3742_v21 = vadd.f32 %v3741_v22, %v3723_v38  ;;  %v4412_v8 = vpack.c.bf16 %v3582_v63, %v3552_v16  ;;  %v3727_v40 = vmul.f32 %v3582_v63, %v3582_v63 }
 0x1ab   : > { %v3580_v32 = vsel %vm3566_vm6, %v3551_v26, 0.0  ;;  %v3734_v0 = vmul.f32 %v3560_v57, %v3560_v57  ;;  %v3735_v14 = vmul.f32 %v3590_v6, %v3590_v6 }
 0x1ac   : > { %v4407_v37 = vpack.c.bf16 %v3580_v32, %v3550_v47  ;;  %v3699_v27 = vadd.f32 %v3698_v13, %v3580_v32  ;;  %v3725_v33 = vmul.f32 %v3580_v32, %v3580_v32  ;;  %v3743_v20 = vadd.f32 %v3742_v21, %v3724_v49  ;;  %4438 = vst [vmem:[%s6392_s9 + $0x28] sm:$0xff] %v4412_v8   ;;  %v3763_v47 = vld [vmem:[%s6212_s6] sm:$0x3] }
 0x1ae   : > { %4437 = vst [vmem:[%s6392_s9 + $0x20] sm:$0xff] %v4407_v37   ;;  %v3700_v19 = vadd.f32 %v3699_v27, %v3552_v16  ;;  %v3744_v4 = vadd.f32 %v3743_v20, %v3725_v33 }
 0x1b0   : > { %v3701_v42 = vadd.f32 %v3700_v19, %v3582_v63  ;;  %v3745_v18 = vadd.f32 %v3744_v4, %v3726_v48 }
 0x1b2   : > { %v3702_v30 = vadd.f32 %v3701_v42, %v6414_v15  ;;  %v3746_v59 = vadd.f32 %v3745_v18, %v3727_v40 }
 0x1b4   : > { %v3703_v1 = vadd.f32 %v3702_v30, %v6420_v3  ;;  %v3747_v50 = vadd.f32 %v3746_v59, %v3728_v36 }
 0x1b6   : > { %v3704_v60 = vadd.f32 %v3703_v1, %v6407_v54  ;;  %v3748_v35 = vadd.f32 %v3747_v50, %v3729_v23 }
 0x1b8   : > { %v3705_v7 = vadd.f32 %v3704_v60, %v6411_v10  ;;  %v3749_v11 = vadd.f32 %v3748_v35, %v3730_v12 }
 0x1ba   : > { %v3706_v15 = vadd.f32 %v3705_v7, %v3558_v34  ;;  %v3750_v62 = vadd.f32 %v3749_v11, %v3731_v9 }
 0x1bc   : > { %v3707_v28 = vadd.f32 %v3706_v15, %v3588_v61  ;;  %v3751_v45 = vadd.f32 %v3750_v62, %v3732_v17 }
 0x1be   : > { %v3708_v3 = vadd.f32 %v3707_v28, %v3560_v57  ;;  %v3752_v58 = vadd.f32 %v3751_v45, %v3733_v43 }
 0x1c0   : > { %v3709_v29 = vadd.f32 %v3708_v3, %v3590_v6  ;;  %v3753_v54 = vadd.f32 %v3752_v58, %v3734_v0 }
 0x1c2   : > { %v3710_v55 = vrot.slane %v3709_v29, 4  ;;  %v3754_v2 = vadd.f32 %v3753_v54, %v3735_v14 }
 0x1c4   : > { %v3711_v56 = vadd.f32 %v3710_v55, %v3709_v29  ;;  %v3755_v31 = vrot.slane %v3754_v2, 4 }
 0x1c6   : > { %v3712_v10 = vrot.slane %v3711_v56, 2  ;;  %v3756_v52 = vadd.f32 %v3755_v31, %v3754_v2 }
 0x1c8   : > { %v3713_v53 = vadd.f32 %v3712_v10, %v3711_v56  ;;  %v3757_v39 = vrot.slane %v3756_v52, 2 }
 0x1ca   : > { %v3714_v51 = vrot.slane %v3713_v53, 1  ;;  %v3758_v34 = vadd.f32 %v3757_v39, %v3756_v52 }
 0x1cc   : > { %v3759_v5 = vrot.slane %v3758_v34, 1  ;;  %v3715_v41 = vadd.f32 %v3714_v51, %v3713_v53 }
 0x1ce   : > { %v3760_v57 = vadd.f32 %v3759_v5, %v3758_v34 }
 0x1d0   : > { %v3762_v38 = vsel %vm3761_vm7, %v3715_v41, %v3760_v57 }
 0x1d1   : > { %v3764_v6 = vadd.f32 %v3763_v47, %v3762_v38 }
 0x1d3   : > { %3765 = vst [vmem:[%s6212_s6] sm:$0x3] %v3764_v6 }
 0x1d4 PF: > { %s14_s14 = sadd.s32 1, %s5096_s14   ;;  %s6516_s12 = smov %s5092_s13 }
 0x1d5   : > { %p11_p5 = scmp.ge.s32.totalorder %s14_s14, 4   ;;  %s6517_s13 = smov %s6519_s15 }
 0x1d7   :  { %13 = sbr.rel (!%p11_p5) target bundleno = 2 (0x2), region = 85 }

</bundles_post_ra>
